<compile_context>
chip_gen: v6e
topology: v6e:2x2x1
jax: 0.10.0
libtpu: 0.0.40
codegen_flags: <defaults>
</compile_context>

<pallas_src>
import functools

import jax
import jax.numpy as jnp
from jax import lax
from jax.experimental import pallas as pl
from jax.experimental.pallas import tpu as pltpu

EPS = 1e-5

# Tap order: t = (sh+1)*3 + (sw+1)  ==  kh*3 + kw of the PyTorch OIHW kernel.
_TAPS = tuple((sh, sw) for sh in (-1, 0, 1) for sw in (-1, 0, 1))

# ------------------------- constant-slab row layout (lane width = H*W) ----------------
_R_B1, _R_G1, _R_BE1, _R_B2, _R_G2, _R_BE2 = 0, 1, 2, 3, 4, 5
_R_MASK = 6            # rows 6..14 : 9 per-tap edge masks (row 15 is padding)
_R_C1W = 16            # rows 16..47 : conv1 weight matrix (32,9) in columns 0:9
_R_C1B = 48            # rows 48..79 : conv1 bias, broadcast to (32, HW)
_R_C1G = 80            # rows 80..111: ln_conv1 gamma (32, HW)
_R_C1BE = 112          # rows 112..143: ln_conv1 beta
_R_C2B = 144           # rows 144..207: conv2 bias broadcast (64, HW)
_R_C2G = 208           # rows 208..271: ln_conv2 gamma
_R_C2BE = 272          # rows 272..335: ln_conv2 beta
_R_C3B = 336           # rows 336..336+C: conv3 bias broadcast (C, HW)
_SLAB_ROWS = 344


# --------------------------------- in-kernel helpers ----------------------------------
def _ln_rows(v, g, b):
    """LayerNorm over the last axis (one row per sample). Single-pass statistics."""
    m = jnp.mean(v, axis=-1, keepdims=True)
    ex2 = jnp.mean(v * v, axis=-1, keepdims=True)
    var = jnp.maximum(ex2 - m * m, 0.0)
    return (v - m) * lax.rsqrt(var + EPS) * g + b


def _ln_all(v, g, b):
    """LayerNorm over every element of v (one (C,H,W) map). Single-pass statistics."""
    m = jnp.mean(v)
    ex2 = jnp.mean(v * v)
    var = jnp.maximum(ex2 - m * m, 0.0)
    return (v - m) * lax.rsqrt(var + EPS) * g + b


def _shift(f, sh, sw, W):
    """f[:, p] -> f[:, p + sh*W + sw]  via an XLU lane rotation (wrap is killed by
    the per-tap edge mask applied by the caller)."""
    delta = sh * W + sw
    if delta == 0:
        return f
    hw = f.shape[-1]
    return pltpu.roll(f, shift=(-delta) % hw, axis=1)


def _conv1_taps(f, masks, W):
    """Cin=1 conv input: build the tiny (9, HW) tap stack (single MXU matmul later)."""
    pieces = []
    for t, (sh, sw) in enumerate(_TAPS):
        g = _shift(f, sh, sw, W)
        if masks[t] is not None:
            g = g * masks[t]
        pieces.append(g)
    return jnp.concatenate(pieces, axis=0)                      # (9, HW)


def _conv3x3_acc(f, w_ref, cout, masks, W):
    """3x3 'same' conv (cross-correlation, like nn.Conv2d) on a channel-major map.

    f:      (Cin, HW)  pixels on the lane axis
    w_ref:  VMEM ref; rows [t*cout:(t+1)*cout] hold weight[:, :, kh, kw] as (cout, Cin)
    masks:  per-tap (Cin, HW) edge masks (None for the centre tap)

    The 9 taps are accumulated directly on the MXU -- no (9*Cin, HW) stack is built.
    """
    acc = None
    for t, (sh, sw) in enumerate(_TAPS):
        g = _shift(f, sh, sw, W)
        if masks[t] is not None:
            g = g * masks[t]
        wt = w_ref[t * cout:(t + 1) * cout, :]                  # (cout, Cin)
        part = jnp.dot(wt, g, preferred_element_type=jnp.float32)
        acc = part if acc is None else acc + part
    return acc                                                  # (cout, HW)


# ------------------------------ fully fused Adaptor kernel ----------------------------
def _adaptor_kernel(x_ref, w1t_ref, w2t_ref, slab_ref, w2s_ref, w3s_ref, o_ref,
                    *, B, C, H, W):
    HW = H * W

    # --------- fc1 -> LN -> relu -> fc2 -> LN -> relu  (whole batch, one matmul each)
    b1 = slab_ref[_R_B1:_R_B1 + 1, :]
    g1 = slab_ref[_R_G1:_R_G1 + 1, :]
    be1 = slab_ref[_R_BE1:_R_BE1 + 1, :]
    b2 = slab_ref[_R_B2:_R_B2 + 1, :]
    g2 = slab_ref[_R_G2:_R_G2 + 1, :]
    be2 = slab_ref[_R_BE2:_R_BE2 + 1, :]

    h = jnp.dot(x_ref[...], w1t_ref[...], preferred_element_type=jnp.float32) + b1
    h = jnp.maximum(_ln_rows(h, g1, be1), 0.0)
    h = jnp.dot(h, w2t_ref[...], preferred_element_type=jnp.float32) + b2
    h = jnp.maximum(_ln_rows(h, g2, be2), 0.0)                  # (B, HW)

    # --------- per-tap edge masks (loads + broadcasts hoisted out of all loops)
    mrow = [slab_ref[_R_MASK + t:_R_MASK + t + 1, :] for t in range(9)]
    m1 = [None if t == 4 else mrow[t] for t in range(9)]
    m32 = [None if t == 4 else jnp.broadcast_to(mrow[t], (32, HW)) for t in range(9)]
    m64 = [None if t == 4 else jnp.broadcast_to(mrow[t], (64, HW)) for t in range(9)]

    # --------- conv-stage constants (single slab -> static row slices)
    c1w = slab_ref[_R_C1W:_R_C1W + 32, 0:9]                     # (32, 9)
    c1b = slab_ref[_R_C1B:_R_C1B + 32, :]
    c1g = slab_ref[_R_C1G:_R_C1G + 32, :]
    c1be = slab_ref[_R_C1BE:_R_C1BE + 32, :]
    c2b = slab_ref[_R_C2B:_R_C2B + 64, :]
    c2g = slab_ref[_R_C2G:_R_C2G + 64, :]
    c2be = slab_ref[_R_C2BE:_R_C2BE + 64, :]
    c3b = slab_ref[_R_C3B:_R_C3B + C, :]

    # --------- conv stack, per sample (B is tiny -> short unrolled loop)
    for b in range(B):
        f = h[b:b + 1, :]                                       # (1, HW) 1-channel image
        # conv1: Cin=1 -> tiny (9, HW) stack, single (32,9)@(9,HW) matmul
        stack = _conv1_taps(f, m1, W)
        y = jnp.dot(c1w, stack, preferred_element_type=jnp.float32) + c1b
        y = jnp.maximum(_ln_all(y, c1g, c1be), 0.0)             # (32, HW)
        # conv2: 9 accumulated (64,32)@(32,HW) MXU matmuls
        y = _conv3x3_acc(y, w2s_ref, 64, m32, W) + c2b
        y = jnp.maximum(_ln_all(y, c2g, c2be), 0.0)             # (64, HW)
        # conv3: Cout padded 4->8 in the weight slab; no LN
        y = _conv3x3_acc(y, w3s_ref, 8, m64, W)[:C, :] + c3b    # (C, HW)
        o_ref[b] = y                                            # lane-dense NCHW order


# ------------------------- one-time parameter prepacking (hoisted) --------------------
def prepack_params(p, C, H, W):
    HW = H * W
    assert C <= 8

    # Per-tap validity masks (applied to the rolled map at destination positions):
    # tap (sh, sw) reads pixel (y+sh, x+sw) -> valid iff it stays inside the image.
    yi = jnp.arange(HW, dtype=jnp.int32) // W
    xi = jnp.arange(HW, dtype=jnp.int32) % W
    mrows = []
    for sh, sw in _TAPS:
        ok = jnp.ones((HW,), jnp.float32)
        if sh == -1:
            ok = ok * (yi >= 1).astype(jnp.float32)
        if sh == 1:
            ok = ok * (yi <= H - 2).astype(jnp.float32)
        if sw == -1:
            ok = ok * (xi >= 1).astype(jnp.float32)
        if sw == 1:
            ok = ok * (xi <= W - 2).astype(jnp.float32)
        mrows.append(ok)
    masks9 = jnp.stack(mrows, axis=0)                           # (9, HW)

    slab = jnp.zeros((_SLAB_ROWS, HW), jnp.float32)
    slab = slab.at[_R_B1].set(p["b1"])
    slab = slab.at[_R_G1].set(p["g1"])
    slab = slab.at[_R_BE1].set(p["be1"])
    slab = slab.at[_R_B2].set(p["b2"])
    slab = slab.at[_R_G2].set(p["g2"])
    slab = slab.at[_R_BE2].set(p["be2"])
    slab = slab.at[_R_MASK:_R_MASK + 9].set(masks9)
    slab = slab.at[_R_C1W:_R_C1W + 32, 0:9].set(p["cw1"].reshape(32, 9))
    slab = slab.at[_R_C1B:_R_C1B + 32].set(jnp.broadcast_to(p["cb1"][:, None], (32, HW)))
    slab = slab.at[_R_C1G:_R_C1G + 32].set(p["cg1"].reshape(32, HW))
    slab = slab.at[_R_C1BE:_R_C1BE + 32].set(p["cbe1"].reshape(32, HW))
    slab = slab.at[_R_C2B:_R_C2B + 64].set(jnp.broadcast_to(p["cb2"][:, None], (64, HW)))
    slab = slab.at[_R_C2G:_R_C2G + 64].set(p["cg2"].reshape(64, HW))
    slab = slab.at[_R_C2BE:_R_C2BE + 64].set(p["cbe2"].reshape(64, HW))
    slab = slab.at[_R_C3B:_R_C3B + C].set(jnp.broadcast_to(p["cb3"][:, None], (C, HW)))

    # Per-tap conv weight slabs: rows [t*Cout:(t+1)*Cout] hold weight[:, :, kh, kw]
    # as a (Cout, Cin) matrix, t = kh*3 + kw (matches _TAPS order).
    w2s = jnp.transpose(p["cw2"], (2, 3, 0, 1)).reshape(9 * 64, 32)
    w3t = jnp.transpose(p["cw3"], (2, 3, 0, 1))                 # (3, 3, C, 64)
    w3t = jnp.pad(w3t, ((0, 0), (0, 0), (0, 8 - C), (0, 0)))    # pad Cout 4 -> 8
    w3s = w3t.reshape(9 * 8, 64)

    return {"w1t": p["w1"].T, "w2t": p["w2"].T, "slab": slab, "w2s": w2s, "w3s": w3s}


# ----------------------------------- fused forward ------------------------------------
def adaptor_forward(x, pp, C, H, W):
    B = x.shape[0]
    HW = H * W
    vmem = pl.BlockSpec(memory_space=pltpu.MemorySpace.VMEM)

    out = pl.pallas_call(
        functools.partial(_adaptor_kernel, B=B, C=C, H=H, W=W),
        out_shape=jax.ShapeDtypeStruct((B, C, HW), jnp.float32),
        in_specs=[vmem] * 6,
        out_specs=vmem,
    )(x, pp["w1t"], pp["w2t"], pp["slab"], pp["w2s"], pp["w3s"])
    # (B, C, H*W) row-major == PyTorch NCHW flatten -> free reshape, no transpose.
    return out.reshape(B, C * HW)


# --------------------------------- deterministic params --------------------------------
def init_params(key, input_dim, C, H, W, hidden):
    ks = jax.random.split(key, 24)

    def u(k, shape, fan_in):
        bound = 1.0 / (fan_in ** 0.5)
        return jax.random.uniform(k, shape, jnp.float32, -bound, bound)

    p = {}
    p["w1"] = u(ks[0], (hidden, input_dim), input_dim)
    p["b1"] = u(ks[1], (hidden,), input_dim)
    p["g1"] = 1.0 + 0.05 * jax.random.normal(ks[2], (hidden,), jnp.float32)
    p["be1"] = 0.05 * jax.random.normal(ks[3], (hidden,), jnp.float32)
    p["w2"] = u(ks[4], (hidden, hidden), hidden)
    p["b2"] = u(ks[5], (hidden,), hidden)
    p["g2"] = 1.0 + 0.05 * jax.random.normal(ks[6], (hidden,), jnp.float32)
    p["be2"] = 0.05 * jax.random.normal(ks[7], (hidden,), jnp.float32)
    p["cw1"] = u(ks[8], (32, 1, 3, 3), 9)
    p["cb1"] = u(ks[9], (32,), 9)
    p["cg1"] = 1.0 + 0.05 * jax.random.normal(ks[10], (32, H, W), jnp.float32)
    p["cbe1"] = 0.05 * jax.random.normal(ks[11], (32, H, W), jnp.float32)
    p["cw2"] = u(ks[12], (64, 32, 3, 3), 32 * 9)
    p["cb2"] = u(ks[13], (64,), 32 * 9)
    p["cg2"] = 1.0 + 0.05 * jax.random.normal(ks[14], (64, H, W), jnp.float32)
    p["cbe2"] = 0.05 * jax.random.normal(ks[15], (64, H, W), jnp.float32)
    p["cw3"] = u(ks[16], (C, 64, 3, 3), 64 * 9)
    p["cb3"] = u(ks[17], (C,), 64 * 9)
    return p


# ------------------------------------ pure-JAX reference -------------------------------
def reference_forward(x, p, C, H, W):
    def ln(v, g, b, axes):
        m = jnp.mean(v, axis=axes, keepdims=True)
        va = jnp.mean((v - m) ** 2, axis=axes, keepdims=True)
        return (v - m) / jnp.sqrt(va + EPS) * g + b

    def conv(v, w, b):
        return lax.conv_general_dilated(
            v, w, window_strides=(1, 1), padding="SAME",
            dimension_numbers=("NCHW", "OIHW", "NCHW")) + b.reshape(1, -1, 1, 1)

    h = x @ p["w1"].T + p["b1"]
    h = jax.nn.relu(ln(h, p["g1"], p["be1"], -1))
    h = h @ p["w2"].T + p["b2"]
    h = jax.nn.relu(ln(h, p["g2"], p["be2"], -1))
    img = h.reshape(-1, 1, H, W)
    c1 = jax.nn.relu(ln(conv(img, p["cw1"], p["cb1"]),
                        p["cg1"][None], p["cbe1"][None], (1, 2, 3)))
    c2 = jax.nn.relu(ln(conv(c1, p["cw2"], p["cb2"]),
                        p["cg2"][None], p["cbe2"][None], (1, 2, 3)))
    c3 = conv(c2, p["cw3"], p["cb3"])
    return c3.reshape(-1, C * H * W)


if __name__ == "__main__":
    # Small shapes consistent with the module: tar_dim=(C,H,W)=(4,16,16), hidden=H*W=256.
    B, input_dim = 2, 32
    C, H, W = 4, 16, 16
    hidden = H * W

    key = jax.random.PRNGKey(0)
    kx, kp = jax.random.split(key)
    x = jax.random.normal(kx, (B, input_dim), jnp.float32)
    params = init_params(kp, input_dim, C, H, W, hidden)

    packed = prepack_params(params, C, H, W)     # one-time prepack, hoisted out of forward

    out = adaptor_forward(x, packed, C, H, W)
    out = jax.block_until_ready(out)
    assert out.shape == (B, C * H * W)

    ref = reference_forward(x, params, C, H, W)
    err = float(jnp.max(jnp.abs(out - ref)))
    assert err < 5e-3, f"max abs err {err}"
    print("KERNEL_OK")
</pallas_src>

<mosaic_0001>
module attributes {stable_mosaic.version = 11 : i64} {
  func.func @_adaptor_kernel(%arg0: memref<2x32xf32, #tpu.memory_space<vmem>>, %arg1: memref<32x256xf32, #tpu.memory_space<vmem>>, %arg2: memref<256x256xf32, #tpu.memory_space<vmem>>, %arg3: memref<344x256xf32, #tpu.memory_space<vmem>>, %arg4: memref<576x32xf32, #tpu.memory_space<vmem>>, %arg5: memref<72x64xf32, #tpu.memory_space<vmem>>, %arg6: memref<2x4x256xf32, #tpu.memory_space<vmem>>) attributes {dimension_semantics = [], scalar_prefetch = 0 : i64, scratch_operands = 0 : i64, tpu.core_type = #tpu.core_type<tc>} {
    %c0 = arith.constant 0 : index
    %c0_0 = arith.constant 0 : index
    %0 = vector.load %arg3[%c0, %c0_0] : memref<344x256xf32, #tpu.memory_space<vmem>>, vector<1x256xf32>
    %c1 = arith.constant 1 : index
    %c0_1 = arith.constant 0 : index
    %1 = vector.load %arg3[%c1, %c0_1] : memref<344x256xf32, #tpu.memory_space<vmem>>, vector<1x256xf32>
    %c2 = arith.constant 2 : index
    %c0_2 = arith.constant 0 : index
    %2 = vector.load %arg3[%c2, %c0_2] : memref<344x256xf32, #tpu.memory_space<vmem>>, vector<1x256xf32>
    %c3 = arith.constant 3 : index
    %c0_3 = arith.constant 0 : index
    %3 = vector.load %arg3[%c3, %c0_3] : memref<344x256xf32, #tpu.memory_space<vmem>>, vector<1x256xf32>
    %c4 = arith.constant 4 : index
    %c0_4 = arith.constant 0 : index
    %4 = vector.load %arg3[%c4, %c0_4] : memref<344x256xf32, #tpu.memory_space<vmem>>, vector<1x256xf32>
    %c5 = arith.constant 5 : index
    %c0_5 = arith.constant 0 : index
    %5 = vector.load %arg3[%c5, %c0_5] : memref<344x256xf32, #tpu.memory_space<vmem>>, vector<1x256xf32>
    %c0_6 = arith.constant 0 : index
    %c0_7 = arith.constant 0 : index
    %6 = vector.load %arg0[%c0_6, %c0_7] : memref<2x32xf32, #tpu.memory_space<vmem>>, vector<2x32xf32>
    %c0_8 = arith.constant 0 : index
    %c0_9 = arith.constant 0 : index
    %7 = vector.load %arg1[%c0_8, %c0_9] : memref<32x256xf32, #tpu.memory_space<vmem>>, vector<32x256xf32>
    %cst = arith.constant dense<0.000000e+00> : vector<2x256xf32>
    %8 = tpu.matmul %6, %7, %cst {dimension_numbers = #tpu.dot_dimension_numbers<[1], [0], [0], [1], [0, 0, 1, 1], [], []>} : vector<2x32xf32>, vector<32x256xf32>, vector<2x256xf32> -> vector<2x256xf32>
    %9 = vector.broadcast %0 : vector<1x256xf32> to vector<2x256xf32>
    %10 = arith.addf %8, %9 : vector<2x256xf32>
    %cst_10 = arith.constant dense<0.000000e+00> : vector<2xf32>
    %11 = vector.multi_reduction <add>, %10, %cst_10 [1] : vector<2x256xf32> to vector<2xf32>
    %12 = vector.shape_cast %11 : vector<2xf32> to vector<2x1xf32>
    %cst_11 = arith.constant 2.560000e+02 : f32
    %13 = vector.broadcast %cst_11 : f32 to vector<2x1xf32>
    %14 = arith.divf %12, %13 : vector<2x1xf32>
    %15 = arith.mulf %10, %10 : vector<2x256xf32>
    %cst_12 = arith.constant dense<0.000000e+00> : vector<2xf32>
    %16 = vector.multi_reduction <add>, %15, %cst_12 [1] : vector<2x256xf32> to vector<2xf32>
    %17 = vector.shape_cast %16 : vector<2xf32> to vector<2x1xf32>
    %cst_13 = arith.constant 2.560000e+02 : f32
    %18 = vector.broadcast %cst_13 : f32 to vector<2x1xf32>
    %19 = arith.divf %17, %18 : vector<2x1xf32>
    %20 = arith.mulf %14, %14 : vector<2x1xf32>
    %21 = arith.subf %19, %20 : vector<2x1xf32>
    %cst_14 = arith.constant 0.000000e+00 : f32
    %22 = vector.broadcast %cst_14 : f32 to vector<2x1xf32>
    %23 = arith.maximumf %21, %22 : vector<2x1xf32>
    %24 = vector.broadcast %14 : vector<2x1xf32> to vector<2x256xf32>
    %25 = arith.subf %10, %24 : vector<2x256xf32>
    %cst_15 = arith.constant 9.99999974E-6 : f32
    %26 = vector.broadcast %cst_15 : f32 to vector<2x1xf32>
    %27 = arith.addf %23, %26 : vector<2x1xf32>
    %28 = math.rsqrt %27 : vector<2x1xf32>
    %29 = vector.broadcast %28 : vector<2x1xf32> to vector<2x256xf32>
    %30 = arith.mulf %25, %29 : vector<2x256xf32>
    %31 = vector.broadcast %1 : vector<1x256xf32> to vector<2x256xf32>
    %32 = arith.mulf %30, %31 : vector<2x256xf32>
    %33 = vector.broadcast %2 : vector<1x256xf32> to vector<2x256xf32>
    %34 = arith.addf %32, %33 : vector<2x256xf32>
    %cst_16 = arith.constant 0.000000e+00 : f32
    %35 = vector.broadcast %cst_16 : f32 to vector<2x256xf32>
    %36 = arith.maximumf %34, %35 : vector<2x256xf32>
    %c0_17 = arith.constant 0 : index
    %c0_18 = arith.constant 0 : index
    %37 = vector.load %arg2[%c0_17, %c0_18] : memref<256x256xf32, #tpu.memory_space<vmem>>, vector<256x256xf32>
    %cst_19 = arith.constant dense<0.000000e+00> : vector<2x256xf32>
    %38 = tpu.matmul %36, %37, %cst_19 {dimension_numbers = #tpu.dot_dimension_numbers<[1], [0], [0], [1], [0, 0, 1, 1], [], []>} : vector<2x256xf32>, vector<256x256xf32>, vector<2x256xf32> -> vector<2x256xf32>
    %39 = vector.broadcast %3 : vector<1x256xf32> to vector<2x256xf32>
    %40 = arith.addf %38, %39 : vector<2x256xf32>
    %cst_20 = arith.constant dense<0.000000e+00> : vector<2xf32>
    %41 = vector.multi_reduction <add>, %40, %cst_20 [1] : vector<2x256xf32> to vector<2xf32>
    %42 = vector.shape_cast %41 : vector<2xf32> to vector<2x1xf32>
    %cst_21 = arith.constant 2.560000e+02 : f32
    %43 = vector.broadcast %cst_21 : f32 to vector<2x1xf32>
    %44 = arith.divf %42, %43 : vector<2x1xf32>
    %45 = arith.mulf %40, %40 : vector<2x256xf32>
    %cst_22 = arith.constant dense<0.000000e+00> : vector<2xf32>
    %46 = vector.multi_reduction <add>, %45, %cst_22 [1] : vector<2x256xf32> to vector<2xf32>
    %47 = vector.shape_cast %46 : vector<2xf32> to vector<2x1xf32>
    %cst_23 = arith.constant 2.560000e+02 : f32
    %48 = vector.broadcast %cst_23 : f32 to vector<2x1xf32>
    %49 = arith.divf %47, %48 : vector<2x1xf32>
    %50 = arith.mulf %44, %44 : vector<2x1xf32>
    %51 = arith.subf %49, %50 : vector<2x1xf32>
    %cst_24 = arith.constant 0.000000e+00 : f32
    %52 = vector.broadcast %cst_24 : f32 to vector<2x1xf32>
    %53 = arith.maximumf %51, %52 : vector<2x1xf32>
    %54 = vector.broadcast %44 : vector<2x1xf32> to vector<2x256xf32>
    %55 = arith.subf %40, %54 : vector<2x256xf32>
    %cst_25 = arith.constant 9.99999974E-6 : f32
    %56 = vector.broadcast %cst_25 : f32 to vector<2x1xf32>
    %57 = arith.addf %53, %56 : vector<2x1xf32>
    %58 = math.rsqrt %57 : vector<2x1xf32>
    %59 = vector.broadcast %58 : vector<2x1xf32> to vector<2x256xf32>
    %60 = arith.mulf %55, %59 : vector<2x256xf32>
    %61 = vector.broadcast %4 : vector<1x256xf32> to vector<2x256xf32>
    %62 = arith.mulf %60, %61 : vector<2x256xf32>
    %63 = vector.broadcast %5 : vector<1x256xf32> to vector<2x256xf32>
    %64 = arith.addf %62, %63 : vector<2x256xf32>
    %cst_26 = arith.constant 0.000000e+00 : f32
    %65 = vector.broadcast %cst_26 : f32 to vector<2x256xf32>
    %66 = arith.maximumf %64, %65 : vector<2x256xf32>
    %c6 = arith.constant 6 : index
    %c0_27 = arith.constant 0 : index
    %67 = vector.load %arg3[%c6, %c0_27] : memref<344x256xf32, #tpu.memory_space<vmem>>, vector<1x256xf32>
    %c7 = arith.constant 7 : index
    %c0_28 = arith.constant 0 : index
    %68 = vector.load %arg3[%c7, %c0_28] : memref<344x256xf32, #tpu.memory_space<vmem>>, vector<1x256xf32>
    %c8 = arith.constant 8 : index
    %c0_29 = arith.constant 0 : index
    %69 = vector.load %arg3[%c8, %c0_29] : memref<344x256xf32, #tpu.memory_space<vmem>>, vector<1x256xf32>
    %c9 = arith.constant 9 : index
    %c0_30 = arith.constant 0 : index
    %70 = vector.load %arg3[%c9, %c0_30] : memref<344x256xf32, #tpu.memory_space<vmem>>, vector<1x256xf32>
    %c11 = arith.constant 11 : index
    %c0_31 = arith.constant 0 : index
    %71 = vector.load %arg3[%c11, %c0_31] : memref<344x256xf32, #tpu.memory_space<vmem>>, vector<1x256xf32>
    %c12 = arith.constant 12 : index
    %c0_32 = arith.constant 0 : index
    %72 = vector.load %arg3[%c12, %c0_32] : memref<344x256xf32, #tpu.memory_space<vmem>>, vector<1x256xf32>
    %c13 = arith.constant 13 : index
    %c0_33 = arith.constant 0 : index
    %73 = vector.load %arg3[%c13, %c0_33] : memref<344x256xf32, #tpu.memory_space<vmem>>, vector<1x256xf32>
    %c14 = arith.constant 14 : index
    %c0_34 = arith.constant 0 : index
    %74 = vector.load %arg3[%c14, %c0_34] : memref<344x256xf32, #tpu.memory_space<vmem>>, vector<1x256xf32>
    %75 = vector.shape_cast %67 : vector<1x256xf32> to vector<1x256xf32>
    %76 = vector.broadcast %75 : vector<1x256xf32> to vector<32x256xf32>
    %77 = vector.shape_cast %68 : vector<1x256xf32> to vector<1x256xf32>
    %78 = vector.broadcast %77 : vector<1x256xf32> to vector<32x256xf32>
    %79 = vector.shape_cast %69 : vector<1x256xf32> to vector<1x256xf32>
    %80 = vector.broadcast %79 : vector<1x256xf32> to vector<32x256xf32>
    %81 = vector.shape_cast %70 : vector<1x256xf32> to vector<1x256xf32>
    %82 = vector.broadcast %81 : vector<1x256xf32> to vector<32x256xf32>
    %83 = vector.shape_cast %71 : vector<1x256xf32> to vector<1x256xf32>
    %84 = vector.broadcast %83 : vector<1x256xf32> to vector<32x256xf32>
    %85 = vector.shape_cast %72 : vector<1x256xf32> to vector<1x256xf32>
    %86 = vector.broadcast %85 : vector<1x256xf32> to vector<32x256xf32>
    %87 = vector.shape_cast %73 : vector<1x256xf32> to vector<1x256xf32>
    %88 = vector.broadcast %87 : vector<1x256xf32> to vector<32x256xf32>
    %89 = vector.shape_cast %74 : vector<1x256xf32> to vector<1x256xf32>
    %90 = vector.broadcast %89 : vector<1x256xf32> to vector<32x256xf32>
    %91 = vector.shape_cast %67 : vector<1x256xf32> to vector<1x256xf32>
    %92 = vector.broadcast %91 : vector<1x256xf32> to vector<64x256xf32>
    %93 = vector.shape_cast %68 : vector<1x256xf32> to vector<1x256xf32>
    %94 = vector.broadcast %93 : vector<1x256xf32> to vector<64x256xf32>
    %95 = vector.shape_cast %69 : vector<1x256xf32> to vector<1x256xf32>
    %96 = vector.broadcast %95 : vector<1x256xf32> to vector<64x256xf32>
    %97 = vector.shape_cast %70 : vector<1x256xf32> to vector<1x256xf32>
    %98 = vector.broadcast %97 : vector<1x256xf32> to vector<64x256xf32>
    %99 = vector.shape_cast %71 : vector<1x256xf32> to vector<1x256xf32>
    %100 = vector.broadcast %99 : vector<1x256xf32> to vector<64x256xf32>
    %101 = vector.shape_cast %72 : vector<1x256xf32> to vector<1x256xf32>
    %102 = vector.broadcast %101 : vector<1x256xf32> to vector<64x256xf32>
    %103 = vector.shape_cast %73 : vector<1x256xf32> to vector<1x256xf32>
    %104 = vector.broadcast %103 : vector<1x256xf32> to vector<64x256xf32>
    %105 = vector.shape_cast %74 : vector<1x256xf32> to vector<1x256xf32>
    %106 = vector.broadcast %105 : vector<1x256xf32> to vector<64x256xf32>
    %c16 = arith.constant 16 : index
    %c0_35 = arith.constant 0 : index
    %107 = vector.load %arg3[%c16, %c0_35] : memref<344x256xf32, #tpu.memory_space<vmem>>, vector<32x9xf32>
    %c48 = arith.constant 48 : index
    %c0_36 = arith.constant 0 : index
    %108 = vector.load %arg3[%c48, %c0_36] : memref<344x256xf32, #tpu.memory_space<vmem>>, vector<32x256xf32>
    %c80 = arith.constant 80 : index
    %c0_37 = arith.constant 0 : index
    %109 = vector.load %arg3[%c80, %c0_37] : memref<344x256xf32, #tpu.memory_space<vmem>>, vector<32x256xf32>
    %c112 = arith.constant 112 : index
    %c0_38 = arith.constant 0 : index
    %110 = vector.load %arg3[%c112, %c0_38] : memref<344x256xf32, #tpu.memory_space<vmem>>, vector<32x256xf32>
    %c144 = arith.constant 144 : index
    %c0_39 = arith.constant 0 : index
    %111 = vector.load %arg3[%c144, %c0_39] : memref<344x256xf32, #tpu.memory_space<vmem>>, vector<64x256xf32>
    %c208 = arith.constant 208 : index
    %c0_40 = arith.constant 0 : index
    %112 = vector.load %arg3[%c208, %c0_40] : memref<344x256xf32, #tpu.memory_space<vmem>>, vector<64x256xf32>
    %c272 = arith.constant 272 : index
    %c0_41 = arith.constant 0 : index
    %113 = vector.load %arg3[%c272, %c0_41] : memref<344x256xf32, #tpu.memory_space<vmem>>, vector<64x256xf32>
    %c336 = arith.constant 336 : index
    %c0_42 = arith.constant 0 : index
    %114 = vector.load %arg3[%c336, %c0_42] : memref<344x256xf32, #tpu.memory_space<vmem>>, vector<4x256xf32>
    %115 = vector.extract_strided_slice %66 {offsets = [0, 0], sizes = [1, 256], strides = [1, 1]} : vector<2x256xf32> to vector<1x256xf32>
    %c17_i32 = arith.constant 17 : i32
    %116 = tpu.dynamic_rotate %115 by %c17_i32 dim 1 : vector<1x256xf32>, i32 -> vector<1x256xf32>
    %117 = arith.mulf %116, %67 : vector<1x256xf32>
    %c16_i32 = arith.constant 16 : i32
    %118 = tpu.dynamic_rotate %115 by %c16_i32 dim 1 : vector<1x256xf32>, i32 -> vector<1x256xf32>
    %119 = arith.mulf %118, %68 : vector<1x256xf32>
    %c15_i32 = arith.constant 15 : i32
    %120 = tpu.dynamic_rotate %115 by %c15_i32 dim 1 : vector<1x256xf32>, i32 -> vector<1x256xf32>
    %121 = arith.mulf %120, %69 : vector<1x256xf32>
    %c1_i32 = arith.constant 1 : i32
    %122 = tpu.dynamic_rotate %115 by %c1_i32 dim 1 : vector<1x256xf32>, i32 -> vector<1x256xf32>
    %123 = arith.mulf %122, %70 : vector<1x256xf32>
    %c255_i32 = arith.constant 255 : i32
    %124 = tpu.dynamic_rotate %115 by %c255_i32 dim 1 : vector<1x256xf32>, i32 -> vector<1x256xf32>
    %125 = arith.mulf %124, %71 : vector<1x256xf32>
    %c241_i32 = arith.constant 241 : i32
    %126 = tpu.dynamic_rotate %115 by %c241_i32 dim 1 : vector<1x256xf32>, i32 -> vector<1x256xf32>
    %127 = arith.mulf %126, %72 : vector<1x256xf32>
    %c240_i32 = arith.constant 240 : i32
    %128 = tpu.dynamic_rotate %115 by %c240_i32 dim 1 : vector<1x256xf32>, i32 -> vector<1x256xf32>
    %129 = arith.mulf %128, %73 : vector<1x256xf32>
    %c239_i32 = arith.constant 239 : i32
    %130 = tpu.dynamic_rotate %115 by %c239_i32 dim 1 : vector<1x256xf32>, i32 -> vector<1x256xf32>
    %131 = arith.mulf %130, %74 : vector<1x256xf32>
    %132 = tpu.concatenate %117, %119, %121, %123, %115, %125, %127, %129, %131 in 0 : vector<1x256xf32>, vector<1x256xf32>, vector<1x256xf32>, vector<1x256xf32>, vector<1x256xf32>, vector<1x256xf32>, vector<1x256xf32>, vector<1x256xf32>, vector<1x256xf32> -> vector<9x256xf32>
    %cst_43 = arith.constant dense<0.000000e+00> : vector<32x256xf32>
    %133 = tpu.matmul %107, %132, %cst_43 {dimension_numbers = #tpu.dot_dimension_numbers<[1], [0], [0], [1], [0, 0, 1, 1], [], []>} : vector<32x9xf32>, vector<9x256xf32>, vector<32x256xf32> -> vector<32x256xf32>
    %134 = arith.addf %133, %108 : vector<32x256xf32>
    %135 = vector.shape_cast %134 : vector<32x256xf32> to vector<1x32x256xf32>
    %cst_44 = arith.constant dense<0.000000e+00> : vector<1xf32>
    %136 = vector.multi_reduction <add>, %135, %cst_44 [1, 2] : vector<1x32x256xf32> to vector<1xf32>
    %137 = vector.shape_cast %136 : vector<1xf32> to vector<1x1x1xf32>
    %138 = vector.extract %137[0, 0, 0] : f32 from vector<1x1x1xf32>
    %cst_45 = arith.constant 8.192000e+03 : f32
    %139 = arith.divf %138, %cst_45 : f32
    %140 = arith.mulf %134, %134 : vector<32x256xf32>
    %141 = vector.shape_cast %140 : vector<32x256xf32> to vector<1x32x256xf32>
    %cst_46 = arith.constant dense<0.000000e+00> : vector<1xf32>
    %142 = vector.multi_reduction <add>, %141, %cst_46 [1, 2] : vector<1x32x256xf32> to vector<1xf32>
    %143 = vector.shape_cast %142 : vector<1xf32> to vector<1x1x1xf32>
    %144 = vector.extract %143[0, 0, 0] : f32 from vector<1x1x1xf32>
    %cst_47 = arith.constant 8.192000e+03 : f32
    %145 = arith.divf %144, %cst_47 : f32
    %146 = arith.mulf %139, %139 : f32
    %147 = arith.subf %145, %146 : f32
    %cst_48 = arith.constant 0.000000e+00 : f32
    %148 = arith.maximumf %147, %cst_48 : f32
    %149 = vector.broadcast %139 : f32 to vector<32x256xf32>
    %150 = arith.subf %134, %149 : vector<32x256xf32>
    %cst_49 = arith.constant 9.99999974E-6 : f32
    %151 = arith.addf %148, %cst_49 : f32
    %152 = math.rsqrt %151 : f32
    %153 = vector.broadcast %152 : f32 to vector<32x256xf32>
    %154 = arith.mulf %150, %153 : vector<32x256xf32>
    %155 = arith.mulf %154, %109 : vector<32x256xf32>
    %156 = arith.addf %155, %110 : vector<32x256xf32>
    %cst_50 = arith.constant 0.000000e+00 : f32
    %157 = vector.broadcast %cst_50 : f32 to vector<32x256xf32>
    %158 = arith.maximumf %156, %157 : vector<32x256xf32>
    %c17_i32_51 = arith.constant 17 : i32
    %159 = tpu.dynamic_rotate %158 by %c17_i32_51 dim 1 : vector<32x256xf32>, i32 -> vector<32x256xf32>
    %160 = arith.mulf %159, %76 : vector<32x256xf32>
    %c0_52 = arith.constant 0 : index
    %c0_53 = arith.constant 0 : index
    %161 = vector.load %arg4[%c0_52, %c0_53] : memref<576x32xf32, #tpu.memory_space<vmem>>, vector<64x32xf32>
    %cst_54 = arith.constant dense<0.000000e+00> : vector<64x256xf32>
    %162 = tpu.matmul %161, %160, %cst_54 {dimension_numbers = #tpu.dot_dimension_numbers<[1], [0], [0], [1], [0, 0, 1, 1], [], []>} : vector<64x32xf32>, vector<32x256xf32>, vector<64x256xf32> -> vector<64x256xf32>
    %c16_i32_55 = arith.constant 16 : i32
    %163 = tpu.dynamic_rotate %158 by %c16_i32_55 dim 1 : vector<32x256xf32>, i32 -> vector<32x256xf32>
    %164 = arith.mulf %163, %78 : vector<32x256xf32>
    %c64 = arith.constant 64 : index
    %c0_56 = arith.constant 0 : index
    %165 = vector.load %arg4[%c64, %c0_56] : memref<576x32xf32, #tpu.memory_space<vmem>>, vector<64x32xf32>
    %cst_57 = arith.constant dense<0.000000e+00> : vector<64x256xf32>
    %166 = tpu.matmul %165, %164, %cst_57 {dimension_numbers = #tpu.dot_dimension_numbers<[1], [0], [0], [1], [0, 0, 1, 1], [], []>} : vector<64x32xf32>, vector<32x256xf32>, vector<64x256xf32> -> vector<64x256xf32>
    %167 = arith.addf %162, %166 : vector<64x256xf32>
    %c15_i32_58 = arith.constant 15 : i32
    %168 = tpu.dynamic_rotate %158 by %c15_i32_58 dim 1 : vector<32x256xf32>, i32 -> vector<32x256xf32>
    %169 = arith.mulf %168, %80 : vector<32x256xf32>
    %c128 = arith.constant 128 : index
    %c0_59 = arith.constant 0 : index
    %170 = vector.load %arg4[%c128, %c0_59] : memref<576x32xf32, #tpu.memory_space<vmem>>, vector<64x32xf32>
    %cst_60 = arith.constant dense<0.000000e+00> : vector<64x256xf32>
    %171 = tpu.matmul %170, %169, %cst_60 {dimension_numbers = #tpu.dot_dimension_numbers<[1], [0], [0], [1], [0, 0, 1, 1], [], []>} : vector<64x32xf32>, vector<32x256xf32>, vector<64x256xf32> -> vector<64x256xf32>
    %172 = arith.addf %167, %171 : vector<64x256xf32>
    %c1_i32_61 = arith.constant 1 : i32
    %173 = tpu.dynamic_rotate %158 by %c1_i32_61 dim 1 : vector<32x256xf32>, i32 -> vector<32x256xf32>
    %174 = arith.mulf %173, %82 : vector<32x256xf32>
    %c192 = arith.constant 192 : index
    %c0_62 = arith.constant 0 : index
    %175 = vector.load %arg4[%c192, %c0_62] : memref<576x32xf32, #tpu.memory_space<vmem>>, vector<64x32xf32>
    %cst_63 = arith.constant dense<0.000000e+00> : vector<64x256xf32>
    %176 = tpu.matmul %175, %174, %cst_63 {dimension_numbers = #tpu.dot_dimension_numbers<[1], [0], [0], [1], [0, 0, 1, 1], [], []>} : vector<64x32xf32>, vector<32x256xf32>, vector<64x256xf32> -> vector<64x256xf32>
    %177 = arith.addf %172, %176 : vector<64x256xf32>
    %c256 = arith.constant 256 : index
    %c0_64 = arith.constant 0 : index
    %178 = vector.load %arg4[%c256, %c0_64] : memref<576x32xf32, #tpu.memory_space<vmem>>, vector<64x32xf32>
    %cst_65 = arith.constant dense<0.000000e+00> : vector<64x256xf32>
    %179 = tpu.matmul %178, %158, %cst_65 {dimension_numbers = #tpu.dot_dimension_numbers<[1], [0], [0], [1], [0, 0, 1, 1], [], []>} : vector<64x32xf32>, vector<32x256xf32>, vector<64x256xf32> -> vector<64x256xf32>
    %180 = arith.addf %177, %179 : vector<64x256xf32>
    %c255_i32_66 = arith.constant 255 : i32
    %181 = tpu.dynamic_rotate %158 by %c255_i32_66 dim 1 : vector<32x256xf32>, i32 -> vector<32x256xf32>
    %182 = arith.mulf %181, %84 : vector<32x256xf32>
    %c320 = arith.constant 320 : index
    %c0_67 = arith.constant 0 : index
    %183 = vector.load %arg4[%c320, %c0_67] : memref<576x32xf32, #tpu.memory_space<vmem>>, vector<64x32xf32>
    %cst_68 = arith.constant dense<0.000000e+00> : vector<64x256xf32>
    %184 = tpu.matmul %183, %182, %cst_68 {dimension_numbers = #tpu.dot_dimension_numbers<[1], [0], [0], [1], [0, 0, 1, 1], [], []>} : vector<64x32xf32>, vector<32x256xf32>, vector<64x256xf32> -> vector<64x256xf32>
    %185 = arith.addf %180, %184 : vector<64x256xf32>
    %c241_i32_69 = arith.constant 241 : i32
    %186 = tpu.dynamic_rotate %158 by %c241_i32_69 dim 1 : vector<32x256xf32>, i32 -> vector<32x256xf32>
    %187 = arith.mulf %186, %86 : vector<32x256xf32>
    %c384 = arith.constant 384 : index
    %c0_70 = arith.constant 0 : index
    %188 = vector.load %arg4[%c384, %c0_70] : memref<576x32xf32, #tpu.memory_space<vmem>>, vector<64x32xf32>
    %cst_71 = arith.constant dense<0.000000e+00> : vector<64x256xf32>
    %189 = tpu.matmul %188, %187, %cst_71 {dimension_numbers = #tpu.dot_dimension_numbers<[1], [0], [0], [1], [0, 0, 1, 1], [], []>} : vector<64x32xf32>, vector<32x256xf32>, vector<64x256xf32> -> vector<64x256xf32>
    %190 = arith.addf %185, %189 : vector<64x256xf32>
    %c240_i32_72 = arith.constant 240 : i32
    %191 = tpu.dynamic_rotate %158 by %c240_i32_72 dim 1 : vector<32x256xf32>, i32 -> vector<32x256xf32>
    %192 = arith.mulf %191, %88 : vector<32x256xf32>
    %c448 = arith.constant 448 : index
    %c0_73 = arith.constant 0 : index
    %193 = vector.load %arg4[%c448, %c0_73] : memref<576x32xf32, #tpu.memory_space<vmem>>, vector<64x32xf32>
    %cst_74 = arith.constant dense<0.000000e+00> : vector<64x256xf32>
    %194 = tpu.matmul %193, %192, %cst_74 {dimension_numbers = #tpu.dot_dimension_numbers<[1], [0], [0], [1], [0, 0, 1, 1], [], []>} : vector<64x32xf32>, vector<32x256xf32>, vector<64x256xf32> -> vector<64x256xf32>
    %195 = arith.addf %190, %194 : vector<64x256xf32>
    %c239_i32_75 = arith.constant 239 : i32
    %196 = tpu.dynamic_rotate %158 by %c239_i32_75 dim 1 : vector<32x256xf32>, i32 -> vector<32x256xf32>
    %197 = arith.mulf %196, %90 : vector<32x256xf32>
    %c512 = arith.constant 512 : index
    %c0_76 = arith.constant 0 : index
    %198 = vector.load %arg4[%c512, %c0_76] : memref<576x32xf32, #tpu.memory_space<vmem>>, vector<64x32xf32>
    %cst_77 = arith.constant dense<0.000000e+00> : vector<64x256xf32>
    %199 = tpu.matmul %198, %197, %cst_77 {dimension_numbers = #tpu.dot_dimension_numbers<[1], [0], [0], [1], [0, 0, 1, 1], [], []>} : vector<64x32xf32>, vector<32x256xf32>, vector<64x256xf32> -> vector<64x256xf32>
    %200 = arith.addf %195, %199 : vector<64x256xf32>
    %201 = arith.addf %200, %111 : vector<64x256xf32>
    %202 = vector.shape_cast %201 : vector<64x256xf32> to vector<1x64x256xf32>
    %cst_78 = arith.constant dense<0.000000e+00> : vector<1xf32>
    %203 = vector.multi_reduction <add>, %202, %cst_78 [1, 2] : vector<1x64x256xf32> to vector<1xf32>
    %204 = vector.shape_cast %203 : vector<1xf32> to vector<1x1x1xf32>
    %205 = vector.extract %204[0, 0, 0] : f32 from vector<1x1x1xf32>
    %cst_79 = arith.constant 1.638400e+04 : f32
    %206 = arith.divf %205, %cst_79 : f32
    %207 = arith.mulf %201, %201 : vector<64x256xf32>
    %208 = vector.shape_cast %207 : vector<64x256xf32> to vector<1x64x256xf32>
    %cst_80 = arith.constant dense<0.000000e+00> : vector<1xf32>
    %209 = vector.multi_reduction <add>, %208, %cst_80 [1, 2] : vector<1x64x256xf32> to vector<1xf32>
    %210 = vector.shape_cast %209 : vector<1xf32> to vector<1x1x1xf32>
    %211 = vector.extract %210[0, 0, 0] : f32 from vector<1x1x1xf32>
    %cst_81 = arith.constant 1.638400e+04 : f32
    %212 = arith.divf %211, %cst_81 : f32
    %213 = arith.mulf %206, %206 : f32
    %214 = arith.subf %212, %213 : f32
    %cst_82 = arith.constant 0.000000e+00 : f32
    %215 = arith.maximumf %214, %cst_82 : f32
    %216 = vector.broadcast %206 : f32 to vector<64x256xf32>
    %217 = arith.subf %201, %216 : vector<64x256xf32>
    %cst_83 = arith.constant 9.99999974E-6 : f32
    %218 = arith.addf %215, %cst_83 : f32
    %219 = math.rsqrt %218 : f32
    %220 = vector.broadcast %219 : f32 to vector<64x256xf32>
    %221 = arith.mulf %217, %220 : vector<64x256xf32>
    %222 = arith.mulf %221, %112 : vector<64x256xf32>
    %223 = arith.addf %222, %113 : vector<64x256xf32>
    %cst_84 = arith.constant 0.000000e+00 : f32
    %224 = vector.broadcast %cst_84 : f32 to vector<64x256xf32>
    %225 = arith.maximumf %223, %224 : vector<64x256xf32>
    %c17_i32_85 = arith.constant 17 : i32
    %226 = tpu.dynamic_rotate %225 by %c17_i32_85 dim 1 : vector<64x256xf32>, i32 -> vector<64x256xf32>
    %227 = arith.mulf %226, %92 : vector<64x256xf32>
    %c0_86 = arith.constant 0 : index
    %c0_87 = arith.constant 0 : index
    %228 = vector.load %arg5[%c0_86, %c0_87] : memref<72x64xf32, #tpu.memory_space<vmem>>, vector<8x64xf32>
    %cst_88 = arith.constant dense<0.000000e+00> : vector<8x256xf32>
    %229 = tpu.matmul %228, %227, %cst_88 {dimension_numbers = #tpu.dot_dimension_numbers<[1], [0], [0], [1], [0, 0, 1, 1], [], []>} : vector<8x64xf32>, vector<64x256xf32>, vector<8x256xf32> -> vector<8x256xf32>
    %c16_i32_89 = arith.constant 16 : i32
    %230 = tpu.dynamic_rotate %225 by %c16_i32_89 dim 1 : vector<64x256xf32>, i32 -> vector<64x256xf32>
    %231 = arith.mulf %230, %94 : vector<64x256xf32>
    %c8_90 = arith.constant 8 : index
    %c0_91 = arith.constant 0 : index
    %232 = vector.load %arg5[%c8_90, %c0_91] : memref<72x64xf32, #tpu.memory_space<vmem>>, vector<8x64xf32>
    %cst_92 = arith.constant dense<0.000000e+00> : vector<8x256xf32>
    %233 = tpu.matmul %232, %231, %cst_92 {dimension_numbers = #tpu.dot_dimension_numbers<[1], [0], [0], [1], [0, 0, 1, 1], [], []>} : vector<8x64xf32>, vector<64x256xf32>, vector<8x256xf32> -> vector<8x256xf32>
    %234 = arith.addf %229, %233 : vector<8x256xf32>
    %c15_i32_93 = arith.constant 15 : i32
    %235 = tpu.dynamic_rotate %225 by %c15_i32_93 dim 1 : vector<64x256xf32>, i32 -> vector<64x256xf32>
    %236 = arith.mulf %235, %96 : vector<64x256xf32>
    %c16_94 = arith.constant 16 : index
    %c0_95 = arith.constant 0 : index
    %237 = vector.load %arg5[%c16_94, %c0_95] : memref<72x64xf32, #tpu.memory_space<vmem>>, vector<8x64xf32>
    %cst_96 = arith.constant dense<0.000000e+00> : vector<8x256xf32>
    %238 = tpu.matmul %237, %236, %cst_96 {dimension_numbers = #tpu.dot_dimension_numbers<[1], [0], [0], [1], [0, 0, 1, 1], [], []>} : vector<8x64xf32>, vector<64x256xf32>, vector<8x256xf32> -> vector<8x256xf32>
    %239 = arith.addf %234, %238 : vector<8x256xf32>
    %c1_i32_97 = arith.constant 1 : i32
    %240 = tpu.dynamic_rotate %225 by %c1_i32_97 dim 1 : vector<64x256xf32>, i32 -> vector<64x256xf32>
    %241 = arith.mulf %240, %98 : vector<64x256xf32>
    %c24 = arith.constant 24 : index
    %c0_98 = arith.constant 0 : index
    %242 = vector.load %arg5[%c24, %c0_98] : memref<72x64xf32, #tpu.memory_space<vmem>>, vector<8x64xf32>
    %cst_99 = arith.constant dense<0.000000e+00> : vector<8x256xf32>
    %243 = tpu.matmul %242, %241, %cst_99 {dimension_numbers = #tpu.dot_dimension_numbers<[1], [0], [0], [1], [0, 0, 1, 1], [], []>} : vector<8x64xf32>, vector<64x256xf32>, vector<8x256xf32> -> vector<8x256xf32>
    %244 = arith.addf %239, %243 : vector<8x256xf32>
    %c32 = arith.constant 32 : index
    %c0_100 = arith.constant 0 : index
    %245 = vector.load %arg5[%c32, %c0_100] : memref<72x64xf32, #tpu.memory_space<vmem>>, vector<8x64xf32>
    %cst_101 = arith.constant dense<0.000000e+00> : vector<8x256xf32>
    %246 = tpu.matmul %245, %225, %cst_101 {dimension_numbers = #tpu.dot_dimension_numbers<[1], [0], [0], [1], [0, 0, 1, 1], [], []>} : vector<8x64xf32>, vector<64x256xf32>, vector<8x256xf32> -> vector<8x256xf32>
    %247 = arith.addf %244, %246 : vector<8x256xf32>
    %c255_i32_102 = arith.constant 255 : i32
    %248 = tpu.dynamic_rotate %225 by %c255_i32_102 dim 1 : vector<64x256xf32>, i32 -> vector<64x256xf32>
    %249 = arith.mulf %248, %100 : vector<64x256xf32>
    %c40 = arith.constant 40 : index
    %c0_103 = arith.constant 0 : index
    %250 = vector.load %arg5[%c40, %c0_103] : memref<72x64xf32, #tpu.memory_space<vmem>>, vector<8x64xf32>
    %cst_104 = arith.constant dense<0.000000e+00> : vector<8x256xf32>
    %251 = tpu.matmul %250, %249, %cst_104 {dimension_numbers = #tpu.dot_dimension_numbers<[1], [0], [0], [1], [0, 0, 1, 1], [], []>} : vector<8x64xf32>, vector<64x256xf32>, vector<8x256xf32> -> vector<8x256xf32>
    %252 = arith.addf %247, %251 : vector<8x256xf32>
    %c241_i32_105 = arith.constant 241 : i32
    %253 = tpu.dynamic_rotate %225 by %c241_i32_105 dim 1 : vector<64x256xf32>, i32 -> vector<64x256xf32>
    %254 = arith.mulf %253, %102 : vector<64x256xf32>
    %c48_106 = arith.constant 48 : index
    %c0_107 = arith.constant 0 : index
    %255 = vector.load %arg5[%c48_106, %c0_107] : memref<72x64xf32, #tpu.memory_space<vmem>>, vector<8x64xf32>
    %cst_108 = arith.constant dense<0.000000e+00> : vector<8x256xf32>
    %256 = tpu.matmul %255, %254, %cst_108 {dimension_numbers = #tpu.dot_dimension_numbers<[1], [0], [0], [1], [0, 0, 1, 1], [], []>} : vector<8x64xf32>, vector<64x256xf32>, vector<8x256xf32> -> vector<8x256xf32>
    %257 = arith.addf %252, %256 : vector<8x256xf32>
    %c240_i32_109 = arith.constant 240 : i32
    %258 = tpu.dynamic_rotate %225 by %c240_i32_109 dim 1 : vector<64x256xf32>, i32 -> vector<64x256xf32>
    %259 = arith.mulf %258, %104 : vector<64x256xf32>
    %c56 = arith.constant 56 : index
    %c0_110 = arith.constant 0 : index
    %260 = vector.load %arg5[%c56, %c0_110] : memref<72x64xf32, #tpu.memory_space<vmem>>, vector<8x64xf32>
    %cst_111 = arith.constant dense<0.000000e+00> : vector<8x256xf32>
    %261 = tpu.matmul %260, %259, %cst_111 {dimension_numbers = #tpu.dot_dimension_numbers<[1], [0], [0], [1], [0, 0, 1, 1], [], []>} : vector<8x64xf32>, vector<64x256xf32>, vector<8x256xf32> -> vector<8x256xf32>
    %262 = arith.addf %257, %261 : vector<8x256xf32>
    %c239_i32_112 = arith.constant 239 : i32
    %263 = tpu.dynamic_rotate %225 by %c239_i32_112 dim 1 : vector<64x256xf32>, i32 -> vector<64x256xf32>
    %264 = arith.mulf %263, %106 : vector<64x256xf32>
    %c64_113 = arith.constant 64 : index
    %c0_114 = arith.constant 0 : index
    %265 = vector.load %arg5[%c64_113, %c0_114] : memref<72x64xf32, #tpu.memory_space<vmem>>, vector<8x64xf32>
    %cst_115 = arith.constant dense<0.000000e+00> : vector<8x256xf32>
    %266 = tpu.matmul %265, %264, %cst_115 {dimension_numbers = #tpu.dot_dimension_numbers<[1], [0], [0], [1], [0, 0, 1, 1], [], []>} : vector<8x64xf32>, vector<64x256xf32>, vector<8x256xf32> -> vector<8x256xf32>
    %267 = arith.addf %262, %266 : vector<8x256xf32>
    %268 = vector.extract_strided_slice %267 {offsets = [0, 0], sizes = [4, 256], strides = [1, 1]} : vector<8x256xf32> to vector<4x256xf32>
    %269 = arith.addf %268, %114 : vector<4x256xf32>
    %c0_116 = arith.constant 0 : index
    %c0_117 = arith.constant 0 : index
    %c0_118 = arith.constant 0 : index
    %270 = vector.load %arg6[%c0_116, %c0_117, %c0_118] : memref<2x4x256xf32, #tpu.memory_space<vmem>>, vector<1x4x256xf32>
    %271 = vector.shape_cast %270 : vector<1x4x256xf32> to vector<4x256xf32>
    %272 = vector.shape_cast %269 : vector<4x256xf32> to vector<1x4x256xf32>
    tpu.vector_store %arg6[%c0_116, %c0_117, %c0_118], %272 {strides = array<i32>} : memref<2x4x256xf32, #tpu.memory_space<vmem>>, vector<1x4x256xf32>,
    %273 = vector.extract_strided_slice %66 {offsets = [1, 0], sizes = [1, 256], strides = [1, 1]} : vector<2x256xf32> to vector<1x256xf32>
    %c17_i32_119 = arith.constant 17 : i32
    %274 = tpu.dynamic_rotate %273 by %c17_i32_119 dim 1 : vector<1x256xf32>, i32 -> vector<1x256xf32>
    %275 = arith.mulf %274, %67 : vector<1x256xf32>
    %c16_i32_120 = arith.constant 16 : i32
    %276 = tpu.dynamic_rotate %273 by %c16_i32_120 dim 1 : vector<1x256xf32>, i32 -> vector<1x256xf32>
    %277 = arith.mulf %276, %68 : vector<1x256xf32>
    %c15_i32_121 = arith.constant 15 : i32
    %278 = tpu.dynamic_rotate %273 by %c15_i32_121 dim 1 : vector<1x256xf32>, i32 -> vector<1x256xf32>
    %279 = arith.mulf %278, %69 : vector<1x256xf32>
    %c1_i32_122 = arith.constant 1 : i32
    %280 = tpu.dynamic_rotate %273 by %c1_i32_122 dim 1 : vector<1x256xf32>, i32 -> vector<1x256xf32>
    %281 = arith.mulf %280, %70 : vector<1x256xf32>
    %c255_i32_123 = arith.constant 255 : i32
    %282 = tpu.dynamic_rotate %273 by %c255_i32_123 dim 1 : vector<1x256xf32>, i32 -> vector<1x256xf32>
    %283 = arith.mulf %282, %71 : vector<1x256xf32>
    %c241_i32_124 = arith.constant 241 : i32
    %284 = tpu.dynamic_rotate %273 by %c241_i32_124 dim 1 : vector<1x256xf32>, i32 -> vector<1x256xf32>
    %285 = arith.mulf %284, %72 : vector<1x256xf32>
    %c240_i32_125 = arith.constant 240 : i32
    %286 = tpu.dynamic_rotate %273 by %c240_i32_125 dim 1 : vector<1x256xf32>, i32 -> vector<1x256xf32>
    %287 = arith.mulf %286, %73 : vector<1x256xf32>
    %c239_i32_126 = arith.constant 239 : i32
    %288 = tpu.dynamic_rotate %273 by %c239_i32_126 dim 1 : vector<1x256xf32>, i32 -> vector<1x256xf32>
    %289 = arith.mulf %288, %74 : vector<1x256xf32>
    %290 = tpu.concatenate %275, %277, %279, %281, %273, %283, %285, %287, %289 in 0 : vector<1x256xf32>, vector<1x256xf32>, vector<1x256xf32>, vector<1x256xf32>, vector<1x256xf32>, vector<1x256xf32>, vector<1x256xf32>, vector<1x256xf32>, vector<1x256xf32> -> vector<9x256xf32>
    %cst_127 = arith.constant dense<0.000000e+00> : vector<32x256xf32>
    %291 = tpu.matmul %107, %290, %cst_127 {dimension_numbers = #tpu.dot_dimension_numbers<[1], [0], [0], [1], [0, 0, 1, 1], [], []>} : vector<32x9xf32>, vector<9x256xf32>, vector<32x256xf32> -> vector<32x256xf32>
    %292 = arith.addf %291, %108 : vector<32x256xf32>
    %293 = vector.shape_cast %292 : vector<32x256xf32> to vector<1x32x256xf32>
    %cst_128 = arith.constant dense<0.000000e+00> : vector<1xf32>
    %294 = vector.multi_reduction <add>, %293, %cst_128 [1, 2] : vector<1x32x256xf32> to vector<1xf32>
    %295 = vector.shape_cast %294 : vector<1xf32> to vector<1x1x1xf32>
    %296 = vector.extract %295[0, 0, 0] : f32 from vector<1x1x1xf32>
    %cst_129 = arith.constant 8.192000e+03 : f32
    %297 = arith.divf %296, %cst_129 : f32
    %298 = arith.mulf %292, %292 : vector<32x256xf32>
    %299 = vector.shape_cast %298 : vector<32x256xf32> to vector<1x32x256xf32>
    %cst_130 = arith.constant dense<0.000000e+00> : vector<1xf32>
    %300 = vector.multi_reduction <add>, %299, %cst_130 [1, 2] : vector<1x32x256xf32> to vector<1xf32>
    %301 = vector.shape_cast %300 : vector<1xf32> to vector<1x1x1xf32>
    %302 = vector.extract %301[0, 0, 0] : f32 from vector<1x1x1xf32>
    %cst_131 = arith.constant 8.192000e+03 : f32
    %303 = arith.divf %302, %cst_131 : f32
    %304 = arith.mulf %297, %297 : f32
    %305 = arith.subf %303, %304 : f32
    %cst_132 = arith.constant 0.000000e+00 : f32
    %306 = arith.maximumf %305, %cst_132 : f32
    %307 = vector.broadcast %297 : f32 to vector<32x256xf32>
    %308 = arith.subf %292, %307 : vector<32x256xf32>
    %cst_133 = arith.constant 9.99999974E-6 : f32
    %309 = arith.addf %306, %cst_133 : f32
    %310 = math.rsqrt %309 : f32
    %311 = vector.broadcast %310 : f32 to vector<32x256xf32>
    %312 = arith.mulf %308, %311 : vector<32x256xf32>
    %313 = arith.mulf %312, %109 : vector<32x256xf32>
    %314 = arith.addf %313, %110 : vector<32x256xf32>
    %cst_134 = arith.constant 0.000000e+00 : f32
    %315 = vector.broadcast %cst_134 : f32 to vector<32x256xf32>
    %316 = arith.maximumf %314, %315 : vector<32x256xf32>
    %c17_i32_135 = arith.constant 17 : i32
    %317 = tpu.dynamic_rotate %316 by %c17_i32_135 dim 1 : vector<32x256xf32>, i32 -> vector<32x256xf32>
    %318 = arith.mulf %317, %76 : vector<32x256xf32>
    %c0_136 = arith.constant 0 : index
    %c0_137 = arith.constant 0 : index
    %319 = vector.load %arg4[%c0_136, %c0_137] : memref<576x32xf32, #tpu.memory_space<vmem>>, vector<64x32xf32>
    %cst_138 = arith.constant dense<0.000000e+00> : vector<64x256xf32>
    %320 = tpu.matmul %319, %318, %cst_138 {dimension_numbers = #tpu.dot_dimension_numbers<[1], [0], [0], [1], [0, 0, 1, 1], [], []>} : vector<64x32xf32>, vector<32x256xf32>, vector<64x256xf32> -> vector<64x256xf32>
    %c16_i32_139 = arith.constant 16 : i32
    %321 = tpu.dynamic_rotate %316 by %c16_i32_139 dim 1 : vector<32x256xf32>, i32 -> vector<32x256xf32>
    %322 = arith.mulf %321, %78 : vector<32x256xf32>
    %c64_140 = arith.constant 64 : index
    %c0_141 = arith.constant 0 : index
    %323 = vector.load %arg4[%c64_140, %c0_141] : memref<576x32xf32, #tpu.memory_space<vmem>>, vector<64x32xf32>
    %cst_142 = arith.constant dense<0.000000e+00> : vector<64x256xf32>
    %324 = tpu.matmul %323, %322, %cst_142 {dimension_numbers = #tpu.dot_dimension_numbers<[1], [0], [0], [1], [0, 0, 1, 1], [], []>} : vector<64x32xf32>, vector<32x256xf32>, vector<64x256xf32> -> vector<64x256xf32>
    %325 = arith.addf %320, %324 : vector<64x256xf32>
    %c15_i32_143 = arith.constant 15 : i32
    %326 = tpu.dynamic_rotate %316 by %c15_i32_143 dim 1 : vector<32x256xf32>, i32 -> vector<32x256xf32>
    %327 = arith.mulf %326, %80 : vector<32x256xf32>
    %c128_144 = arith.constant 128 : index
    %c0_145 = arith.constant 0 : index
    %328 = vector.load %arg4[%c128_144, %c0_145] : memref<576x32xf32, #tpu.memory_space<vmem>>, vector<64x32xf32>
    %cst_146 = arith.constant dense<0.000000e+00> : vector<64x256xf32>
    %329 = tpu.matmul %328, %327, %cst_146 {dimension_numbers = #tpu.dot_dimension_numbers<[1], [0], [0], [1], [0, 0, 1, 1], [], []>} : vector<64x32xf32>, vector<32x256xf32>, vector<64x256xf32> -> vector<64x256xf32>
    %330 = arith.addf %325, %329 : vector<64x256xf32>
    %c1_i32_147 = arith.constant 1 : i32
    %331 = tpu.dynamic_rotate %316 by %c1_i32_147 dim 1 : vector<32x256xf32>, i32 -> vector<32x256xf32>
    %332 = arith.mulf %331, %82 : vector<32x256xf32>
    %c192_148 = arith.constant 192 : index
    %c0_149 = arith.constant 0 : index
    %333 = vector.load %arg4[%c192_148, %c0_149] : memref<576x32xf32, #tpu.memory_space<vmem>>, vector<64x32xf32>
    %cst_150 = arith.constant dense<0.000000e+00> : vector<64x256xf32>
    %334 = tpu.matmul %333, %332, %cst_150 {dimension_numbers = #tpu.dot_dimension_numbers<[1], [0], [0], [1], [0, 0, 1, 1], [], []>} : vector<64x32xf32>, vector<32x256xf32>, vector<64x256xf32> -> vector<64x256xf32>
    %335 = arith.addf %330, %334 : vector<64x256xf32>
    %c256_151 = arith.constant 256 : index
    %c0_152 = arith.constant 0 : index
    %336 = vector.load %arg4[%c256_151, %c0_152] : memref<576x32xf32, #tpu.memory_space<vmem>>, vector<64x32xf32>
    %cst_153 = arith.constant dense<0.000000e+00> : vector<64x256xf32>
    %337 = tpu.matmul %336, %316, %cst_153 {dimension_numbers = #tpu.dot_dimension_numbers<[1], [0], [0], [1], [0, 0, 1, 1], [], []>} : vector<64x32xf32>, vector<32x256xf32>, vector<64x256xf32> -> vector<64x256xf32>
    %338 = arith.addf %335, %337 : vector<64x256xf32>
    %c255_i32_154 = arith.constant 255 : i32
    %339 = tpu.dynamic_rotate %316 by %c255_i32_154 dim 1 : vector<32x256xf32>, i32 -> vector<32x256xf32>
    %340 = arith.mulf %339, %84 : vector<32x256xf32>
    %c320_155 = arith.constant 320 : index
    %c0_156 = arith.constant 0 : index
    %341 = vector.load %arg4[%c320_155, %c0_156] : memref<576x32xf32, #tpu.memory_space<vmem>>, vector<64x32xf32>
    %cst_157 = arith.constant dense<0.000000e+00> : vector<64x256xf32>
    %342 = tpu.matmul %341, %340, %cst_157 {dimension_numbers = #tpu.dot_dimension_numbers<[1], [0], [0], [1], [0, 0, 1, 1], [], []>} : vector<64x32xf32>, vector<32x256xf32>, vector<64x256xf32> -> vector<64x256xf32>
    %343 = arith.addf %338, %342 : vector<64x256xf32>
    %c241_i32_158 = arith.constant 241 : i32
    %344 = tpu.dynamic_rotate %316 by %c241_i32_158 dim 1 : vector<32x256xf32>, i32 -> vector<32x256xf32>
    %345 = arith.mulf %344, %86 : vector<32x256xf32>
    %c384_159 = arith.constant 384 : index
    %c0_160 = arith.constant 0 : index
    %346 = vector.load %arg4[%c384_159, %c0_160] : memref<576x32xf32, #tpu.memory_space<vmem>>, vector<64x32xf32>
    %cst_161 = arith.constant dense<0.000000e+00> : vector<64x256xf32>
    %347 = tpu.matmul %346, %345, %cst_161 {dimension_numbers = #tpu.dot_dimension_numbers<[1], [0], [0], [1], [0, 0, 1, 1], [], []>} : vector<64x32xf32>, vector<32x256xf32>, vector<64x256xf32> -> vector<64x256xf32>
    %348 = arith.addf %343, %347 : vector<64x256xf32>
    %c240_i32_162 = arith.constant 240 : i32
    %349 = tpu.dynamic_rotate %316 by %c240_i32_162 dim 1 : vector<32x256xf32>, i32 -> vector<32x256xf32>
    %350 = arith.mulf %349, %88 : vector<32x256xf32>
    %c448_163 = arith.constant 448 : index
    %c0_164 = arith.constant 0 : index
    %351 = vector.load %arg4[%c448_163, %c0_164] : memref<576x32xf32, #tpu.memory_space<vmem>>, vector<64x32xf32>
    %cst_165 = arith.constant dense<0.000000e+00> : vector<64x256xf32>
    %352 = tpu.matmul %351, %350, %cst_165 {dimension_numbers = #tpu.dot_dimension_numbers<[1], [0], [0], [1], [0, 0, 1, 1], [], []>} : vector<64x32xf32>, vector<32x256xf32>, vector<64x256xf32> -> vector<64x256xf32>
    %353 = arith.addf %348, %352 : vector<64x256xf32>
    %c239_i32_166 = arith.constant 239 : i32
    %354 = tpu.dynamic_rotate %316 by %c239_i32_166 dim 1 : vector<32x256xf32>, i32 -> vector<32x256xf32>
    %355 = arith.mulf %354, %90 : vector<32x256xf32>
    %c512_167 = arith.constant 512 : index
    %c0_168 = arith.constant 0 : index
    %356 = vector.load %arg4[%c512_167, %c0_168] : memref<576x32xf32, #tpu.memory_space<vmem>>, vector<64x32xf32>
    %cst_169 = arith.constant dense<0.000000e+00> : vector<64x256xf32>
    %357 = tpu.matmul %356, %355, %cst_169 {dimension_numbers = #tpu.dot_dimension_numbers<[1], [0], [0], [1], [0, 0, 1, 1], [], []>} : vector<64x32xf32>, vector<32x256xf32>, vector<64x256xf32> -> vector<64x256xf32>
    %358 = arith.addf %353, %357 : vector<64x256xf32>
    %359 = arith.addf %358, %111 : vector<64x256xf32>
    %360 = vector.shape_cast %359 : vector<64x256xf32> to vector<1x64x256xf32>
    %cst_170 = arith.constant dense<0.000000e+00> : vector<1xf32>
    %361 = vector.multi_reduction <add>, %360, %cst_170 [1, 2] : vector<1x64x256xf32> to vector<1xf32>
    %362 = vector.shape_cast %361 : vector<1xf32> to vector<1x1x1xf32>
    %363 = vector.extract %362[0, 0, 0] : f32 from vector<1x1x1xf32>
    %cst_171 = arith.constant 1.638400e+04 : f32
    %364 = arith.divf %363, %cst_171 : f32
    %365 = arith.mulf %359, %359 : vector<64x256xf32>
    %366 = vector.shape_cast %365 : vector<64x256xf32> to vector<1x64x256xf32>
    %cst_172 = arith.constant dense<0.000000e+00> : vector<1xf32>
    %367 = vector.multi_reduction <add>, %366, %cst_172 [1, 2] : vector<1x64x256xf32> to vector<1xf32>
    %368 = vector.shape_cast %367 : vector<1xf32> to vector<1x1x1xf32>
    %369 = vector.extract %368[0, 0, 0] : f32 from vector<1x1x1xf32>
    %cst_173 = arith.constant 1.638400e+04 : f32
    %370 = arith.divf %369, %cst_173 : f32
    %371 = arith.mulf %364, %364 : f32
    %372 = arith.subf %370, %371 : f32
    %cst_174 = arith.constant 0.000000e+00 : f32
    %373 = arith.maximumf %372, %cst_174 : f32
    %374 = vector.broadcast %364 : f32 to vector<64x256xf32>
    %375 = arith.subf %359, %374 : vector<64x256xf32>
    %cst_175 = arith.constant 9.99999974E-6 : f32
    %376 = arith.addf %373, %cst_175 : f32
    %377 = math.rsqrt %376 : f32
    %378 = vector.broadcast %377 : f32 to vector<64x256xf32>
    %379 = arith.mulf %375, %378 : vector<64x256xf32>
    %380 = arith.mulf %379, %112 : vector<64x256xf32>
    %381 = arith.addf %380, %113 : vector<64x256xf32>
    %cst_176 = arith.constant 0.000000e+00 : f32
    %382 = vector.broadcast %cst_176 : f32 to vector<64x256xf32>
    %383 = arith.maximumf %381, %382 : vector<64x256xf32>
    %c17_i32_177 = arith.constant 17 : i32
    %384 = tpu.dynamic_rotate %383 by %c17_i32_177 dim 1 : vector<64x256xf32>, i32 -> vector<64x256xf32>
    %385 = arith.mulf %384, %92 : vector<64x256xf32>
    %c0_178 = arith.constant 0 : index
    %c0_179 = arith.constant 0 : index
    %386 = vector.load %arg5[%c0_178, %c0_179] : memref<72x64xf32, #tpu.memory_space<vmem>>, vector<8x64xf32>
    %cst_180 = arith.constant dense<0.000000e+00> : vector<8x256xf32>
    %387 = tpu.matmul %386, %385, %cst_180 {dimension_numbers = #tpu.dot_dimension_numbers<[1], [0], [0], [1], [0, 0, 1, 1], [], []>} : vector<8x64xf32>, vector<64x256xf32>, vector<8x256xf32> -> vector<8x256xf32>
    %c16_i32_181 = arith.constant 16 : i32
    %388 = tpu.dynamic_rotate %383 by %c16_i32_181 dim 1 : vector<64x256xf32>, i32 -> vector<64x256xf32>
    %389 = arith.mulf %388, %94 : vector<64x256xf32>
    %c8_182 = arith.constant 8 : index
    %c0_183 = arith.constant 0 : index
    %390 = vector.load %arg5[%c8_182, %c0_183] : memref<72x64xf32, #tpu.memory_space<vmem>>, vector<8x64xf32>
    %cst_184 = arith.constant dense<0.000000e+00> : vector<8x256xf32>
    %391 = tpu.matmul %390, %389, %cst_184 {dimension_numbers = #tpu.dot_dimension_numbers<[1], [0], [0], [1], [0, 0, 1, 1], [], []>} : vector<8x64xf32>, vector<64x256xf32>, vector<8x256xf32> -> vector<8x256xf32>
    %392 = arith.addf %387, %391 : vector<8x256xf32>
    %c15_i32_185 = arith.constant 15 : i32
    %393 = tpu.dynamic_rotate %383 by %c15_i32_185 dim 1 : vector<64x256xf32>, i32 -> vector<64x256xf32>
    %394 = arith.mulf %393, %96 : vector<64x256xf32>
    %c16_186 = arith.constant 16 : index
    %c0_187 = arith.constant 0 : index
    %395 = vector.load %arg5[%c16_186, %c0_187] : memref<72x64xf32, #tpu.memory_space<vmem>>, vector<8x64xf32>
    %cst_188 = arith.constant dense<0.000000e+00> : vector<8x256xf32>
    %396 = tpu.matmul %395, %394, %cst_188 {dimension_numbers = #tpu.dot_dimension_numbers<[1], [0], [0], [1], [0, 0, 1, 1], [], []>} : vector<8x64xf32>, vector<64x256xf32>, vector<8x256xf32> -> vector<8x256xf32>
    %397 = arith.addf %392, %396 : vector<8x256xf32>
    %c1_i32_189 = arith.constant 1 : i32
    %398 = tpu.dynamic_rotate %383 by %c1_i32_189 dim 1 : vector<64x256xf32>, i32 -> vector<64x256xf32>
    %399 = arith.mulf %398, %98 : vector<64x256xf32>
    %c24_190 = arith.constant 24 : index
    %c0_191 = arith.constant 0 : index
    %400 = vector.load %arg5[%c24_190, %c0_191] : memref<72x64xf32, #tpu.memory_space<vmem>>, vector<8x64xf32>
    %cst_192 = arith.constant dense<0.000000e+00> : vector<8x256xf32>
    %401 = tpu.matmul %400, %399, %cst_192 {dimension_numbers = #tpu.dot_dimension_numbers<[1], [0], [0], [1], [0, 0, 1, 1], [], []>} : vector<8x64xf32>, vector<64x256xf32>, vector<8x256xf32> -> vector<8x256xf32>
    %402 = arith.addf %397, %401 : vector<8x256xf32>
    %c32_193 = arith.constant 32 : index
    %c0_194 = arith.constant 0 : index
    %403 = vector.load %arg5[%c32_193, %c0_194] : memref<72x64xf32, #tpu.memory_space<vmem>>, vector<8x64xf32>
    %cst_195 = arith.constant dense<0.000000e+00> : vector<8x256xf32>
    %404 = tpu.matmul %403, %383, %cst_195 {dimension_numbers = #tpu.dot_dimension_numbers<[1], [0], [0], [1], [0, 0, 1, 1], [], []>} : vector<8x64xf32>, vector<64x256xf32>, vector<8x256xf32> -> vector<8x256xf32>
    %405 = arith.addf %402, %404 : vector<8x256xf32>
    %c255_i32_196 = arith.constant 255 : i32
    %406 = tpu.dynamic_rotate %383 by %c255_i32_196 dim 1 : vector<64x256xf32>, i32 -> vector<64x256xf32>
    %407 = arith.mulf %406, %100 : vector<64x256xf32>
    %c40_197 = arith.constant 40 : index
    %c0_198 = arith.constant 0 : index
    %408 = vector.load %arg5[%c40_197, %c0_198] : memref<72x64xf32, #tpu.memory_space<vmem>>, vector<8x64xf32>
    %cst_199 = arith.constant dense<0.000000e+00> : vector<8x256xf32>
    %409 = tpu.matmul %408, %407, %cst_199 {dimension_numbers = #tpu.dot_dimension_numbers<[1], [0], [0], [1], [0, 0, 1, 1], [], []>} : vector<8x64xf32>, vector<64x256xf32>, vector<8x256xf32> -> vector<8x256xf32>
    %410 = arith.addf %405, %409 : vector<8x256xf32>
    %c241_i32_200 = arith.constant 241 : i32
    %411 = tpu.dynamic_rotate %383 by %c241_i32_200 dim 1 : vector<64x256xf32>, i32 -> vector<64x256xf32>
    %412 = arith.mulf %411, %102 : vector<64x256xf32>
    %c48_201 = arith.constant 48 : index
    %c0_202 = arith.constant 0 : index
    %413 = vector.load %arg5[%c48_201, %c0_202] : memref<72x64xf32, #tpu.memory_space<vmem>>, vector<8x64xf32>
    %cst_203 = arith.constant dense<0.000000e+00> : vector<8x256xf32>
    %414 = tpu.matmul %413, %412, %cst_203 {dimension_numbers = #tpu.dot_dimension_numbers<[1], [0], [0], [1], [0, 0, 1, 1], [], []>} : vector<8x64xf32>, vector<64x256xf32>, vector<8x256xf32> -> vector<8x256xf32>
    %415 = arith.addf %410, %414 : vector<8x256xf32>
    %c240_i32_204 = arith.constant 240 : i32
    %416 = tpu.dynamic_rotate %383 by %c240_i32_204 dim 1 : vector<64x256xf32>, i32 -> vector<64x256xf32>
    %417 = arith.mulf %416, %104 : vector<64x256xf32>
    %c56_205 = arith.constant 56 : index
    %c0_206 = arith.constant 0 : index
    %418 = vector.load %arg5[%c56_205, %c0_206] : memref<72x64xf32, #tpu.memory_space<vmem>>, vector<8x64xf32>
    %cst_207 = arith.constant dense<0.000000e+00> : vector<8x256xf32>
    %419 = tpu.matmul %418, %417, %cst_207 {dimension_numbers = #tpu.dot_dimension_numbers<[1], [0], [0], [1], [0, 0, 1, 1], [], []>} : vector<8x64xf32>, vector<64x256xf32>, vector<8x256xf32> -> vector<8x256xf32>
    %420 = arith.addf %415, %419 : vector<8x256xf32>
    %c239_i32_208 = arith.constant 239 : i32
    %421 = tpu.dynamic_rotate %383 by %c239_i32_208 dim 1 : vector<64x256xf32>, i32 -> vector<64x256xf32>
    %422 = arith.mulf %421, %106 : vector<64x256xf32>
    %c64_209 = arith.constant 64 : index
    %c0_210 = arith.constant 0 : index
    %423 = vector.load %arg5[%c64_209, %c0_210] : memref<72x64xf32, #tpu.memory_space<vmem>>, vector<8x64xf32>
    %cst_211 = arith.constant dense<0.000000e+00> : vector<8x256xf32>
    %424 = tpu.matmul %423, %422, %cst_211 {dimension_numbers = #tpu.dot_dimension_numbers<[1], [0], [0], [1], [0, 0, 1, 1], [], []>} : vector<8x64xf32>, vector<64x256xf32>, vector<8x256xf32> -> vector<8x256xf32>
    %425 = arith.addf %420, %424 : vector<8x256xf32>
    %426 = vector.extract_strided_slice %425 {offsets = [0, 0], sizes = [4, 256], strides = [1, 1]} : vector<8x256xf32> to vector<4x256xf32>
    %427 = arith.addf %426, %114 : vector<4x256xf32>
    %c1_212 = arith.constant 1 : index
    %c0_213 = arith.constant 0 : index
    %c0_214 = arith.constant 0 : index
    %428 = vector.load %arg6[%c1_212, %c0_213, %c0_214] : memref<2x4x256xf32, #tpu.memory_space<vmem>>, vector<1x4x256xf32>
    %429 = vector.shape_cast %428 : vector<1x4x256xf32> to vector<4x256xf32>
    %430 = vector.shape_cast %427 : vector<4x256xf32> to vector<1x4x256xf32>
    tpu.vector_store %arg6[%c1_212, %c0_213, %c0_214], %430 {strides = array<i32>} : memref<2x4x256xf32, #tpu.memory_space<vmem>>, vector<1x4x256xf32>,
    return
  }
}

</mosaic_0001>

<bundles_post_ra>
// kernel: tpu_custom_call.1
= control target key start
LH: loop header
LB: loop body
LE: loop exit
PB: predicated region body
PF: predicated region fallthrough
CT: control target
= control target key end

     0   :  { %11 = vsyncpa [#allocation3], 0  ;;  %s12457_s0 = inlined_call_operand.vmem [shape: f32[2,32], index: 0, kind: input, shape index: {}]   ;;  %s12458_s1 = inlined_call_operand.vmem [shape: f32[32,256], index: 1, kind: input, shape index: {}]   ;;  %s12459_s2 = inlined_call_operand.hbm [shape: f32[256,256], index: 2, kind: input, shape index: {}]   ;;  %s12460_s3 = inlined_call_operand.vmem [shape: f32[344,256], index: 3, kind: input, shape index: {}]   ;;  %s12461_s4 = inlined_call_operand.vmem [shape: f32[576,32], index: 4, kind: input, shape index: {}]   ;;  %s12462_s5 = inlined_call_operand.vmem [shape: f32[72,64], index: 5, kind: input, shape index: {}]   ;;  %s12463_s6 = inlined_call_operand.hbm [shape: f32[2,4,256], index: 6, kind: output, shape index: {}]  }
   0x1   :  { %12 = vsyncpa [#allocation4], 0  ;;  %s7723_s21 = smov [#allocation2]  }
   0x2   :  { %s22_s22 = sshll.u32 %s7723_s21, 4  ;;  %s23_s22 = int_to_ptr.vmem [resolvable:$true] %s22_s22 }
   0x3   :  { %s7687_s23 = scalar_lea.vmem %s23_s22, 8192  ;;  %p7692_p1 = scmp.lt.s32.totalorder %s23_s22, %s23_s22 }
   0x4   :  { %p7688_p0 = scmp.ne.s32.totalorder %s23_s22, %s7687_s23  ;;  %p7693_p2 = scmp.lt.s32.totalorder %s7687_s23, %s7687_s23 }
   0x6   :  { %p7694_p3 = por %p7693_p2, %p7692_p1 }
   0x8   :  { %p7695_p4 = pnand %p7694_p3, %p7688_p0 }
   0xa   :  { %7698 = shalt.err (!%p7695_p4)
}
   0xb   :  { %s7724_s24 = smov 256   ;;  %s7725_s25 = smov 16  }
   0xc   :  { %28 = dma.hbm_to_vmem [thread:$0]  %s12459_s2, 8192, %s23_s22, [#allocation3], %s7724_s24, %s7724_s24, %s7725_s25  }
   0xd   :  { %7719 = dma.done.wait [#allocation3], 8192  }
   0xe   :  { %7720 = vsyncadd [#allocation3], 4294959104  ;;  %v12465_v0 = vmov 0.0   ;;  %v57_v1 = vld [vmem:[%s12458_s1 + $0x38] sm:$0xff]  ;;  %v56_v2 = vld [vmem:[%s12458_s1 + $0x30] sm:$0xff]  ;;  %vm12505_vm0 = vcmask 261120   ;;  %v59_v39 = vlaneseq }
   0xf   :  { %137 = vmatprep.mubr.f32.mxu0 %v12465_v0  ;;  %v55_v3 = vld [vmem:[%s12458_s1 + $0x28] sm:$0xff]  ;;  %97 = vmatprep.subr.mxu0 %v57_v1  ;;  %v54_v4 = vld [vmem:[%s12458_s1 + $0x20] sm:$0xff]  ;;  %v53_v5 = vld [vmem:[%s12458_s1 + $0x18] sm:$0xff]  ;;  %vm144_vm1 = vcmask 1041408   ;;  %s7727_s8 = smov 15   ;;  %s7728_s9 = smov 17  }
  0x10   :  { %98 = vmatpush1.msra.mxu0 %v56_v2  ;;  %v52_v6 = vld [vmem:[%s12458_s1 + $0x10] sm:$0xff]  ;;  %v51_v7 = vld [vmem:[%s12458_s1 + $0x8] sm:$0xff]  ;;  %v50_v8 = vld [vmem:[%s12458_s1] sm:$0xff]  ;;  %v60_v40 = vshrl.u32 %v59_v39, 7  ;;  %s7729_s10 = smov 1   ;;  %s7730_s2 = smov 127  }
  0x11   :  { %99 = vmatprep.subr.mxu0 %v55_v3  ;;  %v49_v9 = vld [vmem:[%s12457_s0] sm:$0x3]  ;;  %v228_v10 = vld [vmem:[#allocation2 + $0xf8] sm:$0xff]  ;;  %v227_v11 = vld [vmem:[#allocation2 + $0xf0] sm:$0xff]  ;;  %s7731_s11 = smov 113   ;;  %s7732_s12 = smov 112  }
  0x12   :  { %100 = vmatpush1.msra.mxu0 %v54_v4  ;;  %v226_v12 = vld [vmem:[#allocation2 + $0xe8] sm:$0xff]  ;;  %272 = vmatprep.subr.mxu1 %v228_v10  ;;  %v225_v13 = vld [vmem:[#allocation2 + $0xe0] sm:$0xff]  ;;  %v224_v14 = vld [vmem:[#allocation2 + $0xd8] sm:$0xff]  ;;  %v7808_v41 = vsub.s32 0, %v60_v40  ;;  %v7813_v43 = vsub.s32 1, %v60_v40  ;;  %s7733_s13 = smov 111  }
  0x13   :  { %101 = vmatprep.subr.mxu0 %v53_v5  ;;  %273 = vmatpush1.msra.mxu1 %v227_v11  ;;  %v223_v15 = vld [vmem:[#allocation2 + $0xd0] sm:$0xff]  ;;  %v222_v16 = vld [vmem:[#allocation2 + $0xc8] sm:$0xff]  ;;  %v221_v17 = vld [vmem:[#allocation2 + $0xc0] sm:$0xff]  ;;  %vm692_vm10 = vcmask 1040384   ;;  %vm697_vm11 = vcmask 1042432   ;;  %vm12464_vm12 = vcmask 1043456  }
  0x14   :  { %102 = vmatpush1.msra.mxu0 %v52_v6  ;;  %274 = vmatprep.subr.mxu1 %v226_v12  ;;  %v220_v18 = vld [vmem:[#allocation2 + $0xb8] sm:$0xff]  ;;  %v219_v19 = vld [vmem:[#allocation2 + $0xb0] sm:$0xff]  ;;  %v218_v20 = vld [vmem:[#allocation2 + $0xa8] sm:$0xff]  ;;  %vm703_vm13 = vcmask 1044480   ;;  %vm706_vm14 = vcmask 1045504   ;;  %vm709_vm15 = vcmask 1046528  }
  0x15   :  { %103 = vmatprep.subr.mxu0 %v51_v7  ;;  %275 = vmatpush1.msra.mxu1 %v225_v13  ;;  %v217_v21 = vld [vmem:[#allocation2 + $0xa0] sm:$0xff]  ;;  %v216_v22 = vld [vmem:[#allocation2 + $0x98] sm:$0xff]  ;;  %v215_v23 = vld [vmem:[#allocation2 + $0x90] sm:$0xff]  ;;  %s7734_s1 = smov 0.0  }
  0x16   :  { %104 = vmatpush1.msra.mxu0 %v50_v8  ;;  %276 = vmatprep.subr.mxu1 %v224_v14  ;;  %v214_v24 = vld [vmem:[#allocation2 + $0x88] sm:$0xff]  ;;  %v213_v25 = vld [vmem:[#allocation2 + $0x80] sm:$0xff]  ;;  %v212_v26 = vld [vmem:[#allocation2 + $0x78] sm:$0xff] }
  0x17   :  { %7363 = vmatmul.mubr.msk.f32.vlgmr.msra.gmra.mxu0 %vm12505_vm0, %v49_v9  ;;  %277 = vmatpush1.msra.mxu1 %v223_v15  ;;  %v211_v27 = vld [vmem:[#allocation2 + $0x70] sm:$0xff]  ;;  %v210_v28 = vld [vmem:[#allocation2 + $0x68] sm:$0xff]  ;;  %v209_v29 = vld [vmem:[#allocation2 + $0x60] sm:$0xff] }
  0x18   :  { %795 = vmatprep.mubr.f32.mxu0 %v12465_v0  ;;  %278 = vmatprep.subr.mxu1 %v222_v16  ;;  %v208_v30 = vld [vmem:[#allocation2 + $0x58] sm:$0xff]  ;;  %v207_v31 = vld [vmem:[#allocation2 + $0x50] sm:$0xff]  ;;  %v206_v32 = vld [vmem:[#allocation2 + $0x48] sm:$0xff] }
  0x19   :  { %279 = vmatpush1.msra.mxu1 %v221_v17  ;;  %v205_v33 = vld [vmem:[#allocation2 + $0x40] sm:$0xff]  ;;  %v204_v34 = vld [vmem:[#allocation2 + $0x38] sm:$0xff]  ;;  %v203_v35 = vld [vmem:[#allocation2 + $0x30] sm:$0xff] }
  0x1a   :  { %280 = vmatprep.subr.mxu1 %v220_v18  ;;  %v202_v36 = vld [vmem:[#allocation2 + $0x28] sm:$0xff]  ;;  %v201_v37 = vld [vmem:[#allocation2 + $0x20] sm:$0xff]  ;;  %v200_v38 = vld [vmem:[#allocation2 + $0x18] sm:$0xff] }
  0x1b   :  { %281 = vmatpush1.msra.mxu1 %v219_v19  ;;  %v38_v42 = vld [vmem:[%s12460_s3] ss:$8 sm:$0x3]  ;;  %v199_v58 = vld [vmem:[#allocation2 + $0x10] sm:$0xff]  ;;  %v260_v61 = vld [vmem:[#allocation2 + $0x1f8] sm:$0xff] }
  0x1c   :  { %282 = vmatprep.subr.mxu1 %v218_v20  ;;  %v62_v44 = vrot.slane %v38_v42, %v7808_v41  ;;  %v66_v45 = vrot.slane %v38_v42, %v7813_v43  ;;  %v198_v59 = vld [vmem:[#allocation2 + $0x8] sm:$0xff]  ;;  %v197_v60 = vld [vmem:[#allocation2] sm:$0xff]  ;;  %v259_v62 = vld [vmem:[#allocation2 + $0x1f0] sm:$0xff] }
  0x1d   :  { %283 = vmatpush1.msra.mxu1 %v217_v21  ;;  %v258_v63 = vld [vmem:[#allocation2 + $0x1e8] sm:$0xff]  ;;  %v257_v1 = vld [vmem:[#allocation2 + $0x1e0] sm:$0xff]  ;;  %v256_v2 = vld [vmem:[#allocation2 + $0x1d8] sm:$0xff] }
  0x1e   :  { %284 = vmatprep.subr.mxu1 %v216_v22  ;;  %v255_v3 = vld [vmem:[#allocation2 + $0x1d0] sm:$0xff]  ;;  %v254_v4 = vld [vmem:[#allocation2 + $0x1c8] sm:$0xff]  ;;  %v253_v5 = vld [vmem:[#allocation2 + $0x1c0] sm:$0xff] }
  0x1f   :  { %285 = vmatpush1.msra.mxu1 %v215_v23  ;;  %v252_v6 = vld [vmem:[#allocation2 + $0x1b8] sm:$0xff]  ;;  %v251_v7 = vld [vmem:[#allocation2 + $0x1b0] sm:$0xff]  ;;  %v250_v8 = vld [vmem:[#allocation2 + $0x1a8] sm:$0xff] }
  0x20   :  { %286 = vmatprep.subr.mxu1 %v214_v24  ;;  %v249_v9 = vld [vmem:[#allocation2 + $0x1a0] sm:$0xff]  ;;  %v248_v10 = vld [vmem:[#allocation2 + $0x198] sm:$0xff]  ;;  %v247_v11 = vld [vmem:[#allocation2 + $0x190] sm:$0xff] }
  0x21   :  { %287 = vmatpush1.msra.mxu1 %v213_v25  ;;  %v246_v12 = vld [vmem:[#allocation2 + $0x188] sm:$0xff]  ;;  %v245_v13 = vld [vmem:[#allocation2 + $0x180] sm:$0xff]  ;;  %v244_v14 = vld [vmem:[#allocation2 + $0x178] sm:$0xff] }
  0x22   :  { %288 = vmatprep.subr.mxu1 %v212_v26  ;;  %v243_v15 = vld [vmem:[#allocation2 + $0x170] sm:$0xff]  ;;  %v242_v16 = vld [vmem:[#allocation2 + $0x168] sm:$0xff]  ;;  %v241_v17 = vld [vmem:[#allocation2 + $0x160] sm:$0xff] }
  0x23   :  { %289 = vmatpush1.msra.mxu1 %v211_v27  ;;  %v240_v18 = vld [vmem:[#allocation2 + $0x158] sm:$0xff]  ;;  %v239_v19 = vld [vmem:[#allocation2 + $0x150] sm:$0xff]  ;;  %v238_v20 = vld [vmem:[#allocation2 + $0x148] sm:$0xff] }
  0x24   :  { %290 = vmatprep.subr.mxu1 %v210_v28  ;;  %v237_v21 = vld [vmem:[#allocation2 + $0x140] sm:$0xff]  ;;  %v236_v22 = vld [vmem:[#allocation2 + $0x138] sm:$0xff]  ;;  %v235_v23 = vld [vmem:[#allocation2 + $0x130] sm:$0xff] }
  0x25   :  { %291 = vmatpush1.msra.mxu1 %v209_v29  ;;  %v234_v24 = vld [vmem:[#allocation2 + $0x128] sm:$0xff]  ;;  %v233_v25 = vld [vmem:[#allocation2 + $0x120] sm:$0xff]  ;;  %v232_v26 = vld [vmem:[#allocation2 + $0x118] sm:$0xff] }
  0x26   :  { %292 = vmatprep.subr.mxu1 %v208_v30  ;;  %v231_v27 = vld [vmem:[#allocation2 + $0x110] sm:$0xff]  ;;  %v230_v28 = vld [vmem:[#allocation2 + $0x108] sm:$0xff]  ;;  %v229_v29 = vld [vmem:[#allocation2 + $0x100] sm:$0xff] }
  0x27   :  { %293 = vmatpush1.msra.mxu1 %v207_v31  ;;  %v7359_v40 = vld [vmem:[%s12460_s3 + $0x2] ss:$8 sm:$0x3] }
  0x28   :  { %294 = vmatprep.subr.mxu1 %v206_v32 }
  0x29   :  { %295 = vmatpush1.msra.mxu1 %v205_v33 }
  0x2a   :  { %296 = vmatprep.subr.mxu1 %v204_v34 }
  0x2b   :  { %297 = vmatpush1.msra.mxu1 %v203_v35 }
  0x2c   :  { %298 = vmatprep.subr.mxu1 %v202_v36 }
  0x2d   :  { %299 = vmatpush1.msra.mxu1 %v201_v37 }
  0x2e   :  { %300 = vmatprep.subr.mxu1 %v200_v38  ;;  %v7358_v38 = vld [vmem:[%s12460_s3 + $0x1] ss:$8 sm:$0x3] }
  0x2f   :  { %301 = vmatpush1.msra.mxu1 %v199_v58 }
  0x30   :  { %302 = vmatprep.subr.mxu1 %v198_v59 }
  0x31   :  { %303 = vmatpush1.msra.mxu1 %v197_v60 }
  0x32   :  { %304 = vmatprep.subr.mxu1 %v260_v61 }
  0x33   :  { %305 = vmatpush2.msra.mxu1 %v259_v62 }
  0x34   :  { %306 = vmatprep.subr.mxu1 %v258_v63 }
  0x35   :  { %307 = vmatpush2.msra.mxu1 %v257_v1 }
  0x36   :  { %308 = vmatprep.subr.mxu1 %v256_v2 }
  0x37   :  { %309 = vmatpush2.msra.mxu1 %v255_v3 }
  0x38   :  { %310 = vmatprep.subr.mxu1 %v254_v4 }
  0x39   :  { %311 = vmatpush2.msra.mxu1 %v253_v5 }
  0x3a   :  { %312 = vmatprep.subr.mxu1 %v252_v6 }
  0x3b   :  { %313 = vmatpush2.msra.mxu1 %v251_v7 }
  0x3c   :  { %314 = vmatprep.subr.mxu1 %v250_v8 }
  0x3d   :  { %315 = vmatpush2.msra.mxu1 %v249_v9 }
  0x3e   :  { %316 = vmatprep.subr.mxu1 %v248_v10 }
  0x3f   :  { %317 = vmatpush2.msra.mxu1 %v247_v11 }
  0x40   :  { %318 = vmatprep.subr.mxu1 %v246_v12 }
  0x41   :  { %319 = vmatpush2.msra.mxu1 %v245_v13 }
  0x42   :  { %320 = vmatprep.subr.mxu1 %v244_v14 }
  0x43   :  { %321 = vmatpush2.msra.mxu1 %v243_v15 }
  0x44   :  { %322 = vmatprep.subr.mxu1 %v242_v16 }
  0x45   :  { %323 = vmatpush2.msra.mxu1 %v241_v17 }
  0x46   :  { %324 = vmatprep.subr.mxu1 %v240_v18  ;;  %v7361_v18 = vld [vmem:[%s12460_s3 + $0x4] ss:$8 sm:$0x3] }
  0x47   :  { %325 = vmatpush2.msra.mxu1 %v239_v19  ;;  %v7362_v19 = vld [vmem:[%s12460_s3 + $0x5] ss:$8 sm:$0x3] }
  0x48   :  { %326 = vmatprep.subr.mxu1 %v238_v20 }
  0x49   :  { %327 = vmatpush2.msra.mxu1 %v237_v21 }
  0x4a   :  { %328 = vmatprep.subr.mxu1 %v236_v22  ;;  %v370_v22 = vrot.slane %v7361_v18, %v7808_v41 }
  0x4b   :  { %329 = vmatpush2.msra.mxu1 %v235_v23  ;;  %v374_v23 = vrot.slane %v7361_v18, %v7813_v43 }
  0x4c   :  { %330 = vmatprep.subr.mxu1 %v234_v24 }
  0x4d   :  { %331 = vmatpush2.msra.mxu1 %v233_v25  ;;  %v383_v25 = vrot.slane %v7362_v19, %v7808_v41 }
  0x4e   :  { %332 = vmatprep.subr.mxu1 %v232_v26  ;;  %v387_v26 = vrot.slane %v7362_v19, %v7813_v43 }
  0x4f   :  { %333 = vmatpush2.msra.mxu1 %v231_v27 }
  0x50   :  { %334 = vmatprep.subr.mxu1 %v230_v28 }
  0x51   :  { %335 = vmatpush2.msra.mxu1 %v229_v29 }
  0xd7   :  { %v139_v46 = vpop.f32.mrf.mxu0 }
  0xd8   :  { %v7817_v47 = vadd.f32 %v139_v46, %v62_v44  ;;  %v177_v46 = vrot.slane %v7358_v38, %v7813_v43 }
  0xd9   :  { %v141_v48 = vpop.f32.mrf.mxu0 }
  0xda   :  { %v7819_v49 = vadd.f32 %v141_v48, %v66_v45  ;;  %v145_v50 = vsel %vm144_vm1, %v7817_v47, 0.0  ;;  %v152_v52 = vmul.f32 %v7817_v47, %v7817_v47  ;;  %v173_v45 = vrot.slane %v7358_v38, %v7808_v41 }
  0xdc   :  { %v146_v51 = vsel %vm144_vm1, %v7819_v49, 0.0  ;;  %v153_v53 = vmul.f32 %v7819_v49, %v7819_v49  ;;  %v154_v56 = vsel %vm144_vm1, %v152_v52, 0.0  ;;  %v190_v52 = vrot.slane %v7359_v40, %v7813_v43 }
  0xdd   :  { %v147_v54 = vadd.f32 %v146_v51, %v145_v50  ;;  %v186_v51 = vrot.slane %v7359_v40, %v7808_v41 }
  0xde   :  { %v155_v55 = vsel %vm144_vm1, %v153_v53, 0.0 }
  0xdf   :  { %148 = vadd.xlane.f32.xlu0 %v147_v54  ;;  %v156_v57 = vadd.f32 %v155_v55, %v154_v56 }
  0xe3   :  { %157 = vadd.xlane.f32.xlu0 %v156_v57 }
 0x168   :  { %v149_v30 = vpop.xlane.xlu0 %148 }
 0x169   :  { %v151_v31 = vmul.f32 0.00390625, %v149_v30 }
 0x16b   :  { %v160_v33 = vmul.f32 %v151_v31, %v151_v31  ;;  %v163_v42 = vsub.f32 %v7817_v47, %v151_v31  ;;  %v164_v44 = vsub.f32 %v7819_v49, %v151_v31  ;;  %v7360_v47 = vld [vmem:[%s12460_s3 + $0x3] ss:$8 sm:$0x3] }
 0x16c   :  { %v158_v32 = vpop.xlane.xlu0 %157  ;;  %v265_v49 = vrot.slane %v7360_v47, %v7808_v41  ;;  %v269_v60 = vrot.slane %v7360_v47, %v7813_v43 }
 0x16d   :  { %v159_v34 = vmul.f32 0.00390625, %v158_v32 }
 0x16f   :  { %v161_v35 = vsub.f32 %v159_v34, %v160_v33 }
 0x171   :  { %v162_v36 = vmax.f32 %v161_v35, 0.0 }
 0x173   :  { %v165_v37 = vadd.f32 1e-05, %v162_v36 }
 0x175   :  { %7589 = vrsqrt.f32 %v165_v37 }
 0x182   :  { %v7590_v48 = vpop.eup %7589 }
 0x183   :  { %v168_v50 = vmul.f32 %v7590_v48, %v164_v44  ;;  %v167_v53 = vmul.f32 %v7590_v48, %v163_v42  ;;  %v7364_v44 = vld [vmem:[%s12460_s3 + $0x6] ss:$8 sm:$0x3]  ;;  %v7909_v48 = vand.u32 127, %v59_v39 }
 0x184   :  { %v7924_v39 = vrot.slane %v7364_v44, %v7808_v41  ;;  %v7940_v47 = vrot.slane %v7364_v44, %v7813_v43 }
 0x185   :  { %v181_v54 = vmul.f32 %v177_v46, %v168_v50  ;;  %v180_v55 = vmul.f32 %v173_v45, %v167_v53  ;;  %v7365_v45 = vld [vmem:[%s12460_s3 + $0x7] ss:$8 sm:$0x3]  ;;  %v7366_v46 = vld [vmem:[%s12460_s3 + $0x10] ss:$8 sm:$0x3] }
 0x186   :  { %12529 = vst [vmem:[#allocation10_spill] sm:$0xff] %v7909_v48  ;;  %v7367_v50 = vld [vmem:[%s12460_s3 + $0x11] ss:$8 sm:$0x3]  ;;  %12530 = vst [vmem:[#allocation11_spill] sm:$0xff] %v7924_v39  ;;  %vm591_vm2 = vcmp.lt.s32.totalorder %v7909_v48, 16 }
 0x187   :  { %v194_v56 = vadd.f32 %v190_v52, %v181_v54  ;;  %v193_v57 = vadd.f32 %v186_v51, %v180_v55  ;;  %v7368_v52 = vld [vmem:[%s12460_s3 + $0x13] ss:$8 sm:$0x3]  ;;  %v7369_v53 = vld [vmem:[%s12460_s3 + $0x14] ss:$8 sm:$0x3]  ;;  %v7927_v55 = vrot.slane %v7365_v45, %v7808_v41 }
 0x188   :  { %v7370_v54 = vld [vmem:[%s12460_s3 + $0x15] ss:$8 sm:$0x3]  ;;  %12534 = vst [vmem:[#allocation15_spill] sm:$0xff] %v7940_v47  ;;  %vm582_vm3 = vcmp.lt.s32.totalorder %v7909_v48, 17  ;;  %vm600_vm4 = vcmp.lt.s32.totalorder %v7909_v48, 15 }
 0x189   :  { %v196_v58 = vmax.f32 %v194_v56, 0.0  ;;  %v195_v59 = vmax.f32 %v193_v57, 0.0  ;;  %12531 = vst [vmem:[#allocation12_spill] sm:$0xff] %v7927_v55  ;;  %v7930_v56 = vrot.slane %v7366_v46, %v7808_v41  ;;  %vm609_vm5 = vcmp.lt.s32.totalorder %v7909_v48, 1 }
 0x18a   :  { %vm618_vm6 = vcmp.lt.s32.totalorder %v7909_v48, 127  ;;  %vm627_vm7 = vcmp.lt.s32.totalorder %v7909_v48, 113  ;;  %vm636_vm8 = vcmp.lt.s32.totalorder %v7909_v48, 112  ;;  %vm645_vm9 = vcmp.lt.s32.totalorder %v7909_v48, 111 }
 0x18b   :  { %336 = vmatprep.mubr.f32.mxu1 %v196_v58  ;;  %12532 = vst [vmem:[#allocation13_spill] sm:$0xff] %v7930_v56  ;;  %v7371_v58 = vld [vmem:[%s12460_s3 + $0x16] ss:$8 sm:$0x3] }
 0x18c   :  { %337 = vmatmul.mubr.f32.vlgmr.msra.gmra.mxu1 %v195_v59  ;;  %v7936_v59 = vrot.slane %v7367_v50, %v7808_v41 }
 0x18d   :  { %807 = vmatprep.mubr.f32.mxu1 %v12465_v0 }
 0x18e   :  { %12533 = vst [vmem:[#allocation14_spill] sm:$0xff] %v7936_v59 }
 0x24c   :  { %v338_v61 = vpop.f32.mrf.mxu1 }
 0x24d   :  { %v339_v62 = vadd.f32 %v338_v61, %v265_v49  ;;  %v7943_v49 = vrot.slane %v7365_v45, %v7813_v43  ;;  %v7949_v61 = vrot.slane %v7369_v53, %v7808_v41 }
 0x24e   :  { %v340_v63 = vpop.f32.mrf.mxu1 }
 0x24f   :  { %v341_v1 = vadd.f32 %v340_v63, %v269_v60  ;;  %v343_v2 = vsel %vm144_vm1, %v339_v62, 0.0  ;;  %v349_v4 = vmul.f32 %v339_v62, %v339_v62  ;;  %12535 = vst [vmem:[#allocation16_spill] sm:$0xff] %v7943_v49  ;;  %v7946_v60 = vrot.slane %v7368_v52, %v7808_v41  ;;  %12537 = vst [vmem:[#allocation18_spill] sm:$0xff] %v7949_v61 }
 0x250   :  { %v7955_v63 = vrot.slane %v7367_v50, %v7813_v43 }
 0x251   :  { %v344_v3 = vsel %vm144_vm1, %v341_v1, 0.0  ;;  %v350_v5 = vmul.f32 %v341_v1, %v341_v1  ;;  %v351_v8 = vsel %vm144_vm1, %v349_v4, 0.0  ;;  %12536 = vst [vmem:[#allocation17_spill] sm:$0xff] %v7946_v60  ;;  %v7967_v4 = vrot.slane %v7368_v52, %v7813_v43 }
 0x252   :  { %v345_v6 = vadd.f32 %v344_v3, %v343_v2  ;;  %12539 = vst [vmem:[#allocation20_spill] sm:$0xff] %v7955_v63  ;;  %v7958_v2 = vrot.slane %v7370_v54, %v7808_v41  ;;  %v7964_v3 = vrot.slane %v7371_v58, %v7808_v41 }
 0x253   :  { %v352_v7 = vsel %vm144_vm1, %v350_v5, 0.0  ;;  %12542 = vst [vmem:[#allocation23_spill] sm:$0xff] %v7967_v4  ;;  %v7970_v5 = vrot.slane %v7369_v53, %v7813_v43 }
 0x254   :  { %346 = vadd.xlane.f32.xlu1 %v345_v6  ;;  %v353_v9 = vadd.f32 %v352_v7, %v351_v8  ;;  %12540 = vst [vmem:[#allocation21_spill] sm:$0xff] %v7958_v2  ;;  %12541 = vst [vmem:[#allocation22_spill] sm:$0xff] %v7964_v3  ;;  %v7976_v7 = vrot.slane %v7370_v54, %v7813_v43  ;;  %v7979_v8 = vrot.slane %v7371_v58, %v7813_v43 }
 0x255   :  { %12543 = vst [vmem:[#allocation24_spill] sm:$0xff] %v7970_v5 }
 0x256   :  { %12544 = vst [vmem:[#allocation25_spill] sm:$0xff] %v7976_v7  ;;  %12545 = vst [vmem:[#allocation26_spill] sm:$0xff] %v7979_v8 }
 0x258   :  { %354 = vadd.xlane.f32.xlu1 %v353_v9 }
 0x2dd   :  { %v347_v10 = vpop.xlane.xlu1 %346 }
 0x2de   :  { %v348_v11 = vmul.f32 0.00390625, %v347_v10 }
 0x2e0   :  { %v357_v13 = vmul.f32 %v348_v11, %v348_v11  ;;  %v360_v20 = vsub.f32 %v339_v62, %v348_v11  ;;  %v361_v21 = vsub.f32 %v341_v1, %v348_v11  ;;  %v7952_v62 = vrot.slane %v7366_v46, %v7813_v43 }
 0x2e1   :  { %v355_v12 = vpop.xlane.xlu1 %354 }
 0x2e2   :  { %v356_v14 = vmul.f32 0.00390625, %v355_v12  ;;  %12538 = vst [vmem:[#allocation19_spill] sm:$0xff] %v7952_v62 }
 0x2e4   :  { %v358_v15 = vsub.f32 %v356_v14, %v357_v13 }
 0x2e6   :  { %v359_v16 = vmax.f32 %v358_v15, 0.0 }
 0x2e8   :  { %v362_v17 = vadd.f32 1e-05, %v359_v16 }
 0x2ea   :  { %7591 = vrsqrt.f32 %v362_v17 }
 0x2f7   :  { %v7592_v24 = vpop.eup %7591 }
 0x2f8   :  { %v364_v27 = vmul.f32 %v7592_v24, %v360_v20  ;;  %v365_v28 = vmul.f32 %v7592_v24, %v361_v21 }
 0x2fa   :  { %v377_v29 = vmul.f32 %v370_v22, %v364_v27  ;;  %v378_v30 = vmul.f32 %v374_v23, %v365_v28 }
 0x2fc   :  { %v390_v31 = vadd.f32 %v383_v25, %v377_v29  ;;  %v391_v32 = vadd.f32 %v387_v26, %v378_v30 }
 0x2fe   :  { %v7863_v33 = vmax.f32 %v390_v31, 0.0  ;;  %v7865_v34 = vmax.f32 %v391_v32, 0.0 }
 0x300   :  { %12527 = vst [vmem:[#allocation8_spill] sm:$0xff] %v7863_v33  ;;  %12528 = vst [vmem:[#allocation9_spill] sm:$0xff] %v7865_v34  ;;  %589 = vrot.lane.b32.xlu1 %v7865_v34, %s7725_s25  ;;  %587 = vrot.lane.b32.xlu0 %v7863_v33, %s7725_s25  ;;  %v671_v21 = vrot.slane %v7865_v34, 4  ;;  %v670_v26 = vrot.slane %v7863_v33, 4 }
 0x304   :  { %596 = vrot.lane.b32.xlu1 %v7863_v33, %s7727_s8  ;;  %576 = vrot.lane.b32.xlu0 %v7863_v33, %s7728_s9 }
 0x308   :  { %598 = vrot.lane.b32.xlu1 %v7865_v34, %s7727_s8  ;;  %605 = vrot.lane.b32.xlu0 %v7863_v33, %s7729_s10 }
 0x30c   :  { %578 = vrot.lane.b32.xlu1 %v7865_v34, %s7728_s9  ;;  %614 = vrot.lane.b32.xlu0 %v7863_v33, %s7730_s2 }
 0x310   :  { %607 = vrot.lane.b32.xlu1 %v7865_v34, %s7729_s10  ;;  %623 = vrot.lane.b32.xlu0 %v7863_v33, %s7731_s11 }
 0x314   :  { %616 = vrot.lane.b32.xlu1 %v7865_v34, %s7730_s2  ;;  %632 = vrot.lane.b32.xlu0 %v7863_v33, %s7732_s12 }
 0x318   :  { %625 = vrot.lane.b32.xlu1 %v7865_v34, %s7731_s11  ;;  %641 = vrot.lane.b32.xlu0 %v7863_v33, %s7733_s13 }
 0x31c   :  { %634 = vrot.lane.b32.xlu1 %v7865_v34, %s7732_s12 }
 0x320   :  { %643 = vrot.lane.b32.xlu1 %v7865_v34, %s7733_s13 }
 0x372   :  { %v590_v35 = vpop.permute.xlu1 %589  ;;  %v588_v36 = vpop.permute.xlu0 %587 }
 0x373   :  { %v592_v6 = vsel %vm591_vm2, %v588_v36, %v590_v35  ;;  %v593_v41 = vsel %vm591_vm2, %v590_v35, %v588_v36 }
 0x374   :  { %v595_v43 = vmul.f32 %v592_v6, %v7943_v49  ;;  %v594_v16 = vmul.f32 %v593_v41, %v7927_v55 }
 0x376   :  { %v597_v37 = vpop.permute.xlu1 %596  ;;  %v577_v38 = vpop.permute.xlu0 %576  ;;  %v653_v27 = vrot.slane %v595_v43, 7  ;;  %v652_v31 = vrot.slane %v594_v16, 7 }
 0x37a   :  { %v599_v40 = vpop.permute.xlu1 %598  ;;  %v606_v42 = vpop.permute.xlu0 %605 }
 0x37b   :  { %v601_v9 = vsel %vm600_vm4, %v597_v37, %v599_v40  ;;  %v602_v17 = vsel %vm600_vm4, %v599_v40, %v597_v37 }
 0x37c   :  { %v604_v18 = vmul.f32 %v601_v9, %v7952_v62  ;;  %v603_v28 = vmul.f32 %v602_v17, %v7930_v56 }
 0x37e   :  { %v579_v51 = vpop.permute.xlu1 %578  ;;  %v615_v57 = vpop.permute.xlu0 %614  ;;  %v659_v36 = vrot.slane %v604_v18, 6 }
 0x37f   :  { %v583_v10 = vsel %vm582_vm3, %v577_v38, %v579_v51  ;;  %v584_v14 = vsel %vm582_vm3, %v579_v51, %v577_v38  ;;  %v658_v51 = vrot.slane %v603_v28, 6 }
 0x380   :  { %v586_v19 = vmul.f32 %v583_v10, %v7940_v47  ;;  %v585_v22 = vmul.f32 %v584_v14, %v7924_v39 }
 0x382   :  { %v608_v1 = vpop.permute.xlu1 %607  ;;  %v624_v12 = vpop.permute.xlu0 %623  ;;  %v694_v37 = vsel %vm692_vm10, %v586_v19, %v653_v27 }
 0x383   :  { %v610_v11 = vsel %vm609_vm5, %v606_v42, %v608_v1  ;;  %v611_v15 = vsel %vm609_vm5, %v608_v1, %v606_v42  ;;  %v693_v42 = vsel %vm692_vm10, %v585_v22, %v652_v31  ;;  %v499_v31 = vld [vmem:[%s12460_s3 + $0x30] sm:$0xff] }
 0x384   :  { %v613_v20 = vmul.f32 %v610_v11, %v7955_v63  ;;  %v612_v23 = vmul.f32 %v611_v15, %v7936_v59  ;;  %v695_v6 = vsel %vm144_vm1, %v693_v42, %v658_v51  ;;  %v506_v42 = vld [vmem:[%s12460_s3 + $0x80] sm:$0xff] }
 0x386   :  { %v617_v13 = vpop.permute.xlu1 %616  ;;  %v633_v32 = vpop.permute.xlu0 %632  ;;  %v665_v38 = vrot.slane %v613_v20, 5  ;;  %v664_v44 = vrot.slane %v612_v23, 5 }
 0x387   :  { %v620_v24 = vsel %vm618_vm6, %v617_v13, %v615_v57  ;;  %v619_v29 = vsel %vm618_vm6, %v615_v57, %v617_v13  ;;  %v696_v57 = vsel %vm144_vm1, %v694_v37, %v659_v36  ;;  %v503_v37 = vld [vmem:[%s12460_s3 + $0x68] sm:$0xff] }
 0x388   :  { %v622_v40 = vmul.f32 %v620_v24, %v7967_v4  ;;  %v621_v45 = vmul.f32 %v619_v29, %v7946_v60  ;;  %v699_v41 = vsel %vm697_vm11, %v696_v57, %v665_v38  ;;  %v698_v10 = vsel %vm697_vm11, %v695_v6, %v664_v44  ;;  %v500_v29 = vld [vmem:[%s12460_s3 + $0x40] sm:$0xff]  ;;  %v507_v6 = vld [vmem:[%s12460_s3 + $0x88] sm:$0xff] }
 0x389   :  { %v702_v22 = vsel %vm12464_vm12, %v699_v41, %v671_v21  ;;  %v701_v24 = vsel %vm12464_vm12, %v698_v10, %v670_v26  ;;  %v498_v26 = vld [vmem:[%s12460_s3 + $0x20] sm:$0xff]  ;;  %vm712_vm12 = vcmask 72704  }
 0x38a   :  { %v626_v25 = vpop.permute.xlu1 %625  ;;  %v677_v9 = vrot.slane %v622_v40, 3  ;;  %v676_v11 = vrot.slane %v621_v45, 3  ;;  %v642_v13 = vpop.permute.xlu0 %641  ;;  %v504_v45 = vld [vmem:[%s12460_s3 + $0x70] sm:$0xff] }
 0x38b   :  { %v629_v30 = vsel %vm627_vm7, %v626_v25, %v624_v12  ;;  %v628_v35 = vsel %vm627_vm7, %v624_v12, %v626_v25 }
 0x38c   :  { %v631_v46 = vmul.f32 %v629_v30, %v7970_v5  ;;  %v630_v52 = vmul.f32 %v628_v35, %v7949_v61  ;;  %v705_v23 = vsel %vm703_vm13, %v702_v22, %v677_v9  ;;  %v704_v27 = vsel %vm703_vm13, %v701_v24, %v676_v11  ;;  %v502_v35 = vld [vmem:[%s12460_s3 + $0x60] sm:$0xff]  ;;  %v508_v9 = vld [vmem:[%s12460_s3 + $0x90] sm:$0xff] }
 0x38e   :  { %v635_v50 = vpop.permute.xlu1 %634  ;;  %v683_v12 = vrot.slane %v631_v46, 2  ;;  %v682_v14 = vrot.slane %v630_v52, 2  ;;  %v505_v52 = vld [vmem:[%s12460_s3 + $0x78] sm:$0xff] }
 0x38f   :  { %v637_v53 = vsel %vm636_vm8, %v633_v32, %v635_v50  ;;  %v638_v54 = vsel %vm636_vm8, %v635_v50, %v633_v32  ;;  %v501_v32 = vld [vmem:[%s12460_s3 + $0x50] sm:$0xff] }
 0x390   :  { %v639_v58 = vmul.f32 %v637_v53, %v7958_v2  ;;  %v640_v1 = vmul.f32 %v638_v54, %v7976_v7  ;;  %v708_v25 = vsel %vm706_vm14, %v705_v23, %v683_v12  ;;  %v707_v21 = vsel %vm706_vm14, %v704_v27, %v682_v14 }
 0x392   :  { %v644_v43 = vpop.permute.xlu1 %643  ;;  %v689_v15 = vrot.slane %v640_v1, 1  ;;  %v688_v18 = vrot.slane %v639_v58, 1 }
 0x393   :  { %v646_v16 = vsel %vm645_vm9, %v642_v13, %v644_v43  ;;  %v647_v17 = vsel %vm645_vm9, %v644_v43, %v642_v13 }
 0x394   :  { %v648_v19 = vmul.f32 %v646_v16, %v7964_v3  ;;  %v649_v20 = vmul.f32 %v647_v17, %v7979_v8  ;;  %v711_v28 = vsel %vm709_vm15, %v708_v25, %v689_v15  ;;  %v710_v30 = vsel %vm709_vm15, %v707_v21, %v688_v18 }
 0x396   :  { %7372 = vmatprep.subr.msk.mxu0 %vm692_vm10, %v649_v20  ;;  %7546 = vmatprep.subr.msk.mxu1 %vm692_vm10, %v649_v20  ;;  %v509_v20 = vld [vmem:[%s12460_s3 + $0x98] sm:$0xff] }
 0x397   :  { %7373 = vmatpush1.msk.msra.mxu0 %vm692_vm10, %v648_v19  ;;  %7548 = vmatpush1.msk.msra.mxu1 %vm692_vm10, %v648_v19 }
 0x398   :  { %761 = vmatprep.subr.mxu0 %v711_v28  ;;  %7547 = vmatprep.subr.mxu1 %v711_v28 }
 0x399   :  { %762 = vmatpush1.msra.mxu0 %v710_v30  ;;  %7549 = vmatpush1.msra.mxu1 %v710_v30 }
 0x39a   :  { %7374 = vmatmul.mubr.msk.f32.vlgmr.msra.gmra.mxu0 %vm712_vm12, %v498_v26  ;;  %7376 = vmatmul.mubr.msk.f32.vlgmr.msra.gmra.mxu1 %vm712_vm12, %v500_v29 }
 0x39b   :  { %801 = vmatprep.mubr.f32.mxu0 %v12465_v0  ;;  %813 = vmatprep.mubr.f32.mxu1 %v12465_v0 }
 0x39e   :  { %7375 = vmatmul.mubr.msk.f32.gmra.mxu0 %vm712_vm12, %v499_v31  ;;  %7377 = vmatmul.mubr.msk.f32.gmra.mxu1 %vm712_vm12, %v501_v32 }
 0x39f   :  { %1083 = vmatprep.mubr.f32.mxu0 %v12465_v0  ;;  %1397 = vmatprep.mubr.f32.mxu1 %v12465_v0 }
 0x45a   :  { %v797_v36 = vpop.f32.mrf.mxu0  ;;  %v809_v38 = vpop.f32.mrf.mxu1 }
 0x45b   :  { %v8076_v40 = vadd.f32 %v797_v36, %v502_v35  ;;  %v8089_v53 = vadd.f32 %v809_v38, %v506_v42 }
 0x45c   :  { %v799_v44 = vpop.f32.mrf.mxu0  ;;  %v811_v46 = vpop.f32.mrf.mxu1 }
 0x45d   :  { %v8084_v50 = vadd.f32 %v799_v44, %v503_v37  ;;  %v839_v54 = vmul.f32 %v8076_v40, %v8076_v40  ;;  %v843_v14 = vmul.f32 %v8089_v53, %v8089_v53  ;;  %v8112_v15 = vadd.f32 %v811_v46, %v507_v6 }
 0x45e   :  { %v803_v51 = vpop.f32.mrf.mxu0  ;;  %v815_v10 = vpop.f32.mrf.mxu1 }
 0x45f   :  { %v820_v57 = vadd.f32 %v8084_v50, %v8076_v40  ;;  %v840_v58 = vmul.f32 %v8084_v50, %v8084_v50  ;;  %v8097_v1 = vadd.f32 %v803_v51, %v504_v45  ;;  %v8117_v19 = vadd.f32 %v815_v10, %v508_v9 }
 0x460   :  { %v805_v41 = vpop.f32.mrf.mxu0  ;;  %v817_v22 = vpop.f32.mrf.mxu1  ;;  %v844_v25 = vmul.f32 %v8112_v15, %v8112_v15 }
 0x461   :  { %v847_v11 = vadd.f32 %v840_v58, %v839_v54  ;;  %v821_v12 = vadd.f32 %v820_v57, %v8097_v1  ;;  %v841_v13 = vmul.f32 %v8097_v1, %v8097_v1  ;;  %v8108_v43 = vadd.f32 %v805_v41, %v505_v52 }
 0x462   :  { %v845_v28 = vmul.f32 %v8117_v19, %v8117_v19  ;;  %v818_v21 = vadd.f32 %v817_v22, %v509_v20  ;;  %v515_v22 = vld [vmem:[%s12460_s3 + $0xc8] sm:$0xff] }
 0x463   :  { %v848_v16 = vadd.f32 %v847_v11, %v841_v13  ;;  %v822_v17 = vadd.f32 %v821_v12, %v8108_v43  ;;  %v842_v18 = vmul.f32 %v8108_v43, %v8108_v43 }
 0x464   :  { %v846_v32 = vmul.f32 %v818_v21, %v818_v21 }
 0x465   :  { %v849_v23 = vadd.f32 %v848_v16, %v842_v18  ;;  %v823_v24 = vadd.f32 %v822_v17, %v8089_v53 }
 0x467   :  { %v850_v27 = vadd.f32 %v849_v23, %v843_v14  ;;  %v824_v26 = vadd.f32 %v823_v24, %v8112_v15  ;;  %v514_v14 = vld [vmem:[%s12460_s3 + $0xc0] sm:$0xff]  ;;  %v516_v23 = vld [vmem:[%s12460_s3 + $0xd0] sm:$0xff] }
 0x469   :  { %v825_v29 = vadd.f32 %v824_v26, %v8117_v19  ;;  %v851_v30 = vadd.f32 %v850_v27, %v844_v25  ;;  %v525_v26 = vld [vmem:[%s12460_s3 + $0x118] sm:$0xff] }
 0x46b   :  { %v826_v31 = vadd.f32 %v825_v29, %v818_v21  ;;  %v852_v35 = vadd.f32 %v851_v30, %v845_v28 }
 0x46d   :  { %827 = vadd.xlane.f32.xlu0 %v826_v31  ;;  %v853_v36 = vadd.f32 %v852_v35, %v846_v32 }
 0x46f   :  { %854 = vadd.xlane.f32.xlu1 %v853_v36 }
 0x4f6   :  { %v828_v37 = vpop.xlane.xlu0 %827 }
 0x4f7   :  { %v829_v38 = vrot.slane %v828_v37, 4 }
 0x4f8   :  { %v855_v42 = vpop.xlane.xlu1 %854 }
 0x4f9   :  { %v830_v44 = vadd.f32 %v829_v38, %v828_v37  ;;  %v856_v45 = vrot.slane %v855_v42, 4  ;;  %v522_v37 = vld [vmem:[%s12460_s3 + $0x100] sm:$0xff]  ;;  %v523_v38 = vld [vmem:[%s12460_s3 + $0x108] sm:$0xff] }
 0x4fb   :  { %v857_v46 = vadd.f32 %v856_v45, %v855_v42  ;;  %v831_v51 = vrot.slane %v830_v44, 2 }
 0x4fd   :  { %v832_v52 = vadd.f32 %v831_v51, %v830_v44  ;;  %v858_v54 = vrot.slane %v857_v46, 2 }
 0x4ff   :  { %v833_v57 = vrot.slane %v832_v52, 1  ;;  %v859_v58 = vadd.f32 %v858_v54, %v857_v46 }
 0x501   :  { %v834_v6 = vadd.f32 %v833_v57, %v832_v52  ;;  %v860_v41 = vrot.slane %v859_v58, 1 }
 0x503   :  { %7550 = vpush %v834_v6  ;;  %v861_v9 = vadd.f32 %v860_v41, %v859_v58  ;;  %v510_v58 = vld [vmem:[%s12460_s3 + $0xa0] sm:$0xff]  ;;  %v511_v6 = vld [vmem:[%s12460_s3 + $0xa8] sm:$0xff] }
 0x505   :  { %7552 = vpush %v861_v9 }
 0x534   :  { %s7551_s16 = spop %7550 }
 0x535   :  { %s838_s17 = smul.f32 0.00012207031, %s7551_s16 }
 0x536   :  { %s7553_s18 = spop %7552 }
 0x537   :  { %s866_s19 = smul.f32 %s838_s17, %s838_s17  ;;  %v869_v12 = vstv %s838_s17 }
 0x538   :  { %s865_s20 = smul.f32 0.00012207031, %s7553_s18  ;;  %v874_v13 = vsub.f32 %v8089_v53, %v869_v12  ;;  %v875_v16 = vsub.f32 %v8112_v15, %v869_v12  ;;  %v876_v17 = vsub.f32 %v8117_v19, %v869_v12  ;;  %v877_v18 = vsub.f32 %v818_v21, %v869_v12  ;;  %v517_v53 = vld [vmem:[%s12460_s3 + $0xd8] sm:$0xff]  ;;  %v524_v21 = vld [vmem:[%s12460_s3 + $0x110] sm:$0xff] }
 0x539   :  { %v872_v24 = vsub.f32 %v8097_v1, %v869_v12  ;;  %v873_v15 = vsub.f32 %v8108_v43, %v869_v12  ;;  %v512_v1 = vld [vmem:[%s12460_s3 + $0xb0] sm:$0xff]  ;;  %v513_v43 = vld [vmem:[%s12460_s3 + $0xb8] sm:$0xff]  ;;  %v870_v42 = vsub.f32 %v8076_v40, %v869_v12  ;;  %v871_v44 = vsub.f32 %v8084_v50, %v869_v12 }
 0x53a   :  { %s867_s0 = ssub.f32 %s865_s20, %s866_s19  ;;  %v520_v50 = vld [vmem:[%s12460_s3 + $0xf0] sm:$0xff] }
 0x53c   :  { %s868_s21 = smax.f32 %s7734_s1, %s867_s0 }
 0x53d   :  { %s878_s22 = sadd.f32 1e-05, %s868_s21 }
 0x53f   :  { %v879_v10 = vstv %s878_s22 }
 0x540   :  { %7593 = vrsqrt.f32 %v879_v10 }
 0x54d   :  { %v7594_v11 = vpop.eup %7593 }
 0x54e   :  { %7554 = vpush %v7594_v11  ;;  %v521_v11 = vld [vmem:[%s12460_s3 + $0xf8] sm:$0xff] }
 0x57f   :  { %s7555_s23 = spop %7554 }
 0x580   :  { %v882_v20 = vstv %s7555_s23 }
 0x581   :  { %v887_v25 = vmul.f32 %v882_v20, %v874_v13  ;;  %v888_v19 = vmul.f32 %v882_v20, %v875_v16  ;;  %v889_v27 = vmul.f32 %v882_v20, %v876_v17  ;;  %v890_v28 = vmul.f32 %v882_v20, %v877_v18 }
 0x582   :  { %v885_v29 = vmul.f32 %v882_v20, %v872_v24  ;;  %v886_v30 = vmul.f32 %v882_v20, %v873_v15  ;;  %v883_v51 = vmul.f32 %v882_v20, %v870_v42  ;;  %v884_v52 = vmul.f32 %v882_v20, %v871_v44  ;;  %v518_v20 = vld [vmem:[%s12460_s3 + $0xe0] sm:$0xff] }
 0x583   :  { %v895_v31 = vmul.f32 %v887_v25, %v514_v14  ;;  %v896_v32 = vmul.f32 %v888_v19, %v515_v22  ;;  %v897_v35 = vmul.f32 %v889_v27, %v516_v23  ;;  %v898_v36 = vmul.f32 %v890_v28, %v517_v53  ;;  %v519_v22 = vld [vmem:[%s12460_s3 + $0xe8] sm:$0xff] }
 0x584   :  { %v893_v54 = vmul.f32 %v885_v29, %v512_v1  ;;  %v894_v57 = vmul.f32 %v886_v30, %v513_v43  ;;  %v891_v12 = vmul.f32 %v883_v51, %v510_v58  ;;  %v892_v13 = vmul.f32 %v884_v52, %v511_v6 }
 0x585   :  { %v905_v45 = vadd.f32 %v897_v35, %v524_v21  ;;  %v906_v46 = vadd.f32 %v898_v36, %v525_v26  ;;  %v903_v41 = vadd.f32 %v895_v31, %v522_v37  ;;  %v904_v9 = vadd.f32 %v896_v32, %v523_v38 }
 0x586   :  { %v901_v14 = vadd.f32 %v893_v54, %v520_v50  ;;  %v902_v16 = vadd.f32 %v894_v57, %v521_v11  ;;  %v899_v23 = vadd.f32 %v891_v12, %v518_v20  ;;  %v900_v53 = vadd.f32 %v892_v13, %v519_v22 }
 0x587   :  { %v8173_v10 = vmax.f32 %v905_v45, 0.0  ;;  %v8175_v40 = vmax.f32 %v906_v46, 0.0  ;;  %v8187_v17 = vmax.f32 %v903_v41, 0.0  ;;  %v8189_v18 = vmax.f32 %v904_v9, 0.0  ;;  %v987_v41 = vld [vmem:[%s12461_s4 + $0x40] sm:$0xff] }
 0x588   :  { %v8201_v24 = vmax.f32 %v901_v14, 0.0  ;;  %v8203_v15 = vmax.f32 %v902_v16, 0.0  ;;  %v8209_v25 = vmax.f32 %v899_v23, 0.0  ;;  %v8211_v19 = vmax.f32 %v900_v53, 0.0  ;;  %v988_v16 = vld [vmem:[%s12461_s4 + $0x48] sm:$0xff] }
 0x589   :  { %969 = vrot.lane.b32.xlu1 %v8175_v40, %s7725_s25  ;;  %961 = vrot.lane.b32.xlu0 %v8173_v10, %s7725_s25 }
 0x58d   :  { %967 = vrot.lane.b32.xlu1 %v8189_v18, %s7725_s25  ;;  %959 = vrot.lane.b32.xlu0 %v8187_v17, %s7725_s25 }
 0x591   :  { %965 = vrot.lane.b32.xlu1 %v8203_v15, %s7725_s25  ;;  %957 = vrot.lane.b32.xlu0 %v8201_v24, %s7725_s25 }
 0x595   :  { %963 = vrot.lane.b32.xlu1 %v8211_v19, %s7725_s25  ;;  %955 = vrot.lane.b32.xlu0 %v8209_v25, %s7725_s25 }
 0x599   :  { %929 = vrot.lane.b32.xlu1 %v8175_v40, %s7728_s9  ;;  %921 = vrot.lane.b32.xlu0 %v8173_v10, %s7728_s9 }
 0x59d   :  { %927 = vrot.lane.b32.xlu1 %v8189_v18, %s7728_s9  ;;  %919 = vrot.lane.b32.xlu0 %v8187_v17, %s7728_s9 }
 0x5a1   :  { %1283 = vrot.lane.b32.xlu1 %v8175_v40, %s7727_s8  ;;  %1275 = vrot.lane.b32.xlu0 %v8173_v10, %s7727_s8 }
 0x5a5   :  { %925 = vrot.lane.b32.xlu1 %v8203_v15, %s7728_s9  ;;  %917 = vrot.lane.b32.xlu0 %v8201_v24, %s7728_s9 }
 0x5a9   :  { %1281 = vrot.lane.b32.xlu1 %v8189_v18, %s7727_s8  ;;  %1273 = vrot.lane.b32.xlu0 %v8187_v17, %s7727_s8 }
 0x5ad   :  { %923 = vrot.lane.b32.xlu1 %v8211_v19, %s7728_s9  ;;  %915 = vrot.lane.b32.xlu0 %v8209_v25, %s7728_s9 }
 0x5b1   :  { %1279 = vrot.lane.b32.xlu1 %v8203_v15, %s7727_s8  ;;  %1271 = vrot.lane.b32.xlu0 %v8201_v24, %s7727_s8 }
 0x5b5   :  { %1277 = vrot.lane.b32.xlu1 %v8211_v19, %s7727_s8  ;;  %1269 = vrot.lane.b32.xlu0 %v8209_v25, %s7727_s8 }
 0x5b9   :  { %1476 = vrot.lane.b32.xlu1 %v8175_v40, %s7729_s10  ;;  %1468 = vrot.lane.b32.xlu0 %v8173_v10, %s7729_s10 }
 0x5bd   :  { %1474 = vrot.lane.b32.xlu1 %v8189_v18, %s7729_s10  ;;  %1466 = vrot.lane.b32.xlu0 %v8187_v17, %s7729_s10 }
 0x5c1   :  { %1472 = vrot.lane.b32.xlu1 %v8203_v15, %s7729_s10  ;;  %1464 = vrot.lane.b32.xlu0 %v8201_v24, %s7729_s10 }
 0x5c5   :  { %1470 = vrot.lane.b32.xlu1 %v8211_v19, %s7729_s10  ;;  %1462 = vrot.lane.b32.xlu0 %v8209_v25, %s7729_s10 }
 0x5c9   :  { %1830 = vrot.lane.b32.xlu1 %v8175_v40, %s7730_s2  ;;  %1822 = vrot.lane.b32.xlu0 %v8173_v10, %s7730_s2 }
 0x5cd   :  { %1828 = vrot.lane.b32.xlu1 %v8189_v18, %s7730_s2  ;;  %1820 = vrot.lane.b32.xlu0 %v8187_v17, %s7730_s2 }
 0x5d1   :  { %2023 = vrot.lane.b32.xlu1 %v8175_v40, %s7731_s11  ;;  %2015 = vrot.lane.b32.xlu0 %v8173_v10, %s7731_s11 }
 0x5d5   :  { %1826 = vrot.lane.b32.xlu1 %v8203_v15, %s7730_s2  ;;  %1818 = vrot.lane.b32.xlu0 %v8201_v24, %s7730_s2 }
 0x5d9   :  { %2021 = vrot.lane.b32.xlu1 %v8189_v18, %s7731_s11  ;;  %2013 = vrot.lane.b32.xlu0 %v8187_v17, %s7731_s11 }
 0x5dd   :  { %1824 = vrot.lane.b32.xlu1 %v8211_v19, %s7730_s2  ;;  %1816 = vrot.lane.b32.xlu0 %v8209_v25, %s7730_s2 }
 0x5e1   :  { %2019 = vrot.lane.b32.xlu1 %v8203_v15, %s7731_s11  ;;  %2011 = vrot.lane.b32.xlu0 %v8201_v24, %s7731_s11 }
 0x5e5   :  { %2017 = vrot.lane.b32.xlu1 %v8211_v19, %s7731_s11  ;;  %2009 = vrot.lane.b32.xlu0 %v8209_v25, %s7731_s11 }
 0x5e9   :  { %2216 = vrot.lane.b32.xlu1 %v8175_v40, %s7732_s12  ;;  %2208 = vrot.lane.b32.xlu0 %v8173_v10, %s7732_s12 }
 0x5ed   :  { %2214 = vrot.lane.b32.xlu1 %v8189_v18, %s7732_s12  ;;  %2206 = vrot.lane.b32.xlu0 %v8187_v17, %s7732_s12 }
 0x5f1   :  { %2409 = vrot.lane.b32.xlu1 %v8175_v40, %s7733_s13  ;;  %2401 = vrot.lane.b32.xlu0 %v8173_v10, %s7733_s13 }
 0x5f5   :  { %2212 = vrot.lane.b32.xlu1 %v8203_v15, %s7732_s12  ;;  %2204 = vrot.lane.b32.xlu0 %v8201_v24, %s7732_s12 }
 0x5f9   :  { %2407 = vrot.lane.b32.xlu1 %v8189_v18, %s7733_s13  ;;  %2399 = vrot.lane.b32.xlu0 %v8187_v17, %s7733_s13 }
 0x5fb   :  { %v970_v27 = vpop.permute.xlu1 %969  ;;  %v962_v28 = vpop.permute.xlu0 %961 }
 0x5fc   :  { %v974_v21 = vsel %vm591_vm2, %v962_v28, %v970_v27  ;;  %v978_v26 = vsel %vm591_vm2, %v970_v27, %v962_v28 }
 0x5fd   :  { %v985_v29 = vmul.f32 %v978_v26, %v7927_v55  ;;  %2210 = vrot.lane.b32.xlu1 %v8211_v19, %s7732_s12  ;;  %2202 = vrot.lane.b32.xlu0 %v8209_v25, %s7732_s12  ;;  %v986_v30 = vmul.f32 %v974_v21, %v7943_v49  ;;  %v989_v21 = vld [vmem:[%s12461_s4 + $0x50] sm:$0xff] }
 0x5ff   :  { %1043 = vmatprep.subr.mxu0 %v986_v30  ;;  %v968_v1 = vpop.permute.xlu1 %967  ;;  %v960_v43 = vpop.permute.xlu0 %959 }
 0x600   :  { %v973_v31 = vsel %vm591_vm2, %v960_v43, %v968_v1  ;;  %v977_v32 = vsel %vm591_vm2, %v968_v1, %v960_v43  ;;  %1044 = vmatpush1.msra.mxu0 %v985_v29 }
 0x601   :  { %v983_v35 = vmul.f32 %v977_v32, %v7927_v55  ;;  %2405 = vrot.lane.b32.xlu1 %v8203_v15, %s7733_s13  ;;  %2397 = vrot.lane.b32.xlu0 %v8201_v24, %s7733_s13  ;;  %v984_v36 = vmul.f32 %v973_v31, %v7943_v49  ;;  %v990_v32 = vld [vmem:[%s12461_s4 + $0x58] sm:$0xff] }
 0x603   :  { %1045 = vmatprep.subr.mxu0 %v984_v36  ;;  %v966_v37 = vpop.permute.xlu1 %965  ;;  %v958_v38 = vpop.permute.xlu0 %957 }
 0x604   :  { %v972_v42 = vsel %vm591_vm2, %v958_v38, %v966_v37  ;;  %v976_v44 = vsel %vm591_vm2, %v966_v37, %v958_v38  ;;  %1046 = vmatpush1.msra.mxu0 %v983_v35 }
 0x605   :  { %v981_v45 = vmul.f32 %v976_v44, %v7927_v55  ;;  %2403 = vrot.lane.b32.xlu1 %v8211_v19, %s7733_s13  ;;  %2395 = vrot.lane.b32.xlu0 %v8209_v25, %s7733_s13  ;;  %v982_v46 = vmul.f32 %v972_v42, %v7943_v49 }
 0x607   :  { %1047 = vmatprep.subr.mxu0 %v982_v46  ;;  %v964_v51 = vpop.permute.xlu1 %963  ;;  %v956_v52 = vpop.permute.xlu0 %955 }
 0x608   :  { %v971_v54 = vsel %vm591_vm2, %v956_v52, %v964_v51  ;;  %v975_v57 = vsel %vm591_vm2, %v964_v51, %v956_v52  ;;  %1048 = vmatpush1.msra.mxu0 %v981_v45  ;;  %v991_v45 = vld [vmem:[%s12461_s4 + $0x60] sm:$0xff] }
 0x609   :  { %v979_v58 = vmul.f32 %v975_v57, %v7927_v55  ;;  %v980_v6 = vmul.f32 %v971_v54, %v7943_v49 }
 0x60b   :  { %v930_v9 = vpop.permute.xlu1 %929  ;;  %1049 = vmatprep.subr.mxu0 %v980_v6  ;;  %v922_v50 = vpop.permute.xlu0 %921  ;;  %v992_v6 = vld [vmem:[%s12461_s4 + $0x68] sm:$0xff] }
 0x60c   :  { %v934_v11 = vsel %vm582_vm3, %v922_v50, %v930_v9  ;;  %v938_v12 = vsel %vm582_vm3, %v930_v9, %v922_v50  ;;  %1050 = vmatpush1.msra.mxu0 %v979_v58 }
 0x60d   :  { %v945_v13 = vmul.f32 %v938_v12, %v7924_v39  ;;  %7378 = vmatmul.mubr.msk.f32.vlgmr.msra.gmra.mxu0 %vm12505_vm0, %v987_v41  ;;  %v946_v14 = vmul.f32 %v934_v11, %v7940_v47 }
 0x60e   :  { %1089 = vmatprep.mubr.f32.mxu0 %v12465_v0 }
 0x60f   :  { %v928_v20 = vpop.permute.xlu1 %927  ;;  %1180 = vmatprep.subr.mxu0 %v946_v14  ;;  %v920_v22 = vpop.permute.xlu0 %919  ;;  %v993_v14 = vld [vmem:[%s12461_s4 + $0x70] sm:$0xff] }
 0x610   :  { %v933_v23 = vsel %vm582_vm3, %v920_v22, %v928_v20  ;;  %v937_v53 = vsel %vm582_vm3, %v928_v20, %v920_v22  ;;  %1181 = vmatpush1.msra.mxu0 %v945_v13 }
 0x611   :  { %v943_v27 = vmul.f32 %v937_v53, %v7924_v39  ;;  %7379 = vmatmul.mubr.msk.f32.gmra.mxu0 %vm12505_vm0, %v988_v16  ;;  %v944_v28 = vmul.f32 %v933_v23, %v7940_v47 }
 0x612   :  { %1095 = vmatprep.mubr.f32.mxu0 %v12465_v0 }
 0x613   :  { %v1284_v26 = vpop.permute.xlu1 %1283  ;;  %1182 = vmatprep.subr.mxu0 %v944_v28  ;;  %v1276_v29 = vpop.permute.xlu0 %1275  ;;  %v994_v28 = vld [vmem:[%s12461_s4 + $0x78] sm:$0xff] }
 0x614   :  { %v1288_v30 = vsel %vm600_vm4, %v1276_v29, %v1284_v26  ;;  %v1292_v1 = vsel %vm600_vm4, %v1284_v26, %v1276_v29  ;;  %1183 = vmatpush1.msra.mxu0 %v943_v27 }
 0x615   :  { %v1299_v43 = vmul.f32 %v1292_v1, %v7930_v56  ;;  %7380 = vmatmul.mubr.msk.f32.gmra.mxu0 %vm12505_vm0, %v989_v21  ;;  %v1300_v31 = vmul.f32 %v1288_v30, %v7952_v62 }
 0x616   :  { %1101 = vmatprep.mubr.f32.mxu0 %v12465_v0 }
 0x617   :  { %v926_v35 = vpop.permute.xlu1 %925  ;;  %1357 = vmatprep.subr.mxu1 %v1300_v31  ;;  %v918_v36 = vpop.permute.xlu0 %917  ;;  %v947_v31 = vld [vmem:[%s12461_s4] sm:$0xff] }
 0x618   :  { %v932_v37 = vsel %vm582_vm3, %v918_v36, %v926_v35  ;;  %v936_v38 = vsel %vm582_vm3, %v926_v35, %v918_v36  ;;  %1358 = vmatpush1.msra.mxu1 %v1299_v43 }
 0x619   :  { %v941_v42 = vmul.f32 %v936_v38, %v7924_v39  ;;  %7381 = vmatmul.mubr.msk.f32.gmra.mxu0 %vm12505_vm0, %v990_v32  ;;  %v942_v44 = vmul.f32 %v932_v37, %v7940_v47  ;;  %v1301_v32 = vld [vmem:[%s12461_s4 + $0x80] sm:$0xff] }
 0x61a   :  { %1107 = vmatprep.mubr.f32.mxu0 %v12465_v0 }
 0x61b   :  { %v1282_v46 = vpop.permute.xlu1 %1281  ;;  %1184 = vmatprep.subr.mxu0 %v942_v44  ;;  %v1274_v51 = vpop.permute.xlu0 %1273 }
 0x61c   :  { %v1287_v52 = vsel %vm600_vm4, %v1274_v51, %v1282_v46  ;;  %v1291_v54 = vsel %vm600_vm4, %v1282_v46, %v1274_v51  ;;  %1185 = vmatpush1.msra.mxu0 %v941_v42  ;;  %v948_v51 = vld [vmem:[%s12461_s4 + $0x8] sm:$0xff] }
 0x61d   :  { %v1297_v57 = vmul.f32 %v1291_v54, %v7930_v56  ;;  %7382 = vmatmul.mubr.msk.f32.gmra.mxu0 %vm12505_vm0, %v991_v45  ;;  %v1298_v58 = vmul.f32 %v1287_v52, %v7952_v62  ;;  %v1302_v52 = vld [vmem:[%s12461_s4 + $0x88] sm:$0xff] }
 0x61e   :  { %1113 = vmatprep.mubr.f32.mxu0 %v12465_v0 }
 0x61f   :  { %v924_v41 = vpop.permute.xlu1 %923  ;;  %1359 = vmatprep.subr.mxu1 %v1298_v58  ;;  %v916_v9 = vpop.permute.xlu0 %915 }
 0x620   :  { %v931_v50 = vsel %vm582_vm3, %v916_v9, %v924_v41  ;;  %v935_v11 = vsel %vm582_vm3, %v924_v41, %v916_v9  ;;  %1360 = vmatpush1.msra.mxu1 %v1297_v57  ;;  %v949_v41 = vld [vmem:[%s12461_s4 + $0x10] sm:$0xff] }
 0x621   :  { %v939_v12 = vmul.f32 %v935_v11, %v7924_v39  ;;  %7383 = vmatmul.mubr.msk.f32.gmra.mxu0 %vm12505_vm0, %v992_v6  ;;  %v940_v13 = vmul.f32 %v931_v50, %v7940_v47 }
 0x622   :  { %1119 = vmatprep.mubr.f32.mxu0 %v12465_v0 }
 0x623   :  { %v1280_v16 = vpop.permute.xlu1 %1279  ;;  %1186 = vmatprep.subr.mxu0 %v940_v13  ;;  %v1272_v20 = vpop.permute.xlu0 %1271  ;;  %v950_v13 = vld [vmem:[%s12461_s4 + $0x18] sm:$0xff] }
 0x624   :  { %v1286_v22 = vsel %vm600_vm4, %v1272_v20, %v1280_v16  ;;  %v1290_v23 = vsel %vm600_vm4, %v1280_v16, %v1272_v20  ;;  %1187 = vmatpush1.msra.mxu0 %v939_v12 }
 0x625   :  { %v1295_v53 = vmul.f32 %v1290_v23, %v7930_v56  ;;  %7384 = vmatmul.mubr.msk.f32.gmra.mxu0 %vm12505_vm0, %v993_v14  ;;  %v1296_v27 = vmul.f32 %v1286_v22, %v7952_v62 }
 0x626   :  { %1125 = vmatprep.mubr.f32.mxu0 %v12465_v0 }
 0x627   :  { %v1278_v21 = vpop.permute.xlu1 %1277  ;;  %1361 = vmatprep.subr.mxu1 %v1296_v27  ;;  %v1270_v26 = vpop.permute.xlu0 %1269  ;;  %v1305_v27 = vld [vmem:[%s12461_s4 + $0xa0] sm:$0xff] }
 0x628   :  { %v1285_v29 = vsel %vm600_vm4, %v1270_v26, %v1278_v21  ;;  %v1289_v30 = vsel %vm600_vm4, %v1278_v21, %v1270_v26  ;;  %1362 = vmatpush1.msra.mxu1 %v1295_v53  ;;  %v951_v53 = vld [vmem:[%s12461_s4 + $0x20] sm:$0xff] }
 0x629   :  { %v1293_v1 = vmul.f32 %v1289_v30, %v7930_v56  ;;  %7385 = vmatmul.mubr.msk.f32.gmra.mxu0 %vm12505_vm0, %v994_v28  ;;  %v1294_v43 = vmul.f32 %v1285_v29, %v7952_v62  ;;  %v952_v29 = vld [vmem:[%s12461_s4 + $0x28] sm:$0xff] }
 0x62a   :  { %1220 = vmatprep.mubr.f32.mxu0 %v12465_v0  ;;  %v1306_v30 = vld [vmem:[%s12461_s4 + $0xa8] sm:$0xff] }
 0x62b   :  { %v1477_v35 = vpop.permute.xlu1 %1476  ;;  %1363 = vmatprep.subr.mxu1 %v1294_v43  ;;  %v1469_v36 = vpop.permute.xlu0 %1468 }
 0x62c   :  { %v1481_v37 = vsel %vm609_vm5, %v1469_v36, %v1477_v35  ;;  %v1485_v38 = vsel %vm609_vm5, %v1477_v35, %v1469_v36  ;;  %1364 = vmatpush1.msra.mxu1 %v1293_v1  ;;  %v1307_v35 = vld [vmem:[%s12461_s4 + $0xb0] sm:$0xff] }
 0x62d   :  { %v1492_v42 = vmul.f32 %v1485_v38, %v7936_v59  ;;  %7386 = vmatmul.mubr.msk.f32.vlgmr.msra.gmra.mxu0 %vm12505_vm0, %v947_v31  ;;  %7394 = vmatmul.mubr.msk.f32.vlgmr.msra.gmra.mxu1 %vm12505_vm0, %v1301_v32  ;;  %v1493_v44 = vmul.f32 %v1481_v37, %v7955_v63  ;;  %v953_v32 = vld [vmem:[%s12461_s4 + $0x30] sm:$0xff] }
 0x62e   :  { %1711 = vmatprep.subr.mxu1 %v8175_v40  ;;  %1226 = vmatprep.mubr.f32.mxu0 %v12465_v0 }
 0x62f   :  { %1712 = vmatpush1.msra.mxu1 %v8173_v10  ;;  %v1475_v45 = vpop.permute.xlu1 %1474  ;;  %1550 = vmatprep.subr.mxu0 %v1493_v44  ;;  %v1467_v46 = vpop.permute.xlu0 %1466  ;;  %v1308_v44 = vld [vmem:[%s12461_s4 + $0xb8] sm:$0xff] }
 0x630   :  { %1713 = vmatprep.subr.mxu1 %v8189_v18  ;;  %v1480_v40 = vsel %vm609_vm5, %v1467_v46, %v1475_v45  ;;  %v1484_v54 = vsel %vm609_vm5, %v1475_v45, %v1467_v46  ;;  %1403 = vmatprep.mubr.f32.mxu1 %v12465_v0 }
 0x631   :  { %1551 = vmatpush1.msra.mxu0 %v1492_v42  ;;  %1714 = vmatpush1.msra.mxu1 %v8187_v17  ;;  %v1491_v10 = vmul.f32 %v1480_v40, %v7955_v63  ;;  %v1490_v57 = vmul.f32 %v1484_v54, %v7936_v59  ;;  %v954_v42 = vld [vmem:[%s12461_s4 + $0x38] sm:$0xff] }
 0x632   :  { %7387 = vmatmul.mubr.msk.f32.gmra.mxu0 %vm12505_vm0, %v948_v51  ;;  %7395 = vmatmul.mubr.msk.f32.gmra.mxu1 %vm12505_vm0, %v1302_v52 }
 0x633   :  { %1715 = vmatprep.subr.mxu1 %v8203_v15  ;;  %v1473_v18 = vpop.permute.xlu1 %1472  ;;  %1552 = vmatprep.subr.mxu0 %v1491_v10  ;;  %v1465_v58 = vpop.permute.xlu0 %1464  ;;  %v1303_v15 = vld [vmem:[%s12461_s4 + $0x90] sm:$0xff] }
 0x634   :  { %1716 = vmatpush1.msra.mxu1 %v8201_v24  ;;  %v1479_v6 = vsel %vm609_vm5, %v1465_v58, %v1473_v18  ;;  %v1483_v17 = vsel %vm609_vm5, %v1473_v18, %v1465_v58  ;;  %1232 = vmatprep.mubr.f32.mxu0 %v12465_v0  ;;  %v1655_v18 = vld [vmem:[%s12461_s4 + $0x100] sm:$0xff] }
 0x635   :  { %1717 = vmatprep.subr.mxu1 %v8211_v19  ;;  %v1488_v24 = vmul.f32 %v1483_v17, %v7936_v59  ;;  %1409 = vmatprep.mubr.f32.mxu1 %v12465_v0  ;;  %v1489_v9 = vmul.f32 %v1479_v6, %v7955_v63 }
 0x636   :  { %1553 = vmatpush1.msra.mxu0 %v1490_v57  ;;  %1718 = vmatpush1.msra.mxu1 %v8209_v25  ;;  %v1304_v25 = vld [vmem:[%s12461_s4 + $0x98] sm:$0xff]  ;;  %v1494_v57 = vld [vmem:[%s12461_s4 + $0xc0] sm:$0xff] }
 0x637   :  { %7388 = vmatmul.mubr.msk.f32.gmra.mxu0 %vm12505_vm0, %v949_v41  ;;  %7396 = vmatmul.mubr.msk.f32.gmra.mxu1 %vm12505_vm0, %v1303_v15  ;;  %v1471_v50 = vpop.permute.xlu1 %1470  ;;  %v1463_v11 = vpop.permute.xlu0 %1462 }
 0x638   :  { %1554 = vmatprep.subr.mxu0 %v1489_v9  ;;  %v1478_v12 = vsel %vm609_vm5, %v1463_v11, %v1471_v50  ;;  %v1482_v19 = vsel %vm609_vm5, %v1471_v50, %v1463_v11  ;;  %1238 = vmatprep.mubr.f32.mxu0 %v12465_v0 }
 0x639   :  { %v1486_v14 = vmul.f32 %v1482_v19, %v7936_v59  ;;  %1415 = vmatprep.mubr.f32.mxu1 %v12465_v0  ;;  %1555 = vmatpush1.msra.mxu0 %v1488_v24  ;;  %v1487_v16 = vmul.f32 %v1478_v12, %v7955_v63 }
 0x63b   :  { %7389 = vmatmul.mubr.msk.f32.gmra.mxu0 %vm12505_vm0, %v950_v13  ;;  %7397 = vmatmul.mubr.msk.f32.gmra.mxu1 %vm12505_vm0, %v1304_v25  ;;  %v1831_v20 = vpop.permute.xlu1 %1830  ;;  %v1823_v22 = vpop.permute.xlu0 %1822 }
 0x63c   :  { %1556 = vmatprep.subr.mxu0 %v1487_v16  ;;  %v1839_v23 = vsel %vm618_vm6, %v1831_v20, %v1823_v22  ;;  %1244 = vmatprep.mubr.f32.mxu0 %v12465_v0  ;;  %v1835_v45 = vsel %vm618_vm6, %v1823_v22, %v1831_v20  ;;  %v1495_v16 = vld [vmem:[%s12461_s4 + $0xc8] sm:$0xff] }
 0x63d   :  { %1421 = vmatprep.mubr.f32.mxu1 %v12465_v0  ;;  %1557 = vmatpush1.msra.mxu0 %v1486_v14  ;;  %v1847_v28 = vmul.f32 %v1839_v23, %v7967_v4  ;;  %v1846_v17 = vmul.f32 %v1835_v45, %v7946_v60  ;;  %v1656_v20 = vld [vmem:[%s12461_s4 + $0x108] sm:$0xff] }
 0x63f   :  { %7390 = vmatmul.mubr.msk.f32.gmra.mxu0 %vm12505_vm0, %v951_v53  ;;  %7398 = vmatmul.mubr.msk.f32.gmra.mxu1 %vm12505_vm0, %v1305_v27  ;;  %v1829_v21 = vpop.permute.xlu1 %1828  ;;  %v1821_v26 = vpop.permute.xlu0 %1820 }
 0x640   :  { %1904 = vmatprep.subr.mxu0 %v1847_v28  ;;  %1250 = vmatprep.mubr.f32.mxu0 %v12465_v0  ;;  %v1834_v40 = vsel %vm618_vm6, %v1821_v26, %v1829_v21  ;;  %v1838_v54 = vsel %vm618_vm6, %v1829_v21, %v1821_v26 }
 0x641   :  { %1427 = vmatprep.mubr.f32.mxu1 %v12465_v0  ;;  %v1844_v24 = vmul.f32 %v1834_v40, %v7946_v60  ;;  %v1845_v50 = vmul.f32 %v1838_v54, %v7967_v4  ;;  %v1659_v54 = vld [vmem:[%s12461_s4 + $0x120] sm:$0xff] }
 0x643   :  { %7391 = vmatmul.mubr.msk.f32.gmra.mxu0 %vm12505_vm0, %v952_v29  ;;  %7399 = vmatmul.mubr.msk.f32.gmra.mxu1 %vm12505_vm0, %v1306_v30  ;;  %v2024_v1 = vpop.permute.xlu1 %2023  ;;  %v2016_v43 = vpop.permute.xlu0 %2015  ;;  %v1496_v29 = vld [vmem:[%s12461_s4 + $0xd0] sm:$0xff] }
 0x644   :  { %v2032_v31 = vsel %vm627_vm7, %v2024_v1, %v2016_v43  ;;  %1256 = vmatprep.mubr.f32.mxu0 %v12465_v0  ;;  %1433 = vmatprep.mubr.f32.mxu1 %v12465_v0  ;;  %v2028_v46 = vsel %vm627_vm7, %v2016_v43, %v2024_v1  ;;  %v1657_v43 = vld [vmem:[%s12461_s4 + $0x110] sm:$0xff] }
 0x645   :  { %v2040_v36 = vmul.f32 %v2032_v31, %v7970_v5  ;;  %v2039_v41 = vmul.f32 %v2028_v46, %v7949_v61 }
 0x647   :  { %7392 = vmatmul.mubr.msk.f32.gmra.mxu0 %vm12505_vm0, %v953_v32  ;;  %7400 = vmatmul.mubr.msk.f32.gmra.mxu1 %vm12505_vm0, %v1307_v35  ;;  %v1827_v37 = vpop.permute.xlu1 %1826  ;;  %v1819_v38 = vpop.permute.xlu0 %1818 }
 0x648   :  { %2097 = vmatprep.subr.mxu1 %v2040_v36  ;;  %1262 = vmatprep.mubr.f32.mxu0 %v12465_v0  ;;  %v1837_v15 = vsel %vm618_vm6, %v1827_v37, %v1819_v38  ;;  %v1833_v9 = vsel %vm618_vm6, %v1819_v38, %v1827_v37  ;;  %v1497_v38 = vld [vmem:[%s12461_s4 + $0xd8] sm:$0xff] }
 0x649   :  { %1439 = vmatprep.mubr.f32.mxu1 %v12465_v0  ;;  %v1843_v14 = vmul.f32 %v1837_v15, %v7967_v4  ;;  %v1842_v23 = vmul.f32 %v1833_v9, %v7946_v60  ;;  %v1500_v15 = vld [vmem:[%s12461_s4 + $0xf0] sm:$0xff] }
 0x64a   :  { %v1661_v9 = vld [vmem:[%s12461_s4 + $0x130] sm:$0xff] }
 0x64b   :  { %7393 = vmatmul.mubr.msk.f32.gmra.mxu0 %vm12505_vm0, %v954_v42  ;;  %7401 = vmatmul.mubr.msk.f32.gmra.mxu1 %vm12505_vm0, %v1308_v44  ;;  %v2022_v51 = vpop.permute.xlu1 %2021  ;;  %v2014_v52 = vpop.permute.xlu0 %2013  ;;  %v1658_v44 = vld [vmem:[%s12461_s4 + $0x118] sm:$0xff] }
 0x64c   :  { %v2031_v10 = vsel %vm627_vm7, %v2022_v51, %v2014_v52  ;;  %1590 = vmatprep.mubr.f32.mxu0 %v12465_v0  ;;  %1751 = vmatprep.mubr.f32.mxu1 %v12465_v0  ;;  %v2027_v58 = vsel %vm627_vm7, %v2014_v52, %v2022_v51  ;;  %v1498_v52 = vld [vmem:[%s12461_s4 + $0xe0] sm:$0xff] }
 0x64d   :  { %v2038_v6 = vmul.f32 %v2031_v10, %v7970_v5  ;;  %v2037_v19 = vmul.f32 %v2027_v58, %v7949_v61  ;;  %v1660_v58 = vld [vmem:[%s12461_s4 + $0x128] sm:$0xff] }
 0x64f   :  { %7402 = vmatmul.mubr.msk.f32.vlgmr.msra.gmra.mxu0 %vm12505_vm0, %v1494_v57  ;;  %7410 = vmatmul.mubr.msk.f32.vlgmr.msra.gmra.mxu1 %vm12505_vm0, %v1655_v18  ;;  %v1825_v11 = vpop.permute.xlu1 %1824  ;;  %v1817_v12 = vpop.permute.xlu0 %1816  ;;  %v1499_v18 = vld [vmem:[%s12461_s4 + $0xe8] sm:$0xff] }
 0x650   :  { %1905 = vmatpush1.msra.mxu0 %v1846_v17  ;;  %2098 = vmatpush1.msra.mxu1 %v2039_v41  ;;  %v1832_v13 = vsel %vm618_vm6, %v1817_v12, %v1825_v11  ;;  %v1836_v25 = vsel %vm618_vm6, %v1825_v11, %v1817_v12  ;;  %v1501_v12 = vld [vmem:[%s12461_s4 + $0xf8] sm:$0xff] }
 0x651   :  { %1906 = vmatprep.subr.mxu0 %v1845_v50  ;;  %2099 = vmatprep.subr.mxu1 %v2038_v6  ;;  %v1841_v22 = vmul.f32 %v1836_v25, %v7967_v4  ;;  %v1840_v53 = vmul.f32 %v1832_v13, %v7946_v60 }
 0x652   :  { %1907 = vmatpush1.msra.mxu0 %v1844_v24  ;;  %1596 = vmatprep.mubr.f32.mxu0 %v12465_v0 }
 0x653   :  { %1757 = vmatprep.mubr.f32.mxu1 %v12465_v0  ;;  %1908 = vmatprep.subr.mxu0 %v1843_v14  ;;  %v2020_v27 = vpop.permute.xlu1 %2019  ;;  %v2012_v28 = vpop.permute.xlu0 %2011 }
 0x654   :  { %2100 = vmatpush1.msra.mxu1 %v2037_v19  ;;  %7403 = vmatmul.mubr.msk.f32.gmra.mxu0 %vm12505_vm0, %v1495_v16  ;;  %v2026_v21 = vsel %vm627_vm7, %v2012_v28, %v2020_v27  ;;  %v2030_v26 = vsel %vm627_vm7, %v2020_v27, %v2012_v28  ;;  %v1662_v19 = vld [vmem:[%s12461_s4 + $0x138] sm:$0xff]  ;;  %v2041_v28 = vld [vmem:[%s12461_s4 + $0x180] sm:$0xff] }
 0x655   :  { %7411 = vmatmul.mubr.msk.f32.gmra.mxu1 %vm12505_vm0, %v1656_v20  ;;  %1909 = vmatpush1.msra.mxu0 %v1842_v23  ;;  %v2036_v30 = vmul.f32 %v2030_v26, %v7970_v5  ;;  %v2035_v1 = vmul.f32 %v2026_v21, %v7949_v61 }
 0x656   :  { %1910 = vmatprep.subr.mxu0 %v1841_v22  ;;  %1602 = vmatprep.mubr.f32.mxu0 %v12465_v0 }
 0x657   :  { %1763 = vmatprep.mubr.f32.mxu1 %v12465_v0  ;;  %1911 = vmatpush1.msra.mxu0 %v1840_v53  ;;  %v2018_v31 = vpop.permute.xlu1 %2017  ;;  %v2010_v32 = vpop.permute.xlu0 %2009  ;;  %v1848_v53 = vld [vmem:[%s12461_s4 + $0x140] sm:$0xff] }
 0x658   :  { %7404 = vmatmul.mubr.msk.f32.gmra.mxu0 %vm12505_vm0, %v1496_v29  ;;  %2101 = vmatprep.subr.mxu1 %v2036_v30  ;;  %v2025_v35 = vsel %vm627_vm7, %v2010_v32, %v2018_v31  ;;  %v2029_v36 = vsel %vm627_vm7, %v2018_v31, %v2010_v32 }
 0x659   :  { %7412 = vmatmul.mubr.msk.f32.gmra.mxu1 %vm12505_vm0, %v1657_v43  ;;  %v2033_v37 = vmul.f32 %v2025_v35, %v7949_v61  ;;  %1608 = vmatprep.mubr.f32.mxu0 %v12465_v0  ;;  %v2034_v42 = vmul.f32 %v2029_v36, %v7970_v5 }
 0x65a   :  { %1769 = vmatprep.mubr.f32.mxu1 %v12465_v0  ;;  %2102 = vmatpush1.msra.mxu1 %v2035_v1 }
 0x65b   :  { %v2217_v45 = vpop.permute.xlu1 %2216  ;;  %2103 = vmatprep.subr.mxu1 %v2034_v42  ;;  %v2209_v46 = vpop.permute.xlu0 %2208 }
 0x65c   :  { %7405 = vmatmul.mubr.msk.f32.gmra.mxu0 %vm12505_vm0, %v1497_v38  ;;  %v2225_v51 = vsel %vm636_vm8, %v2217_v45, %v2209_v46  ;;  %2104 = vmatpush1.msra.mxu1 %v2033_v37  ;;  %v2221_v14 = vsel %vm636_vm8, %v2209_v46, %v2217_v45  ;;  %v2042_v45 = vld [vmem:[%s12461_s4 + $0x188] sm:$0xff] }
 0x65d   :  { %7413 = vmatmul.mubr.msk.f32.gmra.mxu1 %vm12505_vm0, %v1658_v44  ;;  %1614 = vmatprep.mubr.f32.mxu0 %v12465_v0  ;;  %v2233_v40 = vmul.f32 %v2225_v51, %v7976_v7  ;;  %v2232_v21 = vmul.f32 %v2221_v14, %v7958_v2  ;;  %v1849_v44 = vld [vmem:[%s12461_s4 + $0x148] sm:$0xff] }
 0x65e   :  { %1775 = vmatprep.mubr.f32.mxu1 %v12465_v0  ;;  %v1853_v14 = vld [vmem:[%s12461_s4 + $0x168] sm:$0xff] }
 0x65f   :  { %v2215_v10 = vpop.permute.xlu1 %2214  ;;  %2290 = vmatprep.subr.mxu0 %v2233_v40  ;;  %v2207_v57 = vpop.permute.xlu0 %2206 }
 0x660   :  { %7406 = vmatmul.mubr.msk.f32.gmra.mxu0 %vm12505_vm0, %v1498_v52  ;;  %v2220_v20 = vsel %vm636_vm8, %v2207_v57, %v2215_v10  ;;  %v2224_v22 = vsel %vm636_vm8, %v2215_v10, %v2207_v57 }
 0x661   :  { %7414 = vmatmul.mubr.msk.f32.gmra.mxu1 %vm12505_vm0, %v1659_v54  ;;  %1620 = vmatprep.mubr.f32.mxu0 %v12465_v0  ;;  %v2230_v1 = vmul.f32 %v2220_v20, %v7958_v2  ;;  %v2231_v32 = vmul.f32 %v2224_v22, %v7976_v7  ;;  %v1854_v20 = vld [vmem:[%s12461_s4 + $0x170] sm:$0xff] }
 0x662   :  { %1781 = vmatprep.mubr.f32.mxu1 %v12465_v0  ;;  %v2047_v22 = vld [vmem:[%s12461_s4 + $0x1b0] sm:$0xff] }
 0x663   :  { %v2410_v6 = vpop.permute.xlu1 %2409  ;;  %v2402_v17 = vpop.permute.xlu0 %2401 }
 0x664   :  { %7407 = vmatmul.mubr.msk.f32.gmra.mxu0 %vm12505_vm0, %v1499_v18  ;;  %v2418_v41 = vsel %vm645_vm9, %v2410_v6, %v2402_v17  ;;  %v2414_v23 = vsel %vm645_vm9, %v2402_v17, %v2410_v6  ;;  %v2043_v6 = vld [vmem:[%s12461_s4 + $0x190] sm:$0xff] }
 0x665   :  { %7415 = vmatmul.mubr.msk.f32.gmra.mxu1 %vm12505_vm0, %v1660_v58  ;;  %1626 = vmatprep.mubr.f32.mxu0 %v12465_v0  ;;  %v2426_v24 = vmul.f32 %v2418_v41, %v7979_v8  ;;  %v2425_v43 = vmul.f32 %v2414_v23, %v7964_v3  ;;  %v1850_v58 = vld [vmem:[%s12461_s4 + $0x150] sm:$0xff]  ;;  %v1855_v23 = vld [vmem:[%s12461_s4 + $0x178] sm:$0xff] }
 0x666   :  { %1787 = vmatprep.mubr.f32.mxu1 %v12465_v0 }
 0x667   :  { %v2213_v50 = vpop.permute.xlu1 %2212  ;;  %2483 = vmatprep.subr.mxu1 %v2426_v24  ;;  %v2205_v11 = vpop.permute.xlu0 %2204 }
 0x668   :  { %7408 = vmatmul.mubr.msk.f32.gmra.mxu0 %vm12505_vm0, %v1500_v15  ;;  %v2223_v31 = vsel %vm636_vm8, %v2213_v50, %v2205_v11  ;;  %v2219_v35 = vsel %vm636_vm8, %v2205_v11, %v2213_v50  ;;  %v1851_v11 = vld [vmem:[%s12461_s4 + $0x158] sm:$0xff] }
 0x669   :  { %7416 = vmatmul.mubr.msk.f32.gmra.mxu1 %vm12505_vm0, %v1661_v9  ;;  %1632 = vmatprep.mubr.f32.mxu0 %v12465_v0  ;;  %v2229_v42 = vmul.f32 %v2223_v31, %v7976_v7  ;;  %v2228_v52 = vmul.f32 %v2219_v35, %v7958_v2  ;;  %v2238_v31 = vld [vmem:[%s12461_s4 + $0x1e0] sm:$0xff]  ;;  %v2239_v35 = vld [vmem:[%s12461_s4 + $0x1e8] sm:$0xff] }
 0x66a   :  { %1793 = vmatprep.mubr.f32.mxu1 %v12465_v0 }
 0x66b   :  { %v2408_v13 = vpop.permute.xlu1 %2407  ;;  %v2400_v25 = vpop.permute.xlu0 %2399 }
 0x66c   :  { %7409 = vmatmul.mubr.msk.f32.gmra.mxu0 %vm12505_vm0, %v1501_v12  ;;  %v2417_v16 = vsel %vm645_vm9, %v2408_v13, %v2400_v25  ;;  %v2413_v27 = vsel %vm645_vm9, %v2400_v25, %v2408_v13  ;;  %v2044_v12 = vld [vmem:[%s12461_s4 + $0x198] sm:$0xff]  ;;  %v1852_v13 = vld [vmem:[%s12461_s4 + $0x160] sm:$0xff] }
 0x66d   :  { %7417 = vmatmul.mubr.msk.f32.gmra.mxu1 %vm12505_vm0, %v1662_v19  ;;  %1944 = vmatprep.mubr.f32.mxu0 %v12465_v0  ;;  %v2424_v29 = vmul.f32 %v2417_v16, %v7979_v8  ;;  %v2423_v36 = vmul.f32 %v2413_v27, %v7964_v3  ;;  %v2045_v25 = vld [vmem:[%s12461_s4 + $0x1a0] sm:$0xff]  ;;  %v2046_v16 = vld [vmem:[%s12461_s4 + $0x1a8] sm:$0xff] }
 0x66e   :  { %2137 = vmatprep.mubr.f32.mxu1 %v12465_v0  ;;  %v2234_v27 = vld [vmem:[%s12461_s4 + $0x1c0] sm:$0xff] }
 0x66f   :  { %v2211_v26 = vpop.permute.xlu1 %2210  ;;  %v2203_v30 = vpop.permute.xlu0 %2202 }
 0x670   :  { %7418 = vmatmul.mubr.msk.f32.vlgmr.msra.gmra.mxu0 %vm12505_vm0, %v1848_v53  ;;  %v2222_v37 = vsel %vm636_vm8, %v2211_v26, %v2203_v30  ;;  %v2218_v38 = vsel %vm636_vm8, %v2203_v30, %v2211_v26  ;;  %v2048_v53 = vld [vmem:[%s12461_s4 + $0x1b8] sm:$0xff]  ;;  %v2428_v26 = vld [vmem:[%s12461_s4 + $0x208] sm:$0xff]  ;;  %v2429_v30 = vld [vmem:[%s12461_s4 + $0x210] sm:$0xff] }
 0x671   :  { %7426 = vmatmul.mubr.msk.f32.vlgmr.msra.gmra.mxu1 %vm12505_vm0, %v2041_v28  ;;  %2291 = vmatpush1.msra.mxu0 %v2232_v21  ;;  %v2227_v40 = vmul.f32 %v2222_v37, %v7976_v7  ;;  %v2226_v10 = vmul.f32 %v2218_v38, %v7958_v2  ;;  %v2427_v28 = vld [vmem:[%s12461_s4 + $0x200] sm:$0xff]  ;;  %v2235_v21 = vld [vmem:[%s12461_s4 + $0x1c8] sm:$0xff]  ;;  %v2240_v37 = vld [vmem:[%s12461_s4 + $0x1f0] sm:$0xff] }
 0x672   :  { %2484 = vmatpush1.msra.mxu1 %v2425_v43  ;;  %2292 = vmatprep.subr.mxu0 %v2231_v32  ;;  %v2430_v43 = vld [vmem:[%s12461_s4 + $0x218] sm:$0xff]  ;;  %v2431_v32 = vld [vmem:[%s12461_s4 + $0x220] sm:$0xff]  ;;  %v2433_v38 = vld [vmem:[%s12461_s4 + $0x230] sm:$0xff] }
 0x673   :  { %2293 = vmatpush1.msra.mxu0 %v2230_v1  ;;  %2485 = vmatprep.subr.mxu1 %v2424_v29  ;;  %v2406_v46 = vpop.permute.xlu1 %2405  ;;  %v2398_v51 = vpop.permute.xlu0 %2397  ;;  %v2236_v29 = vld [vmem:[%s12461_s4 + $0x1d0] sm:$0xff]  ;;  %v2237_v1 = vld [vmem:[%s12461_s4 + $0x1d8] sm:$0xff] }
 0x674   :  { %1950 = vmatprep.mubr.f32.mxu0 %v12465_v0  ;;  %2143 = vmatprep.mubr.f32.mxu1 %v12465_v0  ;;  %v2416_v54 = vsel %vm645_vm9, %v2406_v46, %v2398_v51  ;;  %v2412_v57 = vsel %vm645_vm9, %v2398_v51, %v2406_v46 }
 0x675   :  { %2294 = vmatprep.subr.mxu0 %v2229_v42  ;;  %2486 = vmatpush1.msra.mxu1 %v2423_v36  ;;  %v2422_v18 = vmul.f32 %v2416_v54, %v7979_v8  ;;  %v2421_v15 = vmul.f32 %v2412_v57, %v7964_v3  ;;  %v2432_v36 = vld [vmem:[%s12461_s4 + $0x228] sm:$0xff]  ;;  %v2241_v42 = vld [vmem:[%s12461_s4 + $0x1f8] sm:$0xff] }
 0x676   :  { %7419 = vmatmul.mubr.msk.f32.gmra.mxu0 %vm12505_vm0, %v1849_v44  ;;  %7427 = vmatmul.mubr.msk.f32.gmra.mxu1 %vm12505_vm0, %v2042_v45  ;;  %v2434_v44 = vld [vmem:[%s12461_s4 + $0x238] sm:$0xff] }
 0x677   :  { %2295 = vmatpush1.msra.mxu0 %v2228_v52  ;;  %1956 = vmatprep.mubr.f32.mxu0 %v12465_v0  ;;  %v2404_v17 = vpop.permute.xlu1 %2403  ;;  %v2396_v41 = vpop.permute.xlu0 %2395 }
 0x678   :  { %2296 = vmatprep.subr.mxu0 %v2227_v40  ;;  %2149 = vmatprep.mubr.f32.mxu1 %v12465_v0  ;;  %v2415_v24 = vsel %vm645_vm9, %v2404_v17, %v2396_v41  ;;  %v2411_v9 = vsel %vm645_vm9, %v2396_v41, %v2404_v17 }
 0x679   :  { %2297 = vmatpush1.msra.mxu0 %v2226_v10  ;;  %2487 = vmatprep.subr.mxu1 %v2422_v18  ;;  %v2420_v50 = vmul.f32 %v2415_v24, %v7979_v8  ;;  %v2419_v19 = vmul.f32 %v2411_v9, %v7964_v3 }
 0x67a   :  { %7420 = vmatmul.mubr.msk.f32.gmra.mxu0 %vm12505_vm0, %v1850_v58  ;;  %7428 = vmatmul.mubr.msk.f32.gmra.mxu1 %vm12505_vm0, %v2043_v6 }
 0x67b   :  { %1962 = vmatprep.mubr.f32.mxu0 %v12465_v0  ;;  %2155 = vmatprep.mubr.f32.mxu1 %v12465_v0 }
 0x67c   :  { %2488 = vmatpush1.msra.mxu1 %v2421_v15 }
 0x67d   :  { %2489 = vmatprep.subr.mxu1 %v2420_v50 }
 0x67e   :  { %7421 = vmatmul.mubr.msk.f32.gmra.mxu0 %vm12505_vm0, %v1851_v11  ;;  %7429 = vmatmul.mubr.msk.f32.gmra.mxu1 %vm12505_vm0, %v2044_v12 }
 0x67f   :  { %1968 = vmatprep.mubr.f32.mxu0 %v12465_v0  ;;  %2161 = vmatprep.mubr.f32.mxu1 %v12465_v0 }
 0x680   :  { %2490 = vmatpush1.msra.mxu1 %v2419_v19 }
 0x682   :  { %7422 = vmatmul.mubr.msk.f32.gmra.mxu0 %vm12505_vm0, %v1852_v13  ;;  %7430 = vmatmul.mubr.msk.f32.gmra.mxu1 %vm12505_vm0, %v2045_v25 }
 0x683   :  { %1974 = vmatprep.mubr.f32.mxu0 %v12465_v0  ;;  %2167 = vmatprep.mubr.f32.mxu1 %v12465_v0 }
 0x686   :  { %7423 = vmatmul.mubr.msk.f32.gmra.mxu0 %vm12505_vm0, %v1853_v14  ;;  %7431 = vmatmul.mubr.msk.f32.gmra.mxu1 %vm12505_vm0, %v2046_v16 }
 0x687   :  { %1980 = vmatprep.mubr.f32.mxu0 %v12465_v0  ;;  %2173 = vmatprep.mubr.f32.mxu1 %v12465_v0 }
 0x68a   :  { %7424 = vmatmul.mubr.msk.f32.gmra.mxu0 %vm12505_vm0, %v1854_v20  ;;  %7432 = vmatmul.mubr.msk.f32.gmra.mxu1 %vm12505_vm0, %v2047_v22 }
 0x68b   :  { %1986 = vmatprep.mubr.f32.mxu0 %v12465_v0  ;;  %2179 = vmatprep.mubr.f32.mxu1 %v12465_v0 }
 0x68e   :  { %7425 = vmatmul.mubr.msk.f32.gmra.mxu0 %vm12505_vm0, %v1855_v23  ;;  %7433 = vmatmul.mubr.msk.f32.gmra.mxu1 %vm12505_vm0, %v2048_v53 }
 0x68f   :  { %2330 = vmatprep.mubr.f32.mxu0 %v12465_v0  ;;  %2523 = vmatprep.mubr.f32.mxu1 %v12465_v0 }
 0x692   :  { %7434 = vmatmul.mubr.msk.f32.vlgmr.msra.gmra.mxu0 %vm12505_vm0, %v2234_v27  ;;  %7442 = vmatmul.mubr.msk.f32.vlgmr.msra.gmra.mxu1 %vm12505_vm0, %v2427_v28 }
 0x693   :  { %2336 = vmatprep.mubr.f32.mxu0 %v12465_v0  ;;  %2529 = vmatprep.mubr.f32.mxu1 %v12465_v0 }
 0x696   :  { %7435 = vmatmul.mubr.msk.f32.gmra.mxu0 %vm12505_vm0, %v2235_v21  ;;  %7443 = vmatmul.mubr.msk.f32.gmra.mxu1 %vm12505_vm0, %v2428_v26 }
 0x697   :  { %2342 = vmatprep.mubr.f32.mxu0 %v12465_v0  ;;  %2535 = vmatprep.mubr.f32.mxu1 %v12465_v0 }
 0x69a   :  { %7436 = vmatmul.mubr.msk.f32.gmra.mxu0 %vm12505_vm0, %v2236_v29  ;;  %7444 = vmatmul.mubr.msk.f32.gmra.mxu1 %vm12505_vm0, %v2429_v30 }
 0x69b   :  { %2348 = vmatprep.mubr.f32.mxu0 %v12465_v0  ;;  %2541 = vmatprep.mubr.f32.mxu1 %v12465_v0 }
 0x69e   :  { %7437 = vmatmul.mubr.msk.f32.gmra.mxu0 %vm12505_vm0, %v2237_v1  ;;  %7445 = vmatmul.mubr.msk.f32.gmra.mxu1 %vm12505_vm0, %v2430_v43 }
 0x69f   :  { %2354 = vmatprep.mubr.f32.mxu0 %v12465_v0  ;;  %2547 = vmatprep.mubr.f32.mxu1 %v12465_v0 }
 0x6a2   :  { %7438 = vmatmul.mubr.msk.f32.gmra.mxu0 %vm12505_vm0, %v2238_v31  ;;  %7446 = vmatmul.mubr.msk.f32.gmra.mxu1 %vm12505_vm0, %v2431_v32 }
 0x6a3   :  { %2360 = vmatprep.mubr.f32.mxu0 %v12465_v0  ;;  %2553 = vmatprep.mubr.f32.mxu1 %v12465_v0 }
 0x6a6   :  { %7439 = vmatmul.mubr.msk.f32.gmra.mxu0 %vm12505_vm0, %v2239_v35  ;;  %7447 = vmatmul.mubr.msk.f32.gmra.mxu1 %vm12505_vm0, %v2432_v36 }
 0x6a7   :  { %2366 = vmatprep.mubr.f32.mxu0 %v12465_v0  ;;  %2559 = vmatprep.mubr.f32.mxu1 %v12465_v0 }
 0x6aa   :  { %7440 = vmatmul.mubr.msk.f32.gmra.mxu0 %vm12505_vm0, %v2240_v37  ;;  %7448 = vmatmul.mubr.msk.f32.gmra.mxu1 %vm12505_vm0, %v2433_v38 }
 0x6ab   :  { %2372 = vmatprep.mubr.f32.mxu0 %v12465_v0  ;;  %2565 = vmatprep.mubr.f32.mxu1 %v12465_v0 }
 0x6ae   :  { %7441 = vmatmul.mubr.msk.f32.gmra.mxu0 %vm12505_vm0, %v2241_v42  ;;  %7449 = vmatmul.mubr.msk.f32.gmra.mxu1 %vm12505_vm0, %v2434_v44  ;;  %vm2893_vm0 = vcmask 523264  }
 0x6af   :  { %3035 = vmatprep.mubr.f32.mxu1 %v12465_v0  ;;  %2961 = vmatprep.mubr.f32.mxu0 %v12465_v0 }
 0x6cd   :  { %v1085_v45 = vpop.f32.mrf.mxu0 }
 0x6cf   :  { %v8889_v46 = vpop.f32.mrf.mxu0 }
 0x6d1   :  { %v1091_v51 = vpop.f32.mrf.mxu0 }
 0x6d3   :  { %v8891_v52 = vpop.f32.mrf.mxu0 }
 0x6d5   :  { %v1097_v40 = vpop.f32.mrf.mxu0 }
 0x6d7   :  { %v8893_v54 = vpop.f32.mrf.mxu0 }
 0x6d9   :  { %v1103_v10 = vpop.f32.mrf.mxu0 }
 0x6db   :  { %v8895_v57 = vpop.f32.mrf.mxu0 }
 0x6dd   :  { %v1109_v18 = vpop.f32.mrf.mxu0 }
 0x6df   :  { %v8897_v58 = vpop.f32.mrf.mxu0 }
 0x6e1   :  { %v1115_v6 = vpop.f32.mrf.mxu0 }
 0x6e3   :  { %v8899_v17 = vpop.f32.mrf.mxu0 }
 0x6e5   :  { %v1121_v41 = vpop.f32.mrf.mxu0 }
 0x6e7   :  { %v8901_v15 = vpop.f32.mrf.mxu0 }
 0x6e9   :  { %v1127_v24 = vpop.f32.mrf.mxu0 }
 0x6eb   :  { %v8903_v9 = vpop.f32.mrf.mxu0 }
 0x6ed   :  { %v1222_v50 = vpop.f32.mrf.mxu0  ;;  %v1399_v11 = vpop.f32.mrf.mxu1 }
 0x6ee   :  { %v1223_v12 = vadd.f32 %v1222_v50, %v1085_v45 }
 0x6ef   :  { %v8905_v19 = vpop.f32.mrf.mxu0  ;;  %v8907_v13 = vpop.f32.mrf.mxu1 }
 0x6f0   :  { %v8909_v25 = vadd.f32 %v1399_v11, %v1223_v12 }
 0x6f2   :  { %v1228_v14 = vpop.f32.mrf.mxu0  ;;  %v1405_v16 = vpop.f32.mrf.mxu1 }
 0x6f3   :  { %v1229_v20 = vadd.f32 %v1228_v14, %v1091_v51 }
 0x6f4   :  { %v8911_v22 = vpop.f32.mrf.mxu0  ;;  %v8913_v23 = vpop.f32.mrf.mxu1 }
 0x6f5   :  { %v8915_v53 = vadd.f32 %v1405_v16, %v1229_v20 }
 0x6f7   :  { %v1234_v27 = vpop.f32.mrf.mxu0  ;;  %v1411_v28 = vpop.f32.mrf.mxu1 }
 0x6f8   :  { %v1235_v21 = vadd.f32 %v1234_v27, %v1097_v40 }
 0x6f9   :  { %v8917_v26 = vpop.f32.mrf.mxu0  ;;  %v8919_v29 = vpop.f32.mrf.mxu1 }
 0x6fa   :  { %v8921_v30 = vadd.f32 %v1411_v28, %v1235_v21 }
 0x6fb   :  { %v1240_v1 = vpop.f32.mrf.mxu0  ;;  %v1417_v43 = vpop.f32.mrf.mxu1 }
 0x6fc   :  { %v1241_v31 = vadd.f32 %v1240_v1, %v1103_v10 }
 0x6fd   :  { %v8923_v32 = vpop.f32.mrf.mxu0  ;;  %v8925_v35 = vpop.f32.mrf.mxu1 }
 0x6fe   :  { %v8927_v36 = vadd.f32 %v1417_v43, %v1241_v31 }
 0x6ff   :  { %v1246_v37 = vpop.f32.mrf.mxu0  ;;  %v1423_v38 = vpop.f32.mrf.mxu1 }
 0x700   :  { %v1247_v42 = vadd.f32 %v1246_v37, %v1109_v18 }
 0x701   :  { %v8929_v44 = vpop.f32.mrf.mxu0  ;;  %v8931_v45 = vpop.f32.mrf.mxu1 }
 0x702   :  { %v8933_v51 = vadd.f32 %v1423_v38, %v1247_v42 }
 0x703   :  { %v1252_v40 = vpop.f32.mrf.mxu0  ;;  %v1429_v50 = vpop.f32.mrf.mxu1 }
 0x704   :  { %v1253_v11 = vadd.f32 %v1252_v40, %v1115_v6 }
 0x705   :  { %v8935_v12 = vpop.f32.mrf.mxu0  ;;  %v8937_v10 = vpop.f32.mrf.mxu1 }
 0x706   :  { %v8939_v14 = vadd.f32 %v1429_v50, %v1253_v11 }
 0x707   :  { %v1258_v16 = vpop.f32.mrf.mxu0  ;;  %v1435_v20 = vpop.f32.mrf.mxu1 }
 0x708   :  { %v1259_v27 = vadd.f32 %v1258_v16, %v1121_v41 }
 0x709   :  { %v8941_v28 = vpop.f32.mrf.mxu0  ;;  %v8943_v18 = vpop.f32.mrf.mxu1 }
 0x70a   :  { %v8945_v21 = vadd.f32 %v1435_v20, %v1259_v27 }
 0x70b   :  { %v1264_v1 = vpop.f32.mrf.mxu0  ;;  %v1441_v43 = vpop.f32.mrf.mxu1 }
 0x70c   :  { %12546 = vst [vmem:[#allocation27_spill] sm:$0xff] %v8945_v21  ;;  %v1265_v31 = vadd.f32 %v1264_v1, %v1127_v24 }
 0x70d   :  { %v8947_v37 = vpop.f32.mrf.mxu0  ;;  %v8949_v6 = vpop.f32.mrf.mxu1 }
 0x70e   :  { %v8951_v38 = vadd.f32 %v1441_v43, %v1265_v31 }
 0x70f   :  { %v1592_v42 = vpop.f32.mrf.mxu0  ;;  %v8953_v40 = vpop.f32.mrf.mxu1 }
 0x710   :  { %12547 = vst [vmem:[#allocation28_spill] sm:$0xff] %v8951_v38 }
 0x711   :  { %v1594_v50 = vpop.f32.mrf.mxu0  ;;  %v8955_v41 = vpop.f32.mrf.mxu1 }
 0x714   :  { %v8957_v11 = vpop.f32.mrf.mxu0 }
 0x715   :  { %v8959_v16 = vpop.f32.mrf.mxu1 }
 0x716   :  { %v8961_v20 = vpop.f32.mrf.mxu0 }
 0x717   :  { %v8963_v27 = vpop.f32.mrf.mxu1 }
 0x718   :  { %v8965_v24 = vpop.f32.mrf.mxu0 }
 0x719   :  { %v8967_v1 = vpop.f32.mrf.mxu1 }
 0x71a   :  { %v8969_v43 = vpop.f32.mrf.mxu0 }
 0x71b   :  { %v8971_v31 = vpop.f32.mrf.mxu1 }
 0x71c   :  { %v8973_v0 = vpop.f32.mrf.mxu0 }
 0x71d   :  { %v8975_v8 = vpop.f32.mrf.mxu1 }
 0x71e   :  { %v8977_v3 = vpop.f32.mrf.mxu0 }
 0x71f   :  { %v8979_v61 = vpop.f32.mrf.mxu1 }
 0x720   :  { %12548 = vst [vmem:[#allocation29_spill] sm:$0xff] %v8979_v61  ;;  %v8981_v5 = vpop.f32.mrf.mxu0 }
 0x721   :  { %v8983_v62 = vpop.f32.mrf.mxu1 }
 0x722   :  { %12549 = vst [vmem:[#allocation30_spill] sm:$0xff] %v8983_v62  ;;  %v8985_v56 = vpop.f32.mrf.mxu0 }
 0x723   :  { %v8987_v49 = vpop.f32.mrf.mxu1 }
 0x724   :  { %12550 = vst [vmem:[#allocation31_spill] sm:$0xff] %v8987_v49  ;;  %v8989_v55 = vpop.f32.mrf.mxu0 }
 0x725   :  { %v8991_v7 = vpop.f32.mrf.mxu1 }
 0x726   :  { %12551 = vst [vmem:[#allocation32_spill] sm:$0xff] %v8991_v7  ;;  %v8993_v2 = vpop.f32.mrf.mxu0 }
 0x727   :  { %v8995_v4 = vpop.f32.mrf.mxu1 }
 0x728   :  { %12552 = vst [vmem:[#allocation33_spill] sm:$0xff] %v8995_v4  ;;  %v8997_v60 = vpop.f32.mrf.mxu0 }
 0x729   :  { %12553 = vst [vmem:[#allocation34_spill] sm:$0xff] %v8997_v60  ;;  %v8999_v63 = vpop.f32.mrf.mxu1 }
 0x72a   :  { %12554 = vst [vmem:[#allocation35_spill] sm:$0xff] %v8999_v63  ;;  %v9001_v59 = vpop.f32.mrf.mxu0 }
 0x72b   :  { %12555 = vst [vmem:[#allocation36_spill] sm:$0xff] %v9001_v59  ;;  %v9003_v47 = vpop.f32.mrf.mxu1 }
 0x72c   :  { %12556 = vst [vmem:[#allocation37_spill] sm:$0xff] %v9003_v47  ;;  %v9005_v39 = vpop.f32.mrf.mxu0 }
 0x72d   :  { %12557 = vst [vmem:[#allocation38_spill] sm:$0xff] %v9005_v39  ;;  %v9007_v48 = vpop.f32.mrf.mxu1 }
 0x72e   :  { %12558 = vst [vmem:[#allocation39_spill] sm:$0xff] %v9007_v48  ;;  %v9009_v33 = vpop.f32.mrf.mxu0 }
 0x72f   :  { %12559 = vst [vmem:[#allocation40_spill] sm:$0xff] %v9009_v33  ;;  %v9011_v34 = vpop.f32.mrf.mxu1 }
 0x730   :  { %12560 = vst [vmem:[#allocation41_spill] sm:$0xff] %v9011_v34  ;;  %v1946_v7 = vpop.f32.mrf.mxu0 }
 0x731   :  { %v9013_v49 = vpop.f32.mrf.mxu1 }
 0x732   :  { %v1948_v4 = vpop.f32.mrf.mxu0 }
 0x733   :  { %v9015_v38 = vpop.f32.mrf.mxu1 }
 0x734   :  { %12561 = vst [vmem:[#allocation42_spill] sm:$0xff] %v9015_v38 }
 0x736   :  { %v1952_v60 = vpop.f32.mrf.mxu0  ;;  %v9017_v63 = vpop.f32.mrf.mxu1 }
 0x737   :  { %12562 = vst [vmem:[#allocation43_spill] sm:$0xff] %v9017_v63 }
 0x738   :  { %v9019_v59 = vpop.f32.mrf.mxu0  ;;  %v9021_v47 = vpop.f32.mrf.mxu1 }
 0x739   :  { %12563 = vst [vmem:[#allocation44_spill] sm:$0xff] %v9019_v59  ;;  %12564 = vst [vmem:[#allocation45_spill] sm:$0xff] %v9021_v47  ;;  %v1225_v47 = vadd.f32 %v8905_v19, %v8889_v46  ;;  %v1243_v19 = vadd.f32 %v8923_v32, %v8895_v57 }
 0x73a   :  { %v9023_v39 = vpop.f32.mrf.mxu0  ;;  %v9025_v48 = vpop.f32.mrf.mxu1 }
 0x73b   :  { %12565 = vst [vmem:[#allocation46_spill] sm:$0xff] %v9025_v48 }
 0x73c   :  { %v9027_v33 = vpop.f32.mrf.mxu0  ;;  %v9029_v34 = vpop.f32.mrf.mxu1 }
 0x73d   :  { %12566 = vst [vmem:[#allocation47_spill] sm:$0xff] %v9027_v33  ;;  %12567 = vst [vmem:[#allocation48_spill] sm:$0xff] %v9029_v34  ;;  %v1231_v34 = vadd.f32 %v8911_v22, %v8891_v52  ;;  %v1249_v22 = vadd.f32 %v8929_v44, %v8897_v58 }
 0x73e   :  { %v9031_v21 = vpop.f32.mrf.mxu0  ;;  %v9033_v62 = vpop.f32.mrf.mxu1 }
 0x73f   :  { %12568 = vst [vmem:[#allocation49_spill] sm:$0xff] %v9031_v21  ;;  %12569 = vst [vmem:[#allocation50_spill] sm:$0xff] %v9033_v62  ;;  %v1449_v52 = vadd.f32 %v8913_v23, %v1231_v34  ;;  %v1261_v34 = vadd.f32 %v8941_v28, %v8901_v15 }
 0x740   :  { %v9035_v38 = vpop.f32.mrf.mxu0  ;;  %v9037_v61 = vpop.f32.mrf.mxu1 }
 0x741   :  { %12570 = vst [vmem:[#allocation51_spill] sm:$0xff] %v9035_v38  ;;  %12571 = vst [vmem:[#allocation52_spill] sm:$0xff] %v9037_v61  ;;  %v1447_v61 = vadd.f32 %v8907_v13, %v1225_v47  ;;  %v1642_v58 = vadd.f32 %v8961_v20, %v1449_v52  ;;  %v12583_v52 = vld [vmem:[#allocation28_spill] sm:$0xff] }
 0x742   :  { %v9039_v63 = vpop.f32.mrf.mxu0  ;;  %v9041_v59 = vpop.f32.mrf.mxu1 }
 0x743   :  { %12572 = vst [vmem:[#allocation53_spill] sm:$0xff] %v9039_v63  ;;  %12573 = vst [vmem:[#allocation54_spill] sm:$0xff] %v9041_v59  ;;  %v1639_v63 = vadd.f32 %v1592_v42, %v8909_v25  ;;  %v1237_v59 = vadd.f32 %v8917_v26, %v8893_v54  ;;  %v1255_v54 = vadd.f32 %v8935_v12, %v8899_v17 }
 0x744   :  { %v9045_v48 = vpop.f32.mrf.mxu0  ;;  %v9047_v33 = vpop.f32.mrf.mxu1  ;;  %v1641_v25 = vadd.f32 %v8957_v11, %v8915_v53  ;;  %v1453_v17 = vadd.f32 %v8925_v35, %v1243_v19  ;;  %v1643_v53 = vadd.f32 %v8965_v24, %v8921_v30 }
 0x745   :  { %12574 = vst [vmem:[#allocation55_spill] sm:$0xff] %v9047_v33  ;;  %v1640_v33 = vadd.f32 %v1594_v50, %v1447_v61  ;;  %v1800_v13 = vadd.f32 %v8953_v40, %v1639_v63  ;;  %v1451_v57 = vadd.f32 %v8919_v29, %v1237_v59  ;;  %v1267_v61 = vadd.f32 %v8947_v37, %v8903_v9 }
 0x746   :  { %v9051_v21 = vpop.f32.mrf.mxu0  ;;  %v9053_v62 = vpop.f32.mrf.mxu1  ;;  %v1455_v29 = vadd.f32 %v8931_v45, %v1249_v22  ;;  %v1645_v9 = vadd.f32 %v8973_v0, %v8927_v36  ;;  %v1457_v12 = vadd.f32 %v8937_v10, %v1255_v54  ;;  %v1802_v35 = vadd.f32 %v8959_v16, %v1641_v25  ;;  %v12577_v16 = vld [vmem:[#allocation42_spill] sm:$0xff] }
 0x747   :  { %12575 = vst [vmem:[#allocation56_spill] sm:$0xff] %v9053_v62  ;;  %v1801_v63 = vadd.f32 %v8955_v41, %v1640_v33  ;;  %v1993_v59 = vadd.f32 %v1946_v7, %v1800_v13  ;;  %v1644_v15 = vadd.f32 %v8969_v43, %v1451_v57  ;;  %v1646_v33 = vadd.f32 %v8977_v3, %v1453_v17  ;;  %v12576_v41 = vld [vmem:[#allocation29_spill] sm:$0xff]  ;;  %v12581_v43 = vld [vmem:[#allocation34_spill] sm:$0xff]  ;;  %v12585_v13 = vld [vmem:[#allocation31_spill] sm:$0xff] }
 0x748   :  { %v9059_v38 = vpop.f32.mrf.mxu0  ;;  %v9061_v46 = vpop.f32.mrf.mxu1  ;;  %v1459_v7 = vadd.f32 %v8943_v18, %v1261_v34  ;;  %v1461_v30 = vadd.f32 %v8949_v6, %v1267_v61  ;;  %v1803_v45 = vadd.f32 %v8963_v27, %v1642_v58  ;;  %v1647_v0 = vadd.f32 %v8981_v5, %v8933_v51  ;;  %v12578_v27 = vld [vmem:[#allocation44_spill] sm:$0xff]  ;;  %v12586_v57 = vld [vmem:[#allocation43_spill] sm:$0xff] }
 0x749   :  { %v1994_v28 = vadd.f32 %v1948_v4, %v1801_v63  ;;  %v1804_v10 = vadd.f32 %v8967_v1, %v1643_v53  ;;  %v1648_v42 = vadd.f32 %v8985_v56, %v1455_v29  ;;  %v2186_v3 = vadd.f32 %v9013_v49, %v1993_v59  ;;  %v12579_v49 = vld [vmem:[#allocation30_spill] sm:$0xff]  ;;  %v12580_v1 = vld [vmem:[#allocation27_spill] sm:$0xff]  ;;  %v12587_v17 = vld [vmem:[#allocation32_spill] sm:$0xff] }
 0x74a   :  { %v9068_v62 = vpop.f32.mrf.mxu0  ;;  %v9070_v47 = vpop.f32.mrf.mxu1  ;;  %v1995_v4 = vadd.f32 %v1952_v60, %v1802_v35  ;;  %v1805_v18 = vadd.f32 %v8971_v31, %v1644_v15  ;;  %v1806_v6 = vadd.f32 %v8975_v8, %v1645_v9  ;;  %v1649_v40 = vadd.f32 %v8989_v55, %v8939_v14  ;;  %v12582_v8 = vld [vmem:[#allocation36_spill] sm:$0xff]  ;;  %v12584_v55 = vld [vmem:[#allocation38_spill] sm:$0xff]  ;;  %v12588_v53 = vld [vmem:[#allocation33_spill] sm:$0xff] }
 0x74b   :  { %v1650_v5 = vadd.f32 %v8993_v2, %v1457_v12  ;;  %v1807_v11 = vadd.f32 %v12576_v41, %v1646_v33  ;;  %v2187_v20 = vadd.f32 %v12577_v16, %v1994_v28  ;;  %v1996_v56 = vadd.f32 %v12578_v27, %v1803_v45  ;;  %v526_v2 = vld [vmem:[%s12460_s3 + $0x120] sm:$0xff]  ;;  %v12589_v15 = vld [vmem:[#allocation47_spill] sm:$0xff]  ;;  %v12590_v28 = vld [vmem:[#allocation45_spill] sm:$0xff] }
 0x74c   :  { %v9083_v23 = vpop.f32.mrf.mxu0  ;;  %v9085_v26 = vpop.f32.mrf.mxu1  ;;  %v1808_v60 = vadd.f32 %v12579_v49, %v1647_v0  ;;  %v1651_v31 = vadd.f32 %v12581_v43, %v12580_v1  ;;  %v1652_v19 = vadd.f32 %v12582_v8, %v1459_v7  ;;  %v1653_v14 = vadd.f32 %v12584_v55, %v12583_v52  ;;  %v527_v12 = vld [vmem:[%s12460_s3 + $0x128] sm:$0xff]  ;;  %v12596_v1 = vld [vmem:[#allocation46_spill] sm:$0xff]  ;;  %v529_v55 = vld [vmem:[%s12460_s3 + $0x138] sm:$0xff] }
 0x74d   :  { %v1809_v25 = vadd.f32 %v12585_v13, %v1648_v42  ;;  %v2188_v34 = vadd.f32 %v12586_v57, %v1995_v4  ;;  %v1810_v63 = vadd.f32 %v12587_v17, %v1649_v40  ;;  %v9135_v59 = vadd.f32 %v12588_v53, %v1650_v5  ;;  %v12592_v40 = vld [vmem:[#allocation37_spill] sm:$0xff]  ;;  %v12599_v57 = vld [vmem:[#allocation50_spill] sm:$0xff] }
 0x74e   :  { %v9095_v32 = vpop.f32.mrf.mxu0  ;;  %v9097_v44 = vpop.f32.mrf.mxu1  ;;  %v1997_v29 = vadd.f32 %v9023_v39, %v1804_v10  ;;  %v1998_v9 = vadd.f32 %v12589_v15, %v1805_v18  ;;  %v2189_v7 = vadd.f32 %v12590_v28, %v1996_v56  ;;  %v9149_v5 = vadd.f32 %v12592_v40, %v1652_v19  ;;  %v12593_v39 = vld [vmem:[#allocation39_spill] sm:$0xff]  ;;  %v12594_v18 = vld [vmem:[#allocation49_spill] sm:$0xff]  ;;  %v12601_v28 = vld [vmem:[#allocation52_spill] sm:$0xff] }
 0x74f   :  { %v9152_v10 = vadd.f32 %v12593_v39, %v1653_v14  ;;  %v12598_v19 = vld [vmem:[#allocation51_spill] sm:$0xff] }
 0x750   :  { %v9107_v36 = vpop.f32.mrf.mxu0  ;;  %v9109_v37 = vpop.f32.mrf.mxu1  ;;  %v2190_v43 = vadd.f32 %v12596_v1, %v1997_v29  ;;  %v2000_v52 = vadd.f32 %v12598_v19, %v1807_v11 }
 0x752   :  { %v2332_v51 = vpop.f32.mrf.mxu0  ;;  %v2525_v50 = vpop.f32.mrf.mxu1 }
 0x753   :  { %v2379_v24 = vadd.f32 %v2332_v51, %v2186_v3  ;;  %v12591_v3 = vld [vmem:[#allocation35_spill] sm:$0xff]  ;;  %v1999_v51 = vadd.f32 %v12594_v18, %v1806_v6 }
 0x754   :  { %v2334_v22 = vpop.f32.mrf.mxu0  ;;  %v2527_v54 = vpop.f32.mrf.mxu1  ;;  %v9146_v4 = vadd.f32 %v12591_v3, %v1651_v31  ;;  %v12597_v31 = vld [vmem:[#allocation48_spill] sm:$0xff]  ;;  %v531_v18 = vld [vmem:[%s12460_s3 + $0x148] sm:$0xff] }
 0x755   :  { %v2572_v61 = vadd.f32 %v2525_v50, %v2379_v24  ;;  %v2380_v58 = vadd.f32 %v2334_v22, %v2187_v20  ;;  %v528_v50 = vld [vmem:[%s12460_s3 + $0x130] sm:$0xff]  ;;  %v2191_v8 = vadd.f32 %v12597_v31, %v1998_v9  ;;  %v2192_v11 = vadd.f32 %v12599_v57, %v1999_v51 }
 0x756   :  { %v2338_v35 = vpop.f32.mrf.mxu0  ;;  %v2531_v33 = vpop.f32.mrf.mxu1  ;;  %v12595_v20 = vld [vmem:[#allocation40_spill] sm:$0xff] }
 0x757   :  { %v9143_v45 = vadd.f32 %v2572_v61, %v526_v2  ;;  %v2573_v0 = vadd.f32 %v2527_v54, %v2380_v58  ;;  %v2381_v42 = vadd.f32 %v2338_v35, %v2188_v34  ;;  %v1654_v27 = vadd.f32 %v12595_v20, %v1461_v30  ;;  %v12600_v34 = vld [vmem:[#allocation53_spill] sm:$0xff] }
 0x758   :  { %v2340_v41 = vpop.f32.mrf.mxu0  ;;  %v2533_v16 = vpop.f32.mrf.mxu1  ;;  %v2001_v61 = vadd.f32 %v12600_v34, %v1808_v60  ;;  %v2002_v58 = vadd.f32 %v9045_v48, %v1809_v25  ;;  %v2003_v60 = vadd.f32 %v9051_v21, %v1810_v63 }
 0x759   :  { %v9159_v56 = vadd.f32 %v2573_v0, %v527_v12  ;;  %v2574_v24 = vadd.f32 %v2531_v33, %v2381_v42  ;;  %v2382_v49 = vadd.f32 %v2340_v41, %v2189_v7  ;;  %v2631_v6 = vmul.f32 %v9143_v45, %v9143_v45  ;;  %v530_v33 = vld [vmem:[%s12460_s3 + $0x140] sm:$0xff] }
 0x75a   :  { %v2344_v14 = vpop.f32.mrf.mxu0  ;;  %v2537_v2 = vpop.f32.mrf.mxu1  ;;  %v2193_v7 = vadd.f32 %v12601_v28, %v2000_v52 }
 0x75b   :  { %v2604_v30 = vadd.f32 %v9159_v56, %v9143_v45  ;;  %v2632_v22 = vmul.f32 %v9159_v56, %v9159_v56  ;;  %v9173_v54 = vadd.f32 %v2574_v24, %v528_v50  ;;  %v2575_v13 = vadd.f32 %v2533_v16, %v2382_v49  ;;  %v12602_v50 = vld [vmem:[#allocation41_spill] sm:$0xff]  ;;  %v12603_v16 = vld [vmem:[#allocation54_spill] sm:$0xff]  ;;  %v532_v24 = vld [vmem:[%s12460_s3 + $0x150] sm:$0xff] }
 0x75c   :  { %v2383_v17 = vadd.f32 %v2344_v14, %v2190_v43  ;;  %v2346_v53 = vpop.f32.mrf.mxu0  ;;  %v2539_v29 = vpop.f32.mrf.mxu1  ;;  %v1815_v41 = vadd.f32 %v12602_v50, %v1654_v27  ;;  %v2194_v20 = vadd.f32 %v12603_v16, %v2001_v61  ;;  %v12604_v43 = vld [vmem:[#allocation55_spill] sm:$0xff] }
 0x75d   :  { %v2647_v15 = vadd.f32 %v2632_v22, %v2631_v6  ;;  %v2605_v9 = vadd.f32 %v2604_v30, %v9173_v54  ;;  %v2633_v12 = vmul.f32 %v9173_v54, %v9173_v54  ;;  %v9181_v35 = vadd.f32 %v2575_v13, %v529_v55  ;;  %v12605_v13 = vld [vmem:[#allocation56_spill] sm:$0xff] }
 0x75e   :  { %v2576_v48 = vadd.f32 %v2537_v2, %v2383_v17  ;;  %v2384_v25 = vadd.f32 %v2346_v53, %v2191_v8  ;;  %v2350_v0 = vpop.f32.mrf.mxu0  ;;  %v2543_v42 = vpop.f32.mrf.mxu1  ;;  %v2195_v31 = vadd.f32 %v12604_v43, %v2002_v58  ;;  %v2004_v6 = vadd.f32 %v9059_v38, %v9135_v59  ;;  %v533_v2 = vld [vmem:[%s12460_s3 + $0x158] sm:$0xff]  ;;  %v534_v53 = vld [vmem:[%s12460_s3 + $0x160] sm:$0xff] }
 0x75f   :  { %v2648_v3 = vadd.f32 %v2647_v15, %v2633_v12  ;;  %v2606_v40 = vadd.f32 %v2605_v9, %v9181_v35  ;;  %v2634_v39 = vmul.f32 %v9181_v35, %v9181_v35  ;;  %v2385_v51 = vadd.f32 %v2350_v0, %v2192_v11  ;;  %v537_v43 = vld [vmem:[%s12460_s3 + $0x178] sm:$0xff] }
 0x760   :  { %v9196_v21 = vadd.f32 %v2576_v48, %v530_v33  ;;  %v2577_v63 = vadd.f32 %v2539_v29, %v2384_v25  ;;  %v2352_v49 = vpop.f32.mrf.mxu0  ;;  %v2545_v1 = vpop.f32.mrf.mxu1  ;;  %v2196_v57 = vadd.f32 %v12605_v13, %v2003_v60  ;;  %v2005_v38 = vadd.f32 %v9068_v62, %v9146_v4  ;;  %v535_v48 = vld [vmem:[%s12460_s3 + $0x168] sm:$0xff] }
 0x761   :  { %v2649_v8 = vadd.f32 %v2648_v3, %v2634_v39  ;;  %v2578_v19 = vadd.f32 %v2543_v42, %v2385_v51  ;;  %v2386_v52 = vadd.f32 %v2352_v49, %v2193_v7  ;;  %v2197_v62 = vadd.f32 %v9061_v46, %v2004_v6  ;;  %v536_v51 = vld [vmem:[%s12460_s3 + $0x170] sm:$0xff] }
 0x762   :  { %v2607_v27 = vadd.f32 %v2606_v40, %v9196_v21  ;;  %v2635_v55 = vmul.f32 %v9196_v21, %v9196_v21  ;;  %v9207_v14 = vadd.f32 %v2577_v63, %v531_v18  ;;  %v2356_v30 = vpop.f32.mrf.mxu0  ;;  %v2549_v22 = vpop.f32.mrf.mxu1  ;;  %v2006_v4 = vadd.f32 %v9083_v23, %v9149_v5 }
 0x763   :  { %v9213_v11 = vadd.f32 %v2578_v19, %v532_v24  ;;  %v2579_v34 = vadd.f32 %v2545_v1, %v2386_v52  ;;  %v2387_v61 = vadd.f32 %v2356_v30, %v2194_v20  ;;  %v2198_v46 = vadd.f32 %v9070_v47, %v2005_v38 }
 0x764   :  { %v2650_v59 = vadd.f32 %v2649_v8, %v2635_v55  ;;  %v2608_v58 = vadd.f32 %v2607_v27, %v9207_v14  ;;  %v2636_v17 = vmul.f32 %v9207_v14, %v9207_v14  ;;  %v2358_v29 = vpop.f32.mrf.mxu0  ;;  %v2551_v15 = vpop.f32.mrf.mxu1  ;;  %v2007_v23 = vadd.f32 %v9095_v32, %v9152_v10 }
 0x765   :  { %v2637_v9 = vmul.f32 %v9213_v11, %v9213_v11  ;;  %v9225_v12 = vadd.f32 %v2579_v34, %v533_v2  ;;  %v2580_v33 = vadd.f32 %v2549_v22, %v2387_v61  ;;  %v2388_v28 = vadd.f32 %v2358_v29, %v2195_v31 }
 0x766   :  { %v2651_v7 = vadd.f32 %v2650_v59, %v2636_v17  ;;  %v2609_v60 = vadd.f32 %v2608_v58, %v9213_v11  ;;  %v2362_v25 = vpop.f32.mrf.mxu0  ;;  %v2555_v0 = vpop.f32.mrf.mxu1  ;;  %v2199_v47 = vadd.f32 %v9085_v26, %v2006_v4  ;;  %v2008_v32 = vadd.f32 %v9107_v36, %v1815_v41  ;;  %v538_v41 = vld [vmem:[%s12460_s3 + $0x180] sm:$0xff]  ;;  %v539_v59 = vld [vmem:[%s12460_s3 + $0x188] sm:$0xff] }
 0x767   :  { %v2638_v42 = vmul.f32 %v9225_v12, %v9225_v12  ;;  %v9236_v3 = vadd.f32 %v2580_v33, %v534_v53  ;;  %v2581_v40 = vadd.f32 %v2551_v15, %v2388_v28  ;;  %v2389_v39 = vadd.f32 %v2362_v25, %v2196_v57 }
 0x768   :  { %v2652_v5 = vadd.f32 %v2651_v7, %v2637_v9  ;;  %v2610_v18 = vadd.f32 %v2609_v60, %v9225_v12  ;;  %v2364_v50 = vpop.f32.mrf.mxu0  ;;  %v2557_v16 = vpop.f32.mrf.mxu1  ;;  %v2200_v26 = vadd.f32 %v9097_v44, %v2007_v23  ;;  %v2201_v61 = vadd.f32 %v9109_v37, %v2008_v32  ;;  %v540_v37 = vld [vmem:[%s12460_s3 + $0x190] sm:$0xff] }
 0x769   :  { %v2639_v20 = vmul.f32 %v9236_v3, %v9236_v3  ;;  %v9247_v63 = vadd.f32 %v2581_v40, %v535_v48  ;;  %v2582_v24 = vadd.f32 %v2555_v0, %v2389_v39  ;;  %v2390_v49 = vadd.f32 %v2364_v50, %v2197_v62 }
 0x76a   :  { %v2653_v10 = vadd.f32 %v2652_v5, %v2638_v42  ;;  %v2611_v1 = vadd.f32 %v2610_v18, %v9236_v3  ;;  %v2368_v31 = vpop.f32.mrf.mxu0  ;;  %v2561_v8 = vpop.f32.mrf.mxu1  ;;  %v541_v42 = vld [vmem:[%s12460_s3 + $0x198] sm:$0xff] }
 0x76b   :  { %v2640_v19 = vmul.f32 %v9247_v63, %v9247_v63  ;;  %v9257_v52 = vadd.f32 %v2582_v24, %v536_v51  ;;  %v2583_v6 = vadd.f32 %v2557_v16, %v2390_v49  ;;  %v2391_v27 = vadd.f32 %v2368_v31, %v2198_v46 }
 0x76c   :  { %v2654_v55 = vadd.f32 %v2653_v10, %v2639_v20  ;;  %v2612_v36 = vadd.f32 %v2611_v1, %v9247_v63  ;;  %v2370_v2 = vpop.f32.mrf.mxu0  ;;  %v2563_v30 = vpop.f32.mrf.mxu1  ;;  %v12606_v10 = vld [vmem:[#allocation9_spill] sm:$0xff] }
 0x76d   :  { %v2641_v22 = vmul.f32 %v9257_v52, %v9257_v52  ;;  %v9266_v13 = vadd.f32 %v2583_v6, %v537_v43  ;;  %v2584_v57 = vadd.f32 %v2561_v8, %v2391_v27  ;;  %v2392_v34 = vadd.f32 %v2370_v2, %v2199_v47  ;;  %v12607_v43 = vld [vmem:[#allocation8_spill] sm:$0xff] }
 0x76e   :  { %v2655_v38 = vadd.f32 %v2654_v55, %v2640_v19  ;;  %v2613_v44 = vadd.f32 %v2612_v36, %v9257_v52  ;;  %v2374_v58 = vpop.f32.mrf.mxu0  ;;  %v2567_v17 = vpop.f32.mrf.mxu1  ;;  %v9303_v1 = vrot.slane %v12606_v10, 1  ;;  %v9308_v31 = vrot.slane %v12607_v43, 1 }
 0x76f   :  { %v2642_v53 = vmul.f32 %v9266_v13, %v9266_v13  ;;  %v9275_v29 = vadd.f32 %v2584_v57, %v538_v41  ;;  %v2585_v15 = vadd.f32 %v2563_v30, %v2392_v34  ;;  %v2393_v9 = vadd.f32 %v2374_v58, %v2200_v26  ;;  %v557_v58 = vld [vmem:[%s12460_s3 + $0x218] sm:$0xff] }
 0x770   :  { %v2656_v33 = vadd.f32 %v2655_v38, %v2641_v22  ;;  %v2614_v28 = vadd.f32 %v2613_v44, %v9266_v13  ;;  %v2376_v62 = vpop.f32.mrf.mxu0  ;;  %v2569_v40 = vpop.f32.mrf.mxu1 }
 0x771   :  { %v2643_v4 = vmul.f32 %v9275_v29, %v9275_v29  ;;  %v9283_v7 = vadd.f32 %v2585_v15, %v539_v59  ;;  %v2586_v60 = vadd.f32 %v2567_v17, %v2393_v9  ;;  %v2394_v48 = vadd.f32 %v2376_v62, %v2201_v61  ;;  %v554_v62 = vld [vmem:[%s12460_s3 + $0x200] sm:$0xff] }
 0x772   :  { %v2657_v25 = vadd.f32 %v2656_v33, %v2642_v53  ;;  %v2615_v0 = vadd.f32 %v2614_v28, %v9275_v29  ;;  %v556_v28 = vld [vmem:[%s12460_s3 + $0x210] sm:$0xff] }
 0x773   :  { %v2644_v39 = vmul.f32 %v9283_v7, %v9283_v7  ;;  %v9291_v46 = vadd.f32 %v2586_v60, %v540_v37  ;;  %v2587_v23 = vadd.f32 %v2569_v40, %v2394_v48  ;;  %v555_v37 = vld [vmem:[%s12460_s3 + $0x208] sm:$0xff] }
 0x774   :  { %v2616_v5 = vadd.f32 %v2615_v0, %v9283_v7  ;;  %v2658_v18 = vadd.f32 %v2657_v25, %v2643_v4  ;;  %v573_v0 = vld [vmem:[%s12460_s3 + $0x298] sm:$0xff] }
 0x775   :  { %v9294_v51 = vadd.f32 %v2587_v23, %v541_v42  ;;  %v2645_v50 = vmul.f32 %v9291_v46, %v9291_v46  ;;  %v572_v42 = vld [vmem:[%s12460_s3 + $0x290] sm:$0xff] }
 0x776   :  { %v2617_v16 = vadd.f32 %v2616_v5, %v9291_v46  ;;  %v2659_v20 = vadd.f32 %v2658_v18, %v2644_v39  ;;  %v553_v5 = vld [vmem:[%s12460_s3 + $0x1f8] sm:$0xff]  ;;  %v552_v18 = vld [vmem:[%s12460_s3 + $0x1f0] sm:$0xff] }
 0x777   :  { %v2646_v24 = vmul.f32 %v9294_v51, %v9294_v51 }
 0x778   :  { %v2618_v49 = vadd.f32 %v2617_v16, %v9294_v51  ;;  %v2660_v47 = vadd.f32 %v2659_v20, %v2645_v50  ;;  %v570_v50 = vld [vmem:[%s12460_s3 + $0x280] sm:$0xff] }
 0x77a   :  { %2619 = vadd.xlane.f32.xlu0 %v2618_v49  ;;  %v2661_v32 = vadd.f32 %v2660_v47, %v2646_v24 }
 0x77c   :  { %2662 = vadd.xlane.f32.xlu1 %v2661_v32 }
 0x78d   :  { %3986 = vrot.lane.b32.xlu1 %v9303_v1, %s7725_s25 }
 0x790   :  { %3984 = vrot.lane.b32.xlu0 %v9308_v31, %s7725_s25 }
 0x791   :  { %3994 = vrot.lane.b32.xlu1 %v9303_v1, %s7727_s8 }
 0x794   :  { %3992 = vrot.lane.b32.xlu0 %v9308_v31, %s7727_s8 }
 0x795   :  { %3978 = vrot.lane.b32.xlu1 %v9303_v1, %s7728_s9 }
 0x798   :  { %3976 = vrot.lane.b32.xlu0 %v9308_v31, %s7728_s9 }
 0x799   :  { %4002 = vrot.lane.b32.xlu1 %v9303_v1, %s7729_s10 }
 0x79c   :  { %4000 = vrot.lane.b32.xlu0 %v9308_v31, %s7729_s10 }
 0x79d   :  { %4010 = vrot.lane.b32.xlu1 %v9303_v1, %s7730_s2 }
 0x7a0   :  { %4008 = vrot.lane.b32.xlu0 %v9308_v31, %s7730_s2 }
 0x7a1   :  { %4018 = vrot.lane.b32.xlu1 %v9303_v1, %s7731_s11 }
 0x7a4   :  { %4016 = vrot.lane.b32.xlu0 %v9308_v31, %s7731_s11 }
 0x7a5   :  { %4026 = vrot.lane.b32.xlu1 %v9303_v1, %s7732_s12 }
 0x7a8   :  { %4024 = vrot.lane.b32.xlu0 %v9308_v31, %s7732_s12 }
 0x803   :  { %v2620_v8 = vpop.xlane.xlu0 %2619 }
 0x804   :  { %v2621_v19 = vrot.slane %v2620_v8, 4 }
 0x805   :  { %v2663_v6 = vpop.xlane.xlu1 %2662 }
 0x806   :  { %v2622_v27 = vadd.f32 %v2621_v19, %v2620_v8  ;;  %v2664_v26 = vrot.slane %v2663_v6, 4  ;;  %v551_v8 = vld [vmem:[%s12460_s3 + $0x1e8] sm:$0xff] }
 0x808   :  { %v2665_v55 = vadd.f32 %v2664_v26, %v2663_v6  ;;  %v2623_v36 = vrot.slane %v2622_v27, 2 }
 0x80a   :  { %v2624_v41 = vadd.f32 %v2623_v36, %v2622_v27  ;;  %v2666_v2 = vrot.slane %v2665_v55, 2  ;;  %v568_v36 = vld [vmem:[%s12460_s3 + $0x270] sm:$0xff] }
 0x80c   :  { %v2625_v30 = vrot.slane %v2624_v41, 1  ;;  %v2667_v22 = vadd.f32 %v2666_v2, %v2665_v55 }
 0x80e   :  { %v2626_v57 = vadd.f32 %v2625_v30, %v2624_v41  ;;  %v2668_v34 = vrot.slane %v2667_v22, 1  ;;  %v550_v41 = vld [vmem:[%s12460_s3 + $0x1e0] sm:$0xff] }
 0x810   :  { %7556 = vpush %v2626_v57  ;;  %v2669_v61 = vadd.f32 %v2668_v34, %v2667_v22 }
 0x812   :  { %7558 = vpush %v2669_v61 }
 0x841   :  { %s7557_s17 = spop %7556 }
 0x842   :  { %s2630_s18 = smul.f32 6.1035156e-05, %s7557_s17 }
 0x843   :  { %s7559_s19 = spop %7558 }
 0x844   :  { %s2674_s20 = smul.f32 %s2630_s18, %s2630_s18  ;;  %v9337_v59 = vstv %s2630_s18 }
 0x845   :  { %s2673_s0 = smul.f32 6.1035156e-05, %s7559_s19  ;;  %v2693_v17 = vsub.f32 %v9294_v51, %v9337_v59  ;;  %v2692_v53 = vsub.f32 %v9291_v46, %v9337_v59  ;;  %v2691_v15 = vsub.f32 %v9283_v7, %v9337_v59  ;;  %v2690_v9 = vsub.f32 %v9275_v29, %v9337_v59  ;;  %v571_v51 = vld [vmem:[%s12460_s3 + $0x288] sm:$0xff] }
 0x846   :  { %v2689_v4 = vsub.f32 %v9266_v13, %v9337_v59  ;;  %v2688_v29 = vsub.f32 %v9257_v52, %v9337_v59  ;;  %v2687_v16 = vsub.f32 %v9247_v63, %v9337_v59  ;;  %v2686_v20 = vsub.f32 %v9236_v3, %v9337_v59  ;;  %v569_v3 = vld [vmem:[%s12460_s3 + $0x278] sm:$0xff] }
 0x847   :  { %s2675_s21 = ssub.f32 %s2673_s0, %s2674_s20  ;;  %v2685_v2 = vsub.f32 %v9225_v12, %v9337_v59  ;;  %v2684_v30 = vsub.f32 %v9213_v11, %v9337_v59 }
 0x849   :  { %s2676_s22 = smax.f32 %s7734_s1, %s2675_s21 }
 0x84a   :  { %s2694_s23 = sadd.f32 1e-05, %s2676_s22 }
 0x84c   :  { %v2695_v38 = vstv %s2694_s23 }
 0x84d   :  { %7595 = vrsqrt.f32 %v2695_v38 }
 0x85a   :  { %v7596_v44 = vpop.eup %7595 }
 0x85b   :  { %7560 = vpush %v7596_v44 }
 0x88c   :  { %s7561_s24 = spop %7560 }
 0x88d   :  { %v9350_v33 = vstv %s7561_s24 }
 0x88e   :  { %v2714_v7 = vmul.f32 %v9350_v33, %v2693_v17  ;;  %v2713_v60 = vmul.f32 %v9350_v33, %v2692_v53  ;;  %v2712_v48 = vmul.f32 %v9350_v33, %v2691_v15  ;;  %v2711_v25 = vmul.f32 %v9350_v33, %v2690_v9  ;;  %v566_v17 = vld [vmem:[%s12460_s3 + $0x260] sm:$0xff]  ;;  %v549_v53 = vld [vmem:[%s12460_s3 + $0x1d8] sm:$0xff]  ;;  %v548_v15 = vld [vmem:[%s12460_s3 + $0x1d0] sm:$0xff] }
 0x88f   :  { %v2710_v13 = vmul.f32 %v9350_v33, %v2689_v4  ;;  %v2709_v52 = vmul.f32 %v9350_v33, %v2688_v29  ;;  %v2708_v19 = vmul.f32 %v9350_v33, %v2687_v16  ;;  %v2707_v6 = vmul.f32 %v9350_v33, %v2686_v20  ;;  %v563_v16 = vld [vmem:[%s12460_s3 + $0x248] sm:$0xff]  ;;  %v562_v20 = vld [vmem:[%s12460_s3 + $0x240] sm:$0xff] }
 0x890   :  { %v2730_v40 = vmul.f32 %v2714_v7, %v557_v58  ;;  %v2729_v39 = vmul.f32 %v2713_v60, %v556_v28  ;;  %v2728_v46 = vmul.f32 %v2712_v48, %v555_v37  ;;  %v2727_v23 = vmul.f32 %v2711_v25, %v554_v62  ;;  %v567_v58 = vld [vmem:[%s12460_s3 + $0x268] sm:$0xff]  ;;  %v565_v7 = vld [vmem:[%s12460_s3 + $0x258] sm:$0xff] }
 0x891   :  { %v2726_v47 = vmul.f32 %v2710_v13, %v553_v5  ;;  %v2725_v32 = vmul.f32 %v2709_v52, %v552_v18  ;;  %v2724_v34 = vmul.f32 %v2708_v19, %v551_v8  ;;  %v2723_v61 = vmul.f32 %v2707_v6, %v550_v41 }
 0x892   :  { %v2746_v24 = vadd.f32 %v2730_v40, %v573_v0  ;;  %v2745_v49 = vadd.f32 %v2729_v39, %v572_v42  ;;  %v2744_v63 = vadd.f32 %v2728_v46, %v571_v51  ;;  %v2743_v55 = vadd.f32 %v2727_v23, %v570_v50  ;;  %v546_v42 = vld [vmem:[%s12460_s3 + $0x1c0] sm:$0xff]  ;;  %v544_v50 = vld [vmem:[%s12460_s3 + $0x1b0] sm:$0xff] }
 0x893   :  { %v2742_v22 = vadd.f32 %v2726_v47, %v569_v3  ;;  %v2741_v57 = vadd.f32 %v2725_v32, %v568_v36  ;;  %v2706_v12 = vmul.f32 %v9350_v33, %v2685_v2  ;;  %v2705_v11 = vmul.f32 %v9350_v33, %v2684_v30  ;;  %v560_v3 = vld [vmem:[%s12460_s3 + $0x230] sm:$0xff] }
 0x894   :  { %v9398_v27 = vmax.f32 %v2746_v24, 0.0  ;;  %v9400_v26 = vmax.f32 %v2745_v49, 0.0  ;;  %v9419_v38 = vmax.f32 %v2744_v63, 0.0  ;;  %v9421_v44 = vmax.f32 %v2743_v55, 0.0 }
 0x895   :  { %v2683_v9 = vsub.f32 %v9207_v14, %v9337_v59  ;;  %v2682_v28 = vsub.f32 %v9196_v21, %v9337_v59  ;;  %v9445_v37 = vmax.f32 %v2742_v22, 0.0  ;;  %v9447_v62 = vmax.f32 %v2741_v57, 0.0  ;;  %v564_v21 = vld [vmem:[%s12460_s3 + $0x250] sm:$0xff]  ;;  %v547_v14 = vld [vmem:[%s12460_s3 + $0x1c8] sm:$0xff] }
 0x896   :  { %2793 = vrot.lane.b32.xlu1 %v9398_v27, %s7728_s9  ;;  %2777 = vrot.lane.b32.xlu0 %v9400_v26, %s7728_s9  ;;  %v2740_v4 = vadd.f32 %v2724_v34, %v567_v58  ;;  %v2739_v29 = vadd.f32 %v2723_v61, %v566_v17  ;;  %v2722_v60 = vmul.f32 %v2706_v12, %v549_v53  ;;  %v559_v34 = vld [vmem:[%s12460_s3 + $0x228] sm:$0xff]  ;;  %v558_v61 = vld [vmem:[%s12460_s3 + $0x220] sm:$0xff] }
 0x897   :  { %v2721_v48 = vmul.f32 %v2705_v11, %v548_v15  ;;  %v2704_v25 = vmul.f32 %v9350_v33, %v2683_v9  ;;  %v2703_v0 = vmul.f32 %v9350_v33, %v2682_v28  ;;  %v2681_v13 = vsub.f32 %v9181_v35, %v9337_v59  ;;  %v9593_v9 = vpop.permute.xlu0 %3984  ;;  %v9595_v28 = vpop.permute.xlu1 %3986 }
 0x898   :  { %v2680_v52 = vsub.f32 %v9173_v54, %v9337_v59  ;;  %v9471_v40 = vmax.f32 %v2740_v4, 0.0  ;;  %v9473_v39 = vmax.f32 %v2739_v29, 0.0  ;;  %v2738_v5 = vadd.f32 %v2722_v60, %v565_v7  ;;  %v545_v54 = vld [vmem:[%s12460_s3 + $0x1b8] sm:$0xff] }
 0x899   :  { %v2702_v46 = vmul.f32 %v9350_v33, %v2681_v13  ;;  %v2737_v18 = vadd.f32 %v2721_v48, %v564_v21  ;;  %v2720_v35 = vmul.f32 %v2704_v25, %v547_v14  ;;  %v2719_v51 = vmul.f32 %v2703_v0, %v546_v42 }
 0x89a   :  { %2791 = vrot.lane.b32.xlu1 %v9419_v38, %s7728_s9  ;;  %2775 = vrot.lane.b32.xlu0 %v9421_v44, %s7728_s9  ;;  %v2701_v23 = vmul.f32 %v9350_v33, %v2680_v52  ;;  %v2679_v24 = vsub.f32 %v9159_v56, %v9337_v59  ;;  %v2678_v49 = vsub.f32 %v9143_v45, %v9337_v59  ;;  %v9499_v6 = vmax.f32 %v2738_v5, 0.0  ;;  %v561_v45 = vld [vmem:[%s12460_s3 + $0x238] sm:$0xff]  ;;  %v543_v59 = vld [vmem:[%s12460_s3 + $0x1a8] sm:$0xff] }
 0x89b   :  { %v2718_v47 = vmul.f32 %v2702_v46, %v545_v54  ;;  %v9501_v63 = vmax.f32 %v2737_v18, 0.0  ;;  %v2736_v56 = vadd.f32 %v2720_v35, %v563_v16  ;;  %v2735_v55 = vadd.f32 %v2719_v51, %v562_v20  ;;  %v9601_v4 = vpop.permute.xlu0 %3992  ;;  %v9603_v29 = vpop.permute.xlu1 %3994  ;;  %v12609_v51 = vld [vmem:[#allocation11_spill] sm:$0xff] }
 0x89c   :  { %v2717_v32 = vmul.f32 %v2701_v23, %v544_v50  ;;  %v2700_v8 = vmul.f32 %v9350_v33, %v2679_v24  ;;  %v2699_v19 = vmul.f32 %v9350_v33, %v2678_v49  ;;  %v542_v33 = vld [vmem:[%s12460_s3 + $0x1a0] sm:$0xff]  ;;  %v12610_v50 = vld [vmem:[#allocation15_spill] sm:$0xff] }
 0x89d   :  { %v2734_v36 = vadd.f32 %v2718_v47, %v561_v45  ;;  %v9519_v2 = vmax.f32 %v2736_v56, 0.0  ;;  %v9521_v30 = vmax.f32 %v2735_v55, 0.0 }
 0x89e   :  { %2789 = vrot.lane.b32.xlu1 %v9445_v37, %s7728_s9  ;;  %2773 = vrot.lane.b32.xlu0 %v9447_v62, %s7728_s9  ;;  %v2716_v41 = vmul.f32 %v2700_v8, %v543_v59  ;;  %v2733_v22 = vadd.f32 %v2717_v32, %v560_v3  ;;  %v2715_v57 = vmul.f32 %v2699_v19, %v542_v33 }
 0x89f   :  { %v9533_v58 = vmax.f32 %v2734_v36, 0.0  ;;  %v9613_v7 = vpop.permute.xlu0 %3976  ;;  %v9615_v60 = vpop.permute.xlu1 %3978 }
 0x8a0   :  { %v9535_v17 = vmax.f32 %v2733_v22, 0.0  ;;  %v2732_v12 = vadd.f32 %v2716_v41, %v559_v34  ;;  %v2731_v11 = vadd.f32 %v2715_v57, %v558_v61 }
 0x8a2   :  { %2787 = vrot.lane.b32.xlu1 %v9471_v40, %s7728_s9  ;;  %2771 = vrot.lane.b32.xlu0 %v9473_v39, %s7728_s9  ;;  %v9541_v53 = vmax.f32 %v2732_v12, 0.0  ;;  %v9543_v15 = vmax.f32 %v2731_v11, 0.0 }
 0x8a3   :  { %v9621_v48 = vpop.permute.xlu0 %4000  ;;  %v9623_v25 = vpop.permute.xlu1 %4002 }
 0x8a6   :  { %2785 = vrot.lane.b32.xlu1 %v9499_v6, %s7728_s9  ;;  %2769 = vrot.lane.b32.xlu0 %v9501_v63, %s7728_s9 }
 0x8a7   :  { %v9633_v0 = vpop.permute.xlu0 %4008  ;;  %v9635_v21 = vpop.permute.xlu1 %4010 }
 0x8aa   :  { %2783 = vrot.lane.b32.xlu1 %v9519_v2, %s7728_s9  ;;  %2767 = vrot.lane.b32.xlu0 %v9521_v30, %s7728_s9 }
 0x8ab   :  { %v9641_v14 = vpop.permute.xlu0 %4016  ;;  %v9643_v42 = vpop.permute.xlu1 %4018 }
 0x8ae   :  { %2781 = vrot.lane.b32.xlu1 %v9533_v58, %s7728_s9  ;;  %2765 = vrot.lane.b32.xlu0 %v9535_v17, %s7728_s9 }
 0x8af   :  { %v9653_v13 = vpop.permute.xlu0 %4024  ;;  %v9655_v52 = vpop.permute.xlu1 %4026 }
 0x8b2   :  { %2779 = vrot.lane.b32.xlu1 %v9541_v53, %s7728_s9  ;;  %2763 = vrot.lane.b32.xlu0 %v9543_v15, %s7728_s9 }
 0x8b6   :  { %3213 = vrot.lane.b32.xlu1 %v9398_v27, %s7729_s10  ;;  %3197 = vrot.lane.b32.xlu0 %v9400_v26, %s7729_s10 }
 0x8ba   :  { %3211 = vrot.lane.b32.xlu1 %v9419_v38, %s7729_s10  ;;  %3195 = vrot.lane.b32.xlu0 %v9421_v44, %s7729_s10 }
 0x8be   :  { %3209 = vrot.lane.b32.xlu1 %v9445_v37, %s7729_s10  ;;  %3193 = vrot.lane.b32.xlu0 %v9447_v62, %s7729_s10 }
 0x8c2   :  { %3207 = vrot.lane.b32.xlu1 %v9471_v40, %s7729_s10  ;;  %3191 = vrot.lane.b32.xlu0 %v9473_v39, %s7729_s10 }
 0x8c6   :  { %3205 = vrot.lane.b32.xlu1 %v9499_v6, %s7729_s10  ;;  %3189 = vrot.lane.b32.xlu0 %v9501_v63, %s7729_s10 }
 0x8ca   :  { %3203 = vrot.lane.b32.xlu1 %v9519_v2, %s7729_s10  ;;  %3187 = vrot.lane.b32.xlu0 %v9521_v30, %s7729_s10 }
 0x8ce   :  { %3201 = vrot.lane.b32.xlu1 %v9533_v58, %s7729_s10  ;;  %3185 = vrot.lane.b32.xlu0 %v9535_v17, %s7729_s10 }
 0x8d2   :  { %3199 = vrot.lane.b32.xlu1 %v9541_v53, %s7729_s10  ;;  %3183 = vrot.lane.b32.xlu0 %v9543_v15, %s7729_s10 }
 0x8d6   :  { %3431 = vrot.lane.b32.xlu1 %v9398_v27, %s7730_s2  ;;  %3415 = vrot.lane.b32.xlu0 %v9400_v26, %s7730_s2 }
 0x8da   :  { %3429 = vrot.lane.b32.xlu1 %v9419_v38, %s7730_s2  ;;  %3413 = vrot.lane.b32.xlu0 %v9421_v44, %s7730_s2 }
 0x8de   :  { %3427 = vrot.lane.b32.xlu1 %v9445_v37, %s7730_s2  ;;  %3411 = vrot.lane.b32.xlu0 %v9447_v62, %s7730_s2 }
 0x8e2   :  { %3425 = vrot.lane.b32.xlu1 %v9471_v40, %s7730_s2  ;;  %3409 = vrot.lane.b32.xlu0 %v9473_v39, %s7730_s2 }
 0x8e6   :  { %3423 = vrot.lane.b32.xlu1 %v9499_v6, %s7730_s2  ;;  %3407 = vrot.lane.b32.xlu0 %v9501_v63, %s7730_s2 }
 0x8ea   :  { %3421 = vrot.lane.b32.xlu1 %v9519_v2, %s7730_s2  ;;  %3405 = vrot.lane.b32.xlu0 %v9521_v30, %s7730_s2 }
 0x8ee   :  { %3419 = vrot.lane.b32.xlu1 %v9533_v58, %s7730_s2  ;;  %3403 = vrot.lane.b32.xlu0 %v9535_v17, %s7730_s2 }
 0x8f2   :  { %3417 = vrot.lane.b32.xlu1 %v9541_v53, %s7730_s2  ;;  %3401 = vrot.lane.b32.xlu0 %v9543_v15, %s7730_s2 }
 0x8f6   :  { %3713 = vrot.lane.b32.xlu1 %v9398_v27, %s7732_s12  ;;  %3697 = vrot.lane.b32.xlu0 %v9400_v26, %s7732_s12 }
 0x8fa   :  { %3711 = vrot.lane.b32.xlu1 %v9419_v38, %s7732_s12  ;;  %3695 = vrot.lane.b32.xlu0 %v9421_v44, %s7732_s12 }
 0x8fe   :  { %3709 = vrot.lane.b32.xlu1 %v9445_v37, %s7732_s12  ;;  %3693 = vrot.lane.b32.xlu0 %v9447_v62, %s7732_s12 }
 0x902   :  { %3707 = vrot.lane.b32.xlu1 %v9471_v40, %s7732_s12  ;;  %3691 = vrot.lane.b32.xlu0 %v9473_v39, %s7732_s12 }
 0x906   :  { %3705 = vrot.lane.b32.xlu1 %v9499_v6, %s7732_s12  ;;  %3689 = vrot.lane.b32.xlu0 %v9501_v63, %s7732_s12 }
 0x908   :  { %v2794_v46 = vpop.permute.xlu1 %2793  ;;  %v2778_v23 = vpop.permute.xlu0 %2777 }
 0x909   :  { %v2802_v18 = vsel %vm582_vm3, %v2778_v23, %v2794_v46  ;;  %v2810_v35 = vsel %vm582_vm3, %v2794_v46, %v2778_v23 }
 0x90a   :  { %v2825_v54 = vmul.f32 %v2810_v35, %v12609_v51  ;;  %3703 = vrot.lane.b32.xlu1 %v9519_v2, %s7732_s12  ;;  %3687 = vrot.lane.b32.xlu0 %v9521_v30, %s7732_s12  ;;  %v2826_v16 = vmul.f32 %v2802_v18, %v12610_v50 }
 0x90c   :  { %v2792_v20 = vpop.permute.xlu1 %2791  ;;  %2987 = vmatprep.subr.mxu1 %v2826_v16  ;;  %v2776_v24 = vpop.permute.xlu0 %2775 }
 0x90d   :  { %v2801_v49 = vsel %vm582_vm3, %v2776_v24, %v2792_v20  ;;  %v2809_v47 = vsel %vm582_vm3, %v2792_v20, %v2776_v24  ;;  %2988 = vmatpush1.msra.mxu1 %v2825_v54 }
 0x90e   :  { %v2823_v32 = vmul.f32 %v2809_v47, %v12609_v51  ;;  %3701 = vrot.lane.b32.xlu1 %v9533_v58, %s7732_s12  ;;  %3685 = vrot.lane.b32.xlu0 %v9535_v17, %s7732_s12  ;;  %v2824_v8 = vmul.f32 %v2801_v49, %v12610_v50 }
 0x910   :  { %v2790_v19 = vpop.permute.xlu1 %2789  ;;  %2989 = vmatprep.subr.mxu1 %v2824_v8  ;;  %v2774_v56 = vpop.permute.xlu0 %2773 }
 0x911   :  { %v2800_v55 = vsel %vm582_vm3, %v2774_v56, %v2790_v19  ;;  %v2808_v45 = vsel %vm582_vm3, %v2790_v19, %v2774_v56  ;;  %2990 = vmatpush1.msra.mxu1 %v2823_v32 }
 0x912   :  { %v2821_v59 = vmul.f32 %v2808_v45, %v12609_v51  ;;  %3699 = vrot.lane.b32.xlu1 %v9541_v53, %s7732_s12  ;;  %3683 = vrot.lane.b32.xlu0 %v9543_v15, %s7732_s12  ;;  %v2822_v3 = vmul.f32 %v2800_v55, %v12610_v50 }
 0x914   :  { %v2788_v33 = vpop.permute.xlu1 %2787  ;;  %2991 = vmatprep.subr.mxu1 %v2822_v3  ;;  %v2772_v36 = vpop.permute.xlu0 %2771 }
 0x915   :  { %v2799_v41 = vsel %vm582_vm3, %v2772_v36, %v2788_v33  ;;  %v2807_v22 = vsel %vm582_vm3, %v2788_v33, %v2772_v36  ;;  %2992 = vmatpush1.msra.mxu1 %v2821_v59  ;;  %v2827_v36 = vld [vmem:[%s12462_s5] sm:$0xff] }
 0x916   :  { %v2819_v57 = vmul.f32 %v2807_v22, %v12609_v51  ;;  %4034 = vrot.lane.b32.xlu1 %v9303_v1, %s7733_s13  ;;  %4032 = vrot.lane.b32.xlu0 %v9308_v31, %s7733_s13  ;;  %v2820_v34 = vmul.f32 %v2799_v41, %v12610_v50 }
 0x918   :  { %v2786_v61 = vpop.permute.xlu1 %2785  ;;  %2993 = vmatprep.subr.mxu1 %v2820_v34  ;;  %v2770_v12 = vpop.permute.xlu0 %2769 }
 0x919   :  { %v2798_v11 = vsel %vm582_vm3, %v2770_v12, %v2786_v61  ;;  %v2806_v46 = vsel %vm582_vm3, %v2786_v61, %v2770_v12  ;;  %2994 = vmatpush1.msra.mxu1 %v2819_v57  ;;  %v12611_v61 = vld [vmem:[#allocation14_spill] sm:$0xff] }
 0x91a   :  { %v2817_v23 = vmul.f32 %v2806_v46, %v12609_v51  ;;  %v2818_v18 = vmul.f32 %v2798_v11, %v12610_v50  ;;  %v12612_v11 = vld [vmem:[#allocation20_spill] sm:$0xff] }
 0x91c   :  { %v2784_v1 = vpop.permute.xlu1 %2783  ;;  %2995 = vmatprep.subr.mxu1 %v2818_v18  ;;  %v2768_v35 = vpop.permute.xlu0 %2767 }
 0x91d   :  { %v2797_v31 = vsel %vm582_vm3, %v2768_v35, %v2784_v1  ;;  %v2805_v54 = vsel %vm582_vm3, %v2784_v1, %v2768_v35  ;;  %2996 = vmatpush1.msra.mxu1 %v2817_v23  ;;  %v12613_v23 = vmov 0.0  }
 0x91e   :  { %v2815_v16 = vmul.f32 %v2805_v54, %v12609_v51  ;;  %v2816_v20 = vmul.f32 %v2797_v31, %v12610_v50 }
 0x920   :  { %v2782_v24 = vpop.permute.xlu1 %2781  ;;  %2997 = vmatprep.subr.mxu1 %v2816_v20  ;;  %v2766_v49 = vpop.permute.xlu0 %2765 }
 0x921   :  { %v2796_v47 = vsel %vm582_vm3, %v2766_v49, %v2782_v24  ;;  %v2804_v32 = vsel %vm582_vm3, %v2782_v24, %v2766_v49  ;;  %2998 = vmatpush1.msra.mxu1 %v2815_v16 }
 0x922   :  { %v2813_v8 = vmul.f32 %v2804_v32, %v12609_v51  ;;  %v2814_v19 = vmul.f32 %v2796_v47, %v12610_v50 }
 0x924   :  { %v2780_v56 = vpop.permute.xlu1 %2779  ;;  %2999 = vmatprep.subr.mxu1 %v2814_v19  ;;  %v2764_v55 = vpop.permute.xlu0 %2763 }
 0x925   :  { %v2795_v45 = vsel %vm582_vm3, %v2764_v55, %v2780_v56  ;;  %v2803_v59 = vsel %vm582_vm3, %v2780_v56, %v2764_v55  ;;  %3000 = vmatpush1.msra.mxu1 %v2813_v8 }
 0x926   :  { %v2811_v3 = vmul.f32 %v2803_v59, %v12609_v51  ;;  %v2812_v33 = vmul.f32 %v2795_v45, %v12610_v50 }
 0x928   :  { %v3214_v41 = vpop.permute.xlu1 %3213  ;;  %3001 = vmatprep.subr.mxu1 %v2812_v33  ;;  %v3198_v22 = vpop.permute.xlu0 %3197 }
 0x929   :  { %v3222_v57 = vsel %vm609_vm5, %v3198_v22, %v3214_v41  ;;  %v3230_v34 = vsel %vm609_vm5, %v3214_v41, %v3198_v22  ;;  %3002 = vmatpush1.msra.mxu1 %v2811_v3 }
 0x92a   :  { %v3245_v12 = vmul.f32 %v3230_v34, %v12611_v61  ;;  %v3246_v46 = vmul.f32 %v3222_v57, %v12612_v11  ;;  %7451 = vmatmul.mubr.msk.f32.vlgmr.msra.gmra.mxu1 %vm2893_vm0, %v2827_v36 }
 0x92b   :  { %3315 = vmatprep.mubr.f32.mxu1 %v12613_v23 }
 0x92c   :  { %v3212_v18 = vpop.permute.xlu1 %3211  ;;  %3267 = vmatprep.subr.mxu1 %v3246_v46  ;;  %v3196_v1 = vpop.permute.xlu0 %3195 }
 0x92d   :  { %v3221_v35 = vsel %vm609_vm5, %v3196_v1, %v3212_v18  ;;  %v3229_v31 = vsel %vm609_vm5, %v3212_v18, %v3196_v1  ;;  %3268 = vmatpush1.msra.mxu1 %v3245_v12 }
 0x92e   :  { %v3243_v54 = vmul.f32 %v3229_v31, %v12611_v61  ;;  %v3244_v16 = vmul.f32 %v3221_v35, %v12612_v11 }
 0x930   :  { %v3210_v20 = vpop.permute.xlu1 %3209  ;;  %3269 = vmatprep.subr.mxu1 %v3244_v16  ;;  %v3194_v24 = vpop.permute.xlu0 %3193 }
 0x931   :  { %v3220_v49 = vsel %vm609_vm5, %v3194_v24, %v3210_v20  ;;  %v3228_v47 = vsel %vm609_vm5, %v3210_v20, %v3194_v24  ;;  %3270 = vmatpush1.msra.mxu1 %v3243_v54 }
 0x932   :  { %v3241_v32 = vmul.f32 %v3228_v47, %v12611_v61  ;;  %v3242_v8 = vmul.f32 %v3220_v49, %v12612_v11 }
 0x934   :  { %v3208_v19 = vpop.permute.xlu1 %3207  ;;  %3271 = vmatprep.subr.mxu1 %v3242_v8  ;;  %v3192_v56 = vpop.permute.xlu0 %3191 }
 0x935   :  { %v3219_v55 = vsel %vm609_vm5, %v3192_v56, %v3208_v19  ;;  %v3227_v45 = vsel %vm609_vm5, %v3208_v19, %v3192_v56  ;;  %3272 = vmatpush1.msra.mxu1 %v3241_v32 }
 0x936   :  { %v3239_v59 = vmul.f32 %v3227_v45, %v12611_v61  ;;  %v3240_v3 = vmul.f32 %v3219_v55, %v12612_v11 }
 0x938   :  { %v3206_v33 = vpop.permute.xlu1 %3205  ;;  %3273 = vmatprep.subr.mxu1 %v3240_v3  ;;  %v3190_v36 = vpop.permute.xlu0 %3189 }
 0x939   :  { %v3218_v41 = vsel %vm609_vm5, %v3190_v36, %v3206_v33  ;;  %v3226_v22 = vsel %vm609_vm5, %v3206_v33, %v3190_v36  ;;  %3274 = vmatpush1.msra.mxu1 %v3239_v59  ;;  %v3247_v59 = vld [vmem:[%s12462_s5 + $0x18] sm:$0xff] }
 0x93a   :  { %v3237_v57 = vmul.f32 %v3226_v22, %v12611_v61  ;;  %v3238_v34 = vmul.f32 %v3218_v41, %v12612_v11  ;;  %v12614_v22 = vld [vmem:[#allocation17_spill] sm:$0xff] }
 0x93c   :  { %v3204_v12 = vpop.permute.xlu1 %3203  ;;  %3275 = vmatprep.subr.mxu1 %v3238_v34  ;;  %v3188_v46 = vpop.permute.xlu0 %3187  ;;  %v12615_v34 = vld [vmem:[#allocation23_spill] sm:$0xff] }
 0x93d   :  { %v3217_v18 = vsel %vm609_vm5, %v3188_v46, %v3204_v12  ;;  %v3225_v1 = vsel %vm609_vm5, %v3204_v12, %v3188_v46  ;;  %3276 = vmatpush1.msra.mxu1 %v3237_v57 }
 0x93e   :  { %v3235_v35 = vmul.f32 %v3225_v1, %v12611_v61  ;;  %v3236_v31 = vmul.f32 %v3217_v18, %v12612_v11 }
 0x940   :  { %v3202_v54 = vpop.permute.xlu1 %3201  ;;  %3277 = vmatprep.subr.mxu1 %v3236_v31  ;;  %v3186_v16 = vpop.permute.xlu0 %3185 }
 0x941   :  { %v3216_v20 = vsel %vm609_vm5, %v3186_v16, %v3202_v54  ;;  %v3224_v24 = vsel %vm609_vm5, %v3202_v54, %v3186_v16  ;;  %3278 = vmatpush1.msra.mxu1 %v3235_v35 }
 0x942   :  { %v3233_v49 = vmul.f32 %v3224_v24, %v12611_v61  ;;  %v3234_v47 = vmul.f32 %v3216_v20, %v12612_v11 }
 0x944   :  { %v3200_v32 = vpop.permute.xlu1 %3199  ;;  %3279 = vmatprep.subr.mxu1 %v3234_v47  ;;  %v3184_v8 = vpop.permute.xlu0 %3183 }
 0x945   :  { %v3215_v19 = vsel %vm609_vm5, %v3184_v8, %v3200_v32  ;;  %v3223_v56 = vsel %vm609_vm5, %v3200_v32, %v3184_v8  ;;  %3280 = vmatpush1.msra.mxu1 %v3233_v49 }
 0x946   :  { %v3231_v55 = vmul.f32 %v3223_v56, %v12611_v61  ;;  %v3232_v45 = vmul.f32 %v3215_v19, %v12612_v11 }
 0x948   :  { %v3432_v3 = vpop.permute.xlu1 %3431  ;;  %3281 = vmatprep.subr.mxu1 %v3232_v45  ;;  %v3416_v33 = vpop.permute.xlu0 %3415 }
 0x949   :  { %v3440_v36 = vsel %vm618_vm6, %v3416_v33, %v3432_v3  ;;  %v3448_v41 = vsel %vm618_vm6, %v3432_v3, %v3416_v33  ;;  %3282 = vmatpush1.msra.mxu1 %v3231_v55 }
 0x94a   :  { %v3463_v57 = vmul.f32 %v3440_v36, %v12614_v22  ;;  %v3464_v12 = vmul.f32 %v3448_v41, %v12615_v34  ;;  %7453 = vmatmul.mubr.msk.f32.vlgmr.msra.gmra.mxu1 %vm2893_vm0, %v3247_v59 }
 0x94b   :  { %3533 = vmatprep.mubr.f32.mxu1 %v12613_v23 }
 0x94c   :  { %v3430_v46 = vpop.permute.xlu1 %3429  ;;  %3485 = vmatprep.subr.mxu1 %v3464_v12  ;;  %v3414_v18 = vpop.permute.xlu0 %3413 }
 0x94d   :  { %v3439_v1 = vsel %vm618_vm6, %v3414_v18, %v3430_v46  ;;  %v3447_v35 = vsel %vm618_vm6, %v3430_v46, %v3414_v18  ;;  %3486 = vmatpush1.msra.mxu1 %v3463_v57 }
 0x94e   :  { %v3461_v31 = vmul.f32 %v3439_v1, %v12614_v22  ;;  %v3462_v54 = vmul.f32 %v3447_v35, %v12615_v34 }
 0x950   :  { %v3428_v16 = vpop.permute.xlu1 %3427  ;;  %3487 = vmatprep.subr.mxu1 %v3462_v54  ;;  %v3412_v20 = vpop.permute.xlu0 %3411 }
 0x951   :  { %v3438_v24 = vsel %vm618_vm6, %v3412_v20, %v3428_v16  ;;  %v3446_v49 = vsel %vm618_vm6, %v3428_v16, %v3412_v20  ;;  %3488 = vmatpush1.msra.mxu1 %v3461_v31 }
 0x952   :  { %v3459_v47 = vmul.f32 %v3438_v24, %v12614_v22  ;;  %v3460_v32 = vmul.f32 %v3446_v49, %v12615_v34 }
 0x954   :  { %v3426_v8 = vpop.permute.xlu1 %3425  ;;  %3489 = vmatprep.subr.mxu1 %v3460_v32  ;;  %v3410_v19 = vpop.permute.xlu0 %3409 }
 0x955   :  { %v3437_v56 = vsel %vm618_vm6, %v3410_v19, %v3426_v8  ;;  %v3445_v55 = vsel %vm618_vm6, %v3426_v8, %v3410_v19  ;;  %3490 = vmatpush1.msra.mxu1 %v3459_v47 }
 0x956   :  { %v3457_v45 = vmul.f32 %v3437_v56, %v12614_v22  ;;  %v3458_v59 = vmul.f32 %v3445_v55, %v12615_v34 }
 0x958   :  { %v3424_v3 = vpop.permute.xlu1 %3423  ;;  %3491 = vmatprep.subr.mxu1 %v3458_v59  ;;  %v3408_v33 = vpop.permute.xlu0 %3407 }
 0x959   :  { %v3436_v36 = vsel %vm618_vm6, %v3408_v33, %v3424_v3  ;;  %v3444_v41 = vsel %vm618_vm6, %v3424_v3, %v3408_v33  ;;  %3492 = vmatpush1.msra.mxu1 %v3457_v45  ;;  %v3465_v3 = vld [vmem:[%s12462_s5 + $0x28] sm:$0xff] }
 0x95a   :  { %v3455_v57 = vmul.f32 %v3436_v36, %v12614_v22  ;;  %v3456_v12 = vmul.f32 %v3444_v41, %v12615_v34 }
 0x95c   :  { %v3422_v46 = vpop.permute.xlu1 %3421  ;;  %3493 = vmatprep.subr.mxu1 %v3456_v12  ;;  %v3406_v18 = vpop.permute.xlu0 %3405  ;;  %v12616_v12 = vld [vmem:[#allocation21_spill] sm:$0xff] }
 0x95d   :  { %v3435_v1 = vsel %vm618_vm6, %v3406_v18, %v3422_v46  ;;  %v3443_v35 = vsel %vm618_vm6, %v3422_v46, %v3406_v18  ;;  %3494 = vmatpush1.msra.mxu1 %v3455_v57  ;;  %v12617_v18 = vld [vmem:[#allocation25_spill] sm:$0xff] }
 0x95e   :  { %v3453_v31 = vmul.f32 %v3435_v1, %v12614_v22  ;;  %v3454_v54 = vmul.f32 %v3443_v35, %v12615_v34 }
 0x960   :  { %v3420_v16 = vpop.permute.xlu1 %3419  ;;  %3495 = vmatprep.subr.mxu1 %v3454_v54  ;;  %v3404_v20 = vpop.permute.xlu0 %3403 }
 0x961   :  { %v3434_v24 = vsel %vm618_vm6, %v3404_v20, %v3420_v16  ;;  %v3442_v49 = vsel %vm618_vm6, %v3420_v16, %v3404_v20  ;;  %3496 = vmatpush1.msra.mxu1 %v3453_v31 }
 0x962   :  { %v3451_v47 = vmul.f32 %v3434_v24, %v12614_v22  ;;  %v3452_v32 = vmul.f32 %v3442_v49, %v12615_v34 }
 0x964   :  { %v3418_v8 = vpop.permute.xlu1 %3417  ;;  %3497 = vmatprep.subr.mxu1 %v3452_v32  ;;  %v3402_v19 = vpop.permute.xlu0 %3401 }
 0x965   :  { %v3433_v56 = vsel %vm618_vm6, %v3402_v19, %v3418_v8  ;;  %v3441_v55 = vsel %vm618_vm6, %v3418_v8, %v3402_v19  ;;  %3498 = vmatpush1.msra.mxu1 %v3451_v47 }
 0x966   :  { %v3449_v45 = vmul.f32 %v3433_v56, %v12614_v22  ;;  %v3450_v59 = vmul.f32 %v3441_v55, %v12615_v34 }
 0x968   :  { %v3714_v33 = vpop.permute.xlu1 %3713  ;;  %3499 = vmatprep.subr.mxu1 %v3450_v59  ;;  %v3698_v36 = vpop.permute.xlu0 %3697 }
 0x969   :  { %v3722_v41 = vsel %vm636_vm8, %v3698_v36, %v3714_v33  ;;  %v3730_v57 = vsel %vm636_vm8, %v3714_v33, %v3698_v36  ;;  %3500 = vmatpush1.msra.mxu1 %v3449_v45 }
 0x96a   :  { %v3745_v46 = vmul.f32 %v3722_v41, %v12616_v12  ;;  %v3746_v1 = vmul.f32 %v3730_v57, %v12617_v18  ;;  %7455 = vmatmul.mubr.msk.f32.vlgmr.msra.gmra.mxu1 %vm2893_vm0, %v3465_v3  ;;  %v3989_v41 = vsel %vm591_vm2, %v9595_v28, %v9593_v9  ;;  %v3988_v57 = vsel %vm591_vm2, %v9593_v9, %v9595_v28  ;;  %v12618_v9 = vld [vmem:[#allocation12_spill] sm:$0xff] }
 0x96b   :  { %3815 = vmatprep.mubr.f32.mxu1 %v12613_v23  ;;  %v3990_v28 = vmul.f32 %v3989_v41, %v12618_v9 }
 0x96c   :  { %v3712_v35 = vpop.permute.xlu1 %3711  ;;  %3767 = vmatprep.subr.mxu1 %v3746_v1  ;;  %v3696_v31 = vpop.permute.xlu0 %3695 }
 0x96d   :  { %v3721_v54 = vsel %vm636_vm8, %v3696_v31, %v3712_v35  ;;  %v3729_v16 = vsel %vm636_vm8, %v3712_v35, %v3696_v31  ;;  %3768 = vmatpush1.msra.mxu1 %v3745_v46  ;;  %v3997_v46 = vsel %vm600_vm4, %v9603_v29, %v9601_v4  ;;  %v3996_v31 = vsel %vm600_vm4, %v9601_v4, %v9603_v29 }
 0x96e   :  { %v3743_v20 = vmul.f32 %v3721_v54, %v12616_v12  ;;  %v3744_v24 = vmul.f32 %v3729_v16, %v12617_v18  ;;  %v3980_v4 = vsel %vm582_vm3, %v9613_v7, %v9615_v60  ;;  %v4004_v29 = vsel %vm609_vm5, %v9621_v48, %v9623_v25 }
 0x96f   :  { %v4042_v41 = vrot.slane %v3990_v28, 7 }
 0x970   :  { %v3710_v49 = vpop.permute.xlu1 %3709  ;;  %3769 = vmatprep.subr.mxu1 %v3744_v24  ;;  %v3694_v47 = vpop.permute.xlu0 %3693 }
 0x971   :  { %v3720_v32 = vsel %vm636_vm8, %v3694_v47, %v3710_v49  ;;  %v3728_v8 = vsel %vm636_vm8, %v3710_v49, %v3694_v47  ;;  %3770 = vmatpush1.msra.mxu1 %v3743_v20  ;;  %v12619_v49 = vld [vmem:[#allocation16_spill] sm:$0xff] }
 0x972   :  { %v3741_v19 = vmul.f32 %v3720_v32, %v12616_v12  ;;  %v3742_v56 = vmul.f32 %v3728_v8, %v12617_v18  ;;  %v3991_v47 = vmul.f32 %v3988_v57, %v12619_v49  ;;  %v12620_v32 = vld [vmem:[#allocation13_spill] sm:$0xff] }
 0x973   :  { %v3998_v8 = vmul.f32 %v3997_v46, %v12620_v32 }
 0x974   :  { %v3708_v55 = vpop.permute.xlu1 %3707  ;;  %3771 = vmatprep.subr.mxu1 %v3742_v56  ;;  %v3692_v45 = vpop.permute.xlu0 %3691 }
 0x975   :  { %v3719_v59 = vsel %vm636_vm8, %v3692_v45, %v3708_v55  ;;  %v3727_v3 = vsel %vm636_vm8, %v3708_v55, %v3692_v45  ;;  %3772 = vmatpush1.msra.mxu1 %v3741_v19  ;;  %v12621_v19 = vld [vmem:[#allocation19_spill] sm:$0xff] }
 0x976   :  { %v3739_v33 = vmul.f32 %v3719_v59, %v12616_v12  ;;  %v3740_v36 = vmul.f32 %v3727_v3, %v12617_v18  ;;  %v3999_v56 = vmul.f32 %v3996_v31, %v12621_v19  ;;  %v3981_v59 = vsel %vm582_vm3, %v9615_v60, %v9613_v7 }
 0x977   :  { %v4005_v3 = vsel %vm609_vm5, %v9623_v25, %v9621_v48  ;;  %v3983_v7 = vmul.f32 %v3980_v4, %v12610_v50  ;;  %v4007_v60 = vmul.f32 %v4004_v29, %v12612_v11  ;;  %v3982_v48 = vmul.f32 %v3981_v59, %v12609_v51 }
 0x978   :  { %v3706_v1 = vpop.permute.xlu1 %3705  ;;  %3773 = vmatprep.subr.mxu1 %v3740_v36  ;;  %v3690_v35 = vpop.permute.xlu0 %3689  ;;  %v4049_v31 = vrot.slane %v3999_v56, 6  ;;  %v4006_v25 = vmul.f32 %v4005_v3, %v12611_v61  ;;  %v4020_v56 = vsel %vm627_vm7, %v9641_v14, %v9643_v42  ;;  %v4028_v59 = vsel %vm636_vm8, %v9653_v13, %v9655_v52 }
 0x979   :  { %v3718_v54 = vsel %vm636_vm8, %v3690_v35, %v3706_v1  ;;  %v3726_v16 = vsel %vm636_vm8, %v3706_v1, %v3690_v35  ;;  %3774 = vmatpush1.msra.mxu1 %v3739_v33  ;;  %v4043_v1 = vrot.slane %v3991_v47, 7  ;;  %v4048_v35 = vrot.slane %v3998_v8, 6 }
 0x97a   :  { %v3737_v20 = vmul.f32 %v3718_v54, %v12616_v12  ;;  %v3738_v24 = vmul.f32 %v3726_v16, %v12617_v18  ;;  %v4013_v54 = vsel %vm618_vm6, %v9635_v21, %v9633_v0 }
 0x97b   :  { %v4081_v29 = vsel %vm692_vm10, %v3983_v7, %v4043_v1 }
 0x97c   :  { %v3704_v55 = vpop.permute.xlu1 %3703  ;;  %3775 = vmatprep.subr.mxu1 %v3738_v24  ;;  %v3688_v45 = vpop.permute.xlu0 %3687  ;;  %v4021_v24 = vsel %vm627_vm7, %v9643_v42, %v9641_v14  ;;  %v4080_v14 = vsel %vm692_vm10, %v3982_v48, %v4042_v41  ;;  %v4054_v42 = vrot.slane %v4006_v25, 5  ;;  %v4030_v41 = vmul.f32 %v4028_v59, %v12616_v12 }
 0x97d   :  { %v3717_v33 = vsel %vm636_vm8, %v3688_v45, %v3704_v55  ;;  %v3725_v36 = vsel %vm636_vm8, %v3704_v55, %v3688_v45  ;;  %3776 = vmatpush1.msra.mxu1 %v3737_v20  ;;  %v4012_v20 = vsel %vm618_vm6, %v9633_v0, %v9635_v21  ;;  %v4029_v0 = vsel %vm636_vm8, %v9655_v52, %v9653_v13 }
 0x97e   :  { %v3735_v57 = vmul.f32 %v3717_v33, %v12616_v12  ;;  %v3736_v46 = vmul.f32 %v3725_v36, %v12617_v18  ;;  %v4055_v55 = vrot.slane %v4007_v60, 5  ;;  %v4015_v45 = vmul.f32 %v4013_v54, %v12615_v34  ;;  %v12622_v33 = vld [vmem:[#allocation24_spill] sm:$0xff] }
 0x97f   :  { %v4014_v3 = vmul.f32 %v4012_v20, %v12614_v22  ;;  %v4023_v36 = vmul.f32 %v4021_v24, %v12622_v33  ;;  %v4031_v7 = vmul.f32 %v4029_v0, %v12617_v18  ;;  %v4083_v52 = vsel %vm144_vm1, %v4081_v29, %v4049_v31  ;;  %v3747_v24 = vld [vmem:[%s12462_s5 + $0x38] sm:$0xff] }
 0x980   :  { %v3702_v16 = vpop.permute.xlu1 %3701  ;;  %3777 = vmatprep.subr.mxu1 %v3736_v46  ;;  %v3686_v28 = vpop.permute.xlu0 %3685  ;;  %v4082_v54 = vsel %vm144_vm1, %v4080_v14, %v4048_v35  ;;  %v4065_v20 = vrot.slane %v4015_v45, 3  ;;  %v4076_v59 = vrot.slane %v4030_v41, 1  ;;  %vm12626_vm1 = vcmask 1043456   ;;  %v7602_v41 = vld [vmem:[%s12460_s3 + $0x30] sm:$0xff] }
 0x981   :  { %v3716_v47 = vsel %vm636_vm8, %v3686_v28, %v3702_v16  ;;  %v3724_v8 = vsel %vm636_vm8, %v3702_v16, %v3686_v28  ;;  %3778 = vmatpush1.msra.mxu1 %v3735_v57  ;;  %v12623_v16 = vld [vmem:[#allocation18_spill] sm:$0xff]  ;;  %v4085_v28 = vsel %vm697_vm11, %v4083_v52, %v4055_v55  ;;  %v4064_v31 = vrot.slane %v4014_v3, 3 }
 0x982   :  { %v3733_v21 = vmul.f32 %v3716_v47, %v12616_v12  ;;  %v3734_v4 = vmul.f32 %v3724_v8, %v12617_v18  ;;  %v4022_v1 = vmul.f32 %v4020_v56, %v12623_v16  ;;  %v4059_v47 = vrot.slane %v12606_v10, 5  ;;  %v12624_v10 = vld [vmem:[#allocation22_spill] sm:$0xff] }
 0x983   :  { %v4084_v8 = vsel %vm697_vm11, %v4082_v54, %v4054_v42  ;;  %v4071_v56 = vrot.slane %v4023_v36, 2  ;;  %v4077_v35 = vrot.slane %v4031_v7, 1  ;;  %v12625_v42 = vld [vmem:[#allocation26_spill] sm:$0xff]  ;;  %vm12627_vm11 = vmmov %vm12626_vm1 }
 0x984   :  { %v3700_v57 = vpop.permute.xlu1 %3699  ;;  %3779 = vmatprep.subr.mxu1 %v3734_v4  ;;  %v3684_v46 = vpop.permute.xlu0 %3683  ;;  %v4058_v4 = vrot.slane %v12607_v43, 5  ;;  %v4070_v29 = vrot.slane %v4022_v1, 2  ;;  %v4087_v36 = vsel %vm12626_vm1, %v4085_v28, %v4059_v47  ;;  %v7601_v52 = vld [vmem:[%s12460_s3 + $0x20] sm:$0xff] }
 0x985   :  { %v3715_v60 = vsel %vm636_vm8, %v3684_v46, %v3700_v57  ;;  %v3723_v13 = vsel %vm636_vm8, %v3700_v57, %v3684_v46  ;;  %3780 = vmatpush1.msra.mxu1 %v3733_v21  ;;  %v4089_v43 = vsel %vm703_vm13, %v4087_v36, %v4065_v20  ;;  %v7607_v36 = vld [vmem:[%s12460_s3 + $0x70] sm:$0xff] }
 0x986   :  { %v3731_v48 = vmul.f32 %v3715_v60, %v12616_v12  ;;  %v3732_v25 = vmul.f32 %v3723_v13, %v12617_v18  ;;  %v4086_v57 = vsel %vm12627_vm11, %v4084_v8, %v4058_v4  ;;  %v4091_v46 = vsel %vm706_vm14, %v4089_v43, %v4071_v56 }
 0x987   :  { %v4088_v1 = vsel %vm703_vm13, %v4086_v57, %v4064_v31  ;;  %v4093_v7 = vsel %vm709_vm15, %v4091_v46, %v4077_v35  ;;  %v7606_v35 = vld [vmem:[%s12460_s3 + $0x68] sm:$0xff] }
 0x988   :  { %v4035_v0 = vpop.permute.xlu1 %4034  ;;  %3781 = vmatprep.subr.mxu1 %v3732_v25  ;;  %v4033_v21 = vpop.permute.xlu0 %4032  ;;  %v4090_v60 = vsel %vm706_vm14, %v4088_v1, %v4070_v29  ;;  %v7604_v25 = vld [vmem:[%s12460_s3 + $0x50] sm:$0xff] }
 0x989   :  { %v4036_v55 = vsel %vm645_vm9, %v4033_v21, %v4035_v0  ;;  %v4037_v45 = vsel %vm645_vm9, %v4035_v0, %v4033_v21  ;;  %3782 = vmatpush1.msra.mxu1 %v3731_v48  ;;  %v4092_v13 = vsel %vm709_vm15, %v4090_v60, %v4076_v59  ;;  %v7603_v48 = vld [vmem:[%s12460_s3 + $0x40] sm:$0xff]  ;;  %v7608_v60 = vld [vmem:[%s12460_s3 + $0x78] sm:$0xff] }
 0x98a   :  { %v4038_v14 = vmul.f32 %v4036_v55, %v12624_v10  ;;  %v4039_v3 = vmul.f32 %v4037_v45, %v12625_v42  ;;  %7457 = vmatmul.mubr.msk.f32.vlgmr.msra.gmra.mxu1 %vm2893_vm0, %v3747_v24  ;;  %v7605_v21 = vld [vmem:[%s12460_s3 + $0x60] sm:$0xff] }
 0x98b   :  { %4164 = vmatprep.mubr.f32.mxu1 %v12613_v23 }
 0x98c   :  { %7459 = vmatprep.subr.msk.mxu1 %vm692_vm10, %v4039_v3 }
 0x98d   :  { %7460 = vmatpush1.msk.msra.mxu1 %vm692_vm10, %v4038_v14  ;;  %vm12629_vm10 = vcmask 261120  }
 0x98e   :  { %4130 = vmatprep.subr.mxu1 %v4093_v7  ;;  %vm12631_vm13 = vmmov %vm12629_vm10 }
 0x98f   :  { %4131 = vmatpush1.msra.mxu1 %v4092_v13  ;;  %vm12632_vm14 = vmmov %vm12629_vm10 }
 0x990   :  { %7461 = vmatmul.mubr.msk.f32.vlgmr.msra.gmra.mxu1 %vm712_vm12, %v7601_v52  ;;  %vm12633_vm15 = vmmov %vm12629_vm10 }
 0x991   :  { %4170 = vmatprep.mubr.f32.mxu1 %v12613_v23  ;;  %vm12634_vm1 = vmmov %vm12629_vm10 }
 0x992   :  { %vm12635_vm11 = vmmov %vm12634_vm1 }
 0x994   :  { %7462 = vmatmul.mubr.msk.f32.gmra.mxu1 %vm712_vm12, %v7602_v41 }
 0x995   :  { %4176 = vmatprep.mubr.f32.mxu1 %v12613_v23 }
 0x998   :  { %7463 = vmatmul.mubr.msk.f32.gmra.mxu1 %vm712_vm12, %v7603_v48 }
 0x999   :  { %4182 = vmatprep.mubr.f32.mxu1 %v12613_v23 }
 0x99c   :  { %7464 = vmatmul.mubr.msk.f32.gmra.mxu1 %vm712_vm12, %v7604_v25  ;;  %vm12630_vm12 = vmmov %vm12629_vm10 }
 0x99d   :  { %4589 = vmatprep.mubr.f32.mxu1 %v12613_v23 }
 0x9ea   :  { %v10003_v54 = vpop.f32.mrf.mxu1 }
 0x9ec   :  { %v10005_v28 = vpop.f32.mrf.mxu1 }
 0xa0a   :  { %v10007_v20 = vpop.f32.mrf.mxu1 }
 0xa0c   :  { %v10009_v24 = vpop.f32.mrf.mxu1 }
 0xa2a   :  { %v10011_v47 = vpop.f32.mrf.mxu1 }
 0xa2c   :  { %v10013_v8 = vpop.f32.mrf.mxu1 }
 0xa4a   :  { %v10015_v31 = vpop.f32.mrf.mxu1 }
 0xa4c   :  { %v10017_v56 = vpop.f32.mrf.mxu1 }
 0xa4d   :  { %12628 = vst [vmem:[#allocation29_spill] sm:$0xff] %v10017_v56 }
 0xa50   :  { %v4166_v0 = vpop.f32.mrf.mxu1 }
 0xa51   :  { %v10022_v4 = vadd.f32 %v7605_v21, %v4166_v0  ;;  %v7609_v0 = vld [vmem:[%s12460_s3 + $0x80] sm:$0xff] }
 0xa52   :  { %v4168_v29 = vpop.f32.mrf.mxu1 }
 0xa53   :  { %v10027_v55 = vadd.f32 %v7606_v35, %v4168_v29  ;;  %v4208_v59 = vmul.f32 %v10022_v4, %v10022_v4 }
 0xa54   :  { %v4172_v45 = vpop.f32.mrf.mxu1 }
 0xa55   :  { %v4189_v14 = vadd.f32 %v10027_v55, %v10022_v4  ;;  %v4209_v3 = vmul.f32 %v10027_v55, %v10027_v55  ;;  %v10038_v43 = vadd.f32 %v7607_v36, %v4172_v45 }
 0xa56   :  { %v4174_v57 = vpop.f32.mrf.mxu1 }
 0xa57   :  { %v4216_v46 = vadd.f32 %v4209_v3, %v4208_v59  ;;  %v4190_v1 = vadd.f32 %v4189_v14, %v10038_v43  ;;  %v4210_v7 = vmul.f32 %v10038_v43, %v10038_v43  ;;  %v10046_v13 = vadd.f32 %v7608_v60, %v4174_v57  ;;  %v7610_v14 = vld [vmem:[%s12460_s3 + $0x88] sm:$0xff] }
 0xa58   :  { %v4178_v52 = vpop.f32.mrf.mxu1 }
 0xa59   :  { %v4217_v41 = vadd.f32 %v4216_v46, %v4210_v7  ;;  %v4191_v48 = vadd.f32 %v4190_v1, %v10046_v13  ;;  %v4211_v25 = vmul.f32 %v10046_v13, %v10046_v13  ;;  %v10054_v21 = vadd.f32 %v7609_v0, %v4178_v52  ;;  %v7611_v7 = vld [vmem:[%s12460_s3 + $0x90] sm:$0xff]  ;;  %v7612_v0 = vld [vmem:[%s12460_s3 + $0x98] sm:$0xff] }
 0xa5a   :  { %v4180_v29 = vpop.f32.mrf.mxu1 }
 0xa5b   :  { %v4218_v35 = vadd.f32 %v4217_v41, %v4211_v25  ;;  %v4192_v45 = vadd.f32 %v4191_v48, %v10054_v21  ;;  %v4212_v59 = vmul.f32 %v10054_v21, %v10054_v21  ;;  %v10062_v3 = vadd.f32 %v7610_v14, %v4180_v29 }
 0xa5c   :  { %v4184_v36 = vpop.f32.mrf.mxu1 }
 0xa5d   :  { %v4219_v57 = vadd.f32 %v4218_v35, %v4212_v59  ;;  %v4193_v46 = vadd.f32 %v4192_v45, %v10062_v3  ;;  %v4213_v1 = vmul.f32 %v10062_v3, %v10062_v3  ;;  %v10070_v60 = vadd.f32 %v7611_v7, %v4184_v36 }
 0xa5e   :  { %v4186_v52 = vpop.f32.mrf.mxu1 }
 0xa5f   :  { %v4220_v41 = vadd.f32 %v4219_v57, %v4213_v1  ;;  %v4194_v48 = vadd.f32 %v4193_v46, %v10070_v60  ;;  %v4214_v25 = vmul.f32 %v10070_v60, %v10070_v60  ;;  %v10078_v29 = vadd.f32 %v7612_v0, %v4186_v52 }
 0xa61   :  { %v4215_v35 = vmul.f32 %v10078_v29, %v10078_v29  ;;  %v4195_v45 = vadd.f32 %v4194_v48, %v10078_v29  ;;  %v4221_v59 = vadd.f32 %v4220_v41, %v4214_v25 }
 0xa63   :  { %4196 = vadd.xlane.f32.xlu0 %v4195_v45  ;;  %v4222_v14 = vadd.f32 %v4221_v59, %v4215_v35 }
 0xa65   :  { %4223 = vadd.xlane.f32.xlu1 %v4222_v14 }
 0xa76   :  { %2858 = vrot.lane.b32.xlu1 %v9398_v27, %s7725_s25 }
 0xa79   :  { %2842 = vrot.lane.b32.xlu0 %v9400_v26, %s7725_s25 }
 0xa7a   :  { %2856 = vrot.lane.b32.xlu1 %v9419_v38, %s7725_s25 }
 0xa7d   :  { %2840 = vrot.lane.b32.xlu0 %v9421_v44, %s7725_s25 }
 0xa7e   :  { %2854 = vrot.lane.b32.xlu1 %v9445_v37, %s7725_s25 }
 0xa81   :  { %2838 = vrot.lane.b32.xlu0 %v9447_v62, %s7725_s25 }
 0xa82   :  { %2852 = vrot.lane.b32.xlu1 %v9471_v40, %s7725_s25 }
 0xa85   :  { %2836 = vrot.lane.b32.xlu0 %v9473_v39, %s7725_s25 }
 0xa86   :  { %2850 = vrot.lane.b32.xlu1 %v9499_v6, %s7725_s25 }
 0xa89   :  { %2834 = vrot.lane.b32.xlu0 %v9501_v63, %s7725_s25 }
 0xa8a   :  { %2848 = vrot.lane.b32.xlu1 %v9519_v2, %s7725_s25 }
 0xa8d   :  { %2832 = vrot.lane.b32.xlu0 %v9521_v30, %s7725_s25 }
 0xa8e   :  { %2846 = vrot.lane.b32.xlu1 %v9533_v58, %s7725_s25 }
 0xa91   :  { %2830 = vrot.lane.b32.xlu0 %v9535_v17, %s7725_s25 }
 0xa92   :  { %2844 = vrot.lane.b32.xlu1 %v9541_v53, %s7725_s25 }
 0xa95   :  { %2828 = vrot.lane.b32.xlu0 %v9543_v15, %s7725_s25 }
 0xa96   :  { %3072 = vrot.lane.b32.xlu1 %v9398_v27, %s7727_s8 }
 0xa99   :  { %3056 = vrot.lane.b32.xlu0 %v9400_v26, %s7727_s8 }
 0xa9a   :  { %3070 = vrot.lane.b32.xlu1 %v9419_v38, %s7727_s8 }
 0xa9d   :  { %3054 = vrot.lane.b32.xlu0 %v9421_v44, %s7727_s8 }
 0xa9e   :  { %3068 = vrot.lane.b32.xlu1 %v9445_v37, %s7727_s8 }
 0xaa1   :  { %3052 = vrot.lane.b32.xlu0 %v9447_v62, %s7727_s8 }
 0xaa2   :  { %3066 = vrot.lane.b32.xlu1 %v9471_v40, %s7727_s8 }
 0xaa5   :  { %3050 = vrot.lane.b32.xlu0 %v9473_v39, %s7727_s8 }
 0xaa6   :  { %3064 = vrot.lane.b32.xlu1 %v9499_v6, %s7727_s8 }
 0xaa9   :  { %3048 = vrot.lane.b32.xlu0 %v9501_v63, %s7727_s8 }
 0xaaa   :  { %3062 = vrot.lane.b32.xlu1 %v9519_v2, %s7727_s8 }
 0xaad   :  { %3046 = vrot.lane.b32.xlu0 %v9521_v30, %s7727_s8 }
 0xaae   :  { %3060 = vrot.lane.b32.xlu1 %v9533_v58, %s7727_s8 }
 0xab1   :  { %3044 = vrot.lane.b32.xlu0 %v9535_v17, %s7727_s8 }
 0xab2   :  { %3058 = vrot.lane.b32.xlu1 %v9541_v53, %s7727_s8 }
 0xab5   :  { %3042 = vrot.lane.b32.xlu0 %v9543_v15, %s7727_s8 }
 0xab6   :  { %3572 = vrot.lane.b32.xlu1 %v9398_v27, %s7731_s11 }
 0xab9   :  { %3556 = vrot.lane.b32.xlu0 %v9400_v26, %s7731_s11 }
 0xaba   :  { %3570 = vrot.lane.b32.xlu1 %v9419_v38, %s7731_s11 }
 0xabd   :  { %3554 = vrot.lane.b32.xlu0 %v9421_v44, %s7731_s11 }
 0xabe   :  { %3568 = vrot.lane.b32.xlu1 %v9445_v37, %s7731_s11 }
 0xac1   :  { %3552 = vrot.lane.b32.xlu0 %v9447_v62, %s7731_s11 }
 0xac2   :  { %3566 = vrot.lane.b32.xlu1 %v9471_v40, %s7731_s11 }
 0xac5   :  { %3550 = vrot.lane.b32.xlu0 %v9473_v39, %s7731_s11 }
 0xac6   :  { %3564 = vrot.lane.b32.xlu1 %v9499_v6, %s7731_s11 }
 0xac9   :  { %3548 = vrot.lane.b32.xlu0 %v9501_v63, %s7731_s11 }
 0xaca   :  { %3562 = vrot.lane.b32.xlu1 %v9519_v2, %s7731_s11 }
 0xacd   :  { %3546 = vrot.lane.b32.xlu0 %v9521_v30, %s7731_s11 }
 0xace   :  { %3560 = vrot.lane.b32.xlu1 %v9533_v58, %s7731_s11 }
 0xad1   :  { %3544 = vrot.lane.b32.xlu0 %v9535_v17, %s7731_s11 }
 0xad2   :  { %3558 = vrot.lane.b32.xlu1 %v9541_v53, %s7731_s11 }
 0xad5   :  { %3542 = vrot.lane.b32.xlu0 %v9543_v15, %s7731_s11 }
 0xad6   :  { %3854 = vrot.lane.b32.xlu1 %v9398_v27, %s7733_s13 }
 0xad9   :  { %3838 = vrot.lane.b32.xlu0 %v9400_v26, %s7733_s13 }
 0xada   :  { %3852 = vrot.lane.b32.xlu1 %v9419_v38, %s7733_s13 }
 0xadd   :  { %3836 = vrot.lane.b32.xlu0 %v9421_v44, %s7733_s13 }
 0xade   :  { %3850 = vrot.lane.b32.xlu1 %v9445_v37, %s7733_s13 }
 0xae1   :  { %3834 = vrot.lane.b32.xlu0 %v9447_v62, %s7733_s13 }
 0xae2   :  { %3848 = vrot.lane.b32.xlu1 %v9471_v40, %s7733_s13 }
 0xae5   :  { %3832 = vrot.lane.b32.xlu0 %v9473_v39, %s7733_s13 }
 0xae6   :  { %3846 = vrot.lane.b32.xlu1 %v9499_v6, %s7733_s13 }
 0xae9   :  { %3830 = vrot.lane.b32.xlu0 %v9501_v63, %s7733_s13 }
 0xaea   :  { %3844 = vrot.lane.b32.xlu1 %v9519_v2, %s7733_s13 }
 0xaec   :  { %v4197_v36 = vpop.xlane.xlu0 %4196 }
 0xaed   :  { %v4198_v57 = vrot.slane %v4197_v36, 4  ;;  %3828 = vrot.lane.b32.xlu0 %v9521_v30, %s7733_s13 }
 0xaee   :  { %3842 = vrot.lane.b32.xlu1 %v9533_v58, %s7733_s13  ;;  %v4224_v46 = vpop.xlane.xlu1 %4223 }
 0xaef   :  { %v4199_v1 = vadd.f32 %v4198_v57, %v4197_v36  ;;  %v4225_v7 = vrot.slane %v4224_v46, 4 }
 0xaf0   :  { %v2843_v52 = vpop.permute.xlu0 %2842 }
 0xaf1   :  { %v4226_v41 = vadd.f32 %v4225_v7, %v4224_v46  ;;  %3826 = vrot.lane.b32.xlu0 %v9535_v17, %s7733_s13  ;;  %v4200_v48 = vrot.slane %v4199_v1, 2 }
 0xaf2   :  { %3840 = vrot.lane.b32.xlu1 %v9541_v53, %s7733_s13  ;;  %v2859_v25 = vpop.permute.xlu1 %2858 }
 0xaf3   :  { %v2867_v0 = vsel %vm591_vm2, %v2843_v52, %v2859_v25  ;;  %v2875_v35 = vsel %vm591_vm2, %v2859_v25, %v2843_v52  ;;  %v4201_v45 = vadd.f32 %v4200_v48, %v4199_v1  ;;  %v4227_v59 = vrot.slane %v4226_v41, 2 }
 0xaf4   :  { %v2890_v14 = vmul.f32 %v2875_v35, %v12618_v9  ;;  %v2841_v36 = vpop.permute.xlu0 %2840  ;;  %v2891_v57 = vmul.f32 %v2867_v0, %v12619_v49 }
 0xaf5   :  { %3824 = vrot.lane.b32.xlu0 %v9543_v15, %s7733_s13  ;;  %v4202_v46 = vrot.slane %v4201_v45, 1  ;;  %v4228_v7 = vadd.f32 %v4227_v59, %v4226_v41 }
 0xaf6   :  { %v2857_v12 = vpop.permute.xlu1 %2856  ;;  %2913 = vmatprep.subr.mxu0 %v2891_v57 }
 0xaf7   :  { %v2866_v18 = vsel %vm591_vm2, %v2841_v36, %v2857_v12  ;;  %v2874_v52 = vsel %vm591_vm2, %v2857_v12, %v2841_v36  ;;  %2914 = vmatpush1.msra.mxu0 %v2890_v14  ;;  %v4203_v1 = vadd.f32 %v4202_v46, %v4201_v45  ;;  %v4229_v48 = vrot.slane %v4228_v7, 1 }
 0xaf8   :  { %v2888_v25 = vmul.f32 %v2874_v52, %v12618_v9  ;;  %v2839_v35 = vpop.permute.xlu0 %2838  ;;  %v2889_v0 = vmul.f32 %v2866_v18, %v12619_v49 }
 0xaf9   :  { %7562 = vpush %v4203_v1  ;;  %v4230_v22 = vadd.f32 %v4229_v48, %v4228_v7 }
 0xafa   :  { %v2855_v56 = vpop.permute.xlu1 %2854  ;;  %2915 = vmatprep.subr.mxu0 %v2889_v0 }
 0xafb   :  { %v2865_v41 = vsel %vm591_vm2, %v2839_v35, %v2855_v56  ;;  %v2873_v59 = vsel %vm591_vm2, %v2855_v56, %v2839_v35  ;;  %2916 = vmatpush1.msra.mxu0 %v2888_v25  ;;  %7564 = vpush %v4230_v22 }
 0xafc   :  { %v2886_v12 = vmul.f32 %v2873_v59, %v12618_v9  ;;  %v2837_v45 = vpop.permute.xlu0 %2836  ;;  %v2887_v14 = vmul.f32 %v2865_v41, %v12619_v49 }
 0xafe   :  { %v2853_v36 = vpop.permute.xlu1 %2852  ;;  %2917 = vmatprep.subr.mxu0 %v2887_v14 }
 0xaff   :  { %v2864_v18 = vsel %vm591_vm2, %v2837_v45, %v2853_v36  ;;  %v2872_v57 = vsel %vm591_vm2, %v2853_v36, %v2837_v45  ;;  %2918 = vmatpush1.msra.mxu0 %v2886_v12 }
 0xb00   :  { %v2884_v46 = vmul.f32 %v2872_v57, %v12618_v9  ;;  %v2835_v7 = vpop.permute.xlu0 %2834  ;;  %v2885_v56 = vmul.f32 %v2864_v18, %v12619_v49 }
 0xb02   :  { %v2851_v22 = vpop.permute.xlu1 %2850  ;;  %2919 = vmatprep.subr.mxu0 %v2885_v56 }
 0xb03   :  { %v2863_v52 = vsel %vm591_vm2, %v2835_v7, %v2851_v22  ;;  %v2871_v1 = vsel %vm591_vm2, %v2851_v22, %v2835_v7  ;;  %2920 = vmatpush1.msra.mxu0 %v2884_v46 }
 0xb04   :  { %v2882_v48 = vmul.f32 %v2871_v1, %v12618_v9  ;;  %v2833_v25 = vpop.permute.xlu0 %2832  ;;  %v2883_v35 = vmul.f32 %v2863_v52, %v12619_v49 }
 0xb06   :  { %v2849_v0 = vpop.permute.xlu1 %2848  ;;  %2921 = vmatprep.subr.mxu0 %v2883_v35 }
 0xb07   :  { %v2862_v41 = vsel %vm591_vm2, %v2833_v25, %v2849_v0  ;;  %v2870_v59 = vsel %vm591_vm2, %v2849_v0, %v2833_v25  ;;  %2922 = vmatpush1.msra.mxu0 %v2882_v48  ;;  %v2892_v0 = vld [vmem:[%s12462_s5 + $0x8] sm:$0xff] }
 0xb08   :  { %v2880_v12 = vmul.f32 %v2870_v59, %v12618_v9  ;;  %v2831_v45 = vpop.permute.xlu0 %2830  ;;  %v2881_v14 = vmul.f32 %v2862_v41, %v12619_v49 }
 0xb0a   :  { %v2847_v36 = vpop.permute.xlu1 %2846  ;;  %2923 = vmatprep.subr.mxu0 %v2881_v14 }
 0xb0b   :  { %v2861_v18 = vsel %vm591_vm2, %v2831_v45, %v2847_v36  ;;  %v2869_v57 = vsel %vm591_vm2, %v2847_v36, %v2831_v45  ;;  %2924 = vmatpush1.msra.mxu0 %v2880_v12 }
 0xb0c   :  { %v2878_v46 = vmul.f32 %v2869_v57, %v12618_v9  ;;  %v2829_v7 = vpop.permute.xlu0 %2828  ;;  %v2879_v56 = vmul.f32 %v2861_v18, %v12619_v49 }
 0xb0e   :  { %v2845_v22 = vpop.permute.xlu1 %2844  ;;  %2925 = vmatprep.subr.mxu0 %v2879_v56 }
 0xb0f   :  { %v2860_v52 = vsel %vm591_vm2, %v2829_v7, %v2845_v22  ;;  %v2868_v1 = vsel %vm591_vm2, %v2845_v22, %v2829_v7  ;;  %2926 = vmatpush1.msra.mxu0 %v2878_v46 }
 0xb10   :  { %v2876_v48 = vmul.f32 %v2868_v1, %v12618_v9  ;;  %v3057_v25 = vpop.permute.xlu0 %3056  ;;  %v2877_v35 = vmul.f32 %v2860_v52, %v12619_v49 }
 0xb12   :  { %v3073_v41 = vpop.permute.xlu1 %3072  ;;  %2927 = vmatprep.subr.mxu0 %v2877_v35 }
 0xb13   :  { %v3081_v59 = vsel %vm600_vm4, %v3057_v25, %v3073_v41  ;;  %v3089_v12 = vsel %vm600_vm4, %v3073_v41, %v3057_v25  ;;  %2928 = vmatpush1.msra.mxu0 %v2876_v48 }
 0xb14   :  { %v3104_v45 = vmul.f32 %v3089_v12, %v12620_v32  ;;  %7450 = vmatmul.mubr.msk.f32.vlgmr.msra.gmra.mxu0 %vm2893_vm0, %v2892_v0  ;;  %v3055_v14 = vpop.permute.xlu0 %3054  ;;  %v3105_v36 = vmul.f32 %v3081_v59, %v12621_v19 }
 0xb15   :  { %3174 = vmatprep.mubr.f32.mxu0 %v12613_v23 }
 0xb16   :  { %v3071_v18 = vpop.permute.xlu1 %3070  ;;  %3126 = vmatprep.subr.mxu0 %v3105_v36 }
 0xb17   :  { %v3080_v57 = vsel %vm600_vm4, %v3055_v14, %v3071_v18  ;;  %v3088_v46 = vsel %vm600_vm4, %v3071_v18, %v3055_v14  ;;  %3127 = vmatpush1.msra.mxu0 %v3104_v45 }
 0xb18   :  { %v3102_v7 = vmul.f32 %v3088_v46, %v12620_v32  ;;  %v3053_v56 = vpop.permute.xlu0 %3052  ;;  %v3103_v22 = vmul.f32 %v3080_v57, %v12621_v19 }
 0xb1a   :  { %v3069_v52 = vpop.permute.xlu1 %3068  ;;  %3128 = vmatprep.subr.mxu0 %v3103_v22 }
 0xb1b   :  { %v3079_v1 = vsel %vm600_vm4, %v3053_v56, %v3069_v52  ;;  %v3087_v48 = vsel %vm600_vm4, %v3069_v52, %v3053_v56  ;;  %3129 = vmatpush1.msra.mxu0 %v3102_v7 }
 0xb1c   :  { %v3100_v25 = vmul.f32 %v3087_v48, %v12620_v32  ;;  %v3051_v35 = vpop.permute.xlu0 %3050  ;;  %v3101_v0 = vmul.f32 %v3079_v1, %v12621_v19 }
 0xb1e   :  { %v3067_v41 = vpop.permute.xlu1 %3066  ;;  %3130 = vmatprep.subr.mxu0 %v3101_v0 }
 0xb1f   :  { %v3078_v59 = vsel %vm600_vm4, %v3051_v35, %v3067_v41  ;;  %v3086_v12 = vsel %vm600_vm4, %v3067_v41, %v3051_v35  ;;  %3131 = vmatpush1.msra.mxu0 %v3100_v25 }
 0xb20   :  { %v3098_v45 = vmul.f32 %v3086_v12, %v12620_v32  ;;  %v3049_v14 = vpop.permute.xlu0 %3048  ;;  %v3099_v36 = vmul.f32 %v3078_v59, %v12621_v19 }
 0xb22   :  { %v3065_v18 = vpop.permute.xlu1 %3064  ;;  %3132 = vmatprep.subr.mxu0 %v3099_v36 }
 0xb23   :  { %v3077_v57 = vsel %vm600_vm4, %v3049_v14, %v3065_v18  ;;  %v3085_v46 = vsel %vm600_vm4, %v3065_v18, %v3049_v14  ;;  %3133 = vmatpush1.msra.mxu0 %v3098_v45 }
 0xb24   :  { %v3096_v7 = vmul.f32 %v3085_v46, %v12620_v32  ;;  %v3047_v56 = vpop.permute.xlu0 %3046  ;;  %v3097_v22 = vmul.f32 %v3077_v57, %v12621_v19 }
 0xb26   :  { %v3063_v52 = vpop.permute.xlu1 %3062  ;;  %3134 = vmatprep.subr.mxu0 %v3097_v22 }
 0xb27   :  { %v3076_v1 = vsel %vm600_vm4, %v3047_v56, %v3063_v52  ;;  %v3084_v48 = vsel %vm600_vm4, %v3063_v52, %v3047_v56  ;;  %3135 = vmatpush1.msra.mxu0 %v3096_v7  ;;  %v3106_v52 = vld [vmem:[%s12462_s5 + $0x10] sm:$0xff] }
 0xb28   :  { %v3094_v25 = vmul.f32 %v3084_v48, %v12620_v32  ;;  %v3045_v35 = vpop.permute.xlu0 %3044  ;;  %v3095_v0 = vmul.f32 %v3076_v1, %v12621_v19 }
 0xb2a   :  { %v3061_v41 = vpop.permute.xlu1 %3060  ;;  %3136 = vmatprep.subr.mxu0 %v3095_v0  ;;  %s7563_s16 = spop %7562 }
 0xb2b   :  { %v3075_v59 = vsel %vm600_vm4, %v3045_v35, %v3061_v41  ;;  %v3083_v12 = vsel %vm600_vm4, %v3061_v41, %v3045_v35  ;;  %s10304_s17 = smul.f32 0.00012207031, %s7563_s16  ;;  %3137 = vmatpush1.msra.mxu0 %v3094_v25 }
 0xb2c   :  { %v3092_v45 = vmul.f32 %v3083_v12, %v12620_v32  ;;  %s7565_s18 = spop %7564  ;;  %v3043_v14 = vpop.permute.xlu0 %3042  ;;  %v3093_v36 = vmul.f32 %v3075_v59, %v12621_v19 }
 0xb2d   :  { %s4235_s19 = smul.f32 %s10304_s17, %s10304_s17 }
 0xb2e   :  { %s4234_s20 = smul.f32 0.00012207031, %s7565_s18  ;;  %v3059_v18 = vpop.permute.xlu1 %3058  ;;  %3138 = vmatprep.subr.mxu0 %v3093_v36 }
 0xb2f   :  { %v3074_v57 = vsel %vm600_vm4, %v3043_v14, %v3059_v18  ;;  %v3082_v46 = vsel %vm600_vm4, %v3059_v18, %v3043_v14  ;;  %3139 = vmatpush1.msra.mxu0 %v3092_v45 }
 0xb30   :  { %s4236_s0 = ssub.f32 %s4234_s20, %s4235_s19  ;;  %v3090_v7 = vmul.f32 %v3082_v46, %v12620_v32  ;;  %v3557_v56 = vpop.permute.xlu0 %3556  ;;  %v3091_v22 = vmul.f32 %v3074_v57, %v12621_v19 }
 0xb32   :  { %s4237_s23 = smax.f32 %s7734_s1, %s4236_s0  ;;  %v3573_v1 = vpop.permute.xlu1 %3572  ;;  %3140 = vmatprep.subr.mxu0 %v3091_v22 }
 0xb33   :  { %s4247_s24 = sadd.f32 1e-05, %s4237_s23  ;;  %3141 = vmatpush1.msra.mxu0 %v3090_v7 }
 0xb34   :  { %7452 = vmatmul.mubr.msk.f32.vlgmr.msra.gmra.mxu0 %vm2893_vm0, %v3106_v52  ;;  %3344 = vmatprep.subr.mxu0 %v9398_v27  ;;  %v3555_v48 = vpop.permute.xlu0 %3554 }
 0xb35   :  { %v4248_v25 = vstv %s4247_s24  ;;  %3345 = vmatpush1.msra.mxu0 %v9400_v26  ;;  %3392 = vmatprep.mubr.f32.mxu0 %v12613_v23 }
 0xb36   :  { %7597 = vrsqrt.f32 %v4248_v25  ;;  %v3571_v35 = vpop.permute.xlu1 %3570  ;;  %3346 = vmatprep.subr.mxu0 %v9419_v38  ;;  %v3589_v38 = vsel %vm627_vm7, %v3573_v1, %v3557_v56 }
 0xb37   :  { %3347 = vmatpush1.msra.mxu0 %v9421_v44  ;;  %v3581_v44 = vsel %vm627_vm7, %v3557_v56, %v3573_v1 }
 0xb38   :  { %3348 = vmatprep.subr.mxu0 %v9445_v37  ;;  %v3553_v0 = vpop.permute.xlu0 %3552 }
 0xb39   :  { %3349 = vmatpush1.msra.mxu0 %v9447_v62  ;;  %v3588_v62 = vsel %vm627_vm7, %v3571_v35, %v3555_v48 }
 0xb3a   :  { %v3569_v41 = vpop.permute.xlu1 %3568  ;;  %3350 = vmatprep.subr.mxu0 %v9471_v40  ;;  %v3324_v40 = vld [vmem:[%s12462_s5 + $0x20] sm:$0xff] }
 0xb3b   :  { %3351 = vmatpush1.msra.mxu0 %v9473_v39  ;;  %v3580_v39 = vsel %vm627_vm7, %v3555_v48, %v3571_v35 }
 0xb3c   :  { %3352 = vmatprep.subr.mxu0 %v9499_v6  ;;  %v3551_v27 = vpop.permute.xlu0 %3550  ;;  %v3602_v12 = vmul.f32 %v3580_v39, %v12623_v16 }
 0xb3d   :  { %3353 = vmatpush1.msra.mxu0 %v9501_v63  ;;  %v3605_v63 = vmul.f32 %v3589_v38, %v12622_v33 }
 0xb3e   :  { %v3567_v26 = vpop.permute.xlu1 %3566  ;;  %3354 = vmatprep.subr.mxu0 %v9519_v2 }
 0xb3f   :  { %3355 = vmatpush1.msra.mxu0 %v9521_v30  ;;  %v3604_v30 = vmul.f32 %v3581_v44, %v12623_v16  ;;  %v3586_v45 = vsel %vm627_vm7, %v3567_v26, %v3551_v27 }
 0xb40   :  { %3356 = vmatprep.subr.mxu0 %v9533_v58  ;;  %v3549_v37 = vpop.permute.xlu0 %3548  ;;  %v3587_v58 = vsel %vm627_vm7, %v3569_v41, %v3553_v0  ;;  %v3599_v56 = vmul.f32 %v3586_v45, %v12622_v33 }
 0xb41   :  { %3357 = vmatpush1.msra.mxu0 %v9535_v17  ;;  %v3579_v17 = vsel %vm627_vm7, %v3553_v0, %v3569_v41  ;;  %v3601_v36 = vmul.f32 %v3587_v58, %v12622_v33 }
 0xb42   :  { %v3565_v6 = vpop.permute.xlu1 %3564  ;;  %3358 = vmatprep.subr.mxu0 %v9541_v53  ;;  %v3603_v53 = vmul.f32 %v3588_v62, %v12622_v33  ;;  %v3600_v18 = vmul.f32 %v3579_v17, %v12623_v16 }
 0xb43   :  { %v7598_v2 = vpop.eup %7597  ;;  %3359 = vmatpush1.msra.mxu0 %v9543_v15  ;;  %v3578_v15 = vsel %vm627_vm7, %v3551_v27, %v3567_v26  ;;  %v3585_v57 = vsel %vm627_vm7, %v3565_v6, %v3549_v37  ;;  %v3577_v46 = vsel %vm627_vm7, %v3549_v37, %v3565_v6 }
 0xb44   :  { %7566 = vpush %v7598_v2  ;;  %7454 = vmatmul.mubr.msk.f32.vlgmr.msra.gmra.mxu0 %vm2893_vm0, %v3324_v40  ;;  %3626 = vmatprep.subr.mxu0 %v3605_v63  ;;  %v3547_v59 = vpop.permute.xlu0 %3546  ;;  %v3598_v22 = vmul.f32 %v3578_v15, %v12623_v16  ;;  %v3597_v25 = vmul.f32 %v3585_v57, %v12622_v33 }
 0xb45   :  { %3627 = vmatpush1.msra.mxu0 %v3604_v30  ;;  %3674 = vmatprep.mubr.f32.mxu0 %v12613_v23  ;;  %v3596_v35 = vmul.f32 %v3577_v46, %v12623_v16  ;;  %v3606_v30 = vld [vmem:[%s12462_s5 + $0x30] sm:$0xff] }
 0xb46   :  { %v3563_v14 = vpop.permute.xlu1 %3562  ;;  %3628 = vmatprep.subr.mxu0 %v3603_v53 }
 0xb47   :  { %3629 = vmatpush1.msra.mxu0 %v3602_v12  ;;  %v3584_v52 = vsel %vm627_vm7, %v3563_v14, %v3547_v59  ;;  %v3576_v1 = vsel %vm627_vm7, %v3547_v59, %v3563_v14 }
 0xb48   :  { %3630 = vmatprep.subr.mxu0 %v3601_v36  ;;  %v3545_v7 = vpop.permute.xlu0 %3544  ;;  %v3595_v26 = vmul.f32 %v3584_v52, %v12622_v33  ;;  %v3594_v38 = vmul.f32 %v3576_v1, %v12623_v16 }
 0xb49   :  { %3631 = vmatpush1.msra.mxu0 %v3600_v18 }
 0xb4a   :  { %v3561_v48 = vpop.permute.xlu1 %3560  ;;  %3632 = vmatprep.subr.mxu0 %v3599_v56 }
 0xb4b   :  { %v3583_v0 = vsel %vm627_vm7, %v3561_v48, %v3545_v7  ;;  %3633 = vmatpush1.msra.mxu0 %v3598_v22  ;;  %v3575_v41 = vsel %vm627_vm7, %v3545_v7, %v3561_v48 }
 0xb4c   :  { %3634 = vmatprep.subr.mxu0 %v3597_v25  ;;  %v3543_v27 = vpop.permute.xlu0 %3542  ;;  %v3593_v37 = vmul.f32 %v3583_v0, %v12622_v33  ;;  %v3592_v62 = vmul.f32 %v3575_v41, %v12623_v16 }
 0xb4d   :  { %3635 = vmatpush1.msra.mxu0 %v3596_v35 }
 0xb4e   :  { %v3559_v44 = vpop.permute.xlu1 %3558  ;;  %3636 = vmatprep.subr.mxu0 %v3595_v26 }
 0xb4f   :  { %v3574_v40 = vsel %vm627_vm7, %v3543_v27, %v3559_v44  ;;  %v3582_v39 = vsel %vm627_vm7, %v3559_v44, %v3543_v27  ;;  %3637 = vmatpush1.msra.mxu0 %v3594_v38 }
 0xb50   :  { %v3590_v6 = vmul.f32 %v3574_v40, %v12623_v16  ;;  %3638 = vmatprep.subr.mxu0 %v3593_v37  ;;  %v3839_v63 = vpop.permute.xlu0 %3838  ;;  %v3591_v2 = vmul.f32 %v3582_v39, %v12622_v33 }
 0xb51   :  { %3639 = vmatpush1.msra.mxu0 %v3592_v62 }
 0xb52   :  { %v3855_v58 = vpop.permute.xlu1 %3854  ;;  %3640 = vmatprep.subr.mxu0 %v3591_v2 }
 0xb53   :  { %v3863_v17 = vsel %vm645_vm9, %v3839_v63, %v3855_v58  ;;  %v3871_v59 = vsel %vm645_vm9, %v3855_v58, %v3839_v63  ;;  %3641 = vmatpush1.msra.mxu0 %v3590_v6 }
 0xb54   :  { %v3886_v53 = vmul.f32 %v3863_v17, %v12624_v10  ;;  %7456 = vmatmul.mubr.msk.f32.vlgmr.msra.gmra.mxu0 %vm2893_vm0, %v3606_v30  ;;  %v3837_v12 = vpop.permute.xlu0 %3836  ;;  %v3887_v45 = vmul.f32 %v3871_v59, %v12625_v42 }
 0xb55   :  { %3956 = vmatprep.mubr.f32.mxu0 %v12613_v23 }
 0xb56   :  { %v3853_v15 = vpop.permute.xlu1 %3852  ;;  %3908 = vmatprep.subr.mxu0 %v3887_v45 }
 0xb57   :  { %v3862_v14 = vsel %vm645_vm9, %v3837_v12, %v3853_v15  ;;  %v3870_v36 = vsel %vm645_vm9, %v3853_v15, %v3837_v12  ;;  %3909 = vmatpush1.msra.mxu0 %v3886_v53 }
 0xb58   :  { %v3884_v18 = vmul.f32 %v3862_v14, %v12624_v10  ;;  %v3835_v57 = vpop.permute.xlu0 %3834  ;;  %v3885_v46 = vmul.f32 %v3870_v36, %v12625_v42 }
 0xb5a   :  { %v3851_v7 = vpop.permute.xlu1 %3850  ;;  %3910 = vmatprep.subr.mxu0 %v3885_v46 }
 0xb5b   :  { %v3861_v56 = vsel %vm645_vm9, %v3835_v57, %v3851_v7  ;;  %v3869_v22 = vsel %vm645_vm9, %v3851_v7, %v3835_v57  ;;  %3911 = vmatpush1.msra.mxu0 %v3884_v18 }
 0xb5c   :  { %v3882_v52 = vmul.f32 %v3861_v56, %v12624_v10  ;;  %v3833_v1 = vpop.permute.xlu0 %3832  ;;  %v3883_v48 = vmul.f32 %v3869_v22, %v12625_v42  ;;  %v3888_v56 = vld [vmem:[%s12462_s5 + $0x40] sm:$0xff]  ;;  %v4238_v22 = vstv %s10304_s17 }
 0xb5e   :  { %v3849_v25 = vpop.permute.xlu1 %3848  ;;  %3912 = vmatprep.subr.mxu0 %v3883_v48  ;;  %v4245_v48 = vsub.f32 %v10070_v60, %v4238_v22  ;;  %v7614_v60 = vld [vmem:[%s12460_s3 + $0xc8] sm:$0xff] }
 0xb5f   :  { %v3860_v35 = vsel %vm645_vm9, %v3833_v1, %v3849_v25  ;;  %v3868_v0 = vsel %vm645_vm9, %v3849_v25, %v3833_v1  ;;  %3913 = vmatpush1.msra.mxu0 %v3882_v52  ;;  %v4243_v52 = vsub.f32 %v10054_v21, %v4238_v22  ;;  %v4244_v1 = vsub.f32 %v10062_v3, %v4238_v22 }
 0xb60   :  { %v3880_v41 = vmul.f32 %v3860_v35, %v12624_v10  ;;  %v3831_v27 = vpop.permute.xlu0 %3830  ;;  %v3881_v26 = vmul.f32 %v3868_v0, %v12625_v42  ;;  %v4246_v25 = vsub.f32 %v10078_v29, %v4238_v22  ;;  %v4241_v0 = vsub.f32 %v10038_v43, %v4238_v22  ;;  %v7615_v43 = vld [vmem:[%s12460_s3 + $0xd0] sm:$0xff] }
 0xb62   :  { %v3847_v38 = vpop.permute.xlu1 %3846  ;;  %3914 = vmatprep.subr.mxu0 %v3881_v26 }
 0xb63   :  { %v3859_v44 = vsel %vm645_vm9, %v3831_v27, %v3847_v38  ;;  %v3867_v37 = vsel %vm645_vm9, %v3847_v38, %v3831_v27  ;;  %3915 = vmatpush1.msra.mxu0 %v3880_v41  ;;  %v4242_v41 = vsub.f32 %v10046_v13, %v4238_v22 }
 0xb64   :  { %v3878_v62 = vmul.f32 %v3859_v44, %v12624_v10  ;;  %v3829_v40 = vpop.permute.xlu0 %3828  ;;  %v3879_v39 = vmul.f32 %v3867_v37, %v12625_v42 }
 0xb66   :  { %v3845_v6 = vpop.permute.xlu1 %3844  ;;  %3916 = vmatprep.subr.mxu0 %v3879_v39 }
 0xb67   :  { %v3858_v63 = vsel %vm645_vm9, %v3829_v40, %v3845_v6  ;;  %v3866_v2 = vsel %vm645_vm9, %v3845_v6, %v3829_v40  ;;  %3917 = vmatpush1.msra.mxu0 %v3878_v62  ;;  %v7613_v62 = vld [vmem:[%s12460_s3 + $0xc0] sm:$0xff]  ;;  %v7616_v40 = vld [vmem:[%s12460_s3 + $0xd8] sm:$0xff]  ;;  %v4239_v6 = vsub.f32 %v10022_v4, %v4238_v22 }
 0xb68   :  { %v3876_v30 = vmul.f32 %v3858_v63, %v12624_v10  ;;  %v3827_v58 = vpop.permute.xlu0 %3826  ;;  %v3877_v17 = vmul.f32 %v3866_v2, %v12625_v42  ;;  %v4240_v63 = vsub.f32 %v10027_v55, %v4238_v22  ;;  %v7617_v2 = vld [vmem:[%s12460_s3 + $0x110] sm:$0xff]  ;;  %v7620_v4 = vld [vmem:[%s12460_s3 + $0xb8] sm:$0xff]  ;;  %v7624_v22 = vld [vmem:[%s12460_s3 + $0xa8] sm:$0xff] }
 0xb6a   :  { %v3843_v59 = vpop.permute.xlu1 %3842  ;;  %3918 = vmatprep.subr.mxu0 %v3877_v17 }
 0xb6b   :  { %v3857_v53 = vsel %vm645_vm9, %v3827_v58, %v3843_v59  ;;  %v3865_v12 = vsel %vm645_vm9, %v3843_v59, %v3827_v58  ;;  %3919 = vmatpush1.msra.mxu0 %v3876_v30  ;;  %v7618_v58 = vld [vmem:[%s12460_s3 + $0x118] sm:$0xff] }
 0xb6c   :  { %v3874_v45 = vmul.f32 %v3857_v53, %v12624_v10  ;;  %v3875_v15 = vmul.f32 %v3865_v12, %v12625_v42  ;;  %v3825_v14 = vpop.permute.xlu0 %3824  ;;  %v7619_v12 = vld [vmem:[%s12460_s3 + $0xb0] sm:$0xff] }
 0xb6e   :  { %v3841_v36 = vpop.permute.xlu1 %3840  ;;  %3920 = vmatprep.subr.mxu0 %v3875_v15  ;;  %v7621_v15 = vld [vmem:[%s12460_s3 + $0x100] sm:$0xff] }
 0xb6f   :  { %v3856_v18 = vsel %vm645_vm9, %v3825_v14, %v3841_v36  ;;  %v3864_v57 = vsel %vm645_vm9, %v3841_v36, %v3825_v14  ;;  %3921 = vmatpush1.msra.mxu0 %v3874_v45  ;;  %v7622_v36 = vld [vmem:[%s12460_s3 + $0x108] sm:$0xff] }
 0xb70   :  { %v3872_v46 = vmul.f32 %v3856_v18, %v12624_v10  ;;  %v3873_v7 = vmul.f32 %v3864_v57, %v12625_v42 }
 0xb72   :  { %3922 = vmatprep.subr.mxu0 %v3873_v7  ;;  %v7623_v7 = vld [vmem:[%s12460_s3 + $0xa0] sm:$0xff] }
 0xb73   :  { %3923 = vmatpush1.msra.mxu0 %v3872_v46 }
 0xb74   :  { %7458 = vmatmul.mubr.msk.f32.vlgmr.msra.gmra.mxu0 %vm2893_vm0, %v3888_v56 }
 0xb75   :  { %s7567_s14 = spop %7566  ;;  %4452 = vmatprep.mubr.f32.mxu0 %v12613_v23 }
 0xb76   :  { %v4251_v35 = vstv %s7567_s14 }
 0xb77   :  { %v4256_v27 = vmul.f32 %v4251_v35, %v4243_v52  ;;  %v4257_v26 = vmul.f32 %v4251_v35, %v4244_v1  ;;  %v4258_v38 = vmul.f32 %v4251_v35, %v4245_v48  ;;  %v4259_v44 = vmul.f32 %v4251_v35, %v4246_v25  ;;  %v7625_v1 = vld [vmem:[%s12460_s3 + $0xf0] sm:$0xff]  ;;  %v7626_v25 = vld [vmem:[%s12460_s3 + $0xf8] sm:$0xff] }
 0xb78   :  { %v4254_v37 = vmul.f32 %v4251_v35, %v4241_v0  ;;  %v4255_v21 = vmul.f32 %v4251_v35, %v4242_v41  ;;  %v4252_v59 = vmul.f32 %v4251_v35, %v4239_v6  ;;  %v4253_v53 = vmul.f32 %v4251_v35, %v4240_v63 }
 0xb79   :  { %v4264_v3 = vmul.f32 %v7613_v62, %v4256_v27  ;;  %v4265_v29 = vmul.f32 %v7614_v60, %v4257_v26  ;;  %v4266_v13 = vmul.f32 %v7615_v43, %v4258_v38  ;;  %v4267_v39 = vmul.f32 %v7616_v40, %v4259_v44  ;;  %v7627_v27 = vld [vmem:[%s12460_s3 + $0xe0] sm:$0xff]  ;;  %v7628_v38 = vld [vmem:[%s12460_s3 + $0xe8] sm:$0xff] }
 0xb7a   :  { %v4262_v45 = vmul.f32 %v7619_v12, %v4254_v37  ;;  %v4263_v55 = vmul.f32 %v7620_v4, %v4255_v21  ;;  %v4260_v56 = vmul.f32 %v7623_v7, %v4252_v59  ;;  %v4261_v52 = vmul.f32 %v7624_v22, %v4253_v53  ;;  %v4356_v22 = vld [vmem:[%s12461_s4 + $0x40] sm:$0xff] }
 0xb7b   :  { %v4274_v30 = vadd.f32 %v7617_v2, %v4266_v13  ;;  %v4275_v17 = vadd.f32 %v7618_v58, %v4267_v39  ;;  %v4272_v14 = vadd.f32 %v7621_v15, %v4264_v3  ;;  %v4273_v18 = vadd.f32 %v7622_v36, %v4265_v29 }
 0xb7c   :  { %v4270_v48 = vadd.f32 %v7625_v1, %v4262_v45  ;;  %v4271_v35 = vadd.f32 %v7626_v25, %v4263_v55  ;;  %v4268_v26 = vadd.f32 %v7627_v27, %v4260_v56  ;;  %v4269_v44 = vadd.f32 %v7628_v38, %v4261_v52 }
 0xb7d   :  { %v10488_v57 = vmax.f32 %v4274_v30, 0.0  ;;  %v10490_v46 = vmax.f32 %v4275_v17, 0.0  ;;  %v10508_v0 = vmax.f32 %v4272_v14, 0.0  ;;  %v10510_v41 = vmax.f32 %v4273_v18, 0.0 }
 0xb7e   :  { %v10522_v37 = vmax.f32 %v4270_v48, 0.0  ;;  %v10524_v21 = vmax.f32 %v4271_v35, 0.0  ;;  %v10530_v62 = vmax.f32 %v4268_v26, 0.0  ;;  %v10532_v3 = vmax.f32 %v4269_v44, 0.0  ;;  %v4357_v26 = vld [vmem:[%s12461_s4 + $0x48] sm:$0xff] }
 0xb7f   :  { %4338 = vrot.lane.b32.xlu1 %v10490_v46, %s7725_s25  ;;  %4330 = vrot.lane.b32.xlu0 %v10488_v57, %s7725_s25 }
 0xb83   :  { %4336 = vrot.lane.b32.xlu1 %v10510_v41, %s7725_s25  ;;  %4328 = vrot.lane.b32.xlu0 %v10508_v0, %s7725_s25 }
 0xb87   :  { %4334 = vrot.lane.b32.xlu1 %v10524_v21, %s7725_s25  ;;  %4326 = vrot.lane.b32.xlu0 %v10522_v37, %s7725_s25 }
 0xb8b   :  { %4332 = vrot.lane.b32.xlu1 %v10532_v3, %s7725_s25  ;;  %4324 = vrot.lane.b32.xlu0 %v10530_v62, %s7725_s25 }
 0xb8f   :  { %4298 = vrot.lane.b32.xlu1 %v10490_v46, %s7728_s9  ;;  %4290 = vrot.lane.b32.xlu0 %v10488_v57, %s7728_s9 }
 0xb93   :  { %4296 = vrot.lane.b32.xlu1 %v10510_v41, %s7728_s9  ;;  %4288 = vrot.lane.b32.xlu0 %v10508_v0, %s7728_s9 }
 0xb97   :  { %4652 = vrot.lane.b32.xlu1 %v10490_v46, %s7727_s8  ;;  %4644 = vrot.lane.b32.xlu0 %v10488_v57, %s7727_s8 }
 0xb9b   :  { %4294 = vrot.lane.b32.xlu1 %v10524_v21, %s7728_s9  ;;  %4286 = vrot.lane.b32.xlu0 %v10522_v37, %s7728_s9 }
 0xb9f   :  { %4650 = vrot.lane.b32.xlu1 %v10510_v41, %s7727_s8  ;;  %4642 = vrot.lane.b32.xlu0 %v10508_v0, %s7727_s8 }
 0xba3   :  { %4292 = vrot.lane.b32.xlu1 %v10532_v3, %s7728_s9  ;;  %4284 = vrot.lane.b32.xlu0 %v10530_v62, %s7728_s9 }
 0xba7   :  { %4648 = vrot.lane.b32.xlu1 %v10524_v21, %s7727_s8  ;;  %4640 = vrot.lane.b32.xlu0 %v10522_v37, %s7727_s8 }
 0xbab   :  { %4646 = vrot.lane.b32.xlu1 %v10532_v3, %s7727_s8  ;;  %4638 = vrot.lane.b32.xlu0 %v10530_v62, %s7727_s8 }
 0xbaf   :  { %4845 = vrot.lane.b32.xlu1 %v10490_v46, %s7729_s10  ;;  %4837 = vrot.lane.b32.xlu0 %v10488_v57, %s7729_s10 }
 0xbb3   :  { %4843 = vrot.lane.b32.xlu1 %v10510_v41, %s7729_s10  ;;  %4835 = vrot.lane.b32.xlu0 %v10508_v0, %s7729_s10 }
 0xbb7   :  { %4841 = vrot.lane.b32.xlu1 %v10524_v21, %s7729_s10  ;;  %4833 = vrot.lane.b32.xlu0 %v10522_v37, %s7729_s10 }
 0xbbb   :  { %4839 = vrot.lane.b32.xlu1 %v10532_v3, %s7729_s10  ;;  %4831 = vrot.lane.b32.xlu0 %v10530_v62, %s7729_s10 }
 0xbbf   :  { %5199 = vrot.lane.b32.xlu1 %v10490_v46, %s7730_s2  ;;  %5191 = vrot.lane.b32.xlu0 %v10488_v57, %s7730_s2 }
 0xbc3   :  { %5197 = vrot.lane.b32.xlu1 %v10510_v41, %s7730_s2  ;;  %5189 = vrot.lane.b32.xlu0 %v10508_v0, %s7730_s2 }
 0xbc7   :  { %5392 = vrot.lane.b32.xlu1 %v10490_v46, %s7731_s11  ;;  %5384 = vrot.lane.b32.xlu0 %v10488_v57, %s7731_s11 }
 0xbcb   :  { %5195 = vrot.lane.b32.xlu1 %v10524_v21, %s7730_s2  ;;  %5187 = vrot.lane.b32.xlu0 %v10522_v37, %s7730_s2 }
 0xbcf   :  { %5390 = vrot.lane.b32.xlu1 %v10510_v41, %s7731_s11  ;;  %5382 = vrot.lane.b32.xlu0 %v10508_v0, %s7731_s11 }
 0xbd3   :  { %5193 = vrot.lane.b32.xlu1 %v10532_v3, %s7730_s2  ;;  %5185 = vrot.lane.b32.xlu0 %v10530_v62, %s7730_s2 }
 0xbd7   :  { %5388 = vrot.lane.b32.xlu1 %v10524_v21, %s7731_s11  ;;  %5380 = vrot.lane.b32.xlu0 %v10522_v37, %s7731_s11 }
 0xbdb   :  { %5386 = vrot.lane.b32.xlu1 %v10532_v3, %s7731_s11  ;;  %5378 = vrot.lane.b32.xlu0 %v10530_v62, %s7731_s11 }
 0xbdf   :  { %5585 = vrot.lane.b32.xlu1 %v10490_v46, %s7732_s12  ;;  %5577 = vrot.lane.b32.xlu0 %v10488_v57, %s7732_s12 }
 0xbe3   :  { %5583 = vrot.lane.b32.xlu1 %v10510_v41, %s7732_s12  ;;  %5575 = vrot.lane.b32.xlu0 %v10508_v0, %s7732_s12 }
 0xbe7   :  { %5778 = vrot.lane.b32.xlu1 %v10490_v46, %s7733_s13  ;;  %5770 = vrot.lane.b32.xlu0 %v10488_v57, %s7733_s13 }
 0xbeb   :  { %5581 = vrot.lane.b32.xlu1 %v10524_v21, %s7732_s12  ;;  %5573 = vrot.lane.b32.xlu0 %v10522_v37, %s7732_s12 }
 0xbef   :  { %5776 = vrot.lane.b32.xlu1 %v10510_v41, %s7733_s13  ;;  %5768 = vrot.lane.b32.xlu0 %v10508_v0, %s7733_s13 }
 0xbf1   :  { %v4339_v60 = vpop.permute.xlu1 %4338  ;;  %v4331_v29 = vpop.permute.xlu0 %4330 }
 0xbf2   :  { %v4343_v43 = vsel %vm591_vm2, %v4331_v29, %v4339_v60  ;;  %v4347_v13 = vsel %vm591_vm2, %v4339_v60, %v4331_v29 }
 0xbf3   :  { %v4354_v40 = vmul.f32 %v4347_v13, %v12618_v9  ;;  %5579 = vrot.lane.b32.xlu1 %v10532_v3, %s7732_s12  ;;  %5571 = vrot.lane.b32.xlu0 %v10530_v62, %s7732_s12  ;;  %v4355_v39 = vmul.f32 %v4343_v43, %v12619_v49 }
 0xbf5   :  { %v4337_v6 = vpop.permute.xlu1 %4336  ;;  %4412 = vmatprep.subr.mxu0 %v4355_v39  ;;  %v4329_v63 = vpop.permute.xlu0 %4328 }
 0xbf6   :  { %v4342_v2 = vsel %vm591_vm2, %v4329_v63, %v4337_v6  ;;  %v4346_v30 = vsel %vm591_vm2, %v4337_v6, %v4329_v63  ;;  %4413 = vmatpush1.msra.mxu0 %v4354_v40  ;;  %v4358_v40 = vld [vmem:[%s12461_s4 + $0x50] sm:$0xff] }
 0xbf7   :  { %v4352_v58 = vmul.f32 %v4346_v30, %v12618_v9  ;;  %5774 = vrot.lane.b32.xlu1 %v10524_v21, %s7733_s13  ;;  %5766 = vrot.lane.b32.xlu0 %v10522_v37, %s7733_s13  ;;  %v4353_v17 = vmul.f32 %v4342_v2, %v12619_v49 }
 0xbf9   :  { %v4335_v59 = vpop.permute.xlu1 %4334  ;;  %4414 = vmatprep.subr.mxu0 %v4353_v17  ;;  %v4327_v53 = vpop.permute.xlu0 %4326  ;;  %v4359_v17 = vld [vmem:[%s12461_s4 + $0x58] sm:$0xff] }
 0xbfa   :  { %v4341_v12 = vsel %vm591_vm2, %v4327_v53, %v4335_v59  ;;  %v4345_v45 = vsel %vm591_vm2, %v4335_v59, %v4327_v53  ;;  %4415 = vmatpush1.msra.mxu0 %v4352_v58 }
 0xbfb   :  { %v4350_v4 = vmul.f32 %v4345_v45, %v12618_v9  ;;  %5772 = vrot.lane.b32.xlu1 %v10532_v3, %s7733_s13  ;;  %5764 = vrot.lane.b32.xlu0 %v10530_v62, %s7733_s13  ;;  %v4351_v55 = vmul.f32 %v4341_v12, %v12619_v49 }
 0xbfd   :  { %v4333_v15 = vpop.permute.xlu1 %4332  ;;  %4416 = vmatprep.subr.mxu0 %v4351_v55  ;;  %v4325_v14 = vpop.permute.xlu0 %4324 }
 0xbfe   :  { %v4340_v36 = vsel %vm591_vm2, %v4325_v14, %v4333_v15  ;;  %v4344_v18 = vsel %vm591_vm2, %v4333_v15, %v4325_v14  ;;  %4417 = vmatpush1.msra.mxu0 %v4350_v4  ;;  %v4360_v15 = vld [vmem:[%s12461_s4 + $0x60] sm:$0xff] }
 0xbff   :  { %v4348_v7 = vmul.f32 %v4344_v18, %v12618_v9  ;;  %v4349_v56 = vmul.f32 %v4340_v36, %v12619_v49 }
 0xc01   :  { %v4299_v52 = vpop.permute.xlu1 %4298  ;;  %4418 = vmatprep.subr.mxu0 %v4349_v56  ;;  %v4291_v1 = vpop.permute.xlu0 %4290 }
 0xc02   :  { %v4303_v48 = vsel %vm582_vm3, %v4291_v1, %v4299_v52  ;;  %v4307_v25 = vsel %vm582_vm3, %v4299_v52, %v4291_v1  ;;  %4419 = vmatpush1.msra.mxu0 %v4348_v7  ;;  %v4361_v52 = vld [vmem:[%s12461_s4 + $0x68] sm:$0xff] }
 0xc03   :  { %v4314_v35 = vmul.f32 %v4307_v25, %v12609_v51  ;;  %7465 = vmatmul.mubr.msk.f32.vlgmr.msra.gmra.mxu0 %vm12629_vm10, %v4356_v22  ;;  %v4315_v27 = vmul.f32 %v4303_v48, %v12610_v50  ;;  %v2963_v25 = vpop.f32.mrf.mxu0  ;;  %vm12636_vm10 = vmmov %vm12634_vm1 }
 0xc04   :  { %4458 = vmatprep.mubr.f32.mxu0 %v12613_v23 }
 0xc05   :  { %v4297_v38 = vpop.permute.xlu1 %4296  ;;  %4549 = vmatprep.subr.mxu1 %v4315_v27  ;;  %v4289_v44 = vpop.permute.xlu0 %4288 }
 0xc06   :  { %v4302_v60 = vsel %vm582_vm3, %v4289_v44, %v4297_v38  ;;  %v4306_v29 = vsel %vm582_vm3, %v4297_v38, %v4289_v44  ;;  %4550 = vmatpush1.msra.mxu1 %v4314_v35  ;;  %v4362_v44 = vld [vmem:[%s12461_s4 + $0x70] sm:$0xff] }
 0xc07   :  { %v4312_v43 = vmul.f32 %v4306_v29, %v12609_v51  ;;  %7466 = vmatmul.mubr.msk.f32.gmra.mxu0 %vm12630_vm12, %v4357_v26  ;;  %v4313_v13 = vmul.f32 %v4302_v60, %v12610_v50  ;;  %v4316_v60 = vld [vmem:[%s12461_s4] sm:$0xff]  ;;  %vm12637_vm12 = vmmov %vm12634_vm1 }
 0xc08   :  { %4464 = vmatprep.mubr.f32.mxu0 %v12613_v23 }
 0xc09   :  { %v4653_v39 = vpop.permute.xlu1 %4652  ;;  %4551 = vmatprep.subr.mxu1 %v4313_v13  ;;  %v4645_v6 = vpop.permute.xlu0 %4644 }
 0xc0a   :  { %v4657_v63 = vsel %vm600_vm4, %v4645_v6, %v4653_v39  ;;  %v4661_v2 = vsel %vm600_vm4, %v4653_v39, %v4645_v6  ;;  %4552 = vmatpush1.msra.mxu1 %v4312_v43  ;;  %v2965_v13 = vpop.f32.mrf.mxu0 }
 0xc0b   :  { %v4668_v30 = vmul.f32 %v4661_v2, %v12620_v32  ;;  %7467 = vmatmul.mubr.msk.f32.gmra.mxu0 %vm12631_vm13, %v4358_v40  ;;  %v4669_v58 = vmul.f32 %v4657_v63, %v12621_v19  ;;  %vm12638_vm13 = vmmov %vm12634_vm1 }
 0xc0c   :  { %4470 = vmatprep.mubr.f32.mxu0 %v12613_v23  ;;  %v3176_v2 = vpop.f32.mrf.mxu0 }
 0xc0d   :  { %v4295_v59 = vpop.permute.xlu1 %4294  ;;  %4726 = vmatprep.subr.mxu0 %v4669_v58  ;;  %v4287_v53 = vpop.permute.xlu0 %4286  ;;  %v4317_v58 = vld [vmem:[%s12461_s4 + $0x8] sm:$0xff] }
 0xc0e   :  { %v4301_v12 = vsel %vm582_vm3, %v4287_v53, %v4295_v59  ;;  %v4305_v45 = vsel %vm582_vm3, %v4295_v59, %v4287_v53  ;;  %4727 = vmatpush1.msra.mxu0 %v4668_v30  ;;  %v4363_v30 = vld [vmem:[%s12461_s4 + $0x78] sm:$0xff] }
 0xc0f   :  { %v4310_v4 = vmul.f32 %v4305_v45, %v12609_v51  ;;  %7468 = vmatmul.mubr.msk.f32.gmra.mxu0 %vm12632_vm14, %v4359_v17  ;;  %v4311_v55 = vmul.f32 %v4301_v12, %v12610_v50  ;;  %vm12639_vm14 = vmmov %vm12634_vm1 }
 0xc10   :  { %4476 = vmatprep.mubr.f32.mxu0 %v12613_v23 }
 0xc11   :  { %v4651_v14 = vpop.permute.xlu1 %4650  ;;  %4553 = vmatprep.subr.mxu1 %v4311_v55  ;;  %v4643_v36 = vpop.permute.xlu0 %4642 }
 0xc12   :  { %v4656_v18 = vsel %vm600_vm4, %v4643_v36, %v4651_v14  ;;  %v4660_v7 = vsel %vm600_vm4, %v4651_v14, %v4643_v36  ;;  %4554 = vmatpush1.msra.mxu1 %v4310_v4  ;;  %v3178_v55 = vpop.f32.mrf.mxu0  ;;  %v4670_v14 = vld [vmem:[%s12461_s4 + $0x80] sm:$0xff]  ;;  %v3038_v36 = vadd.f32 %v10003_v54, %v2963_v25 }
 0xc13   :  { %v4666_v56 = vmul.f32 %v4660_v7, %v12620_v32  ;;  %7469 = vmatmul.mubr.msk.f32.gmra.mxu0 %vm12633_vm15, %v4360_v15  ;;  %v4667_v22 = vmul.f32 %v4656_v18, %v12621_v19  ;;  %v4318_v15 = vld [vmem:[%s12461_s4 + $0x10] sm:$0xff]  ;;  %vm12640_vm15 = vmmov %vm12634_vm1 }
 0xc14   :  { %4482 = vmatprep.mubr.f32.mxu0 %v12613_v23 }
 0xc15   :  { %v4293_v1 = vpop.permute.xlu1 %4292  ;;  %4728 = vmatprep.subr.mxu0 %v4667_v22  ;;  %v4285_v48 = vpop.permute.xlu0 %4284 }
 0xc16   :  { %v4300_v35 = vsel %vm582_vm3, %v4285_v48, %v4293_v1  ;;  %v4304_v27 = vsel %vm582_vm3, %v4293_v1, %v4285_v48  ;;  %4729 = vmatpush1.msra.mxu0 %v4666_v56  ;;  %v3040_v56 = vadd.f32 %v10005_v28, %v2965_v13  ;;  %v3181_v1 = vadd.f32 %v3176_v2, %v3038_v36  ;;  %v3394_v48 = vpop.f32.mrf.mxu0 }
 0xc17   :  { %v4308_v26 = vmul.f32 %v4304_v27, %v12609_v51  ;;  %7470 = vmatmul.mubr.msk.f32.gmra.mxu0 %vm12634_vm1, %v4361_v52  ;;  %v4309_v38 = vmul.f32 %v4300_v35, %v12610_v50 }
 0xc18   :  { %4488 = vmatprep.mubr.f32.mxu0 %v12613_v23  ;;  %v3182_v25 = vadd.f32 %v3178_v55, %v3040_v56 }
 0xc19   :  { %v4649_v29 = vpop.permute.xlu1 %4648  ;;  %4555 = vmatprep.subr.mxu1 %v4309_v38  ;;  %v4641_v43 = vpop.permute.xlu0 %4640  ;;  %v4671_v38 = vld [vmem:[%s12461_s4 + $0x88] sm:$0xff] }
 0xc1a   :  { %v4655_v40 = vsel %vm600_vm4, %v4641_v43, %v4649_v29  ;;  %v4659_v39 = vsel %vm600_vm4, %v4649_v29, %v4641_v43  ;;  %4556 = vmatpush1.msra.mxu1 %v4308_v26  ;;  %v4319_v26 = vld [vmem:[%s12461_s4 + $0x18] sm:$0xff]  ;;  %v3323_v43 = vadd.f32 %v10009_v24, %v3182_v25 }
 0xc1b   :  { %v4664_v6 = vmul.f32 %v4659_v39, %v12620_v32  ;;  %7471 = vmatmul.mubr.msk.f32.gmra.mxu0 %vm12635_vm11, %v4362_v44  ;;  %7473 = vmatmul.mubr.msk.f32.vlgmr.msra.gmra.mxu1 %vm12636_vm10, %v4316_v60  ;;  %v4665_v63 = vmul.f32 %v4655_v40, %v12621_v19  ;;  %v3396_v60 = vpop.f32.mrf.mxu0  ;;  %vm12641_vm11 = vmmov %vm12634_vm1  ;;  %v12647_v25 = vld [vmem:[#allocation29_spill] sm:$0xff] }
 0xc1c   :  { %4494 = vmatprep.mubr.f32.mxu0 %v12613_v23  ;;  %4595 = vmatprep.mubr.f32.mxu1 %v12613_v23  ;;  %v3400_v39 = vadd.f32 %v3396_v60, %v3323_v43  ;;  %vm12642_vm10 = vmmov %vm12634_vm1 }
 0xc1d   :  { %v4647_v17 = vpop.permute.xlu1 %4646  ;;  %4730 = vmatprep.subr.mxu0 %v4665_v63  ;;  %v4639_v59 = vpop.permute.xlu0 %4638  ;;  %v4320_v63 = vld [vmem:[%s12461_s4 + $0x20] sm:$0xff] }
 0xc1e   :  { %v4654_v53 = vsel %vm600_vm4, %v4639_v59, %v4647_v17  ;;  %v4658_v12 = vsel %vm600_vm4, %v4647_v17, %v4639_v59  ;;  %4731 = vmatpush1.msra.mxu0 %v4664_v6  ;;  %v3676_v6 = vpop.f32.mrf.mxu0  ;;  %v3541_v59 = vadd.f32 %v10013_v8, %v3400_v39 }
 0xc1f   :  { %v4662_v45 = vmul.f32 %v4658_v12, %v12620_v32  ;;  %7472 = vmatmul.mubr.msk.f32.gmra.mxu0 %vm12637_vm12, %v4363_v30  ;;  %7474 = vmatmul.mubr.msk.f32.gmra.mxu1 %vm12638_vm13, %v4317_v58  ;;  %v4663_v4 = vmul.f32 %v4654_v53, %v12621_v19  ;;  %vm12643_vm12 = vmmov %vm12634_vm1 }
 0xc20   :  { %4601 = vmatprep.mubr.f32.mxu1 %v12613_v23  ;;  %4766 = vmatprep.mubr.f32.mxu0 %v12613_v23  ;;  %vm12644_vm13 = vmmov %vm12634_vm1 }
 0xc21   :  { %v4846_v18 = vpop.permute.xlu1 %4845  ;;  %4732 = vmatprep.subr.mxu0 %v4663_v4  ;;  %v4838_v7 = vpop.permute.xlu0 %4837 }
 0xc22   :  { %v4850_v22 = vsel %vm609_vm5, %v4838_v7, %v4846_v18  ;;  %v4854_v52 = vsel %vm609_vm5, %v4846_v18, %v4838_v7  ;;  %4733 = vmatpush1.msra.mxu0 %v4662_v45  ;;  %v4322_v18 = vld [vmem:[%s12461_s4 + $0x30] sm:$0xff]  ;;  %v4674_v7 = vld [vmem:[%s12461_s4 + $0xa0] sm:$0xff] }
 0xc23   :  { %v4861_v35 = vmul.f32 %v4854_v52, %v12611_v61  ;;  %7475 = vmatmul.mubr.msk.f32.gmra.mxu1 %vm12639_vm14, %v4318_v15  ;;  %7481 = vmatmul.mubr.msk.f32.vlgmr.msra.gmra.mxu0 %vm12640_vm15, %v4670_v14  ;;  %v4862_v54 = vmul.f32 %v4850_v22, %v12612_v11  ;;  %vm12645_vm14 = vmmov %vm12634_vm1 }
 0xc24   :  { %5080 = vmatprep.subr.mxu0 %v10490_v46  ;;  %4607 = vmatprep.mubr.f32.mxu1 %v12613_v23  ;;  %vm12646_vm15 = vmmov %vm12634_vm1 }
 0xc25   :  { %5081 = vmatpush1.msra.mxu0 %v10488_v57  ;;  %v4844_v28 = vpop.permute.xlu1 %4843  ;;  %4919 = vmatprep.subr.mxu1 %v4862_v54  ;;  %v4836_v27 = vpop.permute.xlu0 %4835  ;;  %v3322_v57 = vadd.f32 %v10007_v20, %v3181_v1 }
 0xc26   :  { %5082 = vmatprep.subr.mxu0 %v10510_v41  ;;  %v4849_v46 = vsel %vm609_vm5, %v4836_v27, %v4844_v28  ;;  %v4853_v44 = vsel %vm609_vm5, %v4844_v28, %v4836_v27  ;;  %4772 = vmatprep.mubr.f32.mxu0 %v12613_v23 }
 0xc27   :  { %4920 = vmatpush1.msra.mxu1 %v4861_v35  ;;  %5083 = vmatpush1.msra.mxu0 %v10508_v0  ;;  %v4860_v29 = vmul.f32 %v4849_v46, %v12612_v11  ;;  %v4859_v41 = vmul.f32 %v4853_v44, %v12611_v61  ;;  %v3399_v13 = vadd.f32 %v3394_v48, %v3322_v57  ;;  %v574_v48 = vld [vmem:[%s12460_s3 + $0x2a0] sm:$0xf] }
 0xc28   :  { %7476 = vmatmul.mubr.msk.f32.gmra.mxu1 %vm12634_vm1, %v4319_v26  ;;  %7482 = vmatmul.mubr.msk.f32.gmra.mxu0 %vm12641_vm11, %v4671_v38  ;;  %v4323_v26 = vld [vmem:[%s12461_s4 + $0x38] sm:$0xff]  ;;  %v4675_v38 = vld [vmem:[%s12461_s4 + $0xa8] sm:$0xff]  ;;  %vm12648_vm11 = vmmov %vm12634_vm1 }
 0xc29   :  { %5084 = vmatprep.subr.mxu0 %v10524_v21  ;;  %v4842_v40 = vpop.permute.xlu1 %4841  ;;  %4921 = vmatprep.subr.mxu1 %v4860_v29  ;;  %v4834_v20 = vpop.permute.xlu0 %4833  ;;  %v4672_v21 = vld [vmem:[%s12461_s4 + $0x90] sm:$0xff]  ;;  %v3540_v30 = vadd.f32 %v10011_v47, %v3399_v13  ;;  %v4321_v47 = vld [vmem:[%s12461_s4 + $0x28] sm:$0xff] }
 0xc2a   :  { %5085 = vmatpush1.msra.mxu0 %v10522_v37  ;;  %v4848_v0 = vsel %vm609_vm5, %v4834_v20, %v4842_v40  ;;  %v4852_v24 = vsel %vm609_vm5, %v4842_v40, %v4834_v20  ;;  %4613 = vmatprep.mubr.f32.mxu1 %v12613_v23  ;;  %v4676_v40 = vld [vmem:[%s12461_s4 + $0xb0] sm:$0xff]  ;;  %v4863_v20 = vld [vmem:[%s12461_s4 + $0xc0] sm:$0xff] }
 0xc2b   :  { %5086 = vmatprep.subr.mxu0 %v10532_v3  ;;  %v4857_v37 = vmul.f32 %v4852_v24, %v12611_v61  ;;  %4778 = vmatprep.mubr.f32.mxu0 %v12613_v23  ;;  %v4858_v2 = vmul.f32 %v4848_v0, %v12612_v11  ;;  %v3678_v3 = vpop.f32.mrf.mxu0  ;;  %v3681_v45 = vadd.f32 %v3676_v6, %v3540_v30  ;;  %v12650_v24 = vld [vmem:[#allocation17_spill] sm:$0xff] }
 0xc2c   :  { %4922 = vmatpush1.msra.mxu1 %v4859_v41  ;;  %5087 = vmatpush1.msra.mxu0 %v10530_v62  ;;  %v4673_v62 = vld [vmem:[%s12461_s4 + $0x98] sm:$0xff]  ;;  %v3682_v55 = vadd.f32 %v3678_v3, %v3541_v59  ;;  %v4864_v3 = vld [vmem:[%s12461_s4 + $0xc8] sm:$0xff] }
 0xc2d   :  { %7477 = vmatmul.mubr.msk.f32.gmra.mxu1 %vm12642_vm10, %v4320_v63  ;;  %7483 = vmatmul.mubr.msk.f32.gmra.mxu0 %vm12643_vm12, %v4672_v21  ;;  %v4840_v58 = vpop.permute.xlu1 %4839  ;;  %v4832_v17 = vpop.permute.xlu0 %4831  ;;  %v3822_v56 = vadd.f32 %v10015_v31, %v3681_v45  ;;  %v575_v31 = vld [vmem:[%s12460_s3 + $0x2a8] sm:$0xf]  ;;  %vm12649_vm10 = vmmov %vm12634_vm1  ;;  %v4677_v59 = vld [vmem:[%s12461_s4 + $0xb8] sm:$0xff] }
 0xc2e   :  { %4923 = vmatprep.subr.mxu1 %v4858_v2  ;;  %v4847_v53 = vsel %vm609_vm5, %v4832_v17, %v4840_v58  ;;  %v4851_v12 = vsel %vm609_vm5, %v4840_v58, %v4832_v17  ;;  %4619 = vmatprep.mubr.f32.mxu1 %v12613_v23  ;;  %v3823_v28 = vadd.f32 %v12647_v25, %v3682_v55  ;;  %vm12651_vm12 = vmmov %vm12634_vm1  ;;  %v4865_v55 = vld [vmem:[%s12461_s4 + $0xd0] sm:$0xff] }
 0xc2f   :  { %v4855_v8 = vmul.f32 %v4851_v12, %v12611_v61  ;;  %4784 = vmatprep.mubr.f32.mxu0 %v12613_v23  ;;  %4924 = vmatpush1.msra.mxu1 %v4857_v37  ;;  %v4856_v4 = vmul.f32 %v4847_v53, %v12612_v11 }
 0xc31   :  { %7478 = vmatmul.mubr.msk.f32.gmra.mxu1 %vm12644_vm13, %v4321_v47  ;;  %7484 = vmatmul.mubr.msk.f32.gmra.mxu0 %vm12645_vm14, %v4673_v62  ;;  %v5200_v15 = vpop.permute.xlu1 %5199  ;;  %v5192_v14 = vpop.permute.xlu0 %5191  ;;  %vm12652_vm13 = vmmov %vm12634_vm1 }
 0xc32   :  { %4925 = vmatprep.subr.mxu1 %v4856_v4  ;;  %v5208_v36 = vsel %vm618_vm6, %v5200_v15, %v5192_v14  ;;  %4625 = vmatprep.mubr.f32.mxu1 %v12613_v23  ;;  %v5204_v44 = vsel %vm618_vm6, %v5192_v14, %v5200_v15  ;;  %vm12653_vm14 = vmmov %vm12634_vm1  ;;  %v5024_v15 = vld [vmem:[%s12461_s4 + $0x100] sm:$0xff] }
 0xc33   :  { %4790 = vmatprep.mubr.f32.mxu0 %v12613_v23  ;;  %4926 = vmatpush1.msra.mxu1 %v4855_v8  ;;  %v5216_v52 = vmul.f32 %v5208_v36, %v12615_v34  ;;  %v5215_v63 = vmul.f32 %v5204_v44, %v12650_v24 }
 0xc34   :  { %v3958_v22 = vpop.f32.mrf.mxu0 }
 0xc35   :  { %7479 = vmatmul.mubr.msk.f32.gmra.mxu1 %vm12646_vm15, %v4322_v18  ;;  %7485 = vmatmul.mubr.msk.f32.gmra.mxu0 %vm12634_vm1, %v4674_v7  ;;  %v5198_v1 = vpop.permute.xlu1 %5197  ;;  %v3963_v35 = vadd.f32 %v3958_v22, %v3822_v56  ;;  %v5190_v54 = vpop.permute.xlu0 %5189  ;;  %vm12654_vm15 = vmmov %vm12634_vm1 }
 0xc36   :  { %5273 = vmatprep.subr.mxu1 %v5216_v52  ;;  %4631 = vmatprep.mubr.f32.mxu1 %v12613_v23  ;;  %v3960_v27 = vpop.f32.mrf.mxu0  ;;  %v5207_v41 = vsel %vm618_vm6, %v5198_v1, %v5190_v54  ;;  %v5203_v39 = vsel %vm618_vm6, %v5190_v54, %v5198_v1  ;;  %v4866_v1 = vld [vmem:[%s12461_s4 + $0xd8] sm:$0xff] }
 0xc37   :  { %4796 = vmatprep.mubr.f32.mxu0 %v12613_v23  ;;  %v3964_v46 = vadd.f32 %v3960_v27, %v3823_v28  ;;  %v3965_v57 = vadd.f32 %v3963_v35, %v574_v48  ;;  %v5214_v21 = vmul.f32 %v5207_v41, %v12615_v34  ;;  %v5213_v30 = vmul.f32 %v5203_v39, %v12650_v24  ;;  %v5025_v48 = vld [vmem:[%s12461_s4 + $0x108] sm:$0xff] }
 0xc38   :  { %v4868_v41 = vld [vmem:[%s12461_s4 + $0xe8] sm:$0xff] }
 0xc39   :  { %v3966_v60 = vadd.f32 %v3964_v46, %v575_v31  ;;  %7480 = vmatmul.mubr.msk.f32.gmra.mxu1 %vm12648_vm11, %v4323_v26  ;;  %7486 = vmatmul.mubr.msk.f32.gmra.mxu0 %vm12649_vm10, %v4675_v38  ;;  %v5393_v29 = vpop.permute.xlu1 %5392  ;;  %v5385_v43 = vpop.permute.xlu0 %5384  ;;  %vm12655_vm11 = vmmov %vm12634_vm1  ;;  %v4867_v26 = vld [vmem:[%s12461_s4 + $0xe0] sm:$0xff]  ;;  %v5026_v38 = vld [vmem:[%s12461_s4 + $0x110] sm:$0xff] }
 0xc3a   :  { %v5401_v13 = vsel %vm627_vm7, %v5393_v29, %v5385_v43  ;;  %4802 = vmatprep.mubr.f32.mxu0 %v12613_v23  ;;  %4959 = vmatprep.mubr.f32.mxu1 %v12613_v23  ;;  %v5397_v47 = vsel %vm627_vm7, %v5385_v43, %v5393_v29  ;;  %vm12656_vm10 = vmmov %vm12634_vm1 }
 0xc3b   :  { %v3969_v6 = vcombine.low %v3965_v57, %v3966_v60  ;;  %v5409_v0 = vmul.f32 %v5401_v13, %v12622_v33  ;;  %v5408_v36 = vmul.f32 %v5397_v47, %v12623_v16  ;;  %v5027_v13 = vld [vmem:[%s12461_s4 + $0x118] sm:$0xff] }
 0xc3d   :  { %3971 = vst [vmem:[#allocation5] sm:$0xff] %v3969_v6  ;;  %7487 = vmatmul.mubr.msk.f32.gmra.mxu0 %vm12651_vm12, %v4676_v40  ;;  %7489 = vmatmul.mubr.msk.f32.vlgmr.msra.gmra.mxu1 %vm12652_vm13, %v4863_v20  ;;  %v5196_v37 = vpop.permute.xlu1 %5195  ;;  %v5188_v2 = vpop.permute.xlu0 %5187  ;;  %vm12657_vm12 = vmmov %vm12634_vm1 }
 0xc3e   :  { %5274 = vmatpush1.msra.mxu1 %v5215_v63  ;;  %5466 = vmatprep.subr.mxu0 %v5409_v0  ;;  %v5202_v58 = vsel %vm618_vm6, %v5188_v2, %v5196_v37  ;;  %v5206_v17 = vsel %vm618_vm6, %v5196_v37, %v5188_v2  ;;  %vm12658_vm13 = vmmov %vm12634_vm1  ;;  %v4869_v63 = vld [vmem:[%s12461_s4 + $0xf0] sm:$0xff]  ;;  %v12661_v37 = vld [vmem:[#allocation25_spill] sm:$0xff] }
 0xc3f   :  { %5275 = vmatprep.subr.mxu1 %v5214_v21  ;;  %v5211_v53 = vmul.f32 %v5202_v58, %v12650_v24  ;;  %4808 = vmatprep.mubr.f32.mxu0 %v12613_v23  ;;  %v5212_v12 = vmul.f32 %v5206_v17, %v12615_v34  ;;  %v5028_v21 = vld [vmem:[%s12461_s4 + $0x120] sm:$0xff]  ;;  %v4870_v17 = vld [vmem:[%s12461_s4 + $0xf8] sm:$0xff] }
 0xc40   :  { %5276 = vmatpush1.msra.mxu1 %v5213_v30  ;;  %4965 = vmatprep.mubr.f32.mxu1 %v12613_v23 }
 0xc41   :  { %7488 = vmatmul.mubr.msk.f32.gmra.mxu0 %vm12653_vm14, %v4677_v59  ;;  %7490 = vmatmul.mubr.msk.f32.gmra.mxu1 %vm12654_vm15, %v4864_v3  ;;  %v5391_v62 = vpop.permute.xlu1 %5390  ;;  %v5383_v45 = vpop.permute.xlu0 %5382  ;;  %vm12659_vm14 = vmmov %vm12634_vm1  ;;  %v5029_v59 = vld [vmem:[%s12461_s4 + $0x128] sm:$0xff] }
 0xc42   :  { %5277 = vmatprep.subr.mxu1 %v5212_v12  ;;  %v5396_v8 = vsel %vm627_vm7, %v5383_v45, %v5391_v62  ;;  %v5400_v4 = vsel %vm627_vm7, %v5391_v62, %v5383_v45  ;;  %4971 = vmatprep.mubr.f32.mxu1 %v12613_v23  ;;  %vm12660_vm15 = vmmov %vm12634_vm1  ;;  %v5030_v45 = vld [vmem:[%s12461_s4 + $0x130] sm:$0xff] }
 0xc43   :  { %5120 = vmatprep.mubr.f32.mxu0 %v12613_v23  ;;  %5278 = vmatpush1.msra.mxu1 %v5211_v53  ;;  %v5407_v14 = vmul.f32 %v5400_v4, %v12622_v33  ;;  %v5406_v18 = vmul.f32 %v5396_v8, %v12623_v16  ;;  %v5217_v8 = vld [vmem:[%s12461_s4 + $0x140] sm:$0xff] }
 0xc45   :  { %7491 = vmatmul.mubr.msk.f32.gmra.mxu1 %vm12634_vm1, %v4865_v55  ;;  %7497 = vmatmul.mubr.msk.f32.vlgmr.msra.gmra.mxu0 %vm12655_vm11, %v5024_v15  ;;  %v5194_v7 = vpop.permute.xlu1 %5193  ;;  %v5186_v56 = vpop.permute.xlu0 %5185  ;;  %vm12662_vm11 = vmmov %vm12634_vm1  ;;  %v12666_v15 = vld [vmem:[#allocation21_spill] sm:$0xff] }
 0xc46   :  { %5467 = vmatpush1.msra.mxu0 %v5408_v36  ;;  %v5201_v22 = vsel %vm618_vm6, %v5186_v56, %v5194_v7  ;;  %v5205_v52 = vsel %vm618_vm6, %v5194_v7, %v5186_v56  ;;  %4977 = vmatprep.mubr.f32.mxu1 %v12613_v23 }
 0xc47   :  { %5468 = vmatprep.subr.mxu0 %v5407_v14  ;;  %v5209_v35 = vmul.f32 %v5201_v22, %v12650_v24  ;;  %5126 = vmatprep.mubr.f32.mxu0 %v12613_v23  ;;  %v5210_v54 = vmul.f32 %v5205_v52, %v12615_v34 }
 0xc48   :  { %5469 = vmatpush1.msra.mxu0 %v5406_v18 }
 0xc49   :  { %7492 = vmatmul.mubr.msk.f32.gmra.mxu1 %vm12656_vm10, %v4866_v1  ;;  %7498 = vmatmul.mubr.msk.f32.gmra.mxu0 %vm12657_vm12, %v5025_v48  ;;  %v5389_v25 = vpop.permute.xlu1 %5388  ;;  %v5381_v28 = vpop.permute.xlu0 %5380  ;;  %vm12663_vm10 = vmmov %vm12634_vm1  ;;  %v5031_v1 = vld [vmem:[%s12461_s4 + $0x138] sm:$0xff]  ;;  %v5218_v48 = vld [vmem:[%s12461_s4 + $0x148] sm:$0xff] }
 0xc4a   :  { %5279 = vmatprep.subr.mxu1 %v5210_v54  ;;  %v5395_v31 = vsel %vm627_vm7, %v5381_v28, %v5389_v25  ;;  %v5399_v27 = vsel %vm627_vm7, %v5389_v25, %v5381_v28  ;;  %4983 = vmatprep.mubr.f32.mxu1 %v12613_v23  ;;  %vm12664_vm12 = vmmov %vm12634_vm1 }
 0xc4b   :  { %v5404_v46 = vmul.f32 %v5395_v31, %v12623_v16  ;;  %5132 = vmatprep.mubr.f32.mxu0 %v12613_v23  ;;  %5280 = vmatpush1.msra.mxu1 %v5209_v35  ;;  %v5405_v44 = vmul.f32 %v5399_v27, %v12622_v33 }
 0xc4d   :  { %7493 = vmatmul.mubr.msk.f32.gmra.mxu1 %vm12658_vm13, %v4867_v26  ;;  %7499 = vmatmul.mubr.msk.f32.gmra.mxu0 %vm12659_vm14, %v5026_v38  ;;  %v5387_v57 = vpop.permute.xlu1 %5386  ;;  %v5379_v60 = vpop.permute.xlu0 %5378  ;;  %vm12665_vm13 = vmmov %vm12634_vm1  ;;  %v5219_v38 = vld [vmem:[%s12461_s4 + $0x150] sm:$0xff] }
 0xc4e   :  { %5470 = vmatprep.subr.mxu0 %v5405_v44  ;;  %v5394_v29 = vsel %vm627_vm7, %v5379_v60, %v5387_v57  ;;  %v5398_v43 = vsel %vm627_vm7, %v5387_v57, %v5379_v60  ;;  %4989 = vmatprep.mubr.f32.mxu1 %v12613_v23  ;;  %vm12667_vm14 = vmmov %vm12634_vm1 }
 0xc4f   :  { %v5402_v40 = vmul.f32 %v5394_v29, %v12623_v16  ;;  %5138 = vmatprep.mubr.f32.mxu0 %v12613_v23  ;;  %5471 = vmatpush1.msra.mxu0 %v5404_v46  ;;  %v5403_v20 = vmul.f32 %v5398_v43, %v12622_v33  ;;  %v5410_v46 = vld [vmem:[%s12461_s4 + $0x180] sm:$0xff] }
 0xc51   :  { %7494 = vmatmul.mubr.msk.f32.gmra.mxu1 %vm12660_vm15, %v4868_v41  ;;  %7500 = vmatmul.mubr.msk.f32.gmra.mxu0 %vm12634_vm1, %v5027_v13  ;;  %v5586_v39 = vpop.permute.xlu1 %5585  ;;  %v5578_v6 = vpop.permute.xlu0 %5577  ;;  %vm12668_vm15 = vmmov %vm12634_vm1 }
 0xc52   :  { %5472 = vmatprep.subr.mxu0 %v5403_v20  ;;  %v5594_v0 = vsel %vm636_vm8, %v5586_v39, %v5578_v6  ;;  %4995 = vmatprep.mubr.f32.mxu1 %v12613_v23  ;;  %v5590_v3 = vsel %vm636_vm8, %v5578_v6, %v5586_v39  ;;  %v5411_v20 = vld [vmem:[%s12461_s4 + $0x188] sm:$0xff] }
 0xc53   :  { %5144 = vmatprep.mubr.f32.mxu0 %v12613_v23  ;;  %5473 = vmatpush1.msra.mxu0 %v5402_v40  ;;  %v5602_v2 = vmul.f32 %v5594_v0, %v12661_v37  ;;  %v5601_v14 = vmul.f32 %v5590_v3, %v12666_v15  ;;  %v5220_v40 = vld [vmem:[%s12461_s4 + $0x158] sm:$0xff] }
 0xc55   :  { %7495 = vmatmul.mubr.msk.f32.gmra.mxu1 %vm12662_vm11, %v4869_v63  ;;  %7501 = vmatmul.mubr.msk.f32.gmra.mxu0 %vm12663_vm10, %v5028_v21  ;;  %v5584_v30 = vpop.permute.xlu1 %5583  ;;  %v5576_v58 = vpop.permute.xlu0 %5575  ;;  %vm12669_vm11 = vmmov %vm12634_vm1 }
 0xc56   :  { %5659 = vmatprep.subr.mxu1 %v5602_v2  ;;  %5001 = vmatprep.mubr.f32.mxu1 %v12613_v23  ;;  %v5593_v47 = vsel %vm636_vm8, %v5584_v30, %v5576_v58  ;;  %v5589_v4 = vsel %vm636_vm8, %v5576_v58, %v5584_v30  ;;  %vm12670_vm10 = vmmov %vm12634_vm1  ;;  %v5221_v30 = vld [vmem:[%s12461_s4 + $0x160] sm:$0xff]  ;;  %v5412_v58 = vld [vmem:[%s12461_s4 + $0x190] sm:$0xff] }
 0xc57   :  { %5150 = vmatprep.mubr.f32.mxu0 %v12613_v23  ;;  %v5600_v36 = vmul.f32 %v5593_v47, %v12661_v37  ;;  %v5599_v56 = vmul.f32 %v5589_v4, %v12666_v15 }
 0xc59   :  { %7496 = vmatmul.mubr.msk.f32.gmra.mxu1 %vm12664_vm12, %v4870_v17  ;;  %7502 = vmatmul.mubr.msk.f32.gmra.mxu0 %vm12665_vm13, %v5029_v59  ;;  %v5779_v53 = vpop.permute.xlu1 %5778  ;;  %v5771_v12 = vpop.permute.xlu0 %5770  ;;  %vm12671_vm12 = vmmov %vm12634_vm1 }
 0xc5a   :  { %v5787_v62 = vsel %vm645_vm9, %v5779_v53, %v5771_v12  ;;  %5156 = vmatprep.mubr.f32.mxu0 %v12613_v23  ;;  %5313 = vmatprep.mubr.f32.mxu1 %v12613_v23  ;;  %v5783_v25 = vsel %vm645_vm9, %v5771_v12, %v5779_v53  ;;  %vm12672_vm13 = vmmov %vm12634_vm1 }
 0xc5b   :  { %v5795_v55 = vmul.f32 %v5787_v62, %v12625_v42  ;;  %v5794_v57 = vmul.f32 %v5783_v25, %v12624_v10  ;;  %v5222_v62 = vld [vmem:[%s12461_s4 + $0x168] sm:$0xff]  ;;  %v5607_v25 = vld [vmem:[%s12461_s4 + $0x1e0] sm:$0xff] }
 0xc5d   :  { %7503 = vmatmul.mubr.msk.f32.gmra.mxu0 %vm12667_vm14, %v5030_v45  ;;  %7505 = vmatmul.mubr.msk.f32.vlgmr.msra.gmra.mxu1 %vm12668_vm15, %v5217_v8  ;;  %v5582_v18 = vpop.permute.xlu1 %5581  ;;  %v5574_v7 = vpop.permute.xlu0 %5573  ;;  %vm12673_vm14 = vmmov %vm12634_vm1  ;;  %v5413_v45 = vld [vmem:[%s12461_s4 + $0x198] sm:$0xff] }
 0xc5e   :  { %5660 = vmatpush1.msra.mxu1 %v5601_v14  ;;  %5852 = vmatprep.subr.mxu0 %v5795_v55  ;;  %v5588_v22 = vsel %vm636_vm8, %v5574_v7, %v5582_v18  ;;  %v5592_v52 = vsel %vm636_vm8, %v5582_v18, %v5574_v7  ;;  %vm12674_vm15 = vmmov %vm12634_vm1  ;;  %v5223_v55 = vld [vmem:[%s12461_s4 + $0x170] sm:$0xff]  ;;  %v5414_v14 = vld [vmem:[%s12461_s4 + $0x1a0] sm:$0xff] }
 0xc5f   :  { %5661 = vmatprep.subr.mxu1 %v5600_v36  ;;  %v5597_v35 = vmul.f32 %v5588_v22, %v12666_v15  ;;  %5162 = vmatprep.mubr.f32.mxu0 %v12613_v23  ;;  %v5598_v54 = vmul.f32 %v5592_v52, %v12661_v37  ;;  %v5224_v36 = vld [vmem:[%s12461_s4 + $0x178] sm:$0xff]  ;;  %v5415_v18 = vld [vmem:[%s12461_s4 + $0x1a8] sm:$0xff]  ;;  %v5416_v7 = vld [vmem:[%s12461_s4 + $0x1b0] sm:$0xff] }
 0xc60   :  { %5662 = vmatpush1.msra.mxu1 %v5599_v56  ;;  %5319 = vmatprep.mubr.f32.mxu1 %v12613_v23  ;;  %v5603_v56 = vld [vmem:[%s12461_s4 + $0x1c0] sm:$0xff]  ;;  %v5417_v22 = vld [vmem:[%s12461_s4 + $0x1b8] sm:$0xff]  ;;  %v5604_v52 = vld [vmem:[%s12461_s4 + $0x1c8] sm:$0xff] }
 0xc61   :  { %7504 = vmatmul.mubr.msk.f32.gmra.mxu0 %vm12634_vm1, %v5031_v1  ;;  %7506 = vmatmul.mubr.msk.f32.gmra.mxu1 %vm12669_vm11, %v5218_v48  ;;  %v5777_v28 = vpop.permute.xlu1 %5776  ;;  %v5769_v31 = vpop.permute.xlu0 %5768  ;;  %vm12675_vm11 = vmmov %vm12634_vm1  ;;  %v5605_v1 = vld [vmem:[%s12461_s4 + $0x1d0] sm:$0xff]  ;;  %v5796_v48 = vld [vmem:[%s12461_s4 + $0x200] sm:$0xff] }
 0xc62   :  { %5663 = vmatprep.subr.mxu1 %v5598_v54  ;;  %v5782_v27 = vsel %vm645_vm9, %v5769_v31, %v5777_v28  ;;  %v5786_v26 = vsel %vm645_vm9, %v5777_v28, %v5769_v31  ;;  %5325 = vmatprep.mubr.f32.mxu1 %v12613_v23  ;;  %v5797_v54 = vld [vmem:[%s12461_s4 + $0x208] sm:$0xff]  ;;  %v5798_v28 = vld [vmem:[%s12461_s4 + $0x210] sm:$0xff] }
 0xc63   :  { %5506 = vmatprep.mubr.f32.mxu0 %v12613_v23  ;;  %5664 = vmatpush1.msra.mxu1 %v5597_v35  ;;  %v5793_v44 = vmul.f32 %v5786_v26, %v12625_v42  ;;  %v5792_v60 = vmul.f32 %v5782_v27, %v12624_v10  ;;  %v5606_v35 = vld [vmem:[%s12461_s4 + $0x1d8] sm:$0xff]  ;;  %v5608_v31 = vld [vmem:[%s12461_s4 + $0x1e8] sm:$0xff]  ;;  %v5609_v26 = vld [vmem:[%s12461_s4 + $0x1f0] sm:$0xff] }
 0xc64   :  { %v5799_v27 = vld [vmem:[%s12461_s4 + $0x218] sm:$0xff] }
 0xc65   :  { %7507 = vmatmul.mubr.msk.f32.gmra.mxu1 %vm12670_vm10, %v5219_v38  ;;  %7513 = vmatmul.mubr.msk.f32.vlgmr.msra.gmra.mxu0 %vm12671_vm12, %v5410_v46  ;;  %v5580_v29 = vpop.permute.xlu1 %5579  ;;  %v5572_v43 = vpop.permute.xlu0 %5571  ;;  %vm12676_vm10 = vmmov %vm12634_vm1  ;;  %v5800_v38 = vld [vmem:[%s12461_s4 + $0x220] sm:$0xff]  ;;  %v5610_v46 = vld [vmem:[%s12461_s4 + $0x1f8] sm:$0xff] }
 0xc66   :  { %5853 = vmatpush1.msra.mxu0 %v5794_v57  ;;  %v5587_v41 = vsel %vm636_vm8, %v5572_v43, %v5580_v29  ;;  %v5591_v13 = vsel %vm636_vm8, %v5580_v29, %v5572_v43  ;;  %5331 = vmatprep.mubr.f32.mxu1 %v12613_v23  ;;  %vm12677_vm12 = vmmov %vm12634_vm1  ;;  %v5802_v57 = vld [vmem:[%s12461_s4 + $0x230] sm:$0xff] }
 0xc67   :  { %5854 = vmatprep.subr.mxu0 %v5793_v44  ;;  %v5595_v39 = vmul.f32 %v5587_v41, %v12666_v15  ;;  %5512 = vmatprep.mubr.f32.mxu0 %v12613_v23  ;;  %v5596_v6 = vmul.f32 %v5591_v13, %v12661_v37  ;;  %v5801_v44 = vld [vmem:[%s12461_s4 + $0x228] sm:$0xff] }
 0xc68   :  { %5855 = vmatpush1.msra.mxu0 %v5792_v60  ;;  %v5803_v60 = vld [vmem:[%s12461_s4 + $0x238] sm:$0xff] }
 0xc69   :  { %7508 = vmatmul.mubr.msk.f32.gmra.mxu1 %vm12672_vm13, %v5220_v40  ;;  %7514 = vmatmul.mubr.msk.f32.gmra.mxu0 %vm12673_vm14, %v5411_v20  ;;  %v5775_v0 = vpop.permute.xlu1 %5774  ;;  %v5767_v63 = vpop.permute.xlu0 %5766  ;;  %vm12678_vm13 = vmmov %vm12634_vm1 }
 0xc6a   :  { %5665 = vmatprep.subr.mxu1 %v5596_v6  ;;  %v5781_v21 = vsel %vm645_vm9, %v5767_v63, %v5775_v0  ;;  %v5785_v2 = vsel %vm645_vm9, %v5775_v0, %v5767_v63  ;;  %5337 = vmatprep.mubr.f32.mxu1 %v12613_v23  ;;  %vm12679_vm14 = vmmov %vm12634_vm1 }
 0xc6b   :  { %v5790_v17 = vmul.f32 %v5781_v21, %v12624_v10  ;;  %5518 = vmatprep.mubr.f32.mxu0 %v12613_v23  ;;  %5666 = vmatpush1.msra.mxu1 %v5595_v39  ;;  %v5791_v59 = vmul.f32 %v5785_v2, %v12625_v42 }
 0xc6d   :  { %7509 = vmatmul.mubr.msk.f32.gmra.mxu1 %vm12674_vm15, %v5221_v30  ;;  %7515 = vmatmul.mubr.msk.f32.gmra.mxu0 %vm12634_vm1, %v5412_v58  ;;  %v5773_v3 = vpop.permute.xlu1 %5772  ;;  %v5765_v53 = vpop.permute.xlu0 %5764  ;;  %vm12680_vm15 = vmmov %vm12634_vm1 }
 0xc6e   :  { %5856 = vmatprep.subr.mxu0 %v5791_v59  ;;  %v5780_v12 = vsel %vm645_vm9, %v5765_v53, %v5773_v3  ;;  %v5784_v47 = vsel %vm645_vm9, %v5773_v3, %v5765_v53  ;;  %5343 = vmatprep.mubr.f32.mxu1 %v12613_v23 }
 0xc6f   :  { %v5788_v8 = vmul.f32 %v5780_v12, %v12624_v10  ;;  %5524 = vmatprep.mubr.f32.mxu0 %v12613_v23  ;;  %5857 = vmatpush1.msra.mxu0 %v5790_v17  ;;  %v5789_v4 = vmul.f32 %v5784_v47, %v12625_v42 }
 0xc71   :  { %7510 = vmatmul.mubr.msk.f32.gmra.mxu1 %vm12675_vm11, %v5222_v62  ;;  %7516 = vmatmul.mubr.msk.f32.gmra.mxu0 %vm12676_vm10, %v5413_v45  ;;  %vm12681_vm11 = vmmov %vm12634_vm1 }
 0xc72   :  { %5858 = vmatprep.subr.mxu0 %v5789_v4  ;;  %5349 = vmatprep.mubr.f32.mxu1 %v12613_v23  ;;  %vm12682_vm10 = vmmov %vm12634_vm1 }
 0xc73   :  { %5530 = vmatprep.mubr.f32.mxu0 %v12613_v23  ;;  %5859 = vmatpush1.msra.mxu0 %v5788_v8 }
 0xc75   :  { %7511 = vmatmul.mubr.msk.f32.gmra.mxu1 %vm12677_vm12, %v5223_v55  ;;  %7517 = vmatmul.mubr.msk.f32.gmra.mxu0 %vm12678_vm13, %v5414_v14  ;;  %vm12683_vm12 = vmmov %vm12634_vm1 }
 0xc76   :  { %5355 = vmatprep.mubr.f32.mxu1 %v12613_v23  ;;  %5536 = vmatprep.mubr.f32.mxu0 %v12613_v23  ;;  %vm12684_vm13 = vmmov %vm12634_vm1 }
 0xc79   :  { %7512 = vmatmul.mubr.msk.f32.gmra.mxu1 %vm12679_vm14, %v5224_v36  ;;  %7518 = vmatmul.mubr.msk.f32.gmra.mxu0 %vm12680_vm15, %v5415_v18  ;;  %vm12685_vm14 = vmmov %vm12634_vm1 }
 0xc7a   :  { %5542 = vmatprep.mubr.f32.mxu0 %v12613_v23  ;;  %5699 = vmatprep.mubr.f32.mxu1 %v12613_v23  ;;  %vm12686_vm15 = vmmov %vm12634_vm1 }
 0xc7d   :  { %7519 = vmatmul.mubr.msk.f32.gmra.mxu0 %vm12634_vm1, %v5416_v7  ;;  %7521 = vmatmul.mubr.msk.f32.vlgmr.msra.gmra.mxu1 %vm12681_vm11, %v5603_v56  ;;  %vm12687_vm11 = vmmov %vm12634_vm1 }
 0xc7e   :  { %5548 = vmatprep.mubr.f32.mxu0 %v12613_v23  ;;  %5705 = vmatprep.mubr.f32.mxu1 %v12613_v23 }
 0xc81   :  { %7520 = vmatmul.mubr.msk.f32.gmra.mxu0 %vm12682_vm10, %v5417_v22  ;;  %7522 = vmatmul.mubr.msk.f32.gmra.mxu1 %vm12683_vm12, %v5604_v52  ;;  %vm12688_vm10 = vmmov %vm12634_vm1 }
 0xc82   :  { %5711 = vmatprep.mubr.f32.mxu1 %v12613_v23  ;;  %5892 = vmatprep.mubr.f32.mxu0 %v12613_v23  ;;  %vm12689_vm12 = vmmov %vm12634_vm1 }
 0xc85   :  { %7523 = vmatmul.mubr.msk.f32.gmra.mxu1 %vm12684_vm13, %v5605_v1  ;;  %7529 = vmatmul.mubr.msk.f32.vlgmr.msra.gmra.mxu0 %vm12685_vm14, %v5796_v48  ;;  %vm12690_vm13 = vmmov %vm12634_vm1 }
 0xc86   :  { %5717 = vmatprep.mubr.f32.mxu1 %v12613_v23  ;;  %5898 = vmatprep.mubr.f32.mxu0 %v12613_v23  ;;  %vm12691_vm14 = vmmov %vm12634_vm1 }
 0xc89   :  { %7524 = vmatmul.mubr.msk.f32.gmra.mxu1 %vm12686_vm15, %v5606_v35  ;;  %7530 = vmatmul.mubr.msk.f32.gmra.mxu0 %vm12634_vm1, %v5797_v54  ;;  %vm12692_vm15 = vmmov %vm12634_vm1 }
 0xc8a   :  { %5723 = vmatprep.mubr.f32.mxu1 %v12613_v23  ;;  %5904 = vmatprep.mubr.f32.mxu0 %v12613_v23 }
 0xc8d   :  { %7525 = vmatmul.mubr.msk.f32.gmra.mxu1 %vm12687_vm11, %v5607_v25  ;;  %7531 = vmatmul.mubr.msk.f32.gmra.mxu0 %vm12688_vm10, %v5798_v28  ;;  %vm12693_vm11 = vmmov %vm12634_vm1 }
 0xc8e   :  { %5729 = vmatprep.mubr.f32.mxu1 %v12613_v23  ;;  %5910 = vmatprep.mubr.f32.mxu0 %v12613_v23  ;;  %vm12694_vm10 = vmmov %vm12634_vm1 }
 0xc91   :  { %7526 = vmatmul.mubr.msk.f32.gmra.mxu1 %vm12689_vm12, %v5608_v31  ;;  %7532 = vmatmul.mubr.msk.f32.gmra.mxu0 %vm12690_vm13, %v5799_v27  ;;  %vm12695_vm12 = vmmov %vm12634_vm1 }
 0xc92   :  { %5735 = vmatprep.mubr.f32.mxu1 %v12613_v23  ;;  %5916 = vmatprep.mubr.f32.mxu0 %v12613_v23 }
 0xc95   :  { %7527 = vmatmul.mubr.msk.f32.gmra.mxu1 %vm12691_vm14, %v5609_v26  ;;  %7533 = vmatmul.mubr.msk.f32.gmra.mxu0 %vm12692_vm15, %v5800_v38 }
 0xc96   :  { %5741 = vmatprep.mubr.f32.mxu1 %v12613_v23  ;;  %5922 = vmatprep.mubr.f32.mxu0 %v12613_v23 }
 0xc99   :  { %7528 = vmatmul.mubr.msk.f32.gmra.mxu1 %vm12634_vm1, %v5610_v46  ;;  %7534 = vmatmul.mubr.msk.f32.gmra.mxu0 %vm12693_vm11, %v5801_v44 }
 0xc9a   :  { %5928 = vmatprep.mubr.f32.mxu0 %v12613_v23  ;;  %6329 = vmatprep.mubr.f32.mxu1 %v12613_v23 }
 0xc9d   :  { %7535 = vmatmul.mubr.msk.f32.gmra.mxu0 %vm12694_vm10, %v5802_v57 }
 0xc9e   :  { %5934 = vmatprep.mubr.f32.mxu0 %v12613_v23 }
 0xca1   :  { %7536 = vmatmul.mubr.msk.f32.gmra.mxu0 %vm12695_vm12, %v5803_v60 }
 0xca2   :  { %6542 = vmatprep.mubr.f32.mxu0 %v12613_v23 }
 0xcc3   :  { %v4454_v29 = vpop.f32.mrf.mxu0 }
 0xcc5   :  { %v4456_v43 = vpop.f32.mrf.mxu0 }
 0xcc7   :  { %v4460_v41 = vpop.f32.mrf.mxu0 }
 0xcc9   :  { %v4462_v13 = vpop.f32.mrf.mxu0 }
 0xccb   :  { %v4466_v40 = vpop.f32.mrf.mxu0 }
 0xccd   :  { %v4468_v20 = vpop.f32.mrf.mxu0 }
 0xccf   :  { %v4472_v39 = vpop.f32.mrf.mxu0 }
 0xcd1   :  { %v4474_v6 = vpop.f32.mrf.mxu0 }
 0xcd3   :  { %v4478_v0 = vpop.f32.mrf.mxu0 }
 0xcd5   :  { %v4480_v63 = vpop.f32.mrf.mxu0 }
 0xcd7   :  { %v4484_v21 = vpop.f32.mrf.mxu0 }
 0xcd9   :  { %v4486_v2 = vpop.f32.mrf.mxu0 }
 0xcdb   :  { %v4490_v30 = vpop.f32.mrf.mxu0  ;;  %v4591_v58 = vpop.f32.mrf.mxu1 }
 0xcdc   :  { %v4592_v17 = vadd.f32 %v4591_v58, %v4454_v29 }
 0xcdd   :  { %v4492_v59 = vpop.f32.mrf.mxu0  ;;  %v4593_v3 = vpop.f32.mrf.mxu1 }
 0xcde   :  { %v4594_v53 = vadd.f32 %v4593_v3, %v4456_v43 }
 0xcdf   :  { %v4496_v12 = vpop.f32.mrf.mxu0  ;;  %v4597_v47 = vpop.f32.mrf.mxu1 }
 0xce0   :  { %v4598_v62 = vadd.f32 %v4597_v47, %v4460_v41 }
 0xce1   :  { %v4498_v45 = vpop.f32.mrf.mxu0  ;;  %v4599_v8 = vpop.f32.mrf.mxu1 }
 0xce2   :  { %v4600_v4 = vadd.f32 %v4599_v8, %v4462_v13 }
 0xce3   :  { %v4603_v55 = vpop.f32.mrf.mxu1  ;;  %v4768_v14 = vpop.f32.mrf.mxu0 }
 0xce4   :  { %v4604_v36 = vadd.f32 %v4603_v55, %v4466_v40  ;;  %v11224_v18 = vadd.f32 %v4768_v14, %v4592_v17 }
 0xce5   :  { %v4605_v7 = vpop.f32.mrf.mxu1  ;;  %v4770_v56 = vpop.f32.mrf.mxu0 }
 0xce6   :  { %v4606_v22 = vadd.f32 %v4605_v7, %v4468_v20  ;;  %v11226_v52 = vadd.f32 %v4770_v56, %v4594_v53 }
 0xce8   :  { %v4609_v1 = vpop.f32.mrf.mxu1  ;;  %v4774_v48 = vpop.f32.mrf.mxu0 }
 0xce9   :  { %v4610_v35 = vadd.f32 %v4609_v1, %v4472_v39  ;;  %v11228_v54 = vadd.f32 %v4774_v48, %v4598_v62 }
 0xcea   :  { %v4611_v25 = vpop.f32.mrf.mxu1  ;;  %v4776_v28 = vpop.f32.mrf.mxu0 }
 0xceb   :  { %v4612_v31 = vadd.f32 %v4611_v25, %v4474_v6  ;;  %v11230_v27 = vadd.f32 %v4776_v28, %v4600_v4 }
 0xced   :  { %v4615_v26 = vpop.f32.mrf.mxu1  ;;  %v4780_v38 = vpop.f32.mrf.mxu0 }
 0xcee   :  { %v4616_v46 = vadd.f32 %v4615_v26, %v4478_v0  ;;  %v11232_v44 = vadd.f32 %v4780_v38, %v4604_v36 }
 0xcef   :  { %v4617_v57 = vpop.f32.mrf.mxu1  ;;  %v4782_v60 = vpop.f32.mrf.mxu0 }
 0xcf0   :  { %v4618_v29 = vadd.f32 %v4617_v57, %v4480_v63  ;;  %v11234_v43 = vadd.f32 %v4782_v60, %v4606_v22 }
 0xcf1   :  { %v4621_v41 = vpop.f32.mrf.mxu1  ;;  %v4786_v13 = vpop.f32.mrf.mxu0 }
 0xcf2   :  { %v4622_v40 = vadd.f32 %v4621_v41, %v4484_v21  ;;  %v11236_v20 = vadd.f32 %v4786_v13, %v4610_v35 }
 0xcf3   :  { %v4623_v39 = vpop.f32.mrf.mxu1  ;;  %v4788_v58 = vpop.f32.mrf.mxu0 }
 0xcf4   :  { %v4624_v6 = vadd.f32 %v4623_v39, %v4486_v2  ;;  %v11238_v17 = vadd.f32 %v4788_v58, %v4612_v31 }
 0xcf5   :  { %v4627_v3 = vpop.f32.mrf.mxu1  ;;  %v4792_v53 = vpop.f32.mrf.mxu0 }
 0xcf6   :  { %v4628_v0 = vadd.f32 %v4627_v3, %v4490_v30  ;;  %v11240_v47 = vadd.f32 %v4792_v53, %v4616_v46 }
 0xcf7   :  { %v4629_v62 = vpop.f32.mrf.mxu1  ;;  %v4794_v8 = vpop.f32.mrf.mxu0 }
 0xcf8   :  { %v4630_v63 = vadd.f32 %v4629_v62, %v4492_v59  ;;  %v11242_v4 = vadd.f32 %v4794_v8, %v4618_v29 }
 0xcf9   :  { %v4633_v55 = vpop.f32.mrf.mxu1  ;;  %v4798_v14 = vpop.f32.mrf.mxu0 }
 0xcfa   :  { %v4634_v21 = vadd.f32 %v4633_v55, %v4496_v12  ;;  %v11244_v36 = vadd.f32 %v4798_v14, %v4622_v40 }
 0xcfb   :  { %v4635_v7 = vpop.f32.mrf.mxu1  ;;  %v4800_v56 = vpop.f32.mrf.mxu0 }
 0xcfc   :  { %v4636_v2 = vadd.f32 %v4635_v7, %v4498_v45  ;;  %v11246_v22 = vadd.f32 %v4800_v56, %v4624_v6 }
 0xcfd   :  { %v4804_v1 = vpop.f32.mrf.mxu0  ;;  %v11248_v48 = vpop.f32.mrf.mxu1 }
 0xcfe   :  { %v11250_v30 = vadd.f32 %v4804_v1, %v4628_v0 }
 0xcff   :  { %v4806_v35 = vpop.f32.mrf.mxu0  ;;  %v11252_v25 = vpop.f32.mrf.mxu1 }
 0xd00   :  { %v11254_v59 = vadd.f32 %v4806_v35, %v4630_v63 }
 0xd01   :  { %v4810_v28 = vpop.f32.mrf.mxu0  ;;  %v11256_v31 = vpop.f32.mrf.mxu1 }
 0xd02   :  { %v11258_v12 = vadd.f32 %v4810_v28, %v4634_v21 }
 0xd03   :  { %v4812_v26 = vpop.f32.mrf.mxu0  ;;  %v11260_v38 = vpop.f32.mrf.mxu1 }
 0xd04   :  { %v11262_v45 = vadd.f32 %v4812_v26, %v4636_v2 }
 0xd05   :  { %v11264_v46 = vpop.f32.mrf.mxu1  ;;  %v5122_v57 = vpop.f32.mrf.mxu0 }
 0xd07   :  { %v11266_v60 = vpop.f32.mrf.mxu1  ;;  %v11268_v29 = vpop.f32.mrf.mxu0 }
 0xd09   :  { %v11270_v41 = vpop.f32.mrf.mxu1  ;;  %v11272_v13 = vpop.f32.mrf.mxu0 }
 0xd0b   :  { %v11274_v40 = vpop.f32.mrf.mxu1  ;;  %v11276_v39 = vpop.f32.mrf.mxu0 }
 0xd0d   :  { %v11278_v58 = vpop.f32.mrf.mxu1  ;;  %v11280_v6 = vpop.f32.mrf.mxu0 }
 0xd0f   :  { %v11282_v3 = vpop.f32.mrf.mxu1  ;;  %v11284_v53 = vpop.f32.mrf.mxu0 }
 0xd11   :  { %v11286_v0 = vpop.f32.mrf.mxu1  ;;  %v11288_v62 = vpop.f32.mrf.mxu0 }
 0xd13   :  { %v11290_v8 = vpop.f32.mrf.mxu1  ;;  %v11292_v63 = vpop.f32.mrf.mxu0 }
 0xd15   :  { %v11294_v55 = vpop.f32.mrf.mxu1  ;;  %v11296_v14 = vpop.f32.mrf.mxu0 }
 0xd17   :  { %v11298_v21 = vpop.f32.mrf.mxu1  ;;  %v11300_v7 = vpop.f32.mrf.mxu0 }
 0xd19   :  { %v11302_v56 = vpop.f32.mrf.mxu1  ;;  %v11304_v2 = vpop.f32.mrf.mxu0 }
 0xd1b   :  { %v11306_v1 = vpop.f32.mrf.mxu1  ;;  %v11308_v35 = vpop.f32.mrf.mxu0 }
 0xd1d   :  { %v11310_v28 = vpop.f32.mrf.mxu0  ;;  %v5315_v26 = vpop.f32.mrf.mxu1 }
 0xd1f   :  { %v11312_v42 = vpop.f32.mrf.mxu0  ;;  %v5317_v10 = vpop.f32.mrf.mxu1 }
 0xd21   :  { %v11314_v37 = vpop.f32.mrf.mxu0  ;;  %v5321_v15 = vpop.f32.mrf.mxu1 }
 0xd22   :  { %12696 = vst [vmem:[#allocation42_spill] sm:$0xff] %v11314_v37 }
 0xd23   :  { %v11316_v33 = vpop.f32.mrf.mxu0  ;;  %v11318_v16 = vpop.f32.mrf.mxu1 }
 0xd24   :  { %12697 = vst [vmem:[#allocation44_spill] sm:$0xff] %v11316_v33 }
 0xd25   :  { %v11320_v34 = vpop.f32.mrf.mxu1  ;;  %v5508_v24 = vpop.f32.mrf.mxu0 }
 0xd26   :  { %12698 = vst [vmem:[#allocation30_spill] sm:$0xff] %v11320_v34 }
 0xd27   :  { %v11322_v11 = vpop.f32.mrf.mxu1  ;;  %v5510_v61 = vpop.f32.mrf.mxu0 }
 0xd28   :  { %12699 = vst [vmem:[#allocation27_spill] sm:$0xff] %v11322_v11 }
 0xd29   :  { %v11324_v19 = vpop.f32.mrf.mxu1  ;;  %v5514_v32 = vpop.f32.mrf.mxu0 }
 0xd2a   :  { %12700 = vst [vmem:[#allocation34_spill] sm:$0xff] %v11324_v19 }
 0xd2b   :  { %v11326_v23 = vpop.f32.mrf.mxu1  ;;  %v11328_v50 = vpop.f32.mrf.mxu0 }
 0xd2c   :  { %12701 = vst [vmem:[#allocation36_spill] sm:$0xff] %v11326_v23  ;;  %12702 = vst [vmem:[#allocation28_spill] sm:$0xff] %v11328_v50 }
 0xd2d   :  { %v11330_v51 = vpop.f32.mrf.mxu1  ;;  %v11332_v49 = vpop.f32.mrf.mxu0 }
 0xd2e   :  { %12703 = vst [vmem:[#allocation38_spill] sm:$0xff] %v11330_v51  ;;  %12704 = vst [vmem:[#allocation31_spill] sm:$0xff] %v11332_v49 }
 0xd2f   :  { %v11334_v9 = vpop.f32.mrf.mxu1  ;;  %v11336_v5 = vpop.f32.mrf.mxu0 }
 0xd30   :  { %12705 = vst [vmem:[#allocation43_spill] sm:$0xff] %v11334_v9  ;;  %12706 = vst [vmem:[#allocation32_spill] sm:$0xff] %v11336_v5 }
 0xd31   :  { %v11338_v33 = vpop.f32.mrf.mxu1  ;;  %v11340_v37 = vpop.f32.mrf.mxu0 }
 0xd32   :  { %12707 = vst [vmem:[#allocation33_spill] sm:$0xff] %v11338_v33 }
 0xd33   :  { %v11342_v11 = vpop.f32.mrf.mxu1  ;;  %v11344_v19 = vpop.f32.mrf.mxu0 }
 0xd34   :  { %12708 = vst [vmem:[#allocation47_spill] sm:$0xff] %v11342_v11  ;;  %12709 = vst [vmem:[#allocation45_spill] sm:$0xff] %v11344_v19  ;;  %v5008_v11 = vadd.f32 %v11248_v48, %v11224_v18  ;;  %v5013_v18 = vadd.f32 %v11266_v60, %v11234_v43 }
 0xd35   :  { %v11346_v34 = vpop.f32.mrf.mxu1  ;;  %v11348_v23 = vpop.f32.mrf.mxu0 }
 0xd36   :  { %12710 = vst [vmem:[#allocation35_spill] sm:$0xff] %v11346_v34  ;;  %12711 = vst [vmem:[#allocation37_spill] sm:$0xff] %v11348_v23  ;;  %v5009_v23 = vadd.f32 %v11252_v25, %v11226_v52 }
 0xd37   :  { %v11350_v50 = vpop.f32.mrf.mxu1  ;;  %v11352_v51 = vpop.f32.mrf.mxu0 }
 0xd38   :  { %12712 = vst [vmem:[#allocation39_spill] sm:$0xff] %v11350_v50  ;;  %12713 = vst [vmem:[#allocation49_spill] sm:$0xff] %v11352_v51  ;;  %v5169_v50 = vadd.f32 %v5122_v57, %v5008_v11  ;;  %v5010_v51 = vadd.f32 %v11256_v31, %v11228_v54  ;;  %v5170_v48 = vadd.f32 %v11268_v29, %v5009_v23 }
 0xd39   :  { %v11354_v49 = vpop.f32.mrf.mxu1  ;;  %v11356_v9 = vpop.f32.mrf.mxu0  ;;  %v5014_v11 = vadd.f32 %v11270_v41, %v11236_v20  ;;  %v5017_v23 = vadd.f32 %v11282_v3, %v11242_v4 }
 0xd3a   :  { %12714 = vst [vmem:[#allocation40_spill] sm:$0xff] %v11354_v49  ;;  %12715 = vst [vmem:[#allocation46_spill] sm:$0xff] %v11356_v9  ;;  %v5011_v49 = vadd.f32 %v11260_v38, %v11230_v27  ;;  %v5362_v52 = vadd.f32 %v5315_v26, %v5169_v50  ;;  %v5171_v54 = vadd.f32 %v11272_v13, %v5010_v51 }
 0xd3b   :  { %v11358_v5 = vpop.f32.mrf.mxu1  ;;  %v11360_v33 = vpop.f32.mrf.mxu0  ;;  %v5015_v27 = vadd.f32 %v11274_v40, %v11238_v17  ;;  %v5363_v20 = vadd.f32 %v5317_v10, %v5170_v48  ;;  %v5174_v51 = vadd.f32 %v11284_v53, %v5013_v18  ;;  %v5018_v17 = vadd.f32 %v11286_v0, %v11244_v36  ;;  %v12723_v18 = vld [vmem:[#allocation34_spill] sm:$0xff] }
 0xd3c   :  { %12716 = vst [vmem:[#allocation48_spill] sm:$0xff] %v11358_v5  ;;  %12717 = vst [vmem:[#allocation51_spill] sm:$0xff] %v11360_v33  ;;  %v5012_v5 = vadd.f32 %v11264_v46, %v11232_v44  ;;  %v5172_v25 = vadd.f32 %v11276_v39, %v5011_v49  ;;  %v5016_v44 = vadd.f32 %v11278_v58, %v11240_v47 }
 0xd3d   :  { %v11364_v19 = vpop.f32.mrf.mxu0  ;;  %v5701_v34 = vpop.f32.mrf.mxu1  ;;  %v5555_v50 = vadd.f32 %v5508_v24, %v5362_v52  ;;  %v5175_v49 = vadd.f32 %v11288_v62, %v5014_v11  ;;  %v5019_v47 = vadd.f32 %v11290_v8, %v11246_v22  ;;  %v5364_v60 = vadd.f32 %v5321_v15, %v5171_v54  ;;  %v12718_v62 = vld [vmem:[#allocation30_spill] sm:$0xff]  ;;  %v12724_v11 = vld [vmem:[#allocation31_spill] sm:$0xff]  ;;  %v12725_v54 = vld [vmem:[#allocation32_spill] sm:$0xff] }
 0xd3e   :  { %v5173_v43 = vadd.f32 %v11280_v6, %v5012_v5  ;;  %v5176_v5 = vadd.f32 %v11292_v63, %v5015_v27  ;;  %v5556_v29 = vadd.f32 %v5510_v61, %v5363_v20  ;;  %v5020_v10 = vadd.f32 %v11294_v55, %v11250_v30  ;;  %v12719_v63 = vld [vmem:[#allocation27_spill] sm:$0xff]  ;;  %v12720_v55 = vld [vmem:[#allocation28_spill] sm:$0xff] }
 0xd3f   :  { %v11374_v33 = vpop.f32.mrf.mxu0  ;;  %v5703_v9 = vpop.f32.mrf.mxu1  ;;  %v5748_v4 = vadd.f32 %v5701_v34, %v5555_v50  ;;  %v5177_v24 = vadd.f32 %v11296_v14, %v5016_v44  ;;  %v5021_v36 = vadd.f32 %v11298_v21, %v11254_v59  ;;  %v5178_v41 = vadd.f32 %v11300_v7, %v5017_v23  ;;  %v7631_v50 = vld [vmem:[%s12460_s3 + $0x130] sm:$0xff] }
 0xd40   :  { %v5022_v40 = vadd.f32 %v11302_v56, %v11258_v12  ;;  %v5557_v39 = vadd.f32 %v5514_v32, %v5364_v60  ;;  %v5749_v58 = vadd.f32 %v5703_v9, %v5556_v29  ;;  %v5179_v61 = vadd.f32 %v11304_v2, %v5018_v17  ;;  %v7629_v9 = vld [vmem:[%s12460_s3 + $0x120] sm:$0xff]  ;;  %v12726_v17 = vld [vmem:[#allocation36_spill] sm:$0xff] }
 0xd41   :  { %v11387_v31 = vpop.f32.mrf.mxu0  ;;  %v5707_v38 = vpop.f32.mrf.mxu1  ;;  %v5023_v34 = vadd.f32 %v11306_v1, %v11262_v45  ;;  %v11413_v30 = vadd.f32 %v11308_v35, %v5019_v47  ;;  %v5365_v59 = vadd.f32 %v11318_v16, %v5172_v25  ;;  %v11417_v53 = vadd.f32 %v11310_v28, %v5020_v10  ;;  %v12721_v56 = vld [vmem:[#allocation42_spill] sm:$0xff]  ;;  %v12722_v1 = vld [vmem:[#allocation44_spill] sm:$0xff]  ;;  %v7630_v28 = vld [vmem:[%s12460_s3 + $0x128] sm:$0xff] }
 0xd42   :  { %v5750_v0 = vadd.f32 %v5707_v38, %v5557_v39  ;;  %v11425_v45 = vadd.f32 %v11312_v42, %v5021_v36  ;;  %v5366_v8 = vadd.f32 %v12718_v62, %v5173_v43  ;;  %v5367_v16 = vadd.f32 %v12719_v63, %v5174_v51  ;;  %v12727_v39 = vld [vmem:[#allocation38_spill] sm:$0xff] }
 0xd43   :  { %v11398_v46 = vpop.f32.mrf.mxu0  ;;  %v5709_v57 = vpop.f32.mrf.mxu1  ;;  %v5558_v14 = vadd.f32 %v12720_v55, %v5365_v59  ;;  %v11431_v2 = vadd.f32 %v12721_v56, %v5022_v40  ;;  %v11434_v35 = vadd.f32 %v12722_v1, %v5023_v34  ;;  %v5368_v48 = vadd.f32 %v12723_v18, %v5175_v49  ;;  %v12731_v56 = vld [vmem:[#allocation37_spill] sm:$0xff] }
 0xd44   :  { %v5559_v52 = vadd.f32 %v12724_v11, %v5366_v8  ;;  %v5560_v27 = vadd.f32 %v12725_v54, %v5367_v16  ;;  %v5369_v49 = vadd.f32 %v12726_v17, %v5176_v5  ;;  %v7632_v5 = vld [vmem:[%s12460_s3 + $0x138] sm:$0xff]  ;;  %v7633_v16 = vld [vmem:[%s12460_s3 + $0x140] sm:$0xff] }
 0xd45   :  { %v5713_v13 = vpop.f32.mrf.mxu1  ;;  %v5894_v22 = vpop.f32.mrf.mxu0  ;;  %v5751_v25 = vadd.f32 %v5709_v57, %v5558_v14  ;;  %v5561_v47 = vadd.f32 %v11340_v37, %v5368_v48  ;;  %v12730_v8 = vld [vmem:[#allocation33_spill] sm:$0xff] }
 0xd46   :  { %v5941_v15 = vadd.f32 %v5894_v22, %v5748_v4  ;;  %v5752_v57 = vadd.f32 %v5713_v13, %v5559_v52  ;;  %v5372_v63 = vadd.f32 %v12730_v8, %v5179_v61  ;;  %v7634_v61 = vld [vmem:[%s12460_s3 + $0x148] sm:$0xff]  ;;  %v12732_v18 = vld [vmem:[#allocation49_spill] sm:$0xff] }
 0xd47   :  { %v5715_v6 = vpop.f32.mrf.mxu1  ;;  %v5896_v3 = vpop.f32.mrf.mxu0 }
 0xd48   :  { %v11422_v32 = vadd.f32 %v7629_v9, %v5941_v15  ;;  %v5942_v12 = vadd.f32 %v5896_v3, %v5749_v58  ;;  %v5753_v10 = vadd.f32 %v5715_v6, %v5560_v27  ;;  %v5370_v58 = vadd.f32 %v12727_v39, %v5177_v24  ;;  %v12728_v15 = vld [vmem:[#allocation43_spill] sm:$0xff]  ;;  %v12729_v6 = vld [vmem:[#allocation45_spill] sm:$0xff] }
 0xd49   :  { %v5719_v21 = vpop.f32.mrf.mxu1  ;;  %v5900_v7 = vpop.f32.mrf.mxu0  ;;  %v5371_v34 = vadd.f32 %v12728_v15, %v5178_v41  ;;  %v12736_v15 = vld [vmem:[#allocation51_spill] sm:$0xff] }
 0xd4a   :  { %v11439_v42 = vadd.f32 %v7630_v28, %v5942_v12  ;;  %v5943_v26 = vadd.f32 %v5900_v7, %v5750_v0  ;;  %v6000_v43 = vmul.f32 %v11422_v32, %v11422_v32  ;;  %v5562_v0 = vadd.f32 %v12729_v6, %v5369_v49  ;;  %v12734_v49 = vld [vmem:[#allocation46_spill] sm:$0xff] }
 0xd4b   :  { %v5721_v44 = vpop.f32.mrf.mxu1  ;;  %v5902_v38 = vpop.f32.mrf.mxu0  ;;  %v5754_v9 = vadd.f32 %v5719_v21, %v5561_v47  ;;  %v5563_v1 = vadd.f32 %v12731_v56, %v5370_v58  ;;  %v5564_v48 = vadd.f32 %v12732_v18, %v5371_v34  ;;  %v5565_v47 = vadd.f32 %v12734_v49, %v5372_v63  ;;  %v7638_v56 = vld [vmem:[%s12460_s3 + $0x168] sm:$0xff] }
 0xd4c   :  { %v5973_v23 = vadd.f32 %v11439_v42, %v11422_v32  ;;  %v6001_v20 = vmul.f32 %v11439_v42, %v11439_v42  ;;  %v11453_v51 = vadd.f32 %v7631_v50, %v5943_v26  ;;  %v5944_v60 = vadd.f32 %v5902_v38, %v5751_v25  ;;  %v12733_v50 = vld [vmem:[#allocation47_spill] sm:$0xff] }
 0xd4d   :  { %v5725_v29 = vpop.f32.mrf.mxu1  ;;  %v5906_v4 = vpop.f32.mrf.mxu0  ;;  %v5755_v21 = vadd.f32 %v5721_v44, %v5562_v0  ;;  %v5373_v17 = vadd.f32 %v12733_v50, %v11413_v30  ;;  %v12735_v30 = vld [vmem:[#allocation35_spill] sm:$0xff] }
 0xd4e   :  { %v6016_v36 = vadd.f32 %v6001_v20, %v6000_v43  ;;  %v5974_v22 = vadd.f32 %v5973_v23, %v11453_v51  ;;  %v6002_v40 = vmul.f32 %v11453_v51, %v11453_v51  ;;  %v11465_v37 = vadd.f32 %v7632_v5, %v5944_v60  ;;  %v7635_v43 = vld [vmem:[%s12460_s3 + $0x150] sm:$0xff] }
 0xd4f   :  { %v5945_v13 = vadd.f32 %v5906_v4, %v5752_v57  ;;  %v5727_v59 = vpop.f32.mrf.mxu1  ;;  %v5908_v3 = vpop.f32.mrf.mxu0  ;;  %v5756_v38 = vadd.f32 %v5725_v29, %v5563_v1  ;;  %v5374_v58 = vadd.f32 %v12735_v30, %v11417_v53  ;;  %v5566_v34 = vadd.f32 %v12736_v15, %v5373_v17  ;;  %v12737_v53 = vld [vmem:[#allocation39_spill] sm:$0xff] }
 0xd50   :  { %v6017_v12 = vadd.f32 %v6016_v36, %v6002_v40  ;;  %v5946_v62 = vadd.f32 %v5908_v3, %v5753_v10  ;;  %v5975_v24 = vadd.f32 %v5974_v22, %v11465_v37  ;;  %v6003_v41 = vmul.f32 %v11465_v37, %v11465_v37  ;;  %v7636_v22 = vld [vmem:[%s12460_s3 + $0x158] sm:$0xff] }
 0xd51   :  { %v11475_v55 = vadd.f32 %v7633_v16, %v5945_v13  ;;  %v5731_v14 = vpop.f32.mrf.mxu1  ;;  %v5912_v7 = vpop.f32.mrf.mxu0  ;;  %v5757_v10 = vadd.f32 %v5727_v59, %v5564_v48  ;;  %v5375_v8 = vadd.f32 %v12737_v53, %v11425_v45  ;;  %v5567_v63 = vadd.f32 %v11364_v19, %v5374_v58 }
 0xd52   :  { %v11481_v28 = vadd.f32 %v7634_v61, %v5946_v62  ;;  %v5947_v26 = vadd.f32 %v5912_v7, %v5754_v9  ;;  %v6018_v11 = vadd.f32 %v6017_v12, %v6003_v41  ;;  %v5758_v6 = vadd.f32 %v5731_v14, %v5565_v47  ;;  %v7637_v9 = vld [vmem:[%s12460_s3 + $0x160] sm:$0xff]  ;;  %v12738_v61 = vld [vmem:[#allocation40_spill] sm:$0xff]  ;;  %v7640_v47 = vld [vmem:[%s12460_s3 + $0x178] sm:$0xff] }
 0xd53   :  { %v5976_v52 = vadd.f32 %v5975_v24, %v11475_v55  ;;  %v6004_v54 = vmul.f32 %v11475_v55, %v11475_v55  ;;  %v5733_v27 = vpop.f32.mrf.mxu1  ;;  %v5914_v25 = vpop.f32.mrf.mxu0  ;;  %v5376_v45 = vadd.f32 %v12738_v61, %v11431_v2  ;;  %v5568_v19 = vadd.f32 %v11374_v33, %v5375_v8  ;;  %v12739_v2 = vld [vmem:[#allocation48_spill] sm:$0xff] }
 0xd54   :  { %v6005_v44 = vmul.f32 %v11481_v28, %v11481_v28  ;;  %v11492_v23 = vadd.f32 %v7635_v43, %v5947_v26  ;;  %v5948_v20 = vadd.f32 %v5914_v25, %v5755_v21  ;;  %v5759_v14 = vadd.f32 %v5733_v27, %v5566_v34  ;;  %v7639_v27 = vld [vmem:[%s12460_s3 + $0x170] sm:$0xff] }
 0xd55   :  { %v6019_v57 = vadd.f32 %v6018_v11, %v6004_v54  ;;  %v5977_v60 = vadd.f32 %v5976_v52, %v11481_v28  ;;  %v5737_v4 = vpop.f32.mrf.mxu1  ;;  %v5918_v29 = vpop.f32.mrf.mxu0  ;;  %v5569_v33 = vadd.f32 %v11387_v31, %v5376_v45  ;;  %v7643_v8 = vld [vmem:[%s12460_s3 + $0x190] sm:$0xff] }
 0xd56   :  { %v6006_v36 = vmul.f32 %v11492_v23, %v11492_v23  ;;  %v11503_v40 = vadd.f32 %v7636_v22, %v5948_v20  ;;  %v5949_v39 = vadd.f32 %v5918_v29, %v5756_v38  ;;  %v5760_v52 = vadd.f32 %v5737_v4, %v5567_v63 }
 0xd57   :  { %v6020_v5 = vadd.f32 %v6019_v57, %v6005_v44  ;;  %v5978_v13 = vadd.f32 %v5977_v60, %v11492_v23  ;;  %v5739_v3 = vpop.f32.mrf.mxu1  ;;  %v5920_v59 = vpop.f32.mrf.mxu0  ;;  %v5377_v44 = vadd.f32 %v12739_v2, %v11434_v35 }
 0xd58   :  { %v6007_v0 = vmul.f32 %v11503_v40, %v11503_v40  ;;  %v11514_v12 = vadd.f32 %v7637_v9, %v5949_v39  ;;  %v5950_v62 = vadd.f32 %v5920_v59, %v5757_v10  ;;  %v5761_v17 = vadd.f32 %v5739_v3, %v5568_v19  ;;  %v7641_v39 = vld [vmem:[%s12460_s3 + $0x180] sm:$0xff]  ;;  %v7642_v3 = vld [vmem:[%s12460_s3 + $0x188] sm:$0xff] }
 0xd59   :  { %v6021_v24 = vadd.f32 %v6020_v5, %v6006_v36  ;;  %v5979_v41 = vadd.f32 %v5978_v13, %v11503_v40  ;;  %v5924_v16 = vpop.f32.mrf.mxu0  ;;  %v5743_v48 = vpop.f32.mrf.mxu1  ;;  %v5570_v4 = vadd.f32 %v11398_v46, %v5377_v44 }
 0xd5a   :  { %v6008_v7 = vmul.f32 %v11514_v12, %v11514_v12  ;;  %v11525_v1 = vadd.f32 %v7638_v56, %v5950_v62  ;;  %v5951_v21 = vadd.f32 %v5924_v16, %v5758_v6  ;;  %v5762_v36 = vadd.f32 %v5743_v48, %v5569_v33 }
 0xd5b   :  { %v6022_v26 = vadd.f32 %v6021_v24, %v6007_v0  ;;  %v5980_v18 = vadd.f32 %v5979_v41, %v11514_v12  ;;  %v5926_v11 = vpop.f32.mrf.mxu0  ;;  %v5745_v29 = vpop.f32.mrf.mxu1 }
 0xd5c   :  { %v6009_v54 = vmul.f32 %v11525_v1, %v11525_v1  ;;  %v11536_v25 = vadd.f32 %v7639_v27, %v5951_v21  ;;  %v5952_v38 = vadd.f32 %v5926_v11, %v5759_v14  ;;  %v5763_v5 = vadd.f32 %v5745_v29, %v5570_v4 }
 0xd5d   :  { %v6023_v43 = vadd.f32 %v6022_v26, %v6008_v7  ;;  %v5981_v20 = vadd.f32 %v5980_v18, %v11525_v1  ;;  %v5930_v50 = vpop.f32.mrf.mxu0  ;;  %v7644_v7 = vld [vmem:[%s12460_s3 + $0x198] sm:$0xff] }
 0xd5e   :  { %v6010_v49 = vmul.f32 %v11536_v25, %v11536_v25  ;;  %v11547_v57 = vadd.f32 %v7640_v47, %v5952_v38  ;;  %v5953_v60 = vadd.f32 %v5930_v50, %v5760_v52 }
 0xd5f   :  { %v6024_v35 = vadd.f32 %v6023_v43, %v6009_v54  ;;  %v5982_v31 = vadd.f32 %v5981_v20, %v11536_v25  ;;  %v5932_v10 = vpop.f32.mrf.mxu0 }
 0xd60   :  { %v6011_v22 = vmul.f32 %v11547_v57, %v11547_v57  ;;  %v11556_v30 = vadd.f32 %v7641_v39, %v5953_v60  ;;  %v5954_v58 = vadd.f32 %v5932_v10, %v5761_v17 }
 0xd61   :  { %v6025_v15 = vadd.f32 %v6024_v35, %v6010_v49  ;;  %v5983_v34 = vadd.f32 %v5982_v31, %v11547_v57  ;;  %v5936_v46 = vpop.f32.mrf.mxu0 }
 0xd62   :  { %v6012_v13 = vmul.f32 %v11556_v30, %v11556_v30  ;;  %v5970_v59 = vadd.f32 %v7642_v3, %v5954_v58  ;;  %v5955_v6 = vadd.f32 %v5936_v46, %v5762_v36 }
 0xd63   :  { %v6026_v0 = vadd.f32 %v6025_v15, %v6011_v22  ;;  %v5984_v9 = vadd.f32 %v5983_v34, %v11556_v30  ;;  %v5938_v62 = vpop.f32.mrf.mxu0 }
 0xd64   :  { %v6013_v53 = vmul.f32 %v5970_v59, %v5970_v59  ;;  %v5971_v63 = vadd.f32 %v7643_v8, %v5955_v6  ;;  %v5956_v24 = vadd.f32 %v5938_v62, %v5763_v5  ;;  %v7649_v8 = vld [vmem:[%s12460_s3 + $0x298] sm:$0xff] }
 0xd65   :  { %v6027_v41 = vadd.f32 %v6026_v0, %v6012_v13  ;;  %v5985_v16 = vadd.f32 %v5984_v9, %v5970_v59  ;;  %v7645_v13 = vld [vmem:[%s12460_s3 + $0x218] sm:$0xff]  ;;  %v7648_v0 = vld [vmem:[%s12460_s3 + $0x200] sm:$0xff] }
 0xd66   :  { %v6014_v14 = vmul.f32 %v5971_v63, %v5971_v63  ;;  %v5972_v56 = vadd.f32 %v7644_v7, %v5956_v24  ;;  %v7650_v24 = vld [vmem:[%s12460_s3 + $0x290] sm:$0xff] }
 0xd67   :  { %v5986_v21 = vadd.f32 %v5985_v16, %v5971_v63  ;;  %v6028_v61 = vadd.f32 %v6027_v41, %v6013_v53  ;;  %v7651_v16 = vld [vmem:[%s12460_s3 + $0x1f8] sm:$0xff] }
 0xd68   :  { %v6015_v45 = vmul.f32 %v5972_v56, %v5972_v56 }
 0xd69   :  { %v5987_v19 = vadd.f32 %v5986_v21, %v5972_v56  ;;  %v6029_v26 = vadd.f32 %v6028_v61, %v6014_v14 }
 0xd6b   :  { %5988 = vadd.xlane.f32.xlu0 %v5987_v19  ;;  %v6030_v18 = vadd.f32 %v6029_v26, %v6015_v45  ;;  %v7653_v45 = vld [vmem:[%s12460_s3 + $0x288] sm:$0xff]  ;;  %v7654_v26 = vld [vmem:[%s12460_s3 + $0x280] sm:$0xff] }
 0xd6d   :  { %6031 = vadd.xlane.f32.xlu1 %v6030_v18 }
 0xdf4   :  { %v5989_v48 = vpop.xlane.xlu0 %5988 }
 0xdf5   :  { %v5990_v11 = vrot.slane %v5989_v48, 4 }
 0xdf6   :  { %v6032_v52 = vpop.xlane.xlu1 %6031 }
 0xdf7   :  { %v5991_v54 = vadd.f32 %v5990_v11, %v5989_v48  ;;  %v6033_v27 = vrot.slane %v6032_v52, 4 }
 0xdf9   :  { %v6034_v38 = vadd.f32 %v6033_v27, %v6032_v52  ;;  %v5992_v2 = vrot.slane %v5991_v54, 2  ;;  %v7655_v52 = vld [vmem:[%s12460_s3 + $0x278] sm:$0xff]  ;;  %v7656_v27 = vld [vmem:[%s12460_s3 + $0x270] sm:$0xff] }
 0xdfb   :  { %v5993_v44 = vadd.f32 %v5992_v2, %v5991_v54  ;;  %v6035_v33 = vrot.slane %v6034_v38, 2  ;;  %v7657_v2 = vld [vmem:[%s12460_s3 + $0x1e8] sm:$0xff] }
 0xdfd   :  { %v5994_v43 = vrot.slane %v5993_v44, 1  ;;  %v6036_v20 = vadd.f32 %v6035_v33, %v6034_v38 }
 0xdff   :  { %v5995_v50 = vadd.f32 %v5994_v43, %v5993_v44  ;;  %v6037_v17 = vrot.slane %v6036_v20, 1 }
 0xe01   :  { %7568 = vpush %v5995_v50  ;;  %v6038_v49 = vadd.f32 %v6037_v17, %v6036_v20 }
 0xe03   :  { %7570 = vpush %v6038_v49 }
 0xe32   :  { %s7569_s27 = spop %7568 }
 0xe33   :  { %s5999_s28 = smul.f32 6.1035156e-05, %s7569_s27 }
 0xe34   :  { %s7571_s29 = spop %7570 }
 0xe35   :  { %s6043_s30 = smul.f32 %s5999_s28, %s5999_s28  ;;  %v11572_v4 = vstv %s5999_s28 }
 0xe36   :  { %s6042_s7 = smul.f32 6.1035156e-05, %s7571_s29  ;;  %v6062_v35 = vsub.f32 %v5972_v56, %v11572_v4  ;;  %v6061_v31 = vsub.f32 %v5971_v63, %v11572_v4  ;;  %v6060_v29 = vsub.f32 %v5970_v59, %v11572_v4  ;;  %v6059_v10 = vsub.f32 %v11556_v30, %v11572_v4  ;;  %v7647_v59 = vld [vmem:[%s12460_s3 + $0x208] sm:$0xff] }
 0xe37   :  { %v6058_v22 = vsub.f32 %v11547_v57, %v11572_v4  ;;  %v6057_v39 = vsub.f32 %v11536_v25, %v11572_v4  ;;  %v7646_v25 = vld [vmem:[%s12460_s3 + $0x210] sm:$0xff]  ;;  %v6056_v62 = vsub.f32 %v11525_v1, %v11572_v4  ;;  %v6055_v53 = vsub.f32 %v11514_v12, %v11572_v4 }
 0xe38   :  { %s6044_s14 = ssub.f32 %s6042_s7, %s6043_s30  ;;  %v7652_v1 = vld [vmem:[%s12460_s3 + $0x1f0] sm:$0xff]  ;;  %v6054_v48 = vsub.f32 %v11503_v40, %v11572_v4  ;;  %v6053_v11 = vsub.f32 %v11492_v23, %v11572_v4  ;;  %v7658_v40 = vld [vmem:[%s12460_s3 + $0x1e0] sm:$0xff]  ;;  %v6052_v17 = vsub.f32 %v11481_v28, %v11572_v4  ;;  %v6051_v49 = vsub.f32 %v11475_v55, %v11572_v4  ;;  %v7661_v28 = vld [vmem:[%s12460_s3 + $0x1d8] sm:$0xff] }
 0xe39   :  { %v7662_v55 = vld [vmem:[%s12460_s3 + $0x1d0] sm:$0xff] }
 0xe3a   :  { %s6045_s4 = smax.f32 %s7734_s1, %s6044_s14 }
 0xe3b   :  { %s6063_s15 = sadd.f32 1e-05, %s6045_s4 }
 0xe3d   :  { %v6064_v47 = vstv %s6063_s15 }
 0xe3e   :  { %7599 = vrsqrt.f32 %v6064_v47 }
 0xe4b   :  { %v7600_v60 = vpop.eup %7599 }
 0xe4c   :  { %7572 = vpush %v7600_v60 }
 0xe7d   :  { %s7573_s16 = spop %7572 }
 0xe7e   :  { %v11579_v36 = vstv %s7573_s16 }
 0xe7f   :  { %v6083_v58 = vmul.f32 %v11579_v36, %v6062_v35  ;;  %v6082_v15 = vmul.f32 %v11579_v36, %v6061_v31  ;;  %v6081_v34 = vmul.f32 %v11579_v36, %v6060_v29  ;;  %v6080_v46 = vmul.f32 %v11579_v36, %v6059_v10  ;;  %v7659_v35 = vld [vmem:[%s12460_s3 + $0x268] sm:$0xff]  ;;  %v7660_v29 = vld [vmem:[%s12460_s3 + $0x260] sm:$0xff] }
 0xe80   :  { %v6079_v5 = vmul.f32 %v11579_v36, %v6058_v22  ;;  %v6078_v30 = vmul.f32 %v11579_v36, %v6057_v39  ;;  %v6077_v7 = vmul.f32 %v11579_v36, %v6056_v62  ;;  %v6076_v56 = vmul.f32 %v11579_v36, %v6055_v53 }
 0xe81   :  { %v6099_v57 = vmul.f32 %v7645_v13, %v6083_v58  ;;  %v6098_v3 = vmul.f32 %v7646_v25, %v6082_v15  ;;  %v6097_v6 = vmul.f32 %v7647_v59, %v6081_v34  ;;  %v6096_v9 = vmul.f32 %v7648_v0, %v6080_v46  ;;  %v7665_v59 = vld [vmem:[%s12460_s3 + $0x1c8] sm:$0xff]  ;;  %v7666_v0 = vld [vmem:[%s12460_s3 + $0x1c0] sm:$0xff] }
 0xe82   :  { %v6095_v14 = vmul.f32 %v7651_v16, %v6079_v5  ;;  %v6094_v12 = vmul.f32 %v7652_v1, %v6078_v30  ;;  %v6093_v44 = vmul.f32 %v7657_v2, %v6077_v7  ;;  %v6092_v23 = vmul.f32 %v7658_v40, %v6076_v56  ;;  %v7675_v2 = vld [vmem:[%s12460_s3 + $0x228] sm:$0xff]  ;;  %v7676_v40 = vld [vmem:[%s12460_s3 + $0x220] sm:$0xff] }
 0xe83   :  { %v6115_v63 = vadd.f32 %v7649_v8, %v6099_v57  ;;  %v6114_v41 = vadd.f32 %v7650_v24, %v6098_v3  ;;  %v6113_v19 = vadd.f32 %v7653_v45, %v6097_v6  ;;  %v6112_v18 = vadd.f32 %v7654_v26, %v6096_v9  ;;  %v7667_v8 = vld [vmem:[%s12460_s3 + $0x1b8] sm:$0xff]  ;;  %v7668_v24 = vld [vmem:[%s12460_s3 + $0x1b0] sm:$0xff]  ;;  %v7672_v45 = vld [vmem:[%s12460_s3 + $0x1a8] sm:$0xff] }
 0xe84   :  { %v6111_v54 = vadd.f32 %v7655_v52, %v6095_v14  ;;  %v6110_v38 = vadd.f32 %v7656_v27, %v6094_v12  ;;  %v6075_v20 = vmul.f32 %v11579_v36, %v6054_v48  ;;  %v6074_v50 = vmul.f32 %v11579_v36, %v6053_v11  ;;  %v7669_v14 = vld [vmem:[%s12460_s3 + $0x248] sm:$0xff]  ;;  %v7670_v12 = vld [vmem:[%s12460_s3 + $0x240] sm:$0xff]  ;;  %v7673_v48 = vld [vmem:[%s12460_s3 + $0x230] sm:$0xff] }
 0xe85   :  { %v11621_v21 = vmax.f32 %v6115_v63, 0.0  ;;  %v11623_v61 = vmax.f32 %v6114_v41, 0.0  ;;  %v11651_v33 = vmax.f32 %v6113_v19, 0.0  ;;  %v11653_v43 = vmax.f32 %v6112_v18, 0.0  ;;  %v7674_v52 = vld [vmem:[%s12460_s3 + $0x1a0] sm:$0xff] }
 0xe86   :  { %v11665_v47 = vmax.f32 %v6111_v54, 0.0  ;;  %v11667_v60 = vmax.f32 %v6110_v38, 0.0  ;;  %v6109_v31 = vadd.f32 %v7659_v35, %v6093_v44  ;;  %v6108_v10 = vadd.f32 %v7660_v29, %v6092_v23 }
 0xe87   :  { %6227 = vrot.lane.b32.xlu1 %v11621_v21, %s7725_s25  ;;  %6211 = vrot.lane.b32.xlu0 %v11623_v61, %s7725_s25  ;;  %v6091_v22 = vmul.f32 %v7661_v28, %v6075_v20  ;;  %v6090_v39 = vmul.f32 %v7662_v55, %v6074_v50  ;;  %v6073_v58 = vmul.f32 %v11579_v36, %v6052_v17 }
 0xe88   :  { %v6072_v15 = vmul.f32 %v11579_v36, %v6051_v49  ;;  %v6050_v34 = vsub.f32 %v11465_v37, %v11572_v4  ;;  %v6049_v46 = vsub.f32 %v11453_v51, %v11572_v4  ;;  %v11691_v5 = vmax.f32 %v6109_v31, 0.0  ;;  %v7663_v37 = vld [vmem:[%s12460_s3 + $0x258] sm:$0xff]  ;;  %v7664_v51 = vld [vmem:[%s12460_s3 + $0x250] sm:$0xff] }
 0xe89   :  { %v11693_v30 = vmax.f32 %v6108_v10, 0.0  ;;  %v6107_v25 = vadd.f32 %v7663_v37, %v6091_v22  ;;  %v6106_v3 = vadd.f32 %v7664_v51, %v6090_v39  ;;  %v6089_v6 = vmul.f32 %v7665_v59, %v6073_v58  ;;  %v12741_v10 = vld [vmem:[#allocation12_spill] sm:$0xff] }
 0xe8a   :  { %v6071_v13 = vmul.f32 %v11579_v36, %v6050_v34  ;;  %v6070_v57 = vmul.f32 %v11579_v36, %v6049_v46  ;;  %v6088_v9 = vmul.f32 %v7666_v0, %v6072_v15  ;;  %v6048_v62 = vsub.f32 %v11439_v42, %v11572_v4  ;;  %v12742_v22 = vld [vmem:[#allocation16_spill] sm:$0xff] }
 0xe8b   :  { %6225 = vrot.lane.b32.xlu1 %v11651_v33, %s7725_s25  ;;  %6209 = vrot.lane.b32.xlu0 %v11653_v43, %s7725_s25  ;;  %v6047_v53 = vsub.f32 %v11422_v32, %v11572_v4  ;;  %v11725_v4 = vmax.f32 %v6107_v25, 0.0  ;;  %v11727_v16 = vmax.f32 %v6106_v3, 0.0  ;;  %v6105_v1 = vadd.f32 %v7669_v14, %v6089_v6 }
 0xe8c   :  { %v6087_v63 = vmul.f32 %v7667_v8, %v6071_v13  ;;  %v6086_v41 = vmul.f32 %v7668_v24, %v6070_v57  ;;  %v6069_v42 = vmul.f32 %v11579_v36, %v6048_v62  ;;  %v6104_v7 = vadd.f32 %v7670_v12, %v6088_v9 }
 0xe8d   :  { %v6068_v32 = vmul.f32 %v11579_v36, %v6047_v53  ;;  %v7671_v36 = vld [vmem:[%s12460_s3 + $0x238] sm:$0xff]  ;;  %v11745_v26 = vmax.f32 %v6105_v1, 0.0 }
 0xe8e   :  { %v6103_v56 = vadd.f32 %v7671_v36, %v6087_v63  ;;  %v6085_v19 = vmul.f32 %v7672_v45, %v6069_v42  ;;  %v11747_v18 = vmax.f32 %v6104_v7, 0.0  ;;  %v6102_v11 = vadd.f32 %v7673_v48, %v6086_v41 }
 0xe8f   :  { %6223 = vrot.lane.b32.xlu1 %v11665_v47, %s7725_s25  ;;  %6207 = vrot.lane.b32.xlu0 %v11667_v60, %s7725_s25  ;;  %v6084_v54 = vmul.f32 %v7674_v52, %v6068_v32 }
 0xe90   :  { %v11759_v27 = vmax.f32 %v6103_v56, 0.0  ;;  %v11761_v38 = vmax.f32 %v6102_v11, 0.0  ;;  %v6101_v44 = vadd.f32 %v7675_v2, %v6085_v19 }
 0xe91   :  { %v6100_v23 = vadd.f32 %v7676_v40, %v6084_v54 }
 0xe92   :  { %v11773_v20 = vmax.f32 %v6101_v44, 0.0 }
 0xe93   :  { %6221 = vrot.lane.b32.xlu1 %v11691_v5, %s7725_s25  ;;  %6205 = vrot.lane.b32.xlu0 %v11693_v30, %s7725_s25  ;;  %v11775_v50 = vmax.f32 %v6100_v23, 0.0 }
 0xe97   :  { %6219 = vrot.lane.b32.xlu1 %v11725_v4, %s7725_s25  ;;  %6203 = vrot.lane.b32.xlu0 %v11727_v16, %s7725_s25 }
 0xe9b   :  { %6217 = vrot.lane.b32.xlu1 %v11745_v26, %s7725_s25  ;;  %6201 = vrot.lane.b32.xlu0 %v11747_v18, %s7725_s25 }
 0xe9f   :  { %6215 = vrot.lane.b32.xlu1 %v11759_v27, %s7725_s25  ;;  %6199 = vrot.lane.b32.xlu0 %v11761_v38, %s7725_s25 }
 0xea3   :  { %6213 = vrot.lane.b32.xlu1 %v11773_v20, %s7725_s25  ;;  %6197 = vrot.lane.b32.xlu0 %v11775_v50, %s7725_s25 }
 0xea7   :  { %6162 = vrot.lane.b32.xlu1 %v11621_v21, %s7728_s9  ;;  %6146 = vrot.lane.b32.xlu0 %v11623_v61, %s7728_s9 }
 0xeab   :  { %6160 = vrot.lane.b32.xlu1 %v11651_v33, %s7728_s9  ;;  %6144 = vrot.lane.b32.xlu0 %v11653_v43, %s7728_s9 }
 0xeaf   :  { %6440 = vrot.lane.b32.xlu1 %v11621_v21, %s7727_s8  ;;  %6424 = vrot.lane.b32.xlu0 %v11623_v61, %s7727_s8 }
 0xeb3   :  { %6158 = vrot.lane.b32.xlu1 %v11665_v47, %s7728_s9  ;;  %6142 = vrot.lane.b32.xlu0 %v11667_v60, %s7728_s9 }
 0xeb7   :  { %6438 = vrot.lane.b32.xlu1 %v11651_v33, %s7727_s8  ;;  %6422 = vrot.lane.b32.xlu0 %v11653_v43, %s7727_s8 }
 0xebb   :  { %6156 = vrot.lane.b32.xlu1 %v11691_v5, %s7728_s9  ;;  %6140 = vrot.lane.b32.xlu0 %v11693_v30, %s7728_s9 }
 0xebf   :  { %6436 = vrot.lane.b32.xlu1 %v11665_v47, %s7727_s8  ;;  %6420 = vrot.lane.b32.xlu0 %v11667_v60, %s7727_s8 }
 0xec3   :  { %6154 = vrot.lane.b32.xlu1 %v11725_v4, %s7728_s9  ;;  %6138 = vrot.lane.b32.xlu0 %v11727_v16, %s7728_s9 }
 0xec7   :  { %6434 = vrot.lane.b32.xlu1 %v11691_v5, %s7727_s8  ;;  %6418 = vrot.lane.b32.xlu0 %v11693_v30, %s7727_s8 }
 0xecb   :  { %6152 = vrot.lane.b32.xlu1 %v11745_v26, %s7728_s9  ;;  %6136 = vrot.lane.b32.xlu0 %v11747_v18, %s7728_s9 }
 0xecf   :  { %6432 = vrot.lane.b32.xlu1 %v11725_v4, %s7727_s8  ;;  %6416 = vrot.lane.b32.xlu0 %v11727_v16, %s7727_s8 }
 0xed3   :  { %6150 = vrot.lane.b32.xlu1 %v11759_v27, %s7728_s9  ;;  %6134 = vrot.lane.b32.xlu0 %v11761_v38, %s7728_s9 }
 0xed7   :  { %6430 = vrot.lane.b32.xlu1 %v11745_v26, %s7727_s8  ;;  %6414 = vrot.lane.b32.xlu0 %v11747_v18, %s7727_s8 }
 0xedb   :  { %6148 = vrot.lane.b32.xlu1 %v11773_v20, %s7728_s9  ;;  %6132 = vrot.lane.b32.xlu0 %v11775_v50, %s7728_s9 }
 0xedf   :  { %6428 = vrot.lane.b32.xlu1 %v11759_v27, %s7727_s8  ;;  %6412 = vrot.lane.b32.xlu0 %v11761_v38, %s7727_s8 }
 0xee3   :  { %6426 = vrot.lane.b32.xlu1 %v11773_v20, %s7727_s8  ;;  %6410 = vrot.lane.b32.xlu0 %v11775_v50, %s7727_s8 }
 0xee7   :  { %6581 = vrot.lane.b32.xlu1 %v11621_v21, %s7729_s10  ;;  %6565 = vrot.lane.b32.xlu0 %v11623_v61, %s7729_s10 }
 0xeeb   :  { %6579 = vrot.lane.b32.xlu1 %v11651_v33, %s7729_s10  ;;  %6563 = vrot.lane.b32.xlu0 %v11653_v43, %s7729_s10 }
 0xeef   :  { %6577 = vrot.lane.b32.xlu1 %v11665_v47, %s7729_s10  ;;  %6561 = vrot.lane.b32.xlu0 %v11667_v60, %s7729_s10 }
 0xef3   :  { %6575 = vrot.lane.b32.xlu1 %v11691_v5, %s7729_s10  ;;  %6559 = vrot.lane.b32.xlu0 %v11693_v30, %s7729_s10 }
 0xef7   :  { %6573 = vrot.lane.b32.xlu1 %v11725_v4, %s7729_s10  ;;  %6557 = vrot.lane.b32.xlu0 %v11727_v16, %s7729_s10 }
 0xef9   :  { %v6228_v17 = vpop.permute.xlu1 %6227  ;;  %v6212_v49 = vpop.permute.xlu0 %6211 }
 0xefa   :  { %v6236_v31 = vsel %vm591_vm2, %v6212_v49, %v6228_v17  ;;  %v6244_v29 = vsel %vm591_vm2, %v6228_v17, %v6212_v49 }
 0xefb   :  { %v6259_v28 = vmul.f32 %v6244_v29, %v12741_v10  ;;  %6571 = vrot.lane.b32.xlu1 %v11745_v26, %s7729_s10  ;;  %6555 = vrot.lane.b32.xlu0 %v11747_v18, %s7729_s10  ;;  %v6260_v55 = vmul.f32 %v6236_v31, %v12742_v22 }
 0xefd   :  { %6281 = vmatprep.subr.mxu1 %v6260_v55  ;;  %v6226_v39 = vpop.permute.xlu1 %6225  ;;  %v6210_v58 = vpop.permute.xlu0 %6209  ;;  %v6261_v55 = vld [vmem:[%s12462_s5 + $0x8] sm:$0xff] }
 0xefe   :  { %v6235_v15 = vsel %vm591_vm2, %v6210_v58, %v6226_v39  ;;  %v6243_v34 = vsel %vm591_vm2, %v6226_v39, %v6210_v58  ;;  %6282 = vmatpush1.msra.mxu1 %v6259_v28  ;;  %v12743_v58 = vld [vmem:[#allocation11_spill] sm:$0xff] }
 0xeff   :  { %v6257_v46 = vmul.f32 %v6243_v34, %v12741_v10  ;;  %6569 = vrot.lane.b32.xlu1 %v11759_v27, %s7729_s10  ;;  %6553 = vrot.lane.b32.xlu0 %v11761_v38, %s7729_s10  ;;  %v6258_v13 = vmul.f32 %v6235_v15, %v12742_v22 }
 0xf01   :  { %6283 = vmatprep.subr.mxu1 %v6258_v13  ;;  %v6224_v57 = vpop.permute.xlu1 %6223  ;;  %v6208_v37 = vpop.permute.xlu0 %6207 }
 0xf02   :  { %v6234_v25 = vsel %vm591_vm2, %v6208_v37, %v6224_v57  ;;  %v6242_v51 = vsel %vm591_vm2, %v6224_v57, %v6208_v37  ;;  %6284 = vmatpush1.msra.mxu1 %v6257_v46  ;;  %v12745_v57 = vmov 0.0  }
 0xf03   :  { %v6255_v3 = vmul.f32 %v6242_v51, %v12741_v10  ;;  %6567 = vrot.lane.b32.xlu1 %v11773_v20, %s7729_s10  ;;  %6551 = vrot.lane.b32.xlu0 %v11775_v50, %s7729_s10  ;;  %v6256_v59 = vmul.f32 %v6234_v25, %v12742_v22 }
 0xf05   :  { %6285 = vmatprep.subr.mxu1 %v6256_v59  ;;  %v6222_v6 = vpop.permute.xlu1 %6221  ;;  %v6206_v0 = vpop.permute.xlu0 %6205 }
 0xf06   :  { %v6233_v9 = vsel %vm591_vm2, %v6206_v0, %v6222_v6  ;;  %v6241_v62 = vsel %vm591_vm2, %v6222_v6, %v6206_v0  ;;  %6286 = vmatpush1.msra.mxu1 %v6255_v3 }
 0xf07   :  { %v6253_v53 = vmul.f32 %v6241_v62, %v12741_v10  ;;  %6799 = vrot.lane.b32.xlu1 %v11621_v21, %s7730_s2  ;;  %6783 = vrot.lane.b32.xlu0 %v11623_v61, %s7730_s2  ;;  %v6254_v8 = vmul.f32 %v6233_v9, %v12742_v22  ;;  %v12746_v62 = vld [vmem:[#allocation13_spill] sm:$0xff] }
 0xf09   :  { %6287 = vmatprep.subr.mxu1 %v6254_v8  ;;  %v6220_v63 = vpop.permute.xlu1 %6219  ;;  %v6204_v24 = vpop.permute.xlu0 %6203  ;;  %v12747_v8 = vld [vmem:[#allocation19_spill] sm:$0xff] }
 0xf0a   :  { %v6232_v41 = vsel %vm591_vm2, %v6204_v24, %v6220_v63  ;;  %v6240_v42 = vsel %vm591_vm2, %v6220_v63, %v6204_v24  ;;  %6288 = vmatpush1.msra.mxu1 %v6253_v53 }
 0xf0b   :  { %v6251_v32 = vmul.f32 %v6240_v42, %v12741_v10  ;;  %6797 = vrot.lane.b32.xlu1 %v11651_v33, %s7730_s2  ;;  %6781 = vrot.lane.b32.xlu0 %v11653_v43, %s7730_s2  ;;  %v6252_v14 = vmul.f32 %v6232_v41, %v12742_v22 }
 0xf0d   :  { %6289 = vmatprep.subr.mxu1 %v6252_v14  ;;  %v6218_v1 = vpop.permute.xlu1 %6217  ;;  %v6202_v12 = vpop.permute.xlu0 %6201 }
 0xf0e   :  { %v6231_v7 = vsel %vm591_vm2, %v6202_v12, %v6218_v1  ;;  %v6239_v36 = vsel %vm591_vm2, %v6218_v1, %v6202_v12  ;;  %6290 = vmatpush1.msra.mxu1 %v6251_v32 }
 0xf0f   :  { %v6249_v56 = vmul.f32 %v6239_v36, %v12741_v10  ;;  %6940 = vrot.lane.b32.xlu1 %v11621_v21, %s7731_s11  ;;  %6924 = vrot.lane.b32.xlu0 %v11623_v61, %s7731_s11  ;;  %v6250_v45 = vmul.f32 %v6231_v7, %v12742_v22 }
 0xf11   :  { %6291 = vmatprep.subr.mxu1 %v6250_v45  ;;  %v6216_v19 = vpop.permute.xlu1 %6215  ;;  %v6200_v48 = vpop.permute.xlu0 %6199 }
 0xf12   :  { %v6230_v11 = vsel %vm591_vm2, %v6200_v48, %v6216_v19  ;;  %v6238_v52 = vsel %vm591_vm2, %v6216_v19, %v6200_v48  ;;  %6292 = vmatpush1.msra.mxu1 %v6249_v56 }
 0xf13   :  { %v6247_v54 = vmul.f32 %v6238_v52, %v12741_v10  ;;  %6795 = vrot.lane.b32.xlu1 %v11665_v47, %s7730_s2  ;;  %6779 = vrot.lane.b32.xlu0 %v11667_v60, %s7730_s2  ;;  %v6248_v2 = vmul.f32 %v6230_v11, %v12742_v22 }
 0xf15   :  { %6293 = vmatprep.subr.mxu1 %v6248_v2  ;;  %v6214_v44 = vpop.permute.xlu1 %6213  ;;  %v6198_v40 = vpop.permute.xlu0 %6197 }
 0xf16   :  { %v6229_v23 = vsel %vm591_vm2, %v6198_v40, %v6214_v44  ;;  %v6237_v17 = vsel %vm591_vm2, %v6214_v44, %v6198_v40  ;;  %6294 = vmatpush1.msra.mxu1 %v6247_v54 }
 0xf17   :  { %v6245_v49 = vmul.f32 %v6237_v17, %v12741_v10  ;;  %6938 = vrot.lane.b32.xlu1 %v11651_v33, %s7731_s11  ;;  %6922 = vrot.lane.b32.xlu0 %v11653_v43, %s7731_s11  ;;  %v6246_v31 = vmul.f32 %v6229_v23, %v12742_v22  ;;  %v12744_v22 = vld [vmem:[#allocation15_spill] sm:$0xff] }
 0xf19   :  { %v6163_v29 = vpop.permute.xlu1 %6162  ;;  %6295 = vmatprep.subr.mxu1 %v6246_v31  ;;  %v6147_v28 = vpop.permute.xlu0 %6146 }
 0xf1a   :  { %v6171_v39 = vsel %vm582_vm3, %v6147_v28, %v6163_v29  ;;  %v6179_v10 = vsel %vm582_vm3, %v6163_v29, %v6147_v28  ;;  %6296 = vmatpush1.msra.mxu1 %v6245_v49 }
 0xf1b   :  { %v6194_v15 = vmul.f32 %v6179_v10, %v12743_v58  ;;  %6793 = vrot.lane.b32.xlu1 %v11691_v5, %s7730_s2  ;;  %6777 = vrot.lane.b32.xlu0 %v11693_v30, %s7730_s2  ;;  %v6195_v34 = vmul.f32 %v6171_v39, %v12744_v22 }
 0xf1c   :  { %7537 = vmatmul.mubr.msk.f32.vlgmr.msra.gmra.mxu1 %vm2893_vm0, %v6261_v55 }
 0xf1d   :  { %v6161_v46 = vpop.permute.xlu1 %6160  ;;  %6355 = vmatprep.subr.mxu1 %v6195_v34  ;;  %v6145_v13 = vpop.permute.xlu0 %6144  ;;  %6403 = vmatprep.mubr.f32.mxu1 %v12745_v57 }
 0xf1e   :  { %v6170_v37 = vsel %vm582_vm3, %v6145_v13, %v6161_v46  ;;  %v6178_v25 = vsel %vm582_vm3, %v6161_v46, %v6145_v13  ;;  %6356 = vmatpush1.msra.mxu1 %v6194_v15 }
 0xf1f   :  { %v6192_v51 = vmul.f32 %v6178_v25, %v12743_v58  ;;  %6936 = vrot.lane.b32.xlu1 %v11665_v47, %s7731_s11  ;;  %6920 = vrot.lane.b32.xlu0 %v11667_v60, %s7731_s11  ;;  %v6193_v3 = vmul.f32 %v6170_v37, %v12744_v22 }
 0xf21   :  { %v6441_v59 = vpop.permute.xlu1 %6440  ;;  %6357 = vmatprep.subr.mxu1 %v6193_v3  ;;  %v6425_v6 = vpop.permute.xlu0 %6424 }
 0xf22   :  { %v6449_v0 = vsel %vm600_vm4, %v6425_v6, %v6441_v59  ;;  %v6457_v9 = vsel %vm600_vm4, %v6441_v59, %v6425_v6  ;;  %6358 = vmatpush1.msra.mxu1 %v6192_v51 }
 0xf23   :  { %v6472_v53 = vmul.f32 %v6457_v9, %v12746_v62  ;;  %6791 = vrot.lane.b32.xlu1 %v11725_v4, %s7730_s2  ;;  %6775 = vrot.lane.b32.xlu0 %v11727_v16, %s7730_s2  ;;  %v6473_v63 = vmul.f32 %v6449_v0, %v12747_v8 }
 0xf25   :  { %v6159_v24 = vpop.permute.xlu1 %6158  ;;  %6494 = vmatprep.subr.mxu0 %v6473_v63  ;;  %v6143_v41 = vpop.permute.xlu0 %6142 }
 0xf26   :  { %v6169_v42 = vsel %vm582_vm3, %v6143_v41, %v6159_v24  ;;  %v6177_v32 = vsel %vm582_vm3, %v6159_v24, %v6143_v41  ;;  %6495 = vmatpush1.msra.mxu0 %v6472_v53 }
 0xf27   :  { %v6190_v14 = vmul.f32 %v6177_v32, %v12743_v58  ;;  %6934 = vrot.lane.b32.xlu1 %v11691_v5, %s7731_s11  ;;  %6918 = vrot.lane.b32.xlu0 %v11693_v30, %s7731_s11  ;;  %v6191_v1 = vmul.f32 %v6169_v42, %v12744_v22 }
 0xf29   :  { %v6439_v12 = vpop.permute.xlu1 %6438  ;;  %6359 = vmatprep.subr.mxu1 %v6191_v1  ;;  %v6423_v7 = vpop.permute.xlu0 %6422 }
 0xf2a   :  { %v6448_v36 = vsel %vm600_vm4, %v6423_v7, %v6439_v12  ;;  %v6456_v56 = vsel %vm600_vm4, %v6439_v12, %v6423_v7  ;;  %6360 = vmatpush1.msra.mxu1 %v6190_v14 }
 0xf2b   :  { %v6470_v45 = vmul.f32 %v6456_v56, %v12746_v62  ;;  %6789 = vrot.lane.b32.xlu1 %v11745_v26, %s7730_s2  ;;  %6773 = vrot.lane.b32.xlu0 %v11747_v18, %s7730_s2  ;;  %v6471_v19 = vmul.f32 %v6448_v36, %v12747_v8 }
 0xf2d   :  { %v6157_v48 = vpop.permute.xlu1 %6156  ;;  %6496 = vmatprep.subr.mxu0 %v6471_v19  ;;  %v6141_v11 = vpop.permute.xlu0 %6140 }
 0xf2e   :  { %v6168_v52 = vsel %vm582_vm3, %v6141_v11, %v6157_v48  ;;  %v6176_v54 = vsel %vm582_vm3, %v6157_v48, %v6141_v11  ;;  %6497 = vmatpush1.msra.mxu0 %v6470_v45 }
 0xf2f   :  { %v6188_v2 = vmul.f32 %v6176_v54, %v12743_v58  ;;  %6932 = vrot.lane.b32.xlu1 %v11725_v4, %s7731_s11  ;;  %6916 = vrot.lane.b32.xlu0 %v11727_v16, %s7731_s11  ;;  %v6189_v44 = vmul.f32 %v6168_v52, %v12744_v22 }
 0xf31   :  { %v6437_v40 = vpop.permute.xlu1 %6436  ;;  %6361 = vmatprep.subr.mxu1 %v6189_v44  ;;  %v6421_v23 = vpop.permute.xlu0 %6420 }
 0xf32   :  { %v6447_v17 = vsel %vm600_vm4, %v6421_v23, %v6437_v40  ;;  %v6455_v49 = vsel %vm600_vm4, %v6437_v40, %v6421_v23  ;;  %6362 = vmatpush1.msra.mxu1 %v6188_v2 }
 0xf33   :  { %v6468_v31 = vmul.f32 %v6455_v49, %v12746_v62  ;;  %6787 = vrot.lane.b32.xlu1 %v11759_v27, %s7730_s2  ;;  %6771 = vrot.lane.b32.xlu0 %v11761_v38, %s7730_s2  ;;  %v6469_v29 = vmul.f32 %v6447_v17, %v12747_v8 }
 0xf35   :  { %v6155_v28 = vpop.permute.xlu1 %6154  ;;  %6498 = vmatprep.subr.mxu0 %v6469_v29  ;;  %v6139_v55 = vpop.permute.xlu0 %6138 }
 0xf36   :  { %v6167_v39 = vsel %vm582_vm3, %v6139_v55, %v6155_v28  ;;  %v6175_v10 = vsel %vm582_vm3, %v6155_v28, %v6139_v55  ;;  %6499 = vmatpush1.msra.mxu0 %v6468_v31 }
 0xf37   :  { %v6186_v15 = vmul.f32 %v6175_v10, %v12743_v58  ;;  %v6187_v34 = vmul.f32 %v6167_v39, %v12744_v22  ;;  %6930 = vrot.lane.b32.xlu1 %v11745_v26, %s7731_s11  ;;  %6914 = vrot.lane.b32.xlu0 %v11747_v18, %s7731_s11  ;;  %v6196_v39 = vld [vmem:[%s12462_s5] sm:$0xff] }
 0xf39   :  { %v6435_v46 = vpop.permute.xlu1 %6434  ;;  %6363 = vmatprep.subr.mxu1 %v6187_v34  ;;  %v6419_v13 = vpop.permute.xlu0 %6418 }
 0xf3a   :  { %v6446_v37 = vsel %vm600_vm4, %v6419_v13, %v6435_v46  ;;  %v6454_v25 = vsel %vm600_vm4, %v6435_v46, %v6419_v13  ;;  %6364 = vmatpush1.msra.mxu1 %v6186_v15 }
 0xf3b   :  { %v6466_v51 = vmul.f32 %v6454_v25, %v12746_v62  ;;  %v6467_v3 = vmul.f32 %v6446_v37, %v12747_v8  ;;  %6785 = vrot.lane.b32.xlu1 %v11773_v20, %s7730_s2  ;;  %6769 = vrot.lane.b32.xlu0 %v11775_v50, %s7730_s2 }
 0xf3d   :  { %v6153_v59 = vpop.permute.xlu1 %6152  ;;  %6500 = vmatprep.subr.mxu0 %v6467_v3  ;;  %v6137_v6 = vpop.permute.xlu0 %6136 }
 0xf3e   :  { %v6166_v0 = vsel %vm582_vm3, %v6137_v6, %v6153_v59  ;;  %v6174_v9 = vsel %vm582_vm3, %v6153_v59, %v6137_v6  ;;  %6501 = vmatpush1.msra.mxu0 %v6466_v51  ;;  %v6474_v6 = vld [vmem:[%s12462_s5 + $0x10] sm:$0xff] }
 0xf3f   :  { %v6184_v53 = vmul.f32 %v6174_v9, %v12743_v58  ;;  %v6185_v63 = vmul.f32 %v6166_v0, %v12744_v22  ;;  %6928 = vrot.lane.b32.xlu1 %v11759_v27, %s7731_s11  ;;  %6912 = vrot.lane.b32.xlu0 %v11761_v38, %s7731_s11 }
 0xf41   :  { %v6433_v24 = vpop.permute.xlu1 %6432  ;;  %6365 = vmatprep.subr.mxu1 %v6185_v63  ;;  %v6417_v41 = vpop.permute.xlu0 %6416 }
 0xf42   :  { %v6445_v42 = vsel %vm600_vm4, %v6417_v41, %v6433_v24  ;;  %v6453_v32 = vsel %vm600_vm4, %v6433_v24, %v6417_v41  ;;  %6366 = vmatpush1.msra.mxu1 %v6184_v53  ;;  %v12749_v53 = vld [vmem:[#allocation20_spill] sm:$0xff] }
 0xf43   :  { %v6464_v14 = vmul.f32 %v6453_v32, %v12746_v62  ;;  %v6465_v1 = vmul.f32 %v6445_v42, %v12747_v8  ;;  %6926 = vrot.lane.b32.xlu1 %v11773_v20, %s7731_s11  ;;  %6910 = vrot.lane.b32.xlu0 %v11775_v50, %s7731_s11 }
 0xf45   :  { %v6151_v12 = vpop.permute.xlu1 %6150  ;;  %6502 = vmatprep.subr.mxu0 %v6465_v1  ;;  %v6135_v7 = vpop.permute.xlu0 %6134 }
 0xf46   :  { %v6165_v36 = vsel %vm582_vm3, %v6135_v7, %v6151_v12  ;;  %v6173_v56 = vsel %vm582_vm3, %v6151_v12, %v6135_v7  ;;  %6503 = vmatpush1.msra.mxu0 %v6464_v14 }
 0xf47   :  { %v6182_v45 = vmul.f32 %v6173_v56, %v12743_v58  ;;  %v6183_v19 = vmul.f32 %v6165_v36, %v12744_v22  ;;  %7081 = vrot.lane.b32.xlu1 %v11621_v21, %s7732_s12  ;;  %7065 = vrot.lane.b32.xlu0 %v11623_v61, %s7732_s12 }
 0xf49   :  { %v6431_v48 = vpop.permute.xlu1 %6430  ;;  %6367 = vmatprep.subr.mxu1 %v6183_v19  ;;  %v6415_v11 = vpop.permute.xlu0 %6414 }
 0xf4a   :  { %v6444_v52 = vsel %vm600_vm4, %v6415_v11, %v6431_v48  ;;  %v6452_v54 = vsel %vm600_vm4, %v6431_v48, %v6415_v11  ;;  %6368 = vmatpush1.msra.mxu1 %v6182_v45 }
 0xf4b   :  { %v6462_v2 = vmul.f32 %v6452_v54, %v12746_v62  ;;  %v6463_v44 = vmul.f32 %v6444_v52, %v12747_v8  ;;  %7079 = vrot.lane.b32.xlu1 %v11651_v33, %s7732_s12  ;;  %7063 = vrot.lane.b32.xlu0 %v11653_v43, %s7732_s12 }
 0xf4d   :  { %v6149_v40 = vpop.permute.xlu1 %6148  ;;  %6504 = vmatprep.subr.mxu0 %v6463_v44  ;;  %v6133_v23 = vpop.permute.xlu0 %6132 }
 0xf4e   :  { %v6164_v17 = vsel %vm582_vm3, %v6133_v23, %v6149_v40  ;;  %v6172_v49 = vsel %vm582_vm3, %v6149_v40, %v6133_v23  ;;  %6505 = vmatpush1.msra.mxu0 %v6462_v2 }
 0xf4f   :  { %v6180_v31 = vmul.f32 %v6172_v49, %v12743_v58  ;;  %v6181_v29 = vmul.f32 %v6164_v17, %v12744_v22  ;;  %7222 = vrot.lane.b32.xlu1 %v11621_v21, %s7733_s13  ;;  %7206 = vrot.lane.b32.xlu0 %v11623_v61, %s7733_s13 }
 0xf51   :  { %v6429_v28 = vpop.permute.xlu1 %6428  ;;  %6369 = vmatprep.subr.mxu1 %v6181_v29  ;;  %v6413_v55 = vpop.permute.xlu0 %6412 }
 0xf52   :  { %v6443_v10 = vsel %vm600_vm4, %v6413_v55, %v6429_v28  ;;  %v6451_v58 = vsel %vm600_vm4, %v6429_v28, %v6413_v55  ;;  %6370 = vmatpush1.msra.mxu1 %v6180_v31 }
 0xf53   :  { %v6460_v22 = vmul.f32 %v6451_v58, %v12746_v62  ;;  %v6461_v15 = vmul.f32 %v6443_v10, %v12747_v8  ;;  %7077 = vrot.lane.b32.xlu1 %v11665_v47, %s7732_s12  ;;  %7061 = vrot.lane.b32.xlu0 %v11667_v60, %s7732_s12 }
 0xf54   :  { %7538 = vmatmul.mubr.msk.f32.vlgmr.msra.gmra.mxu1 %vm2893_vm0, %v6196_v39 }
 0xf55   :  { %v6427_v34 = vpop.permute.xlu1 %6426  ;;  %6506 = vmatprep.subr.mxu0 %v6461_v15  ;;  %v6411_v46 = vpop.permute.xlu0 %6410  ;;  %6683 = vmatprep.mubr.f32.mxu1 %v12745_v57 }
 0xf56   :  { %v6442_v13 = vsel %vm600_vm4, %v6411_v46, %v6427_v34  ;;  %v6450_v37 = vsel %vm600_vm4, %v6427_v34, %v6411_v46  ;;  %6507 = vmatpush1.msra.mxu0 %v6460_v22 }
 0xf57   :  { %v6458_v25 = vmul.f32 %v6450_v37, %v12746_v62  ;;  %v6459_v51 = vmul.f32 %v6442_v13, %v12747_v8  ;;  %7220 = vrot.lane.b32.xlu1 %v11651_v33, %s7733_s13  ;;  %7204 = vrot.lane.b32.xlu0 %v11653_v43, %s7733_s13  ;;  %v12748_v8 = vld [vmem:[#allocation14_spill] sm:$0xff]  ;;  %v6615_v13 = vld [vmem:[%s12462_s5 + $0x18] sm:$0xff] }
 0xf59   :  { %v6582_v3 = vpop.permute.xlu1 %6581  ;;  %6508 = vmatprep.subr.mxu0 %v6459_v51  ;;  %v6566_v59 = vpop.permute.xlu0 %6565 }
 0xf5a   :  { %v6590_v0 = vsel %vm609_vm5, %v6566_v59, %v6582_v3  ;;  %v6598_v62 = vsel %vm609_vm5, %v6582_v3, %v6566_v59  ;;  %6509 = vmatpush1.msra.mxu0 %v6458_v25  ;;  %v12750_v59 = vld [vmem:[#allocation17_spill] sm:$0xff] }
 0xf5b   :  { %v6613_v9 = vmul.f32 %v6598_v62, %v12748_v8  ;;  %v6614_v63 = vmul.f32 %v6590_v0, %v12749_v53  ;;  %7075 = vrot.lane.b32.xlu1 %v11691_v5, %s7732_s12  ;;  %7059 = vrot.lane.b32.xlu0 %v11693_v30, %s7732_s12 }
 0xf5c   :  { %6712 = vmatprep.subr.mxu0 %v11621_v21  ;;  %7539 = vmatmul.mubr.msk.f32.vlgmr.msra.gmra.mxu0 %vm2893_vm0, %v6474_v6 }
 0xf5d   :  { %6713 = vmatpush1.msra.mxu0 %v11623_v61  ;;  %v6580_v24 = vpop.permute.xlu1 %6579  ;;  %6635 = vmatprep.subr.mxu1 %v6614_v63  ;;  %v6564_v41 = vpop.permute.xlu0 %6563 }
 0xf5e   :  { %6714 = vmatprep.subr.mxu0 %v11651_v33  ;;  %v6589_v42 = vsel %vm609_vm5, %v6564_v41, %v6580_v24  ;;  %v6597_v32 = vsel %vm609_vm5, %v6580_v24, %v6564_v41  ;;  %6636 = vmatpush1.msra.mxu1 %v6613_v9 }
 0xf5f   :  { %v6611_v14 = vmul.f32 %v6597_v32, %v12748_v8  ;;  %v6612_v21 = vmul.f32 %v6589_v42, %v12749_v53  ;;  %6715 = vmatpush1.msra.mxu0 %v11653_v43  ;;  %7218 = vrot.lane.b32.xlu1 %v11665_v47, %s7733_s13 }
 0xf60   :  { %7202 = vrot.lane.b32.xlu0 %v11667_v60, %s7733_s13  ;;  %6716 = vmatprep.subr.mxu0 %v11665_v47 }
 0xf61   :  { %6717 = vmatpush1.msra.mxu0 %v11667_v60  ;;  %v6578_v61 = vpop.permute.xlu1 %6577  ;;  %6637 = vmatprep.subr.mxu1 %v6612_v21  ;;  %v6562_v33 = vpop.permute.xlu0 %6561 }
 0xf62   :  { %6718 = vmatprep.subr.mxu0 %v11691_v5  ;;  %v6588_v1 = vsel %vm609_vm5, %v6562_v33, %v6578_v61  ;;  %v6596_v43 = vsel %vm609_vm5, %v6578_v61, %v6562_v33  ;;  %6638 = vmatpush1.msra.mxu1 %v6611_v14  ;;  %v12752_v14 = vld [vmem:[#allocation18_spill] sm:$0xff]  ;;  %v12753_v61 = vld [vmem:[#allocation24_spill] sm:$0xff] }
 0xf63   :  { %v6609_v12 = vmul.f32 %v6596_v43, %v12748_v8  ;;  %v6610_v7 = vmul.f32 %v6588_v1, %v12749_v53  ;;  %6719 = vmatpush1.msra.mxu0 %v11693_v30  ;;  %7073 = vrot.lane.b32.xlu1 %v11725_v4, %s7732_s12 }
 0xf64   :  { %7057 = vrot.lane.b32.xlu0 %v11727_v16, %s7732_s12  ;;  %6720 = vmatprep.subr.mxu0 %v11725_v4 }
 0xf65   :  { %6721 = vmatpush1.msra.mxu0 %v11727_v16  ;;  %v6576_v47 = vpop.permute.xlu1 %6575  ;;  %6639 = vmatprep.subr.mxu1 %v6610_v7  ;;  %v6560_v60 = vpop.permute.xlu0 %6559 }
 0xf66   :  { %6722 = vmatprep.subr.mxu0 %v11745_v26  ;;  %v6587_v36 = vsel %vm609_vm5, %v6560_v60, %v6576_v47  ;;  %v6595_v56 = vsel %vm609_vm5, %v6576_v47, %v6560_v60  ;;  %6640 = vmatpush1.msra.mxu1 %v6609_v12 }
 0xf67   :  { %v6607_v45 = vmul.f32 %v6595_v56, %v12748_v8  ;;  %v6608_v19 = vmul.f32 %v6587_v36, %v12749_v53  ;;  %6723 = vmatpush1.msra.mxu0 %v11747_v18  ;;  %7216 = vrot.lane.b32.xlu1 %v11691_v5, %s7733_s13  ;;  %v6692_v5 = vld [vmem:[%s12462_s5 + $0x20] sm:$0xff] }
 0xf68   :  { %7200 = vrot.lane.b32.xlu0 %v11693_v30, %s7733_s13  ;;  %6724 = vmatprep.subr.mxu0 %v11759_v27 }
 0xf69   :  { %6725 = vmatpush1.msra.mxu0 %v11761_v38  ;;  %v6574_v48 = vpop.permute.xlu1 %6573  ;;  %6641 = vmatprep.subr.mxu1 %v6608_v19  ;;  %v6558_v11 = vpop.permute.xlu0 %6557 }
 0xf6a   :  { %6726 = vmatprep.subr.mxu0 %v11773_v20  ;;  %v6586_v52 = vsel %vm609_vm5, %v6558_v11, %v6574_v48  ;;  %v6594_v54 = vsel %vm609_vm5, %v6574_v48, %v6558_v11  ;;  %6642 = vmatpush1.msra.mxu1 %v6607_v45 }
 0xf6b   :  { %v6605_v30 = vmul.f32 %v6594_v54, %v12748_v8  ;;  %v6606_v2 = vmul.f32 %v6586_v52, %v12749_v53  ;;  %6727 = vmatpush1.msra.mxu0 %v11775_v50  ;;  %7071 = vrot.lane.b32.xlu1 %v11745_v26, %s7732_s12 }
 0xf6c   :  { %7055 = vrot.lane.b32.xlu0 %v11747_v18, %s7732_s12  ;;  %6760 = vmatprep.mubr.f32.mxu0 %v12745_v57 }
 0xf6d   :  { %v6572_v44 = vpop.permute.xlu1 %6571  ;;  %6643 = vmatprep.subr.mxu1 %v6606_v2  ;;  %v6556_v40 = vpop.permute.xlu0 %6555  ;;  %7541 = vmatmul.mubr.msk.f32.vlgmr.msra.gmra.mxu0 %vm2893_vm0, %v6692_v5 }
 0xf6e   :  { %v6585_v23 = vsel %vm609_vm5, %v6556_v40, %v6572_v44  ;;  %v6593_v17 = vsel %vm609_vm5, %v6572_v44, %v6556_v40  ;;  %6644 = vmatpush1.msra.mxu1 %v6605_v30  ;;  %7042 = vmatprep.mubr.f32.mxu0 %v12745_v57 }
 0xf6f   :  { %v6603_v49 = vmul.f32 %v6593_v17, %v12748_v8  ;;  %v6604_v31 = vmul.f32 %v6585_v23, %v12749_v53  ;;  %7214 = vrot.lane.b32.xlu1 %v11725_v4, %s7733_s13 }
 0xf70   :  { %7198 = vrot.lane.b32.xlu0 %v11727_v16, %s7733_s13 }
 0xf71   :  { %v6570_v29 = vpop.permute.xlu1 %6569  ;;  %6645 = vmatprep.subr.mxu1 %v6604_v31  ;;  %v6554_v28 = vpop.permute.xlu0 %6553 }
 0xf72   :  { %v6584_v55 = vsel %vm609_vm5, %v6554_v28, %v6570_v29  ;;  %v6592_v39 = vsel %vm609_vm5, %v6570_v29, %v6554_v28  ;;  %6646 = vmatpush1.msra.mxu1 %v6603_v49 }
 0xf73   :  { %v6601_v10 = vmul.f32 %v6592_v39, %v12748_v8  ;;  %v6602_v58 = vmul.f32 %v6584_v55, %v12749_v53  ;;  %7069 = vrot.lane.b32.xlu1 %v11759_v27, %s7732_s12 }
 0xf74   :  { %7053 = vrot.lane.b32.xlu0 %v11761_v38, %s7732_s12 }
 0xf75   :  { %v6568_v4 = vpop.permute.xlu1 %6567  ;;  %6647 = vmatprep.subr.mxu1 %v6602_v58  ;;  %v6552_v16 = vpop.permute.xlu0 %6551 }
 0xf76   :  { %v6583_v22 = vsel %vm609_vm5, %v6552_v16, %v6568_v4  ;;  %v6591_v15 = vsel %vm609_vm5, %v6568_v4, %v6552_v16  ;;  %6648 = vmatpush1.msra.mxu1 %v6601_v10 }
 0xf77   :  { %v6599_v34 = vmul.f32 %v6591_v15, %v12748_v8  ;;  %v6600_v46 = vmul.f32 %v6583_v22, %v12749_v53  ;;  %7212 = vrot.lane.b32.xlu1 %v11745_v26, %s7733_s13  ;;  %v12751_v26 = vld [vmem:[#allocation23_spill] sm:$0xff] }
 0xf78   :  { %7196 = vrot.lane.b32.xlu0 %v11747_v18, %s7733_s13 }
 0xf79   :  { %v6800_v37 = vpop.permute.xlu1 %6799  ;;  %6649 = vmatprep.subr.mxu1 %v6600_v46  ;;  %v6784_v25 = vpop.permute.xlu0 %6783 }
 0xf7a   :  { %v6808_v51 = vsel %vm618_vm6, %v6784_v25, %v6800_v37  ;;  %v6816_v3 = vsel %vm618_vm6, %v6800_v37, %v6784_v25  ;;  %6650 = vmatpush1.msra.mxu1 %v6599_v34 }
 0xf7b   :  { %v6831_v6 = vmul.f32 %v6808_v51, %v12750_v59  ;;  %v6832_v0 = vmul.f32 %v6816_v3, %v12751_v26  ;;  %7067 = vrot.lane.b32.xlu1 %v11773_v20, %s7732_s12  ;;  %7540 = vmatmul.mubr.msk.f32.vlgmr.msra.gmra.mxu1 %vm2893_vm0, %v6615_v13 }
 0xf7c   :  { %7051 = vrot.lane.b32.xlu0 %v11775_v50, %s7732_s12  ;;  %6901 = vmatprep.mubr.f32.mxu1 %v12745_v57 }
 0xf7d   :  { %v6798_v18 = vpop.permute.xlu1 %6797  ;;  %6853 = vmatprep.subr.mxu1 %v6832_v0  ;;  %v6782_v62 = vpop.permute.xlu0 %6781 }
 0xf7e   :  { %v6807_v8 = vsel %vm618_vm6, %v6782_v62, %v6798_v18  ;;  %v6815_v9 = vsel %vm618_vm6, %v6798_v18, %v6782_v62  ;;  %6854 = vmatpush1.msra.mxu1 %v6831_v6 }
 0xf7f   :  { %v6829_v53 = vmul.f32 %v6807_v8, %v12750_v59  ;;  %v6830_v63 = vmul.f32 %v6815_v9, %v12751_v26  ;;  %7210 = vrot.lane.b32.xlu1 %v11759_v27, %s7733_s13 }
 0xf80   :  { %7194 = vrot.lane.b32.xlu0 %v11761_v38, %s7733_s13 }
 0xf81   :  { %v6941_v24 = vpop.permute.xlu1 %6940  ;;  %6855 = vmatprep.subr.mxu1 %v6830_v63  ;;  %v6925_v41 = vpop.permute.xlu0 %6924 }
 0xf82   :  { %v6949_v42 = vsel %vm627_vm7, %v6925_v41, %v6941_v24  ;;  %v6957_v32 = vsel %vm627_vm7, %v6941_v24, %v6925_v41  ;;  %6856 = vmatpush1.msra.mxu1 %v6829_v53 }
 0xf83   :  { %v6972_v21 = vmul.f32 %v6949_v42, %v12752_v14  ;;  %v6973_v33 = vmul.f32 %v6957_v32, %v12753_v61  ;;  %7208 = vrot.lane.b32.xlu1 %v11773_v20, %s7733_s13 }
 0xf84   :  { %7192 = vrot.lane.b32.xlu0 %v11775_v50, %s7733_s13 }
 0xf85   :  { %v6796_v27 = vpop.permute.xlu1 %6795  ;;  %6994 = vmatprep.subr.mxu0 %v6973_v33  ;;  %v6780_v38 = vpop.permute.xlu0 %6779 }
 0xf86   :  { %v6806_v1 = vsel %vm618_vm6, %v6780_v38, %v6796_v27  ;;  %v6814_v43 = vsel %vm618_vm6, %v6796_v27, %v6780_v38  ;;  %6995 = vmatpush1.msra.mxu0 %v6972_v21 }
 0xf87   :  { %v6827_v12 = vmul.f32 %v6806_v1, %v12750_v59  ;;  %v6828_v7 = vmul.f32 %v6814_v43, %v12751_v26 }
 0xf89   :  { %v6939_v47 = vpop.permute.xlu1 %6938  ;;  %6857 = vmatprep.subr.mxu1 %v6828_v7  ;;  %v6923_v20 = vpop.permute.xlu0 %6922 }
 0xf8a   :  { %v6948_v50 = vsel %vm627_vm7, %v6923_v20, %v6939_v47  ;;  %v6956_v60 = vsel %vm627_vm7, %v6939_v47, %v6923_v20  ;;  %6858 = vmatpush1.msra.mxu1 %v6827_v12 }
 0xf8b   :  { %v6970_v36 = vmul.f32 %v6948_v50, %v12752_v14  ;;  %v6971_v56 = vmul.f32 %v6956_v60, %v12753_v61  ;;  %v6833_v50 = vld [vmem:[%s12462_s5 + $0x28] sm:$0xff] }
 0xf8d   :  { %v6794_v45 = vpop.permute.xlu1 %6793  ;;  %6996 = vmatprep.subr.mxu0 %v6971_v56  ;;  %v6778_v19 = vpop.permute.xlu0 %6777 }
 0xf8e   :  { %v6805_v48 = vsel %vm618_vm6, %v6778_v19, %v6794_v45  ;;  %v6813_v11 = vsel %vm618_vm6, %v6794_v45, %v6778_v19  ;;  %6997 = vmatpush1.msra.mxu0 %v6970_v36 }
 0xf8f   :  { %v6825_v52 = vmul.f32 %v6805_v48, %v12750_v59  ;;  %v6826_v54 = vmul.f32 %v6813_v11, %v12751_v26 }
 0xf91   :  { %v6937_v5 = vpop.permute.xlu1 %6936  ;;  %6859 = vmatprep.subr.mxu1 %v6826_v54  ;;  %v6921_v30 = vpop.permute.xlu0 %6920 }
 0xf92   :  { %v6947_v2 = vsel %vm627_vm7, %v6921_v30, %v6937_v5  ;;  %v6955_v44 = vsel %vm627_vm7, %v6937_v5, %v6921_v30  ;;  %6860 = vmatpush1.msra.mxu1 %v6825_v52  ;;  %v6974_v30 = vld [vmem:[%s12462_s5 + $0x30] sm:$0xff] }
 0xf93   :  { %v6968_v40 = vmul.f32 %v6947_v2, %v12752_v14  ;;  %v6969_v23 = vmul.f32 %v6955_v44, %v12753_v61 }
 0xf95   :  { %v6792_v17 = vpop.permute.xlu1 %6791  ;;  %6998 = vmatprep.subr.mxu0 %v6969_v23  ;;  %v6776_v49 = vpop.permute.xlu0 %6775 }
 0xf96   :  { %v6804_v31 = vsel %vm618_vm6, %v6776_v49, %v6792_v17  ;;  %v6812_v29 = vsel %vm618_vm6, %v6792_v17, %v6776_v49  ;;  %6999 = vmatpush1.msra.mxu0 %v6968_v40  ;;  %v12754_v17 = vld [vmem:[#allocation21_spill] sm:$0xff] }
 0xf97   :  { %v6823_v28 = vmul.f32 %v6804_v31, %v12750_v59  ;;  %v6824_v55 = vmul.f32 %v6812_v29, %v12751_v26  ;;  %v12755_v31 = vld [vmem:[#allocation25_spill] sm:$0xff] }
 0xf99   :  { %v6935_v39 = vpop.permute.xlu1 %6934  ;;  %6861 = vmatprep.subr.mxu1 %v6824_v55  ;;  %v6919_v10 = vpop.permute.xlu0 %6918 }
 0xf9a   :  { %v6946_v58 = vsel %vm627_vm7, %v6919_v10, %v6935_v39  ;;  %v6954_v4 = vsel %vm627_vm7, %v6935_v39, %v6919_v10  ;;  %6862 = vmatpush1.msra.mxu1 %v6823_v28 }
 0xf9b   :  { %v6966_v16 = vmul.f32 %v6946_v58, %v12752_v14  ;;  %v6967_v22 = vmul.f32 %v6954_v4, %v12753_v61 }
 0xf9d   :  { %v6790_v15 = vpop.permute.xlu1 %6789  ;;  %7000 = vmatprep.subr.mxu0 %v6967_v22  ;;  %v6774_v34 = vpop.permute.xlu0 %6773  ;;  %v12756_v22 = vld [vmem:[#allocation22_spill] sm:$0xff] }
 0xf9e   :  { %v6803_v46 = vsel %vm618_vm6, %v6774_v34, %v6790_v15  ;;  %v6811_v13 = vsel %vm618_vm6, %v6790_v15, %v6774_v34  ;;  %7001 = vmatpush1.msra.mxu0 %v6966_v16  ;;  %v12757_v34 = vld [vmem:[#allocation26_spill] sm:$0xff] }
 0xf9f   :  { %v6821_v37 = vmul.f32 %v6803_v46, %v12750_v59  ;;  %v6822_v25 = vmul.f32 %v6811_v13, %v12751_v26 }
 0xfa1   :  { %v6933_v51 = vpop.permute.xlu1 %6932  ;;  %6863 = vmatprep.subr.mxu1 %v6822_v25  ;;  %v6917_v3 = vpop.permute.xlu0 %6916 }
 0xfa2   :  { %v6945_v6 = vsel %vm627_vm7, %v6917_v3, %v6933_v51  ;;  %v6953_v0 = vsel %vm627_vm7, %v6933_v51, %v6917_v3  ;;  %6864 = vmatpush1.msra.mxu1 %v6821_v37 }
 0xfa3   :  { %v6964_v18 = vmul.f32 %v6945_v6, %v12752_v14  ;;  %v6965_v62 = vmul.f32 %v6953_v0, %v12753_v61 }
 0xfa5   :  { %v6788_v8 = vpop.permute.xlu1 %6787  ;;  %7002 = vmatprep.subr.mxu0 %v6965_v62  ;;  %v6772_v9 = vpop.permute.xlu0 %6771 }
 0xfa6   :  { %v6802_v53 = vsel %vm618_vm6, %v6772_v9, %v6788_v8  ;;  %v6810_v63 = vsel %vm618_vm6, %v6788_v8, %v6772_v9  ;;  %7003 = vmatpush1.msra.mxu0 %v6964_v18 }
 0xfa7   :  { %v6819_v24 = vmul.f32 %v6802_v53, %v12750_v59  ;;  %v6820_v41 = vmul.f32 %v6810_v63, %v12751_v26 }
 0xfa9   :  { %v6931_v42 = vpop.permute.xlu1 %6930  ;;  %6865 = vmatprep.subr.mxu1 %v6820_v41  ;;  %v6915_v32 = vpop.permute.xlu0 %6914 }
 0xfaa   :  { %v6944_v21 = vsel %vm627_vm7, %v6915_v32, %v6931_v42  ;;  %v6952_v33 = vsel %vm627_vm7, %v6931_v42, %v6915_v32  ;;  %6866 = vmatpush1.msra.mxu1 %v6819_v24 }
 0xfab   :  { %v6962_v27 = vmul.f32 %v6944_v21, %v12752_v14  ;;  %v6963_v38 = vmul.f32 %v6952_v33, %v12753_v61 }
 0xfad   :  { %v6786_v1 = vpop.permute.xlu1 %6785  ;;  %7004 = vmatprep.subr.mxu0 %v6963_v38  ;;  %v6770_v43 = vpop.permute.xlu0 %6769 }
 0xfae   :  { %v6801_v12 = vsel %vm618_vm6, %v6770_v43, %v6786_v1  ;;  %v6809_v7 = vsel %vm618_vm6, %v6786_v1, %v6770_v43  ;;  %7005 = vmatpush1.msra.mxu0 %v6962_v27 }
 0xfaf   :  { %v6817_v47 = vmul.f32 %v6801_v12, %v12750_v59  ;;  %v6818_v20 = vmul.f32 %v6809_v7, %v12751_v26 }
 0xfb1   :  { %v6929_v60 = vpop.permute.xlu1 %6928  ;;  %6867 = vmatprep.subr.mxu1 %v6818_v20  ;;  %v6913_v36 = vpop.permute.xlu0 %6912 }
 0xfb2   :  { %v6943_v56 = vsel %vm627_vm7, %v6913_v36, %v6929_v60  ;;  %v6951_v45 = vsel %vm627_vm7, %v6929_v60, %v6913_v36  ;;  %6868 = vmatpush1.msra.mxu1 %v6817_v47 }
 0xfb3   :  { %v6960_v19 = vmul.f32 %v6943_v56, %v12752_v14  ;;  %v6961_v59 = vmul.f32 %v6951_v45, %v12753_v61  ;;  %7542 = vmatmul.mubr.msk.f32.vlgmr.msra.gmra.mxu1 %vm2893_vm0, %v6833_v50 }
 0xfb4   :  { %7183 = vmatprep.mubr.f32.mxu1 %v12745_v57 }
 0xfb5   :  { %v6927_v26 = vpop.permute.xlu1 %6926  ;;  %7006 = vmatprep.subr.mxu0 %v6961_v59  ;;  %v6911_v48 = vpop.permute.xlu0 %6910 }
 0xfb6   :  { %v6942_v11 = vsel %vm627_vm7, %v6911_v48, %v6927_v26  ;;  %v6950_v52 = vsel %vm627_vm7, %v6927_v26, %v6911_v48  ;;  %7007 = vmatpush1.msra.mxu0 %v6960_v19 }
 0xfb7   :  { %v6958_v54 = vmul.f32 %v6942_v11, %v12752_v14  ;;  %v6959_v5 = vmul.f32 %v6950_v52, %v12753_v61 }
 0xfb9   :  { %v7082_v2 = vpop.permute.xlu1 %7081  ;;  %7008 = vmatprep.subr.mxu0 %v6959_v5  ;;  %v7066_v44 = vpop.permute.xlu0 %7065 }
 0xfba   :  { %v7090_v40 = vsel %vm636_vm8, %v7066_v44, %v7082_v2  ;;  %v7098_v23 = vsel %vm636_vm8, %v7082_v2, %v7066_v44  ;;  %7009 = vmatpush1.msra.mxu0 %v6958_v54 }
 0xfbb   :  { %v7113_v49 = vmul.f32 %v7090_v40, %v12754_v17  ;;  %v7114_v14 = vmul.f32 %v7098_v23, %v12755_v31  ;;  %7543 = vmatmul.mubr.msk.f32.vlgmr.msra.gmra.mxu0 %vm2893_vm0, %v6974_v30 }
 0xfbc   :  { %7324 = vmatprep.mubr.f32.mxu0 %v12745_v57 }
 0xfbd   :  { %v7080_v61 = vpop.permute.xlu1 %7079  ;;  %7135 = vmatprep.subr.mxu1 %v7114_v14  ;;  %v7064_v29 = vpop.permute.xlu0 %7063 }
 0xfbe   :  { %v7089_v28 = vsel %vm636_vm8, %v7064_v29, %v7080_v61  ;;  %v7097_v55 = vsel %vm636_vm8, %v7080_v61, %v7064_v29  ;;  %7136 = vmatpush1.msra.mxu1 %v7113_v49 }
 0xfbf   :  { %v7111_v39 = vmul.f32 %v7089_v28, %v12754_v17  ;;  %v7112_v10 = vmul.f32 %v7097_v55, %v12755_v31 }
 0xfc1   :  { %v7223_v58 = vpop.permute.xlu1 %7222  ;;  %7137 = vmatprep.subr.mxu1 %v7112_v10  ;;  %v7207_v4 = vpop.permute.xlu0 %7206 }
 0xfc2   :  { %v7231_v57 = vsel %vm645_vm9, %v7207_v4, %v7223_v58  ;;  %v7239_v16 = vsel %vm645_vm9, %v7223_v58, %v7207_v4  ;;  %7138 = vmatpush1.msra.mxu1 %v7111_v39 }
 0xfc3   :  { %v7254_v15 = vmul.f32 %v7231_v57, %v12756_v22  ;;  %v7255_v46 = vmul.f32 %v7239_v16, %v12757_v34 }
 0xfc5   :  { %v7078_v13 = vpop.permute.xlu1 %7077  ;;  %7276 = vmatprep.subr.mxu0 %v7255_v46  ;;  %v7062_v37 = vpop.permute.xlu0 %7061 }
 0xfc6   :  { %v7088_v25 = vsel %vm636_vm8, %v7062_v37, %v7078_v13  ;;  %v7096_v51 = vsel %vm636_vm8, %v7078_v13, %v7062_v37  ;;  %7277 = vmatpush1.msra.mxu0 %v7254_v15 }
 0xfc7   :  { %v7109_v3 = vmul.f32 %v7088_v25, %v12754_v17  ;;  %v7110_v6 = vmul.f32 %v7096_v51, %v12755_v31 }
 0xfc9   :  { %v7221_v0 = vpop.permute.xlu1 %7220  ;;  %7139 = vmatprep.subr.mxu1 %v7110_v6  ;;  %v7205_v18 = vpop.permute.xlu0 %7204 }
 0xfca   :  { %v7230_v62 = vsel %vm645_vm9, %v7205_v18, %v7221_v0  ;;  %v7238_v8 = vsel %vm645_vm9, %v7221_v0, %v7205_v18  ;;  %7140 = vmatpush1.msra.mxu1 %v7109_v3 }
 0xfcb   :  { %v7252_v9 = vmul.f32 %v7230_v62, %v12756_v22  ;;  %v7253_v53 = vmul.f32 %v7238_v8, %v12757_v34  ;;  %v7115_v62 = vld [vmem:[%s12462_s5 + $0x38] sm:$0xff] }
 0xfcd   :  { %v7076_v63 = vpop.permute.xlu1 %7075  ;;  %7278 = vmatprep.subr.mxu0 %v7253_v53  ;;  %v7060_v24 = vpop.permute.xlu0 %7059 }
 0xfce   :  { %v7087_v41 = vsel %vm636_vm8, %v7060_v24, %v7076_v63  ;;  %v7095_v42 = vsel %vm636_vm8, %v7076_v63, %v7060_v24  ;;  %7279 = vmatpush1.msra.mxu0 %v7252_v9 }
 0xfcf   :  { %v7107_v32 = vmul.f32 %v7087_v41, %v12754_v17  ;;  %v7108_v21 = vmul.f32 %v7095_v42, %v12755_v31 }
 0xfd1   :  { %v7219_v33 = vpop.permute.xlu1 %7218  ;;  %7141 = vmatprep.subr.mxu1 %v7108_v21 }
 0xfd2   :  { %v7203_v27 = vpop.permute.xlu0 %7202  ;;  %7142 = vmatpush1.msra.mxu1 %v7107_v32 }
 0xfd3   :  { %v7229_v38 = vsel %vm645_vm9, %v7203_v27, %v7219_v33  ;;  %v7237_v1 = vsel %vm645_vm9, %v7219_v33, %v7203_v27  ;;  %v7256_v33 = vld [vmem:[%s12462_s5 + $0x40] sm:$0xff]  ;;  %s7735_s5 = smov [#allocation5]  }
 0xfd4   :  { %v7250_v43 = vmul.f32 %v7229_v38, %v12756_v22  ;;  %v7251_v12 = vmul.f32 %v7237_v1, %v12757_v34  ;;  %s7346_s30 = sshll.u32 %s7735_s5, 4  ;;  %s7347_s30 = int_to_ptr.vmem [resolvable:$true] %s7346_s30 }
 0xfd5   :  { %v7074_v7 = vpop.permute.xlu1 %7073  ;;  %s7699_s16 = scalar_lea.vmem %s7347_s30, 256  ;;  %p7704_p6 = scmp.lt.s32.totalorder %s7347_s30, %s7347_s30 }
 0xfd6   :  { %7280 = vmatprep.subr.mxu0 %v7251_v12  ;;  %v7058_v47 = vpop.permute.xlu0 %7057  ;;  %p7700_p5 = scmp.ne.s32.totalorder %s7347_s30, %s7699_s16  ;;  %p7705_p7 = scmp.lt.s32.totalorder %s7699_s16, %s7699_s16 }
 0xfd7   :  { %v7086_v20 = vsel %vm636_vm8, %v7058_v47, %v7074_v7  ;;  %v7094_v50 = vsel %vm636_vm8, %v7074_v7, %v7058_v47  ;;  %7281 = vmatpush1.msra.mxu0 %v7250_v43 }
 0xfd8   :  { %v7105_v60 = vmul.f32 %v7086_v20, %v12754_v17  ;;  %v7106_v36 = vmul.f32 %v7094_v50, %v12755_v31  ;;  %p7706_p8 = por %p7705_p7, %p7704_p6 }
 0xfd9   :  { %v7217_v56 = vpop.permute.xlu1 %7216 }
 0xfda   :  { %7143 = vmatprep.subr.mxu1 %v7106_v36  ;;  %v7201_v45 = vpop.permute.xlu0 %7200  ;;  %p7707_p9 = pnand %p7706_p8, %p7700_p5 }
 0xfdb   :  { %v7228_v19 = vsel %vm645_vm9, %v7201_v45, %v7217_v56  ;;  %v7236_v59 = vsel %vm645_vm9, %v7217_v56, %v7201_v45  ;;  %7144 = vmatpush1.msra.mxu1 %v7105_v60 }
 0xfdc   :  { %v7248_v26 = vmul.f32 %v7228_v19, %v12756_v22  ;;  %v7249_v48 = vmul.f32 %v7236_v59, %v12757_v34  ;;  %v6331_v27 = vpop.f32.mrf.mxu1 }
 0xfdd   :  { %v7072_v11 = vpop.permute.xlu1 %7071 }
 0xfde   :  { %7282 = vmatprep.subr.mxu0 %v7249_v48  ;;  %v7056_v52 = vpop.permute.xlu0 %7055  ;;  %v6333_v38 = vpop.f32.mrf.mxu1 }
 0xfdf   :  { %v7085_v54 = vsel %vm636_vm8, %v7056_v52, %v7072_v11  ;;  %v7093_v5 = vsel %vm636_vm8, %v7072_v11, %v7056_v52  ;;  %7283 = vmatpush1.msra.mxu0 %v7248_v26 }
 0xfe0   :  { %v7103_v30 = vmul.f32 %v7085_v54, %v12754_v17  ;;  %v7104_v2 = vmul.f32 %v7093_v5, %v12755_v31 }
 0xfe1   :  { %v7215_v44 = vpop.permute.xlu1 %7214 }
 0xfe2   :  { %7145 = vmatprep.subr.mxu1 %v7104_v2  ;;  %v7199_v40 = vpop.permute.xlu0 %7198 }
 0xfe3   :  { %v7227_v23 = vsel %vm645_vm9, %v7199_v40, %v7215_v44  ;;  %v7235_v49 = vsel %vm645_vm9, %v7215_v44, %v7199_v40  ;;  %7146 = vmatpush1.msra.mxu1 %v7103_v30 }
 0xfe4   :  { %v7246_v14 = vmul.f32 %v7227_v23, %v12756_v22  ;;  %v7247_v61 = vmul.f32 %v7235_v49, %v12757_v34 }
 0xfe5   :  { %v7070_v29 = vpop.permute.xlu1 %7069 }
 0xfe6   :  { %7284 = vmatprep.subr.mxu0 %v7247_v61  ;;  %v7054_v28 = vpop.permute.xlu0 %7053 }
 0xfe7   :  { %v7084_v55 = vsel %vm636_vm8, %v7054_v28, %v7070_v29  ;;  %v7092_v39 = vsel %vm636_vm8, %v7070_v29, %v7054_v28  ;;  %7285 = vmatpush1.msra.mxu0 %v7246_v14 }
 0xfe8   :  { %v7101_v10 = vmul.f32 %v7084_v55, %v12754_v17  ;;  %v7102_v58 = vmul.f32 %v7092_v39, %v12755_v31  ;;  %v7677_v55 = vld [vmem:[%s12460_s3 + $0x2a0] sm:$0xf] }
 0xfe9   :  { %v7213_v4 = vpop.permute.xlu1 %7212 }
 0xfea   :  { %7147 = vmatprep.subr.mxu1 %v7102_v58  ;;  %v7197_v57 = vpop.permute.xlu0 %7196 }
 0xfeb   :  { %v7226_v16 = vsel %vm645_vm9, %v7197_v57, %v7213_v4  ;;  %v7234_v15 = vsel %vm645_vm9, %v7213_v4, %v7197_v57  ;;  %7148 = vmatpush1.msra.mxu1 %v7101_v10  ;;  %v7678_v10 = vld [vmem:[%s12460_s3 + $0x2a8] sm:$0xf] }
 0xfec   :  { %v7244_v46 = vmul.f32 %v7226_v16, %v12756_v22  ;;  %v7245_v13 = vmul.f32 %v7234_v15, %v12757_v34 }
 0xfed   :  { %v7068_v37 = vpop.permute.xlu1 %7067 }
 0xfee   :  { %7286 = vmatprep.subr.mxu0 %v7245_v13  ;;  %v7052_v25 = vpop.permute.xlu0 %7051 }
 0xfef   :  { %v7083_v51 = vsel %vm636_vm8, %v7052_v25, %v7068_v37  ;;  %v7091_v3 = vsel %vm636_vm8, %v7068_v37, %v7052_v25  ;;  %7287 = vmatpush1.msra.mxu0 %v7244_v46 }
 0xff0   :  { %v7099_v6 = vmul.f32 %v7083_v51, %v12754_v17  ;;  %v7100_v0 = vmul.f32 %v7091_v3, %v12755_v31 }
 0xff1   :  { %v7211_v18 = vpop.permute.xlu1 %7210 }
 0xff2   :  { %7149 = vmatprep.subr.mxu1 %v7100_v0  ;;  %v7195_v8 = vpop.permute.xlu0 %7194 }
 0xff3   :  { %v7225_v9 = vsel %vm645_vm9, %v7195_v8, %v7211_v18  ;;  %v7233_v53 = vsel %vm645_vm9, %v7211_v18, %v7195_v8  ;;  %7150 = vmatpush1.msra.mxu1 %v7099_v6 }
 0xff4   :  { %v7242_v63 = vmul.f32 %v7225_v9, %v12756_v22  ;;  %v7243_v17 = vmul.f32 %v7233_v53, %v12757_v34  ;;  %7544 = vmatmul.mubr.msk.f32.vlgmr.msra.gmra.mxu1 %vm2893_vm0, %v7115_v62 }
 0xff5   :  { %v7209_v31 = vpop.permute.xlu1 %7208 }
 0xff6   :  { %7288 = vmatprep.subr.mxu0 %v7243_v17  ;;  %v7193_v24 = vpop.permute.xlu0 %7192 }
 0xff7   :  { %v7224_v41 = vsel %vm645_vm9, %v7193_v24, %v7209_v31  ;;  %v7232_v42 = vsel %vm645_vm9, %v7209_v31, %v7193_v24  ;;  %7289 = vmatpush1.msra.mxu0 %v7242_v63 }
 0xff8   :  { %v7240_v32 = vmul.f32 %v7224_v41, %v12756_v22  ;;  %v7241_v21 = vmul.f32 %v7232_v42, %v12757_v34 }
 0xffa   :  { %7290 = vmatprep.subr.mxu0 %v7241_v21 }
 0xffb   :  { %7291 = vmatpush1.msra.mxu0 %v7240_v32 }
 0xffc   :  { %7545 = vmatmul.mubr.msk.f32.vlgmr.msra.gmra.mxu0 %vm2893_vm0, %v7256_v33 }
0x1014   :  { %v6405_v1 = vpop.f32.mrf.mxu1 }
0x1015   :  { %v6406_v35 = vadd.f32 %v6405_v1, %v6331_v27 }
0x1016   :  { %v6407_v43 = vpop.f32.mrf.mxu1 }
0x1017   :  { %v6408_v7 = vadd.f32 %v6407_v43, %v6333_v38 }
0x101c   :  { %v6544_v12 = vpop.f32.mrf.mxu0 }
0x101d   :  { %v6549_v22 = vadd.f32 %v6544_v12, %v6406_v35 }
0x101e   :  { %v6546_v47 = vpop.f32.mrf.mxu0 }
0x101f   :  { %v6550_v50 = vadd.f32 %v6546_v47, %v6408_v7 }
0x102d   :  { %v6762_v60 = vpop.f32.mrf.mxu0 }
0x102f   :  { %v6764_v45 = vpop.f32.mrf.mxu0 }
0x103b   :  { %v6685_v20 = vpop.f32.mrf.mxu1 }
0x103c   :  { %v6690_v36 = vadd.f32 %v6685_v20, %v6549_v22 }
0x103d   :  { %v6687_v34 = vpop.f32.mrf.mxu1 }
0x103e   :  { %v6691_v56 = vadd.f32 %v6687_v34, %v6550_v50  ;;  %v6767_v59 = vadd.f32 %v6762_v60, %v6690_v36 }
0x1040   :  { %v6768_v26 = vadd.f32 %v6764_v45, %v6691_v56 }
0x1073   :  { %v6903_v19 = vpop.f32.mrf.mxu1 }
0x1074   :  { %v6908_v52 = vadd.f32 %v6903_v19, %v6767_v59 }
0x1075   :  { %v6905_v48 = vpop.f32.mrf.mxu1 }
0x1076   :  { %v6909_v5 = vadd.f32 %v6905_v48, %v6768_v26 }
0x107b   :  { %v7044_v11 = vpop.f32.mrf.mxu0 }
0x107c   :  { %v7049_v2 = vadd.f32 %v7044_v11, %v6908_v52 }
0x107d   :  { %v7046_v30 = vpop.f32.mrf.mxu0 }
0x107e   :  { %v7050_v40 = vadd.f32 %v7046_v30, %v6909_v5 }
0x10b4   :  { %v7185_v54 = vpop.f32.mrf.mxu1 }
0x10b5   :  { %v7190_v23 = vadd.f32 %v7185_v54, %v7049_v2 }
0x10b6   :  { %v7187_v44 = vpop.f32.mrf.mxu1 }
0x10b7   :  { %v7191_v14 = vadd.f32 %v7187_v44, %v7050_v40 }
0x10bc   :  { %v7326_v49 = vpop.f32.mrf.mxu0 }
0x10bd   :  { %v7331_v61 = vadd.f32 %v7326_v49, %v7190_v23 }
0x10be   :  { %v7328_v29 = vpop.f32.mrf.mxu0 }
0x10bf   :  { %v7332_v28 = vadd.f32 %v7328_v29, %v7191_v14  ;;  %v7333_v39 = vadd.f32 %v7677_v55, %v7331_v61 }
0x10c1   :  { %v7334_v58 = vadd.f32 %v7678_v10, %v7332_v28 }
0x10c3   :  { %v7337_v4 = vcombine.low %v7333_v39, %v7334_v58 }
0x10c5   :  { %7340 = vst [vmem:[#allocation5 + $0x8] sm:$0xff] %v7337_v4 }
0x10c6   :  { %7710 = shalt.err (!%p7707_p9)
}
0x10c7   :  { %s7736_s1 = smov 128   ;;  %s7737_s17 = smov 8  }
0x10c8   :  { %7352 = dma.vmem_to_hbm [thread:$0]  %s7347_s30, 256, %s12463_s6, [#allocation4], %s7736_s1, %s7736_s1, %s7737_s17  }
0x10c9   :  { %7721 = dma.done.wait [#allocation4], 256  }
0x10ca   :  { %7722 = vsyncadd [#allocation4], 4294967040 }
0x10cb   :  { %7356 = vsyncpa [#allocation3], 1 }
0x10cc   :  { %7357 = vsyncpa [#allocation4], 1 }

</bundles_post_ra>
